<compile_context>
chip_gen: v7x
topology: tpu7x:2x2x1
jax: 0.10.0
libtpu: 0.0.40
codegen_flags: <defaults>
</compile_context>

<pallas_src>
import jax
import jax.numpy as jnp
from jax import lax
from jax.experimental import pallas as pl
from jax.experimental.pallas import tpu as pltpu

KSIZE = 5   # nn.Conv2d(in, out, 5), stride 1, no padding
POOL = 2    # nn.MaxPool2d(2, 2)


def _round_up(x, m):
    return (x + m - 1) // m * m


def _conv_relu_pool_kernel(x_ref, w_ref, b_ref, o_ref, cols_ref):
    """Conv2d(5x5, VALID) + bias -> ReLU -> MaxPool2d(2,2) for one batch block.

    x_ref:    (B, 4*Hh, Wh, Cin)      bf16  space-to-depth input block;
                                      plane p = 2*(h%2)+(w%2) lives at rows
                                      [p*Hh, (p+1)*Hh) of axis 1.
    w_ref:    (Kdim, Cout)            bf16  conv weight, rows ordered (kh, kw, cin)
    b_ref:    (1, Cout)               f32   bias
    o_ref:    (B, Hp, Wp, Cout)       f32   pooled + ReLU'd output (compact NHWC)
    cols_ref: (4*B, Hp, Wp_pad, Kdim) bf16  VMEM scratch holding the im2col rows
    """
    B, Hp, Wp, Cout = o_ref.shape
    Cin = x_ref.shape[-1]
    Hh = x_ref.shape[1] // (POOL * POOL)
    Kdim = w_ref.shape[0]
    Wp_pad = cols_ref.shape[2]
    rows = B * Hp * Wp_pad                      # matmul rows per pooling corner

    # Keep the (never-consumed) sublane padding deterministic.
    if Wp_pad > Wp:
        cols_ref[:, :, Wp:, :] = jnp.zeros(
            (POOL * POOL * B, Hp, Wp_pad - Wp, Kdim), cols_ref.dtype)

    # ---- in-kernel im2col ---------------------------------------------------
    # Pooled pixel (i, j), pool corner (di, dj), conv tap (kh, kw) reads input
    # pixel (2i+di+kh, 2j+dj+kw).  In space-to-depth coordinates this is
    # plane 2*((di+kh)%2) + (dj+kw)%2, row i + (di+kh)//2, col j + (dj+kw)//2,
    # i.e. a static unstrided slice of x_ref per (corner, tap).
    for c, (di, dj) in enumerate(((0, 0), (0, 1), (1, 0), (1, 1))):
        for kh in range(KSIZE):
            for kw in range(KSIZE):
                t = kh * KSIZE + kw
                p = POOL * ((di + kh) % POOL) + (dj + kw) % POOL
                ah = (di + kh) // POOL
                aw = (dj + kw) // POOL
                cols_ref[c * B:(c + 1) * B, :, :Wp, t * Cin:(t + 1) * Cin] = (
                    x_ref[:, p * Hh + ah:p * Hh + ah + Hp, aw:aw + Wp, :])

    # ---- one MXU matmul covering all 4 pooling corners of this batch block --
    patches = cols_ref[...].reshape(POOL * POOL * rows, Kdim)   # tile-aligned collapse
    y = jnp.dot(patches, w_ref[...], preferred_element_type=jnp.float32)

    # ---- 2x2 max-pool == elementwise max across the 4 corner row groups -----
    acc = y[0:rows]
    for c in range(1, POOL * POOL):
        acc = jnp.maximum(acc, y[c * rows:(c + 1) * rows])

    # bias + ReLU folded once, after the max (both commute with the max)
    acc = jnp.maximum(acc + b_ref[...], 0.0)
    acc = acc.reshape(B, Hp, Wp_pad, Cout)
    o_ref[...] = acc[:, :, :Wp, :].astype(o_ref.dtype)


def _pick_batch_block(N, Hh, Wh, Hp, Wp_pad, Cin, Cout, Kdim):
    """Largest batch block that (a) keeps the per-step VMEM footprint well under
    the scoped limit (v7x has the smallest physical VMEM), (b) still yields
    ~>=8 grid steps when N allows (pipeline overlap + 2-way core split), and
    (c) divides N."""
    in_block = 2 * (POOL * POOL * Hh) * Wh * Cin * 2       # 2 pipeline buffers, bf16
    im2col = POOL * POOL * Hp * Wp_pad * Kdim * 2          # VMEM scratch, bf16
    mm_out = POOL * POOL * Hp * Wp_pad * Cout * 4          # f32 dot result
    out_block = 2 * Hp * Wp_pad * Cout * 4                 # 2 pipeline buffers, f32
    per_sample = in_block + im2col + mm_out + out_block
    budget = 8 * 1024 * 1024     # headroom inside the 32 MiB scoped VMEM requested
    b = max(1, min(N, budget // max(per_sample, 1), pl.cdiv(N, 8)))
    while N % b:
        b -= 1
    return b


def conv_layer_forward(x, weight, bias):
    """MaxPool2d(2,2)(ReLU(Conv2d(kernel=5, stride=1, pad=0)(x))).

    x:      (N, Cin, H, W)   float32, NCHW
    weight: (Cout, Cin, 5, 5) float32
    bias:   (Cout,)           float32
    returns (N, Cout, (H-4)//2, (W-4)//2) float32, NCHW
    """
    N, Cin, H, W = x.shape
    Cout = weight.shape[0]
    Ho, Wo = H - KSIZE + 1, W - KSIZE + 1
    Hp, Wp = Ho // POOL, Wo // POOL
    if Hp <= 0 or Wp <= 0:
        raise ValueError(f"spatial dims too small for conv5 + pool2: {(H, W)}")
    Kdim = Cin * KSIZE * KSIZE
    Hh, Wh = -(-H // POOL), -(-W // POOL)      # ceil(H/2), ceil(W/2)
    Wp_pad = _round_up(Wp, 8)                  # keeps in-kernel reshapes tile aligned

    # --- wrapper glue: 1x-sized space-to-depth relayout (+ bf16 cast) --------
    # x_q[n, (2*(h%2)+(w%2))*Hh + h//2, w//2, c] = x[n, c, h, w]
    # Pure layout plumbing (same byte count as x); the 25x im2col expansion
    # happens inside the kernel, in VMEM.
    x_nhwc = jnp.transpose(x, (0, 2, 3, 1)).astype(jnp.bfloat16)
    x_nhwc = jnp.pad(
        x_nhwc, ((0, 0), (0, POOL * Hh - H), (0, POOL * Wh - W), (0, 0)))
    x_q = (x_nhwc.reshape(N, Hh, POOL, Wh, POOL, Cin)
                 .transpose(0, 2, 4, 1, 3, 5)
                 .reshape(N, POOL * POOL * Hh, Wh, Cin))

    # weight flattened with rows ordered (kh, kw, cin) to match the tap order
    w_mat = jnp.transpose(weight, (2, 3, 1, 0)).reshape(Kdim, Cout).astype(jnp.bfloat16)
    b_mat = bias.reshape(1, Cout).astype(jnp.float32)

    B = _pick_batch_block(N, Hh, Wh, Hp, Wp_pad, Cin, Cout, Kdim)
    grid = (N // B,)

    out = pl.pallas_call(
        _conv_relu_pool_kernel,
        out_shape=jax.ShapeDtypeStruct((N, Hp, Wp, Cout), jnp.float32),
        grid_spec=pltpu.PrefetchScalarGridSpec(
            num_scalar_prefetch=0,
            grid=grid,
            in_specs=[
                pl.BlockSpec((B, POOL * POOL * Hh, Wh, Cin), lambda n: (n, 0, 0, 0)),
                # constant index maps -> fetched once, no per-step re-DMA
                pl.BlockSpec((Kdim, Cout), lambda n: (0, 0)),
                pl.BlockSpec((1, Cout), lambda n: (0, 0)),
            ],
            out_specs=pl.BlockSpec((B, Hp, Wp, Cout), lambda n: (n, 0, 0, 0)),
            scratch_shapes=[
                pltpu.VMEM((POOL * POOL * B, Hp, Wp_pad, Kdim), jnp.bfloat16),
            ],
        ),
        compiler_params=pltpu.CompilerParams(
            dimension_semantics=("parallel",),
            vmem_limit_bytes=32 * 1024 * 1024,
        ),
    )(x_q, w_mat, b_mat)

    # tiny pooled output: NHWC -> NCHW to match the PyTorch module
    return jnp.transpose(out, (0, 3, 1, 2))


def _reference(x, weight, bias):
    y = lax.conv_general_dilated(x, weight, (1, 1), "VALID",
                                 dimension_numbers=("NCHW", "OIHW", "NCHW"))
    y = y + bias[None, :, None, None]
    y = jnp.maximum(y, 0.0)
    y = lax.reduce_window(y, -jnp.inf, lax.max, (1, 1, 2, 2), (1, 1, 2, 2), "VALID")
    return y


if __name__ == "__main__":
    key = jax.random.PRNGKey(0)
    kx, kw, kb = jax.random.split(key, 3)

    # small shapes consistent with the module's forward
    N, Cin, H, W = 2, 4, 16, 16
    Cout = 8

    x = jax.random.normal(kx, (N, Cin, H, W), dtype=jnp.float32)

    # deterministic param init (PyTorch-style uniform(-1/sqrt(fan_in), 1/sqrt(fan_in)))
    fan_in = Cin * KSIZE * KSIZE
    bound = 1.0 / (fan_in ** 0.5)
    weight = jax.random.uniform(kw, (Cout, Cin, KSIZE, KSIZE), jnp.float32, -bound, bound)
    bias = jax.random.uniform(kb, (Cout,), jnp.float32, -bound, bound)

    out = jax.jit(conv_layer_forward)(x, weight, bias)
    jax.block_until_ready(out)

    ref = _reference(x, weight, bias)
    assert out.shape == (N, Cout, (H - 4) // 2, (W - 4) // 2), out.shape
    # bf16 MXU inputs (f32 accumulation) -> tolerance loosened vs the f32 reference
    err = float(jnp.max(jnp.abs(out - ref)))
    assert jnp.allclose(out, ref, atol=2e-2, rtol=2e-2), err
    print("KERNEL_OK")
</pallas_src>

<mosaic_0001>
module attributes {stable_mosaic.version = 11 : i64} {
  func.func @_conv_relu_pool_kernel(%arg0: i32, %arg1: memref<1x32x8x4xbf16, #tpu.memory_space<vmem>>, %arg2: memref<100x8xbf16, #tpu.memory_space<vmem>>, %arg3: memref<1x8xf32, #tpu.memory_space<vmem>>, %arg4: memref<1x6x6x8xf32, #tpu.memory_space<vmem>>, %arg5: memref<4x6x8x100xbf16, #tpu.memory_space<vmem>>) attributes {dimension_semantics = [#tpu.dimension_semantics<parallel>], iteration_bounds = array<i64: 2>, scalar_prefetch = 0 : i64, scratch_operands = 1 : i64, tpu.core_type = #tpu.core_type<tc>, window_params = [{transform_indices = @transform_0, window_bounds = array<i64: 1, 32, 8, 4>}, {pipeline_mode = #tpu.pipeline_mode<synchronous>, transform_indices = @transform_1, window_bounds = array<i64: 100, 8>}, {pipeline_mode = #tpu.pipeline_mode<synchronous>, transform_indices = @transform_2, window_bounds = array<i64: 1, 8>}, {transform_indices = @transform_3, window_bounds = array<i64: 1, 6, 6, 8>}]} {
    %cst = arith.constant 0.000000e+00 : bf16
    %0 = vector.broadcast %cst : bf16 to vector<4x6x2x100xbf16>
    %c0 = arith.constant 0 : index
    %c0_0 = arith.constant 0 : index
    %c6 = arith.constant 6 : index
    %c0_1 = arith.constant 0 : index
    %1 = vector.load %arg5[%c0, %c0_0, %c6, %c0_1] : memref<4x6x8x100xbf16, #tpu.memory_space<vmem>>, vector<4x6x2x100xbf16>
    tpu.vector_store %arg5[%c0, %c0_0, %c6, %c0_1], %0 {strides = array<i32>} : memref<4x6x8x100xbf16, #tpu.memory_space<vmem>>, vector<4x6x2x100xbf16>,
    %c0_2 = arith.constant 0 : index
    %c0_3 = arith.constant 0 : index
    %c0_4 = arith.constant 0 : index
    %c0_5 = arith.constant 0 : index
    %2 = vector.load %arg1[%c0_2, %c0_3, %c0_4, %c0_5] : memref<1x32x8x4xbf16, #tpu.memory_space<vmem>>, vector<1x6x6x4xbf16>
    %c0_6 = arith.constant 0 : index
    %c0_7 = arith.constant 0 : index
    %c0_8 = arith.constant 0 : index
    %c0_9 = arith.constant 0 : index
    %3 = vector.load %arg5[%c0_6, %c0_7, %c0_8, %c0_9] : memref<4x6x8x100xbf16, #tpu.memory_space<vmem>>, vector<1x6x6x4xbf16>
    tpu.vector_store %arg5[%c0_6, %c0_7, %c0_8, %c0_9], %2 {strides = array<i32>} : memref<4x6x8x100xbf16, #tpu.memory_space<vmem>>, vector<1x6x6x4xbf16>,
    %c0_10 = arith.constant 0 : index
    %c8 = arith.constant 8 : index
    %c0_11 = arith.constant 0 : index
    %c0_12 = arith.constant 0 : index
    %4 = vector.load %arg1[%c0_10, %c8, %c0_11, %c0_12] : memref<1x32x8x4xbf16, #tpu.memory_space<vmem>>, vector<1x6x6x4xbf16>
    %c0_13 = arith.constant 0 : index
    %c0_14 = arith.constant 0 : index
    %c0_15 = arith.constant 0 : index
    %c4 = arith.constant 4 : index
    %5 = vector.load %arg5[%c0_13, %c0_14, %c0_15, %c4] : memref<4x6x8x100xbf16, #tpu.memory_space<vmem>>, vector<1x6x6x4xbf16>
    tpu.vector_store %arg5[%c0_13, %c0_14, %c0_15, %c4], %4 {strides = array<i32>} : memref<4x6x8x100xbf16, #tpu.memory_space<vmem>>, vector<1x6x6x4xbf16>,
    %c0_16 = arith.constant 0 : index
    %c0_17 = arith.constant 0 : index
    %c1 = arith.constant 1 : index
    %c0_18 = arith.constant 0 : index
    %6 = vector.load %arg1[%c0_16, %c0_17, %c1, %c0_18] : memref<1x32x8x4xbf16, #tpu.memory_space<vmem>>, vector<1x6x6x4xbf16>
    %c0_19 = arith.constant 0 : index
    %c0_20 = arith.constant 0 : index
    %c0_21 = arith.constant 0 : index
    %c8_22 = arith.constant 8 : index
    %7 = vector.load %arg5[%c0_19, %c0_20, %c0_21, %c8_22] : memref<4x6x8x100xbf16, #tpu.memory_space<vmem>>, vector<1x6x6x4xbf16>
    tpu.vector_store %arg5[%c0_19, %c0_20, %c0_21, %c8_22], %6 {strides = array<i32>} : memref<4x6x8x100xbf16, #tpu.memory_space<vmem>>, vector<1x6x6x4xbf16>,
    %c0_23 = arith.constant 0 : index
    %c8_24 = arith.constant 8 : index
    %c1_25 = arith.constant 1 : index
    %c0_26 = arith.constant 0 : index
    %8 = vector.load %arg1[%c0_23, %c8_24, %c1_25, %c0_26] : memref<1x32x8x4xbf16, #tpu.memory_space<vmem>>, vector<1x6x6x4xbf16>
    %c0_27 = arith.constant 0 : index
    %c0_28 = arith.constant 0 : index
    %c0_29 = arith.constant 0 : index
    %c12 = arith.constant 12 : index
    %9 = vector.load %arg5[%c0_27, %c0_28, %c0_29, %c12] : memref<4x6x8x100xbf16, #tpu.memory_space<vmem>>, vector<1x6x6x4xbf16>
    tpu.vector_store %arg5[%c0_27, %c0_28, %c0_29, %c12], %8 {strides = array<i32>} : memref<4x6x8x100xbf16, #tpu.memory_space<vmem>>, vector<1x6x6x4xbf16>,
    %c0_30 = arith.constant 0 : index
    %c0_31 = arith.constant 0 : index
    %c2 = arith.constant 2 : index
    %c0_32 = arith.constant 0 : index
    %10 = vector.load %arg1[%c0_30, %c0_31, %c2, %c0_32] : memref<1x32x8x4xbf16, #tpu.memory_space<vmem>>, vector<1x6x6x4xbf16>
    %c0_33 = arith.constant 0 : index
    %c0_34 = arith.constant 0 : index
    %c0_35 = arith.constant 0 : index
    %c16 = arith.constant 16 : index
    %11 = vector.load %arg5[%c0_33, %c0_34, %c0_35, %c16] : memref<4x6x8x100xbf16, #tpu.memory_space<vmem>>, vector<1x6x6x4xbf16>
    tpu.vector_store %arg5[%c0_33, %c0_34, %c0_35, %c16], %10 {strides = array<i32>} : memref<4x6x8x100xbf16, #tpu.memory_space<vmem>>, vector<1x6x6x4xbf16>,
    %c0_36 = arith.constant 0 : index
    %c16_37 = arith.constant 16 : index
    %c0_38 = arith.constant 0 : index
    %c0_39 = arith.constant 0 : index
    %12 = vector.load %arg1[%c0_36, %c16_37, %c0_38, %c0_39] : memref<1x32x8x4xbf16, #tpu.memory_space<vmem>>, vector<1x6x6x4xbf16>
    %c0_40 = arith.constant 0 : index
    %c0_41 = arith.constant 0 : index
    %c0_42 = arith.constant 0 : index
    %c20 = arith.constant 20 : index
    %13 = vector.load %arg5[%c0_40, %c0_41, %c0_42, %c20] : memref<4x6x8x100xbf16, #tpu.memory_space<vmem>>, vector<1x6x6x4xbf16>
    tpu.vector_store %arg5[%c0_40, %c0_41, %c0_42, %c20], %12 {strides = array<i32>} : memref<4x6x8x100xbf16, #tpu.memory_space<vmem>>, vector<1x6x6x4xbf16>,
    %c0_43 = arith.constant 0 : index
    %c24 = arith.constant 24 : index
    %c0_44 = arith.constant 0 : index
    %c0_45 = arith.constant 0 : index
    %14 = vector.load %arg1[%c0_43, %c24, %c0_44, %c0_45] : memref<1x32x8x4xbf16, #tpu.memory_space<vmem>>, vector<1x6x6x4xbf16>
    %c0_46 = arith.constant 0 : index
    %c0_47 = arith.constant 0 : index
    %c0_48 = arith.constant 0 : index
    %c24_49 = arith.constant 24 : index
    %15 = vector.load %arg5[%c0_46, %c0_47, %c0_48, %c24_49] : memref<4x6x8x100xbf16, #tpu.memory_space<vmem>>, vector<1x6x6x4xbf16>
    tpu.vector_store %arg5[%c0_46, %c0_47, %c0_48, %c24_49], %14 {strides = array<i32>} : memref<4x6x8x100xbf16, #tpu.memory_space<vmem>>, vector<1x6x6x4xbf16>,
    %c0_50 = arith.constant 0 : index
    %c16_51 = arith.constant 16 : index
    %c1_52 = arith.constant 1 : index
    %c0_53 = arith.constant 0 : index
    %16 = vector.load %arg1[%c0_50, %c16_51, %c1_52, %c0_53] : memref<1x32x8x4xbf16, #tpu.memory_space<vmem>>, vector<1x6x6x4xbf16>
    %c0_54 = arith.constant 0 : index
    %c0_55 = arith.constant 0 : index
    %c0_56 = arith.constant 0 : index
    %c28 = arith.constant 28 : index
    %17 = vector.load %arg5[%c0_54, %c0_55, %c0_56, %c28] : memref<4x6x8x100xbf16, #tpu.memory_space<vmem>>, vector<1x6x6x4xbf16>
    tpu.vector_store %arg5[%c0_54, %c0_55, %c0_56, %c28], %16 {strides = array<i32>} : memref<4x6x8x100xbf16, #tpu.memory_space<vmem>>, vector<1x6x6x4xbf16>,
    %c0_57 = arith.constant 0 : index
    %c24_58 = arith.constant 24 : index
    %c1_59 = arith.constant 1 : index
    %c0_60 = arith.constant 0 : index
    %18 = vector.load %arg1[%c0_57, %c24_58, %c1_59, %c0_60] : memref<1x32x8x4xbf16, #tpu.memory_space<vmem>>, vector<1x6x6x4xbf16>
    %c0_61 = arith.constant 0 : index
    %c0_62 = arith.constant 0 : index
    %c0_63 = arith.constant 0 : index
    %c32 = arith.constant 32 : index
    %19 = vector.load %arg5[%c0_61, %c0_62, %c0_63, %c32] : memref<4x6x8x100xbf16, #tpu.memory_space<vmem>>, vector<1x6x6x4xbf16>
    tpu.vector_store %arg5[%c0_61, %c0_62, %c0_63, %c32], %18 {strides = array<i32>} : memref<4x6x8x100xbf16, #tpu.memory_space<vmem>>, vector<1x6x6x4xbf16>,
    %c0_64 = arith.constant 0 : index
    %c16_65 = arith.constant 16 : index
    %c2_66 = arith.constant 2 : index
    %c0_67 = arith.constant 0 : index
    %20 = vector.load %arg1[%c0_64, %c16_65, %c2_66, %c0_67] : memref<1x32x8x4xbf16, #tpu.memory_space<vmem>>, vector<1x6x6x4xbf16>
    %c0_68 = arith.constant 0 : index
    %c0_69 = arith.constant 0 : index
    %c0_70 = arith.constant 0 : index
    %c36 = arith.constant 36 : index
    %21 = vector.load %arg5[%c0_68, %c0_69, %c0_70, %c36] : memref<4x6x8x100xbf16, #tpu.memory_space<vmem>>, vector<1x6x6x4xbf16>
    tpu.vector_store %arg5[%c0_68, %c0_69, %c0_70, %c36], %20 {strides = array<i32>} : memref<4x6x8x100xbf16, #tpu.memory_space<vmem>>, vector<1x6x6x4xbf16>,
    %c0_71 = arith.constant 0 : index
    %c1_72 = arith.constant 1 : index
    %c0_73 = arith.constant 0 : index
    %c0_74 = arith.constant 0 : index
    %22 = vector.load %arg1[%c0_71, %c1_72, %c0_73, %c0_74] : memref<1x32x8x4xbf16, #tpu.memory_space<vmem>>, vector<1x6x6x4xbf16>
    %c0_75 = arith.constant 0 : index
    %c0_76 = arith.constant 0 : index
    %c0_77 = arith.constant 0 : index
    %c40 = arith.constant 40 : index
    %23 = vector.load %arg5[%c0_75, %c0_76, %c0_77, %c40] : memref<4x6x8x100xbf16, #tpu.memory_space<vmem>>, vector<1x6x6x4xbf16>
    tpu.vector_store %arg5[%c0_75, %c0_76, %c0_77, %c40], %22 {strides = array<i32>} : memref<4x6x8x100xbf16, #tpu.memory_space<vmem>>, vector<1x6x6x4xbf16>,
    %c0_78 = arith.constant 0 : index
    %c9 = arith.constant 9 : index
    %c0_79 = arith.constant 0 : index
    %c0_80 = arith.constant 0 : index
    %24 = vector.load %arg1[%c0_78, %c9, %c0_79, %c0_80] : memref<1x32x8x4xbf16, #tpu.memory_space<vmem>>, vector<1x6x6x4xbf16>
    %c0_81 = arith.constant 0 : index
    %c0_82 = arith.constant 0 : index
    %c0_83 = arith.constant 0 : index
    %c44 = arith.constant 44 : index
    %25 = vector.load %arg5[%c0_81, %c0_82, %c0_83, %c44] : memref<4x6x8x100xbf16, #tpu.memory_space<vmem>>, vector<1x6x6x4xbf16>
    tpu.vector_store %arg5[%c0_81, %c0_82, %c0_83, %c44], %24 {strides = array<i32>} : memref<4x6x8x100xbf16, #tpu.memory_space<vmem>>, vector<1x6x6x4xbf16>,
    %c0_84 = arith.constant 0 : index
    %c1_85 = arith.constant 1 : index
    %c1_86 = arith.constant 1 : index
    %c0_87 = arith.constant 0 : index
    %26 = vector.load %arg1[%c0_84, %c1_85, %c1_86, %c0_87] : memref<1x32x8x4xbf16, #tpu.memory_space<vmem>>, vector<1x6x6x4xbf16>
    %c0_88 = arith.constant 0 : index
    %c0_89 = arith.constant 0 : index
    %c0_90 = arith.constant 0 : index
    %c48 = arith.constant 48 : index
    %27 = vector.load %arg5[%c0_88, %c0_89, %c0_90, %c48] : memref<4x6x8x100xbf16, #tpu.memory_space<vmem>>, vector<1x6x6x4xbf16>
    tpu.vector_store %arg5[%c0_88, %c0_89, %c0_90, %c48], %26 {strides = array<i32>} : memref<4x6x8x100xbf16, #tpu.memory_space<vmem>>, vector<1x6x6x4xbf16>,
    %c0_91 = arith.constant 0 : index
    %c9_92 = arith.constant 9 : index
    %c1_93 = arith.constant 1 : index
    %c0_94 = arith.constant 0 : index
    %28 = vector.load %arg1[%c0_91, %c9_92, %c1_93, %c0_94] : memref<1x32x8x4xbf16, #tpu.memory_space<vmem>>, vector<1x6x6x4xbf16>
    %c0_95 = arith.constant 0 : index
    %c0_96 = arith.constant 0 : index
    %c0_97 = arith.constant 0 : index
    %c52 = arith.constant 52 : index
    %29 = vector.load %arg5[%c0_95, %c0_96, %c0_97, %c52] : memref<4x6x8x100xbf16, #tpu.memory_space<vmem>>, vector<1x6x6x4xbf16>
    tpu.vector_store %arg5[%c0_95, %c0_96, %c0_97, %c52], %28 {strides = array<i32>} : memref<4x6x8x100xbf16, #tpu.memory_space<vmem>>, vector<1x6x6x4xbf16>,
    %c0_98 = arith.constant 0 : index
    %c1_99 = arith.constant 1 : index
    %c2_100 = arith.constant 2 : index
    %c0_101 = arith.constant 0 : index
    %30 = vector.load %arg1[%c0_98, %c1_99, %c2_100, %c0_101] : memref<1x32x8x4xbf16, #tpu.memory_space<vmem>>, vector<1x6x6x4xbf16>
    %c0_102 = arith.constant 0 : index
    %c0_103 = arith.constant 0 : index
    %c0_104 = arith.constant 0 : index
    %c56 = arith.constant 56 : index
    %31 = vector.load %arg5[%c0_102, %c0_103, %c0_104, %c56] : memref<4x6x8x100xbf16, #tpu.memory_space<vmem>>, vector<1x6x6x4xbf16>
    tpu.vector_store %arg5[%c0_102, %c0_103, %c0_104, %c56], %30 {strides = array<i32>} : memref<4x6x8x100xbf16, #tpu.memory_space<vmem>>, vector<1x6x6x4xbf16>,
    %c0_105 = arith.constant 0 : index
    %c17 = arith.constant 17 : index
    %c0_106 = arith.constant 0 : index
    %c0_107 = arith.constant 0 : index
    %32 = vector.load %arg1[%c0_105, %c17, %c0_106, %c0_107] : memref<1x32x8x4xbf16, #tpu.memory_space<vmem>>, vector<1x6x6x4xbf16>
    %c0_108 = arith.constant 0 : index
    %c0_109 = arith.constant 0 : index
    %c0_110 = arith.constant 0 : index
    %c60 = arith.constant 60 : index
    %33 = vector.load %arg5[%c0_108, %c0_109, %c0_110, %c60] : memref<4x6x8x100xbf16, #tpu.memory_space<vmem>>, vector<1x6x6x4xbf16>
    tpu.vector_store %arg5[%c0_108, %c0_109, %c0_110, %c60], %32 {strides = array<i32>} : memref<4x6x8x100xbf16, #tpu.memory_space<vmem>>, vector<1x6x6x4xbf16>,
    %c0_111 = arith.constant 0 : index
    %c25 = arith.constant 25 : index
    %c0_112 = arith.constant 0 : index
    %c0_113 = arith.constant 0 : index
    %34 = vector.load %arg1[%c0_111, %c25, %c0_112, %c0_113] : memref<1x32x8x4xbf16, #tpu.memory_space<vmem>>, vector<1x6x6x4xbf16>
    %c0_114 = arith.constant 0 : index
    %c0_115 = arith.constant 0 : index
    %c0_116 = arith.constant 0 : index
    %c64 = arith.constant 64 : index
    %35 = vector.load %arg5[%c0_114, %c0_115, %c0_116, %c64] : memref<4x6x8x100xbf16, #tpu.memory_space<vmem>>, vector<1x6x6x4xbf16>
    tpu.vector_store %arg5[%c0_114, %c0_115, %c0_116, %c64], %34 {strides = array<i32>} : memref<4x6x8x100xbf16, #tpu.memory_space<vmem>>, vector<1x6x6x4xbf16>,
    %c0_117 = arith.constant 0 : index
    %c17_118 = arith.constant 17 : index
    %c1_119 = arith.constant 1 : index
    %c0_120 = arith.constant 0 : index
    %36 = vector.load %arg1[%c0_117, %c17_118, %c1_119, %c0_120] : memref<1x32x8x4xbf16, #tpu.memory_space<vmem>>, vector<1x6x6x4xbf16>
    %c0_121 = arith.constant 0 : index
    %c0_122 = arith.constant 0 : index
    %c0_123 = arith.constant 0 : index
    %c68 = arith.constant 68 : index
    %37 = vector.load %arg5[%c0_121, %c0_122, %c0_123, %c68] : memref<4x6x8x100xbf16, #tpu.memory_space<vmem>>, vector<1x6x6x4xbf16>
    tpu.vector_store %arg5[%c0_121, %c0_122, %c0_123, %c68], %36 {strides = array<i32>} : memref<4x6x8x100xbf16, #tpu.memory_space<vmem>>, vector<1x6x6x4xbf16>,
    %c0_124 = arith.constant 0 : index
    %c25_125 = arith.constant 25 : index
    %c1_126 = arith.constant 1 : index
    %c0_127 = arith.constant 0 : index
    %38 = vector.load %arg1[%c0_124, %c25_125, %c1_126, %c0_127] : memref<1x32x8x4xbf16, #tpu.memory_space<vmem>>, vector<1x6x6x4xbf16>
    %c0_128 = arith.constant 0 : index
    %c0_129 = arith.constant 0 : index
    %c0_130 = arith.constant 0 : index
    %c72 = arith.constant 72 : index
    %39 = vector.load %arg5[%c0_128, %c0_129, %c0_130, %c72] : memref<4x6x8x100xbf16, #tpu.memory_space<vmem>>, vector<1x6x6x4xbf16>
    tpu.vector_store %arg5[%c0_128, %c0_129, %c0_130, %c72], %38 {strides = array<i32>} : memref<4x6x8x100xbf16, #tpu.memory_space<vmem>>, vector<1x6x6x4xbf16>,
    %c0_131 = arith.constant 0 : index
    %c17_132 = arith.constant 17 : index
    %c2_133 = arith.constant 2 : index
    %c0_134 = arith.constant 0 : index
    %40 = vector.load %arg1[%c0_131, %c17_132, %c2_133, %c0_134] : memref<1x32x8x4xbf16, #tpu.memory_space<vmem>>, vector<1x6x6x4xbf16>
    %c0_135 = arith.constant 0 : index
    %c0_136 = arith.constant 0 : index
    %c0_137 = arith.constant 0 : index
    %c76 = arith.constant 76 : index
    %41 = vector.load %arg5[%c0_135, %c0_136, %c0_137, %c76] : memref<4x6x8x100xbf16, #tpu.memory_space<vmem>>, vector<1x6x6x4xbf16>
    tpu.vector_store %arg5[%c0_135, %c0_136, %c0_137, %c76], %40 {strides = array<i32>} : memref<4x6x8x100xbf16, #tpu.memory_space<vmem>>, vector<1x6x6x4xbf16>,
    %c0_138 = arith.constant 0 : index
    %c2_139 = arith.constant 2 : index
    %c0_140 = arith.constant 0 : index
    %c0_141 = arith.constant 0 : index
    %42 = vector.load %arg1[%c0_138, %c2_139, %c0_140, %c0_141] : memref<1x32x8x4xbf16, #tpu.memory_space<vmem>>, vector<1x6x6x4xbf16>
    %c0_142 = arith.constant 0 : index
    %c0_143 = arith.constant 0 : index
    %c0_144 = arith.constant 0 : index
    %c80 = arith.constant 80 : index
    %43 = vector.load %arg5[%c0_142, %c0_143, %c0_144, %c80] : memref<4x6x8x100xbf16, #tpu.memory_space<vmem>>, vector<1x6x6x4xbf16>
    tpu.vector_store %arg5[%c0_142, %c0_143, %c0_144, %c80], %42 {strides = array<i32>} : memref<4x6x8x100xbf16, #tpu.memory_space<vmem>>, vector<1x6x6x4xbf16>,
    %c0_145 = arith.constant 0 : index
    %c10 = arith.constant 10 : index
    %c0_146 = arith.constant 0 : index
    %c0_147 = arith.constant 0 : index
    %44 = vector.load %arg1[%c0_145, %c10, %c0_146, %c0_147] : memref<1x32x8x4xbf16, #tpu.memory_space<vmem>>, vector<1x6x6x4xbf16>
    %c0_148 = arith.constant 0 : index
    %c0_149 = arith.constant 0 : index
    %c0_150 = arith.constant 0 : index
    %c84 = arith.constant 84 : index
    %45 = vector.load %arg5[%c0_148, %c0_149, %c0_150, %c84] : memref<4x6x8x100xbf16, #tpu.memory_space<vmem>>, vector<1x6x6x4xbf16>
    tpu.vector_store %arg5[%c0_148, %c0_149, %c0_150, %c84], %44 {strides = array<i32>} : memref<4x6x8x100xbf16, #tpu.memory_space<vmem>>, vector<1x6x6x4xbf16>,
    %c0_151 = arith.constant 0 : index
    %c2_152 = arith.constant 2 : index
    %c1_153 = arith.constant 1 : index
    %c0_154 = arith.constant 0 : index
    %46 = vector.load %arg1[%c0_151, %c2_152, %c1_153, %c0_154] : memref<1x32x8x4xbf16, #tpu.memory_space<vmem>>, vector<1x6x6x4xbf16>
    %c0_155 = arith.constant 0 : index
    %c0_156 = arith.constant 0 : index
    %c0_157 = arith.constant 0 : index
    %c88 = arith.constant 88 : index
    %47 = vector.load %arg5[%c0_155, %c0_156, %c0_157, %c88] : memref<4x6x8x100xbf16, #tpu.memory_space<vmem>>, vector<1x6x6x4xbf16>
    tpu.vector_store %arg5[%c0_155, %c0_156, %c0_157, %c88], %46 {strides = array<i32>} : memref<4x6x8x100xbf16, #tpu.memory_space<vmem>>, vector<1x6x6x4xbf16>,
    %c0_158 = arith.constant 0 : index
    %c10_159 = arith.constant 10 : index
    %c1_160 = arith.constant 1 : index
    %c0_161 = arith.constant 0 : index
    %48 = vector.load %arg1[%c0_158, %c10_159, %c1_160, %c0_161] : memref<1x32x8x4xbf16, #tpu.memory_space<vmem>>, vector<1x6x6x4xbf16>
    %c0_162 = arith.constant 0 : index
    %c0_163 = arith.constant 0 : index
    %c0_164 = arith.constant 0 : index
    %c92 = arith.constant 92 : index
    %49 = vector.load %arg5[%c0_162, %c0_163, %c0_164, %c92] : memref<4x6x8x100xbf16, #tpu.memory_space<vmem>>, vector<1x6x6x4xbf16>
    tpu.vector_store %arg5[%c0_162, %c0_163, %c0_164, %c92], %48 {strides = array<i32>} : memref<4x6x8x100xbf16, #tpu.memory_space<vmem>>, vector<1x6x6x4xbf16>,
    %c0_165 = arith.constant 0 : index
    %c2_166 = arith.constant 2 : index
    %c2_167 = arith.constant 2 : index
    %c0_168 = arith.constant 0 : index
    %50 = vector.load %arg1[%c0_165, %c2_166, %c2_167, %c0_168] : memref<1x32x8x4xbf16, #tpu.memory_space<vmem>>, vector<1x6x6x4xbf16>
    %c0_169 = arith.constant 0 : index
    %c0_170 = arith.constant 0 : index
    %c0_171 = arith.constant 0 : index
    %c96 = arith.constant 96 : index
    %51 = vector.load %arg5[%c0_169, %c0_170, %c0_171, %c96] : memref<4x6x8x100xbf16, #tpu.memory_space<vmem>>, vector<1x6x6x4xbf16>
    tpu.vector_store %arg5[%c0_169, %c0_170, %c0_171, %c96], %50 {strides = array<i32>} : memref<4x6x8x100xbf16, #tpu.memory_space<vmem>>, vector<1x6x6x4xbf16>,
    %c0_172 = arith.constant 0 : index
    %c8_173 = arith.constant 8 : index
    %c0_174 = arith.constant 0 : index
    %c0_175 = arith.constant 0 : index
    %52 = vector.load %arg1[%c0_172, %c8_173, %c0_174, %c0_175] : memref<1x32x8x4xbf16, #tpu.memory_space<vmem>>, vector<1x6x6x4xbf16>
    %c1_176 = arith.constant 1 : index
    %c0_177 = arith.constant 0 : index
    %c0_178 = arith.constant 0 : index
    %c0_179 = arith.constant 0 : index
    %53 = vector.load %arg5[%c1_176, %c0_177, %c0_178, %c0_179] : memref<4x6x8x100xbf16, #tpu.memory_space<vmem>>, vector<1x6x6x4xbf16>
    tpu.vector_store %arg5[%c1_176, %c0_177, %c0_178, %c0_179], %52 {strides = array<i32>} : memref<4x6x8x100xbf16, #tpu.memory_space<vmem>>, vector<1x6x6x4xbf16>,
    %c0_180 = arith.constant 0 : index
    %c0_181 = arith.constant 0 : index
    %c1_182 = arith.constant 1 : index
    %c0_183 = arith.constant 0 : index
    %54 = vector.load %arg1[%c0_180, %c0_181, %c1_182, %c0_183] : memref<1x32x8x4xbf16, #tpu.memory_space<vmem>>, vector<1x6x6x4xbf16>
    %c1_184 = arith.constant 1 : index
    %c0_185 = arith.constant 0 : index
    %c0_186 = arith.constant 0 : index
    %c4_187 = arith.constant 4 : index
    %55 = vector.load %arg5[%c1_184, %c0_185, %c0_186, %c4_187] : memref<4x6x8x100xbf16, #tpu.memory_space<vmem>>, vector<1x6x6x4xbf16>
    tpu.vector_store %arg5[%c1_184, %c0_185, %c0_186, %c4_187], %54 {strides = array<i32>} : memref<4x6x8x100xbf16, #tpu.memory_space<vmem>>, vector<1x6x6x4xbf16>,
    %c0_188 = arith.constant 0 : index
    %c8_189 = arith.constant 8 : index
    %c1_190 = arith.constant 1 : index
    %c0_191 = arith.constant 0 : index
    %56 = vector.load %arg1[%c0_188, %c8_189, %c1_190, %c0_191] : memref<1x32x8x4xbf16, #tpu.memory_space<vmem>>, vector<1x6x6x4xbf16>
    %c1_192 = arith.constant 1 : index
    %c0_193 = arith.constant 0 : index
    %c0_194 = arith.constant 0 : index
    %c8_195 = arith.constant 8 : index
    %57 = vector.load %arg5[%c1_192, %c0_193, %c0_194, %c8_195] : memref<4x6x8x100xbf16, #tpu.memory_space<vmem>>, vector<1x6x6x4xbf16>
    tpu.vector_store %arg5[%c1_192, %c0_193, %c0_194, %c8_195], %56 {strides = array<i32>} : memref<4x6x8x100xbf16, #tpu.memory_space<vmem>>, vector<1x6x6x4xbf16>,
    %c0_196 = arith.constant 0 : index
    %c0_197 = arith.constant 0 : index
    %c2_198 = arith.constant 2 : index
    %c0_199 = arith.constant 0 : index
    %58 = vector.load %arg1[%c0_196, %c0_197, %c2_198, %c0_199] : memref<1x32x8x4xbf16, #tpu.memory_space<vmem>>, vector<1x6x6x4xbf16>
    %c1_200 = arith.constant 1 : index
    %c0_201 = arith.constant 0 : index
    %c0_202 = arith.constant 0 : index
    %c12_203 = arith.constant 12 : index
    %59 = vector.load %arg5[%c1_200, %c0_201, %c0_202, %c12_203] : memref<4x6x8x100xbf16, #tpu.memory_space<vmem>>, vector<1x6x6x4xbf16>
    tpu.vector_store %arg5[%c1_200, %c0_201, %c0_202, %c12_203], %58 {strides = array<i32>} : memref<4x6x8x100xbf16, #tpu.memory_space<vmem>>, vector<1x6x6x4xbf16>,
    %c0_204 = arith.constant 0 : index
    %c8_205 = arith.constant 8 : index
    %c2_206 = arith.constant 2 : index
    %c0_207 = arith.constant 0 : index
    %60 = vector.load %arg1[%c0_204, %c8_205, %c2_206, %c0_207] : memref<1x32x8x4xbf16, #tpu.memory_space<vmem>>, vector<1x6x6x4xbf16>
    %c1_208 = arith.constant 1 : index
    %c0_209 = arith.constant 0 : index
    %c0_210 = arith.constant 0 : index
    %c16_211 = arith.constant 16 : index
    %61 = vector.load %arg5[%c1_208, %c0_209, %c0_210, %c16_211] : memref<4x6x8x100xbf16, #tpu.memory_space<vmem>>, vector<1x6x6x4xbf16>
    tpu.vector_store %arg5[%c1_208, %c0_209, %c0_210, %c16_211], %60 {strides = array<i32>} : memref<4x6x8x100xbf16, #tpu.memory_space<vmem>>, vector<1x6x6x4xbf16>,
    %c0_212 = arith.constant 0 : index
    %c24_213 = arith.constant 24 : index
    %c0_214 = arith.constant 0 : index
    %c0_215 = arith.constant 0 : index
    %62 = vector.load %arg1[%c0_212, %c24_213, %c0_214, %c0_215] : memref<1x32x8x4xbf16, #tpu.memory_space<vmem>>, vector<1x6x6x4xbf16>
    %c1_216 = arith.constant 1 : index
    %c0_217 = arith.constant 0 : index
    %c0_218 = arith.constant 0 : index
    %c20_219 = arith.constant 20 : index
    %63 = vector.load %arg5[%c1_216, %c0_217, %c0_218, %c20_219] : memref<4x6x8x100xbf16, #tpu.memory_space<vmem>>, vector<1x6x6x4xbf16>
    tpu.vector_store %arg5[%c1_216, %c0_217, %c0_218, %c20_219], %62 {strides = array<i32>} : memref<4x6x8x100xbf16, #tpu.memory_space<vmem>>, vector<1x6x6x4xbf16>,
    %c0_220 = arith.constant 0 : index
    %c16_221 = arith.constant 16 : index
    %c1_222 = arith.constant 1 : index
    %c0_223 = arith.constant 0 : index
    %64 = vector.load %arg1[%c0_220, %c16_221, %c1_222, %c0_223] : memref<1x32x8x4xbf16, #tpu.memory_space<vmem>>, vector<1x6x6x4xbf16>
    %c1_224 = arith.constant 1 : index
    %c0_225 = arith.constant 0 : index
    %c0_226 = arith.constant 0 : index
    %c24_227 = arith.constant 24 : index
    %65 = vector.load %arg5[%c1_224, %c0_225, %c0_226, %c24_227] : memref<4x6x8x100xbf16, #tpu.memory_space<vmem>>, vector<1x6x6x4xbf16>
    tpu.vector_store %arg5[%c1_224, %c0_225, %c0_226, %c24_227], %64 {strides = array<i32>} : memref<4x6x8x100xbf16, #tpu.memory_space<vmem>>, vector<1x6x6x4xbf16>,
    %c0_228 = arith.constant 0 : index
    %c24_229 = arith.constant 24 : index
    %c1_230 = arith.constant 1 : index
    %c0_231 = arith.constant 0 : index
    %66 = vector.load %arg1[%c0_228, %c24_229, %c1_230, %c0_231] : memref<1x32x8x4xbf16, #tpu.memory_space<vmem>>, vector<1x6x6x4xbf16>
    %c1_232 = arith.constant 1 : index
    %c0_233 = arith.constant 0 : index
    %c0_234 = arith.constant 0 : index
    %c28_235 = arith.constant 28 : index
    %67 = vector.load %arg5[%c1_232, %c0_233, %c0_234, %c28_235] : memref<4x6x8x100xbf16, #tpu.memory_space<vmem>>, vector<1x6x6x4xbf16>
    tpu.vector_store %arg5[%c1_232, %c0_233, %c0_234, %c28_235], %66 {strides = array<i32>} : memref<4x6x8x100xbf16, #tpu.memory_space<vmem>>, vector<1x6x6x4xbf16>,
    %c0_236 = arith.constant 0 : index
    %c16_237 = arith.constant 16 : index
    %c2_238 = arith.constant 2 : index
    %c0_239 = arith.constant 0 : index
    %68 = vector.load %arg1[%c0_236, %c16_237, %c2_238, %c0_239] : memref<1x32x8x4xbf16, #tpu.memory_space<vmem>>, vector<1x6x6x4xbf16>
    %c1_240 = arith.constant 1 : index
    %c0_241 = arith.constant 0 : index
    %c0_242 = arith.constant 0 : index
    %c32_243 = arith.constant 32 : index
    %69 = vector.load %arg5[%c1_240, %c0_241, %c0_242, %c32_243] : memref<4x6x8x100xbf16, #tpu.memory_space<vmem>>, vector<1x6x6x4xbf16>
    tpu.vector_store %arg5[%c1_240, %c0_241, %c0_242, %c32_243], %68 {strides = array<i32>} : memref<4x6x8x100xbf16, #tpu.memory_space<vmem>>, vector<1x6x6x4xbf16>,
    %c0_244 = arith.constant 0 : index
    %c24_245 = arith.constant 24 : index
    %c2_246 = arith.constant 2 : index
    %c0_247 = arith.constant 0 : index
    %70 = vector.load %arg1[%c0_244, %c24_245, %c2_246, %c0_247] : memref<1x32x8x4xbf16, #tpu.memory_space<vmem>>, vector<1x6x6x4xbf16>
    %c1_248 = arith.constant 1 : index
    %c0_249 = arith.constant 0 : index
    %c0_250 = arith.constant 0 : index
    %c36_251 = arith.constant 36 : index
    %71 = vector.load %arg5[%c1_248, %c0_249, %c0_250, %c36_251] : memref<4x6x8x100xbf16, #tpu.memory_space<vmem>>, vector<1x6x6x4xbf16>
    tpu.vector_store %arg5[%c1_248, %c0_249, %c0_250, %c36_251], %70 {strides = array<i32>} : memref<4x6x8x100xbf16, #tpu.memory_space<vmem>>, vector<1x6x6x4xbf16>,
    %c0_252 = arith.constant 0 : index
    %c9_253 = arith.constant 9 : index
    %c0_254 = arith.constant 0 : index
    %c0_255 = arith.constant 0 : index
    %72 = vector.load %arg1[%c0_252, %c9_253, %c0_254, %c0_255] : memref<1x32x8x4xbf16, #tpu.memory_space<vmem>>, vector<1x6x6x4xbf16>
    %c1_256 = arith.constant 1 : index
    %c0_257 = arith.constant 0 : index
    %c0_258 = arith.constant 0 : index
    %c40_259 = arith.constant 40 : index
    %73 = vector.load %arg5[%c1_256, %c0_257, %c0_258, %c40_259] : memref<4x6x8x100xbf16, #tpu.memory_space<vmem>>, vector<1x6x6x4xbf16>
    tpu.vector_store %arg5[%c1_256, %c0_257, %c0_258, %c40_259], %72 {strides = array<i32>} : memref<4x6x8x100xbf16, #tpu.memory_space<vmem>>, vector<1x6x6x4xbf16>,
    %c0_260 = arith.constant 0 : index
    %c1_261 = arith.constant 1 : index
    %c1_262 = arith.constant 1 : index
    %c0_263 = arith.constant 0 : index
    %74 = vector.load %arg1[%c0_260, %c1_261, %c1_262, %c0_263] : memref<1x32x8x4xbf16, #tpu.memory_space<vmem>>, vector<1x6x6x4xbf16>
    %c1_264 = arith.constant 1 : index
    %c0_265 = arith.constant 0 : index
    %c0_266 = arith.constant 0 : index
    %c44_267 = arith.constant 44 : index
    %75 = vector.load %arg5[%c1_264, %c0_265, %c0_266, %c44_267] : memref<4x6x8x100xbf16, #tpu.memory_space<vmem>>, vector<1x6x6x4xbf16>
    tpu.vector_store %arg5[%c1_264, %c0_265, %c0_266, %c44_267], %74 {strides = array<i32>} : memref<4x6x8x100xbf16, #tpu.memory_space<vmem>>, vector<1x6x6x4xbf16>,
    %c0_268 = arith.constant 0 : index
    %c9_269 = arith.constant 9 : index
    %c1_270 = arith.constant 1 : index
    %c0_271 = arith.constant 0 : index
    %76 = vector.load %arg1[%c0_268, %c9_269, %c1_270, %c0_271] : memref<1x32x8x4xbf16, #tpu.memory_space<vmem>>, vector<1x6x6x4xbf16>
    %c1_272 = arith.constant 1 : index
    %c0_273 = arith.constant 0 : index
    %c0_274 = arith.constant 0 : index
    %c48_275 = arith.constant 48 : index
    %77 = vector.load %arg5[%c1_272, %c0_273, %c0_274, %c48_275] : memref<4x6x8x100xbf16, #tpu.memory_space<vmem>>, vector<1x6x6x4xbf16>
    tpu.vector_store %arg5[%c1_272, %c0_273, %c0_274, %c48_275], %76 {strides = array<i32>} : memref<4x6x8x100xbf16, #tpu.memory_space<vmem>>, vector<1x6x6x4xbf16>,
    %c0_276 = arith.constant 0 : index
    %c1_277 = arith.constant 1 : index
    %c2_278 = arith.constant 2 : index
    %c0_279 = arith.constant 0 : index
    %78 = vector.load %arg1[%c0_276, %c1_277, %c2_278, %c0_279] : memref<1x32x8x4xbf16, #tpu.memory_space<vmem>>, vector<1x6x6x4xbf16>
    %c1_280 = arith.constant 1 : index
    %c0_281 = arith.constant 0 : index
    %c0_282 = arith.constant 0 : index
    %c52_283 = arith.constant 52 : index
    %79 = vector.load %arg5[%c1_280, %c0_281, %c0_282, %c52_283] : memref<4x6x8x100xbf16, #tpu.memory_space<vmem>>, vector<1x6x6x4xbf16>
    tpu.vector_store %arg5[%c1_280, %c0_281, %c0_282, %c52_283], %78 {strides = array<i32>} : memref<4x6x8x100xbf16, #tpu.memory_space<vmem>>, vector<1x6x6x4xbf16>,
    %c0_284 = arith.constant 0 : index
    %c9_285 = arith.constant 9 : index
    %c2_286 = arith.constant 2 : index
    %c0_287 = arith.constant 0 : index
    %80 = vector.load %arg1[%c0_284, %c9_285, %c2_286, %c0_287] : memref<1x32x8x4xbf16, #tpu.memory_space<vmem>>, vector<1x6x6x4xbf16>
    %c1_288 = arith.constant 1 : index
    %c0_289 = arith.constant 0 : index
    %c0_290 = arith.constant 0 : index
    %c56_291 = arith.constant 56 : index
    %81 = vector.load %arg5[%c1_288, %c0_289, %c0_290, %c56_291] : memref<4x6x8x100xbf16, #tpu.memory_space<vmem>>, vector<1x6x6x4xbf16>
    tpu.vector_store %arg5[%c1_288, %c0_289, %c0_290, %c56_291], %80 {strides = array<i32>} : memref<4x6x8x100xbf16, #tpu.memory_space<vmem>>, vector<1x6x6x4xbf16>,
    %c0_292 = arith.constant 0 : index
    %c25_293 = arith.constant 25 : index
    %c0_294 = arith.constant 0 : index
    %c0_295 = arith.constant 0 : index
    %82 = vector.load %arg1[%c0_292, %c25_293, %c0_294, %c0_295] : memref<1x32x8x4xbf16, #tpu.memory_space<vmem>>, vector<1x6x6x4xbf16>
    %c1_296 = arith.constant 1 : index
    %c0_297 = arith.constant 0 : index
    %c0_298 = arith.constant 0 : index
    %c60_299 = arith.constant 60 : index
    %83 = vector.load %arg5[%c1_296, %c0_297, %c0_298, %c60_299] : memref<4x6x8x100xbf16, #tpu.memory_space<vmem>>, vector<1x6x6x4xbf16>
    tpu.vector_store %arg5[%c1_296, %c0_297, %c0_298, %c60_299], %82 {strides = array<i32>} : memref<4x6x8x100xbf16, #tpu.memory_space<vmem>>, vector<1x6x6x4xbf16>,
    %c0_300 = arith.constant 0 : index
    %c17_301 = arith.constant 17 : index
    %c1_302 = arith.constant 1 : index
    %c0_303 = arith.constant 0 : index
    %84 = vector.load %arg1[%c0_300, %c17_301, %c1_302, %c0_303] : memref<1x32x8x4xbf16, #tpu.memory_space<vmem>>, vector<1x6x6x4xbf16>
    %c1_304 = arith.constant 1 : index
    %c0_305 = arith.constant 0 : index
    %c0_306 = arith.constant 0 : index
    %c64_307 = arith.constant 64 : index
    %85 = vector.load %arg5[%c1_304, %c0_305, %c0_306, %c64_307] : memref<4x6x8x100xbf16, #tpu.memory_space<vmem>>, vector<1x6x6x4xbf16>
    tpu.vector_store %arg5[%c1_304, %c0_305, %c0_306, %c64_307], %84 {strides = array<i32>} : memref<4x6x8x100xbf16, #tpu.memory_space<vmem>>, vector<1x6x6x4xbf16>,
    %c0_308 = arith.constant 0 : index
    %c25_309 = arith.constant 25 : index
    %c1_310 = arith.constant 1 : index
    %c0_311 = arith.constant 0 : index
    %86 = vector.load %arg1[%c0_308, %c25_309, %c1_310, %c0_311] : memref<1x32x8x4xbf16, #tpu.memory_space<vmem>>, vector<1x6x6x4xbf16>
    %c1_312 = arith.constant 1 : index
    %c0_313 = arith.constant 0 : index
    %c0_314 = arith.constant 0 : index
    %c68_315 = arith.constant 68 : index
    %87 = vector.load %arg5[%c1_312, %c0_313, %c0_314, %c68_315] : memref<4x6x8x100xbf16, #tpu.memory_space<vmem>>, vector<1x6x6x4xbf16>
    tpu.vector_store %arg5[%c1_312, %c0_313, %c0_314, %c68_315], %86 {strides = array<i32>} : memref<4x6x8x100xbf16, #tpu.memory_space<vmem>>, vector<1x6x6x4xbf16>,
    %c0_316 = arith.constant 0 : index
    %c17_317 = arith.constant 17 : index
    %c2_318 = arith.constant 2 : index
    %c0_319 = arith.constant 0 : index
    %88 = vector.load %arg1[%c0_316, %c17_317, %c2_318, %c0_319] : memref<1x32x8x4xbf16, #tpu.memory_space<vmem>>, vector<1x6x6x4xbf16>
    %c1_320 = arith.constant 1 : index
    %c0_321 = arith.constant 0 : index
    %c0_322 = arith.constant 0 : index
    %c72_323 = arith.constant 72 : index
    %89 = vector.load %arg5[%c1_320, %c0_321, %c0_322, %c72_323] : memref<4x6x8x100xbf16, #tpu.memory_space<vmem>>, vector<1x6x6x4xbf16>
    tpu.vector_store %arg5[%c1_320, %c0_321, %c0_322, %c72_323], %88 {strides = array<i32>} : memref<4x6x8x100xbf16, #tpu.memory_space<vmem>>, vector<1x6x6x4xbf16>,
    %c0_324 = arith.constant 0 : index
    %c25_325 = arith.constant 25 : index
    %c2_326 = arith.constant 2 : index
    %c0_327 = arith.constant 0 : index
    %90 = vector.load %arg1[%c0_324, %c25_325, %c2_326, %c0_327] : memref<1x32x8x4xbf16, #tpu.memory_space<vmem>>, vector<1x6x6x4xbf16>
    %c1_328 = arith.constant 1 : index
    %c0_329 = arith.constant 0 : index
    %c0_330 = arith.constant 0 : index
    %c76_331 = arith.constant 76 : index
    %91 = vector.load %arg5[%c1_328, %c0_329, %c0_330, %c76_331] : memref<4x6x8x100xbf16, #tpu.memory_space<vmem>>, vector<1x6x6x4xbf16>
    tpu.vector_store %arg5[%c1_328, %c0_329, %c0_330, %c76_331], %90 {strides = array<i32>} : memref<4x6x8x100xbf16, #tpu.memory_space<vmem>>, vector<1x6x6x4xbf16>,
    %c0_332 = arith.constant 0 : index
    %c10_333 = arith.constant 10 : index
    %c0_334 = arith.constant 0 : index
    %c0_335 = arith.constant 0 : index
    %92 = vector.load %arg1[%c0_332, %c10_333, %c0_334, %c0_335] : memref<1x32x8x4xbf16, #tpu.memory_space<vmem>>, vector<1x6x6x4xbf16>
    %c1_336 = arith.constant 1 : index
    %c0_337 = arith.constant 0 : index
    %c0_338 = arith.constant 0 : index
    %c80_339 = arith.constant 80 : index
    %93 = vector.load %arg5[%c1_336, %c0_337, %c0_338, %c80_339] : memref<4x6x8x100xbf16, #tpu.memory_space<vmem>>, vector<1x6x6x4xbf16>
    tpu.vector_store %arg5[%c1_336, %c0_337, %c0_338, %c80_339], %92 {strides = array<i32>} : memref<4x6x8x100xbf16, #tpu.memory_space<vmem>>, vector<1x6x6x4xbf16>,
    %c0_340 = arith.constant 0 : index
    %c2_341 = arith.constant 2 : index
    %c1_342 = arith.constant 1 : index
    %c0_343 = arith.constant 0 : index
    %94 = vector.load %arg1[%c0_340, %c2_341, %c1_342, %c0_343] : memref<1x32x8x4xbf16, #tpu.memory_space<vmem>>, vector<1x6x6x4xbf16>
    %c1_344 = arith.constant 1 : index
    %c0_345 = arith.constant 0 : index
    %c0_346 = arith.constant 0 : index
    %c84_347 = arith.constant 84 : index
    %95 = vector.load %arg5[%c1_344, %c0_345, %c0_346, %c84_347] : memref<4x6x8x100xbf16, #tpu.memory_space<vmem>>, vector<1x6x6x4xbf16>
    tpu.vector_store %arg5[%c1_344, %c0_345, %c0_346, %c84_347], %94 {strides = array<i32>} : memref<4x6x8x100xbf16, #tpu.memory_space<vmem>>, vector<1x6x6x4xbf16>,
    %c0_348 = arith.constant 0 : index
    %c10_349 = arith.constant 10 : index
    %c1_350 = arith.constant 1 : index
    %c0_351 = arith.constant 0 : index
    %96 = vector.load %arg1[%c0_348, %c10_349, %c1_350, %c0_351] : memref<1x32x8x4xbf16, #tpu.memory_space<vmem>>, vector<1x6x6x4xbf16>
    %c1_352 = arith.constant 1 : index
    %c0_353 = arith.constant 0 : index
    %c0_354 = arith.constant 0 : index
    %c88_355 = arith.constant 88 : index
    %97 = vector.load %arg5[%c1_352, %c0_353, %c0_354, %c88_355] : memref<4x6x8x100xbf16, #tpu.memory_space<vmem>>, vector<1x6x6x4xbf16>
    tpu.vector_store %arg5[%c1_352, %c0_353, %c0_354, %c88_355], %96 {strides = array<i32>} : memref<4x6x8x100xbf16, #tpu.memory_space<vmem>>, vector<1x6x6x4xbf16>,
    %c0_356 = arith.constant 0 : index
    %c2_357 = arith.constant 2 : index
    %c2_358 = arith.constant 2 : index
    %c0_359 = arith.constant 0 : index
    %98 = vector.load %arg1[%c0_356, %c2_357, %c2_358, %c0_359] : memref<1x32x8x4xbf16, #tpu.memory_space<vmem>>, vector<1x6x6x4xbf16>
    %c1_360 = arith.constant 1 : index
    %c0_361 = arith.constant 0 : index
    %c0_362 = arith.constant 0 : index
    %c92_363 = arith.constant 92 : index
    %99 = vector.load %arg5[%c1_360, %c0_361, %c0_362, %c92_363] : memref<4x6x8x100xbf16, #tpu.memory_space<vmem>>, vector<1x6x6x4xbf16>
    tpu.vector_store %arg5[%c1_360, %c0_361, %c0_362, %c92_363], %98 {strides = array<i32>} : memref<4x6x8x100xbf16, #tpu.memory_space<vmem>>, vector<1x6x6x4xbf16>,
    %c0_364 = arith.constant 0 : index
    %c10_365 = arith.constant 10 : index
    %c2_366 = arith.constant 2 : index
    %c0_367 = arith.constant 0 : index
    %100 = vector.load %arg1[%c0_364, %c10_365, %c2_366, %c0_367] : memref<1x32x8x4xbf16, #tpu.memory_space<vmem>>, vector<1x6x6x4xbf16>
    %c1_368 = arith.constant 1 : index
    %c0_369 = arith.constant 0 : index
    %c0_370 = arith.constant 0 : index
    %c96_371 = arith.constant 96 : index
    %101 = vector.load %arg5[%c1_368, %c0_369, %c0_370, %c96_371] : memref<4x6x8x100xbf16, #tpu.memory_space<vmem>>, vector<1x6x6x4xbf16>
    tpu.vector_store %arg5[%c1_368, %c0_369, %c0_370, %c96_371], %100 {strides = array<i32>} : memref<4x6x8x100xbf16, #tpu.memory_space<vmem>>, vector<1x6x6x4xbf16>,
    %c0_372 = arith.constant 0 : index
    %c16_373 = arith.constant 16 : index
    %c0_374 = arith.constant 0 : index
    %c0_375 = arith.constant 0 : index
    %102 = vector.load %arg1[%c0_372, %c16_373, %c0_374, %c0_375] : memref<1x32x8x4xbf16, #tpu.memory_space<vmem>>, vector<1x6x6x4xbf16>
    %c2_376 = arith.constant 2 : index
    %c0_377 = arith.constant 0 : index
    %c0_378 = arith.constant 0 : index
    %c0_379 = arith.constant 0 : index
    %103 = vector.load %arg5[%c2_376, %c0_377, %c0_378, %c0_379] : memref<4x6x8x100xbf16, #tpu.memory_space<vmem>>, vector<1x6x6x4xbf16>
    tpu.vector_store %arg5[%c2_376, %c0_377, %c0_378, %c0_379], %102 {strides = array<i32>} : memref<4x6x8x100xbf16, #tpu.memory_space<vmem>>, vector<1x6x6x4xbf16>,
    %c0_380 = arith.constant 0 : index
    %c24_381 = arith.constant 24 : index
    %c0_382 = arith.constant 0 : index
    %c0_383 = arith.constant 0 : index
    %104 = vector.load %arg1[%c0_380, %c24_381, %c0_382, %c0_383] : memref<1x32x8x4xbf16, #tpu.memory_space<vmem>>, vector<1x6x6x4xbf16>
    %c2_384 = arith.constant 2 : index
    %c0_385 = arith.constant 0 : index
    %c0_386 = arith.constant 0 : index
    %c4_387 = arith.constant 4 : index
    %105 = vector.load %arg5[%c2_384, %c0_385, %c0_386, %c4_387] : memref<4x6x8x100xbf16, #tpu.memory_space<vmem>>, vector<1x6x6x4xbf16>
    tpu.vector_store %arg5[%c2_384, %c0_385, %c0_386, %c4_387], %104 {strides = array<i32>} : memref<4x6x8x100xbf16, #tpu.memory_space<vmem>>, vector<1x6x6x4xbf16>,
    %c0_388 = arith.constant 0 : index
    %c16_389 = arith.constant 16 : index
    %c1_390 = arith.constant 1 : index
    %c0_391 = arith.constant 0 : index
    %106 = vector.load %arg1[%c0_388, %c16_389, %c1_390, %c0_391] : memref<1x32x8x4xbf16, #tpu.memory_space<vmem>>, vector<1x6x6x4xbf16>
    %c2_392 = arith.constant 2 : index
    %c0_393 = arith.constant 0 : index
    %c0_394 = arith.constant 0 : index
    %c8_395 = arith.constant 8 : index
    %107 = vector.load %arg5[%c2_392, %c0_393, %c0_394, %c8_395] : memref<4x6x8x100xbf16, #tpu.memory_space<vmem>>, vector<1x6x6x4xbf16>
    tpu.vector_store %arg5[%c2_392, %c0_393, %c0_394, %c8_395], %106 {strides = array<i32>} : memref<4x6x8x100xbf16, #tpu.memory_space<vmem>>, vector<1x6x6x4xbf16>,
    %c0_396 = arith.constant 0 : index
    %c24_397 = arith.constant 24 : index
    %c1_398 = arith.constant 1 : index
    %c0_399 = arith.constant 0 : index
    %108 = vector.load %arg1[%c0_396, %c24_397, %c1_398, %c0_399] : memref<1x32x8x4xbf16, #tpu.memory_space<vmem>>, vector<1x6x6x4xbf16>
    %c2_400 = arith.constant 2 : index
    %c0_401 = arith.constant 0 : index
    %c0_402 = arith.constant 0 : index
    %c12_403 = arith.constant 12 : index
    %109 = vector.load %arg5[%c2_400, %c0_401, %c0_402, %c12_403] : memref<4x6x8x100xbf16, #tpu.memory_space<vmem>>, vector<1x6x6x4xbf16>
    tpu.vector_store %arg5[%c2_400, %c0_401, %c0_402, %c12_403], %108 {strides = array<i32>} : memref<4x6x8x100xbf16, #tpu.memory_space<vmem>>, vector<1x6x6x4xbf16>,
    %c0_404 = arith.constant 0 : index
    %c16_405 = arith.constant 16 : index
    %c2_406 = arith.constant 2 : index
    %c0_407 = arith.constant 0 : index
    %110 = vector.load %arg1[%c0_404, %c16_405, %c2_406, %c0_407] : memref<1x32x8x4xbf16, #tpu.memory_space<vmem>>, vector<1x6x6x4xbf16>
    %c2_408 = arith.constant 2 : index
    %c0_409 = arith.constant 0 : index
    %c0_410 = arith.constant 0 : index
    %c16_411 = arith.constant 16 : index
    %111 = vector.load %arg5[%c2_408, %c0_409, %c0_410, %c16_411] : memref<4x6x8x100xbf16, #tpu.memory_space<vmem>>, vector<1x6x6x4xbf16>
    tpu.vector_store %arg5[%c2_408, %c0_409, %c0_410, %c16_411], %110 {strides = array<i32>} : memref<4x6x8x100xbf16, #tpu.memory_space<vmem>>, vector<1x6x6x4xbf16>,
    %c0_412 = arith.constant 0 : index
    %c1_413 = arith.constant 1 : index
    %c0_414 = arith.constant 0 : index
    %c0_415 = arith.constant 0 : index
    %112 = vector.load %arg1[%c0_412, %c1_413, %c0_414, %c0_415] : memref<1x32x8x4xbf16, #tpu.memory_space<vmem>>, vector<1x6x6x4xbf16>
    %c2_416 = arith.constant 2 : index
    %c0_417 = arith.constant 0 : index
    %c0_418 = arith.constant 0 : index
    %c20_419 = arith.constant 20 : index
    %113 = vector.load %arg5[%c2_416, %c0_417, %c0_418, %c20_419] : memref<4x6x8x100xbf16, #tpu.memory_space<vmem>>, vector<1x6x6x4xbf16>
    tpu.vector_store %arg5[%c2_416, %c0_417, %c0_418, %c20_419], %112 {strides = array<i32>} : memref<4x6x8x100xbf16, #tpu.memory_space<vmem>>, vector<1x6x6x4xbf16>,
    %c0_420 = arith.constant 0 : index
    %c9_421 = arith.constant 9 : index
    %c0_422 = arith.constant 0 : index
    %c0_423 = arith.constant 0 : index
    %114 = vector.load %arg1[%c0_420, %c9_421, %c0_422, %c0_423] : memref<1x32x8x4xbf16, #tpu.memory_space<vmem>>, vector<1x6x6x4xbf16>
    %c2_424 = arith.constant 2 : index
    %c0_425 = arith.constant 0 : index
    %c0_426 = arith.constant 0 : index
    %c24_427 = arith.constant 24 : index
    %115 = vector.load %arg5[%c2_424, %c0_425, %c0_426, %c24_427] : memref<4x6x8x100xbf16, #tpu.memory_space<vmem>>, vector<1x6x6x4xbf16>
    tpu.vector_store %arg5[%c2_424, %c0_425, %c0_426, %c24_427], %114 {strides = array<i32>} : memref<4x6x8x100xbf16, #tpu.memory_space<vmem>>, vector<1x6x6x4xbf16>,
    %c0_428 = arith.constant 0 : index
    %c1_429 = arith.constant 1 : index
    %c1_430 = arith.constant 1 : index
    %c0_431 = arith.constant 0 : index
    %116 = vector.load %arg1[%c0_428, %c1_429, %c1_430, %c0_431] : memref<1x32x8x4xbf16, #tpu.memory_space<vmem>>, vector<1x6x6x4xbf16>
    %c2_432 = arith.constant 2 : index
    %c0_433 = arith.constant 0 : index
    %c0_434 = arith.constant 0 : index
    %c28_435 = arith.constant 28 : index
    %117 = vector.load %arg5[%c2_432, %c0_433, %c0_434, %c28_435] : memref<4x6x8x100xbf16, #tpu.memory_space<vmem>>, vector<1x6x6x4xbf16>
    tpu.vector_store %arg5[%c2_432, %c0_433, %c0_434, %c28_435], %116 {strides = array<i32>} : memref<4x6x8x100xbf16, #tpu.memory_space<vmem>>, vector<1x6x6x4xbf16>,
    %c0_436 = arith.constant 0 : index
    %c9_437 = arith.constant 9 : index
    %c1_438 = arith.constant 1 : index
    %c0_439 = arith.constant 0 : index
    %118 = vector.load %arg1[%c0_436, %c9_437, %c1_438, %c0_439] : memref<1x32x8x4xbf16, #tpu.memory_space<vmem>>, vector<1x6x6x4xbf16>
    %c2_440 = arith.constant 2 : index
    %c0_441 = arith.constant 0 : index
    %c0_442 = arith.constant 0 : index
    %c32_443 = arith.constant 32 : index
    %119 = vector.load %arg5[%c2_440, %c0_441, %c0_442, %c32_443] : memref<4x6x8x100xbf16, #tpu.memory_space<vmem>>, vector<1x6x6x4xbf16>
    tpu.vector_store %arg5[%c2_440, %c0_441, %c0_442, %c32_443], %118 {strides = array<i32>} : memref<4x6x8x100xbf16, #tpu.memory_space<vmem>>, vector<1x6x6x4xbf16>,
    %c0_444 = arith.constant 0 : index
    %c1_445 = arith.constant 1 : index
    %c2_446 = arith.constant 2 : index
    %c0_447 = arith.constant 0 : index
    %120 = vector.load %arg1[%c0_444, %c1_445, %c2_446, %c0_447] : memref<1x32x8x4xbf16, #tpu.memory_space<vmem>>, vector<1x6x6x4xbf16>
    %c2_448 = arith.constant 2 : index
    %c0_449 = arith.constant 0 : index
    %c0_450 = arith.constant 0 : index
    %c36_451 = arith.constant 36 : index
    %121 = vector.load %arg5[%c2_448, %c0_449, %c0_450, %c36_451] : memref<4x6x8x100xbf16, #tpu.memory_space<vmem>>, vector<1x6x6x4xbf16>
    tpu.vector_store %arg5[%c2_448, %c0_449, %c0_450, %c36_451], %120 {strides = array<i32>} : memref<4x6x8x100xbf16, #tpu.memory_space<vmem>>, vector<1x6x6x4xbf16>,
    %c0_452 = arith.constant 0 : index
    %c17_453 = arith.constant 17 : index
    %c0_454 = arith.constant 0 : index
    %c0_455 = arith.constant 0 : index
    %122 = vector.load %arg1[%c0_452, %c17_453, %c0_454, %c0_455] : memref<1x32x8x4xbf16, #tpu.memory_space<vmem>>, vector<1x6x6x4xbf16>
    %c2_456 = arith.constant 2 : index
    %c0_457 = arith.constant 0 : index
    %c0_458 = arith.constant 0 : index
    %c40_459 = arith.constant 40 : index
    %123 = vector.load %arg5[%c2_456, %c0_457, %c0_458, %c40_459] : memref<4x6x8x100xbf16, #tpu.memory_space<vmem>>, vector<1x6x6x4xbf16>
    tpu.vector_store %arg5[%c2_456, %c0_457, %c0_458, %c40_459], %122 {strides = array<i32>} : memref<4x6x8x100xbf16, #tpu.memory_space<vmem>>, vector<1x6x6x4xbf16>,
    %c0_460 = arith.constant 0 : index
    %c25_461 = arith.constant 25 : index
    %c0_462 = arith.constant 0 : index
    %c0_463 = arith.constant 0 : index
    %124 = vector.load %arg1[%c0_460, %c25_461, %c0_462, %c0_463] : memref<1x32x8x4xbf16, #tpu.memory_space<vmem>>, vector<1x6x6x4xbf16>
    %c2_464 = arith.constant 2 : index
    %c0_465 = arith.constant 0 : index
    %c0_466 = arith.constant 0 : index
    %c44_467 = arith.constant 44 : index
    %125 = vector.load %arg5[%c2_464, %c0_465, %c0_466, %c44_467] : memref<4x6x8x100xbf16, #tpu.memory_space<vmem>>, vector<1x6x6x4xbf16>
    tpu.vector_store %arg5[%c2_464, %c0_465, %c0_466, %c44_467], %124 {strides = array<i32>} : memref<4x6x8x100xbf16, #tpu.memory_space<vmem>>, vector<1x6x6x4xbf16>,
    %c0_468 = arith.constant 0 : index
    %c17_469 = arith.constant 17 : index
    %c1_470 = arith.constant 1 : index
    %c0_471 = arith.constant 0 : index
    %126 = vector.load %arg1[%c0_468, %c17_469, %c1_470, %c0_471] : memref<1x32x8x4xbf16, #tpu.memory_space<vmem>>, vector<1x6x6x4xbf16>
    %c2_472 = arith.constant 2 : index
    %c0_473 = arith.constant 0 : index
    %c0_474 = arith.constant 0 : index
    %c48_475 = arith.constant 48 : index
    %127 = vector.load %arg5[%c2_472, %c0_473, %c0_474, %c48_475] : memref<4x6x8x100xbf16, #tpu.memory_space<vmem>>, vector<1x6x6x4xbf16>
    tpu.vector_store %arg5[%c2_472, %c0_473, %c0_474, %c48_475], %126 {strides = array<i32>} : memref<4x6x8x100xbf16, #tpu.memory_space<vmem>>, vector<1x6x6x4xbf16>,
    %c0_476 = arith.constant 0 : index
    %c25_477 = arith.constant 25 : index
    %c1_478 = arith.constant 1 : index
    %c0_479 = arith.constant 0 : index
    %128 = vector.load %arg1[%c0_476, %c25_477, %c1_478, %c0_479] : memref<1x32x8x4xbf16, #tpu.memory_space<vmem>>, vector<1x6x6x4xbf16>
    %c2_480 = arith.constant 2 : index
    %c0_481 = arith.constant 0 : index
    %c0_482 = arith.constant 0 : index
    %c52_483 = arith.constant 52 : index
    %129 = vector.load %arg5[%c2_480, %c0_481, %c0_482, %c52_483] : memref<4x6x8x100xbf16, #tpu.memory_space<vmem>>, vector<1x6x6x4xbf16>
    tpu.vector_store %arg5[%c2_480, %c0_481, %c0_482, %c52_483], %128 {strides = array<i32>} : memref<4x6x8x100xbf16, #tpu.memory_space<vmem>>, vector<1x6x6x4xbf16>,
    %c0_484 = arith.constant 0 : index
    %c17_485 = arith.constant 17 : index
    %c2_486 = arith.constant 2 : index
    %c0_487 = arith.constant 0 : index
    %130 = vector.load %arg1[%c0_484, %c17_485, %c2_486, %c0_487] : memref<1x32x8x4xbf16, #tpu.memory_space<vmem>>, vector<1x6x6x4xbf16>
    %c2_488 = arith.constant 2 : index
    %c0_489 = arith.constant 0 : index
    %c0_490 = arith.constant 0 : index
    %c56_491 = arith.constant 56 : index
    %131 = vector.load %arg5[%c2_488, %c0_489, %c0_490, %c56_491] : memref<4x6x8x100xbf16, #tpu.memory_space<vmem>>, vector<1x6x6x4xbf16>
    tpu.vector_store %arg5[%c2_488, %c0_489, %c0_490, %c56_491], %130 {strides = array<i32>} : memref<4x6x8x100xbf16, #tpu.memory_space<vmem>>, vector<1x6x6x4xbf16>,
    %c0_492 = arith.constant 0 : index
    %c2_493 = arith.constant 2 : index
    %c0_494 = arith.constant 0 : index
    %c0_495 = arith.constant 0 : index
    %132 = vector.load %arg1[%c0_492, %c2_493, %c0_494, %c0_495] : memref<1x32x8x4xbf16, #tpu.memory_space<vmem>>, vector<1x6x6x4xbf16>
    %c2_496 = arith.constant 2 : index
    %c0_497 = arith.constant 0 : index
    %c0_498 = arith.constant 0 : index
    %c60_499 = arith.constant 60 : index
    %133 = vector.load %arg5[%c2_496, %c0_497, %c0_498, %c60_499] : memref<4x6x8x100xbf16, #tpu.memory_space<vmem>>, vector<1x6x6x4xbf16>
    tpu.vector_store %arg5[%c2_496, %c0_497, %c0_498, %c60_499], %132 {strides = array<i32>} : memref<4x6x8x100xbf16, #tpu.memory_space<vmem>>, vector<1x6x6x4xbf16>,
    %c0_500 = arith.constant 0 : index
    %c10_501 = arith.constant 10 : index
    %c0_502 = arith.constant 0 : index
    %c0_503 = arith.constant 0 : index
    %134 = vector.load %arg1[%c0_500, %c10_501, %c0_502, %c0_503] : memref<1x32x8x4xbf16, #tpu.memory_space<vmem>>, vector<1x6x6x4xbf16>
    %c2_504 = arith.constant 2 : index
    %c0_505 = arith.constant 0 : index
    %c0_506 = arith.constant 0 : index
    %c64_507 = arith.constant 64 : index
    %135 = vector.load %arg5[%c2_504, %c0_505, %c0_506, %c64_507] : memref<4x6x8x100xbf16, #tpu.memory_space<vmem>>, vector<1x6x6x4xbf16>
    tpu.vector_store %arg5[%c2_504, %c0_505, %c0_506, %c64_507], %134 {strides = array<i32>} : memref<4x6x8x100xbf16, #tpu.memory_space<vmem>>, vector<1x6x6x4xbf16>,
    %c0_508 = arith.constant 0 : index
    %c2_509 = arith.constant 2 : index
    %c1_510 = arith.constant 1 : index
    %c0_511 = arith.constant 0 : index
    %136 = vector.load %arg1[%c0_508, %c2_509, %c1_510, %c0_511] : memref<1x32x8x4xbf16, #tpu.memory_space<vmem>>, vector<1x6x6x4xbf16>
    %c2_512 = arith.constant 2 : index
    %c0_513 = arith.constant 0 : index
    %c0_514 = arith.constant 0 : index
    %c68_515 = arith.constant 68 : index
    %137 = vector.load %arg5[%c2_512, %c0_513, %c0_514, %c68_515] : memref<4x6x8x100xbf16, #tpu.memory_space<vmem>>, vector<1x6x6x4xbf16>
    tpu.vector_store %arg5[%c2_512, %c0_513, %c0_514, %c68_515], %136 {strides = array<i32>} : memref<4x6x8x100xbf16, #tpu.memory_space<vmem>>, vector<1x6x6x4xbf16>,
    %c0_516 = arith.constant 0 : index
    %c10_517 = arith.constant 10 : index
    %c1_518 = arith.constant 1 : index
    %c0_519 = arith.constant 0 : index
    %138 = vector.load %arg1[%c0_516, %c10_517, %c1_518, %c0_519] : memref<1x32x8x4xbf16, #tpu.memory_space<vmem>>, vector<1x6x6x4xbf16>
    %c2_520 = arith.constant 2 : index
    %c0_521 = arith.constant 0 : index
    %c0_522 = arith.constant 0 : index
    %c72_523 = arith.constant 72 : index
    %139 = vector.load %arg5[%c2_520, %c0_521, %c0_522, %c72_523] : memref<4x6x8x100xbf16, #tpu.memory_space<vmem>>, vector<1x6x6x4xbf16>
    tpu.vector_store %arg5[%c2_520, %c0_521, %c0_522, %c72_523], %138 {strides = array<i32>} : memref<4x6x8x100xbf16, #tpu.memory_space<vmem>>, vector<1x6x6x4xbf16>,
    %c0_524 = arith.constant 0 : index
    %c2_525 = arith.constant 2 : index
    %c2_526 = arith.constant 2 : index
    %c0_527 = arith.constant 0 : index
    %140 = vector.load %arg1[%c0_524, %c2_525, %c2_526, %c0_527] : memref<1x32x8x4xbf16, #tpu.memory_space<vmem>>, vector<1x6x6x4xbf16>
    %c2_528 = arith.constant 2 : index
    %c0_529 = arith.constant 0 : index
    %c0_530 = arith.constant 0 : index
    %c76_531 = arith.constant 76 : index
    %141 = vector.load %arg5[%c2_528, %c0_529, %c0_530, %c76_531] : memref<4x6x8x100xbf16, #tpu.memory_space<vmem>>, vector<1x6x6x4xbf16>
    tpu.vector_store %arg5[%c2_528, %c0_529, %c0_530, %c76_531], %140 {strides = array<i32>} : memref<4x6x8x100xbf16, #tpu.memory_space<vmem>>, vector<1x6x6x4xbf16>,
    %c0_532 = arith.constant 0 : index
    %c18 = arith.constant 18 : index
    %c0_533 = arith.constant 0 : index
    %c0_534 = arith.constant 0 : index
    %142 = vector.load %arg1[%c0_532, %c18, %c0_533, %c0_534] : memref<1x32x8x4xbf16, #tpu.memory_space<vmem>>, vector<1x6x6x4xbf16>
    %c2_535 = arith.constant 2 : index
    %c0_536 = arith.constant 0 : index
    %c0_537 = arith.constant 0 : index
    %c80_538 = arith.constant 80 : index
    %143 = vector.load %arg5[%c2_535, %c0_536, %c0_537, %c80_538] : memref<4x6x8x100xbf16, #tpu.memory_space<vmem>>, vector<1x6x6x4xbf16>
    tpu.vector_store %arg5[%c2_535, %c0_536, %c0_537, %c80_538], %142 {strides = array<i32>} : memref<4x6x8x100xbf16, #tpu.memory_space<vmem>>, vector<1x6x6x4xbf16>,
    %c0_539 = arith.constant 0 : index
    %c26 = arith.constant 26 : index
    %c0_540 = arith.constant 0 : index
    %c0_541 = arith.constant 0 : index
    %144 = vector.load %arg1[%c0_539, %c26, %c0_540, %c0_541] : memref<1x32x8x4xbf16, #tpu.memory_space<vmem>>, vector<1x6x6x4xbf16>
    %c2_542 = arith.constant 2 : index
    %c0_543 = arith.constant 0 : index
    %c0_544 = arith.constant 0 : index
    %c84_545 = arith.constant 84 : index
    %145 = vector.load %arg5[%c2_542, %c0_543, %c0_544, %c84_545] : memref<4x6x8x100xbf16, #tpu.memory_space<vmem>>, vector<1x6x6x4xbf16>
    tpu.vector_store %arg5[%c2_542, %c0_543, %c0_544, %c84_545], %144 {strides = array<i32>} : memref<4x6x8x100xbf16, #tpu.memory_space<vmem>>, vector<1x6x6x4xbf16>,
    %c0_546 = arith.constant 0 : index
    %c18_547 = arith.constant 18 : index
    %c1_548 = arith.constant 1 : index
    %c0_549 = arith.constant 0 : index
    %146 = vector.load %arg1[%c0_546, %c18_547, %c1_548, %c0_549] : memref<1x32x8x4xbf16, #tpu.memory_space<vmem>>, vector<1x6x6x4xbf16>
    %c2_550 = arith.constant 2 : index
    %c0_551 = arith.constant 0 : index
    %c0_552 = arith.constant 0 : index
    %c88_553 = arith.constant 88 : index
    %147 = vector.load %arg5[%c2_550, %c0_551, %c0_552, %c88_553] : memref<4x6x8x100xbf16, #tpu.memory_space<vmem>>, vector<1x6x6x4xbf16>
    tpu.vector_store %arg5[%c2_550, %c0_551, %c0_552, %c88_553], %146 {strides = array<i32>} : memref<4x6x8x100xbf16, #tpu.memory_space<vmem>>, vector<1x6x6x4xbf16>,
    %c0_554 = arith.constant 0 : index
    %c26_555 = arith.constant 26 : index
    %c1_556 = arith.constant 1 : index
    %c0_557 = arith.constant 0 : index
    %148 = vector.load %arg1[%c0_554, %c26_555, %c1_556, %c0_557] : memref<1x32x8x4xbf16, #tpu.memory_space<vmem>>, vector<1x6x6x4xbf16>
    %c2_558 = arith.constant 2 : index
    %c0_559 = arith.constant 0 : index
    %c0_560 = arith.constant 0 : index
    %c92_561 = arith.constant 92 : index
    %149 = vector.load %arg5[%c2_558, %c0_559, %c0_560, %c92_561] : memref<4x6x8x100xbf16, #tpu.memory_space<vmem>>, vector<1x6x6x4xbf16>
    tpu.vector_store %arg5[%c2_558, %c0_559, %c0_560, %c92_561], %148 {strides = array<i32>} : memref<4x6x8x100xbf16, #tpu.memory_space<vmem>>, vector<1x6x6x4xbf16>,
    %c0_562 = arith.constant 0 : index
    %c18_563 = arith.constant 18 : index
    %c2_564 = arith.constant 2 : index
    %c0_565 = arith.constant 0 : index
    %150 = vector.load %arg1[%c0_562, %c18_563, %c2_564, %c0_565] : memref<1x32x8x4xbf16, #tpu.memory_space<vmem>>, vector<1x6x6x4xbf16>
    %c2_566 = arith.constant 2 : index
    %c0_567 = arith.constant 0 : index
    %c0_568 = arith.constant 0 : index
    %c96_569 = arith.constant 96 : index
    %151 = vector.load %arg5[%c2_566, %c0_567, %c0_568, %c96_569] : memref<4x6x8x100xbf16, #tpu.memory_space<vmem>>, vector<1x6x6x4xbf16>
    tpu.vector_store %arg5[%c2_566, %c0_567, %c0_568, %c96_569], %150 {strides = array<i32>} : memref<4x6x8x100xbf16, #tpu.memory_space<vmem>>, vector<1x6x6x4xbf16>,
    %c0_570 = arith.constant 0 : index
    %c24_571 = arith.constant 24 : index
    %c0_572 = arith.constant 0 : index
    %c0_573 = arith.constant 0 : index
    %152 = vector.load %arg1[%c0_570, %c24_571, %c0_572, %c0_573] : memref<1x32x8x4xbf16, #tpu.memory_space<vmem>>, vector<1x6x6x4xbf16>
    %c3 = arith.constant 3 : index
    %c0_574 = arith.constant 0 : index
    %c0_575 = arith.constant 0 : index
    %c0_576 = arith.constant 0 : index
    %153 = vector.load %arg5[%c3, %c0_574, %c0_575, %c0_576] : memref<4x6x8x100xbf16, #tpu.memory_space<vmem>>, vector<1x6x6x4xbf16>
    tpu.vector_store %arg5[%c3, %c0_574, %c0_575, %c0_576], %152 {strides = array<i32>} : memref<4x6x8x100xbf16, #tpu.memory_space<vmem>>, vector<1x6x6x4xbf16>,
    %c0_577 = arith.constant 0 : index
    %c16_578 = arith.constant 16 : index
    %c1_579 = arith.constant 1 : index
    %c0_580 = arith.constant 0 : index
    %154 = vector.load %arg1[%c0_577, %c16_578, %c1_579, %c0_580] : memref<1x32x8x4xbf16, #tpu.memory_space<vmem>>, vector<1x6x6x4xbf16>
    %c3_581 = arith.constant 3 : index
    %c0_582 = arith.constant 0 : index
    %c0_583 = arith.constant 0 : index
    %c4_584 = arith.constant 4 : index
    %155 = vector.load %arg5[%c3_581, %c0_582, %c0_583, %c4_584] : memref<4x6x8x100xbf16, #tpu.memory_space<vmem>>, vector<1x6x6x4xbf16>
    tpu.vector_store %arg5[%c3_581, %c0_582, %c0_583, %c4_584], %154 {strides = array<i32>} : memref<4x6x8x100xbf16, #tpu.memory_space<vmem>>, vector<1x6x6x4xbf16>,
    %c0_585 = arith.constant 0 : index
    %c24_586 = arith.constant 24 : index
    %c1_587 = arith.constant 1 : index
    %c0_588 = arith.constant 0 : index
    %156 = vector.load %arg1[%c0_585, %c24_586, %c1_587, %c0_588] : memref<1x32x8x4xbf16, #tpu.memory_space<vmem>>, vector<1x6x6x4xbf16>
    %c3_589 = arith.constant 3 : index
    %c0_590 = arith.constant 0 : index
    %c0_591 = arith.constant 0 : index
    %c8_592 = arith.constant 8 : index
    %157 = vector.load %arg5[%c3_589, %c0_590, %c0_591, %c8_592] : memref<4x6x8x100xbf16, #tpu.memory_space<vmem>>, vector<1x6x6x4xbf16>
    tpu.vector_store %arg5[%c3_589, %c0_590, %c0_591, %c8_592], %156 {strides = array<i32>} : memref<4x6x8x100xbf16, #tpu.memory_space<vmem>>, vector<1x6x6x4xbf16>,
    %c0_593 = arith.constant 0 : index
    %c16_594 = arith.constant 16 : index
    %c2_595 = arith.constant 2 : index
    %c0_596 = arith.constant 0 : index
    %158 = vector.load %arg1[%c0_593, %c16_594, %c2_595, %c0_596] : memref<1x32x8x4xbf16, #tpu.memory_space<vmem>>, vector<1x6x6x4xbf16>
    %c3_597 = arith.constant 3 : index
    %c0_598 = arith.constant 0 : index
    %c0_599 = arith.constant 0 : index
    %c12_600 = arith.constant 12 : index
    %159 = vector.load %arg5[%c3_597, %c0_598, %c0_599, %c12_600] : memref<4x6x8x100xbf16, #tpu.memory_space<vmem>>, vector<1x6x6x4xbf16>
    tpu.vector_store %arg5[%c3_597, %c0_598, %c0_599, %c12_600], %158 {strides = array<i32>} : memref<4x6x8x100xbf16, #tpu.memory_space<vmem>>, vector<1x6x6x4xbf16>,
    %c0_601 = arith.constant 0 : index
    %c24_602 = arith.constant 24 : index
    %c2_603 = arith.constant 2 : index
    %c0_604 = arith.constant 0 : index
    %160 = vector.load %arg1[%c0_601, %c24_602, %c2_603, %c0_604] : memref<1x32x8x4xbf16, #tpu.memory_space<vmem>>, vector<1x6x6x4xbf16>
    %c3_605 = arith.constant 3 : index
    %c0_606 = arith.constant 0 : index
    %c0_607 = arith.constant 0 : index
    %c16_608 = arith.constant 16 : index
    %161 = vector.load %arg5[%c3_605, %c0_606, %c0_607, %c16_608] : memref<4x6x8x100xbf16, #tpu.memory_space<vmem>>, vector<1x6x6x4xbf16>
    tpu.vector_store %arg5[%c3_605, %c0_606, %c0_607, %c16_608], %160 {strides = array<i32>} : memref<4x6x8x100xbf16, #tpu.memory_space<vmem>>, vector<1x6x6x4xbf16>,
    %c0_609 = arith.constant 0 : index
    %c9_610 = arith.constant 9 : index
    %c0_611 = arith.constant 0 : index
    %c0_612 = arith.constant 0 : index
    %162 = vector.load %arg1[%c0_609, %c9_610, %c0_611, %c0_612] : memref<1x32x8x4xbf16, #tpu.memory_space<vmem>>, vector<1x6x6x4xbf16>
    %c3_613 = arith.constant 3 : index
    %c0_614 = arith.constant 0 : index
    %c0_615 = arith.constant 0 : index
    %c20_616 = arith.constant 20 : index
    %163 = vector.load %arg5[%c3_613, %c0_614, %c0_615, %c20_616] : memref<4x6x8x100xbf16, #tpu.memory_space<vmem>>, vector<1x6x6x4xbf16>
    tpu.vector_store %arg5[%c3_613, %c0_614, %c0_615, %c20_616], %162 {strides = array<i32>} : memref<4x6x8x100xbf16, #tpu.memory_space<vmem>>, vector<1x6x6x4xbf16>,
    %c0_617 = arith.constant 0 : index
    %c1_618 = arith.constant 1 : index
    %c1_619 = arith.constant 1 : index
    %c0_620 = arith.constant 0 : index
    %164 = vector.load %arg1[%c0_617, %c1_618, %c1_619, %c0_620] : memref<1x32x8x4xbf16, #tpu.memory_space<vmem>>, vector<1x6x6x4xbf16>
    %c3_621 = arith.constant 3 : index
    %c0_622 = arith.constant 0 : index
    %c0_623 = arith.constant 0 : index
    %c24_624 = arith.constant 24 : index
    %165 = vector.load %arg5[%c3_621, %c0_622, %c0_623, %c24_624] : memref<4x6x8x100xbf16, #tpu.memory_space<vmem>>, vector<1x6x6x4xbf16>
    tpu.vector_store %arg5[%c3_621, %c0_622, %c0_623, %c24_624], %164 {strides = array<i32>} : memref<4x6x8x100xbf16, #tpu.memory_space<vmem>>, vector<1x6x6x4xbf16>,
    %c0_625 = arith.constant 0 : index
    %c9_626 = arith.constant 9 : index
    %c1_627 = arith.constant 1 : index
    %c0_628 = arith.constant 0 : index
    %166 = vector.load %arg1[%c0_625, %c9_626, %c1_627, %c0_628] : memref<1x32x8x4xbf16, #tpu.memory_space<vmem>>, vector<1x6x6x4xbf16>
    %c3_629 = arith.constant 3 : index
    %c0_630 = arith.constant 0 : index
    %c0_631 = arith.constant 0 : index
    %c28_632 = arith.constant 28 : index
    %167 = vector.load %arg5[%c3_629, %c0_630, %c0_631, %c28_632] : memref<4x6x8x100xbf16, #tpu.memory_space<vmem>>, vector<1x6x6x4xbf16>
    tpu.vector_store %arg5[%c3_629, %c0_630, %c0_631, %c28_632], %166 {strides = array<i32>} : memref<4x6x8x100xbf16, #tpu.memory_space<vmem>>, vector<1x6x6x4xbf16>,
    %c0_633 = arith.constant 0 : index
    %c1_634 = arith.constant 1 : index
    %c2_635 = arith.constant 2 : index
    %c0_636 = arith.constant 0 : index
    %168 = vector.load %arg1[%c0_633, %c1_634, %c2_635, %c0_636] : memref<1x32x8x4xbf16, #tpu.memory_space<vmem>>, vector<1x6x6x4xbf16>
    %c3_637 = arith.constant 3 : index
    %c0_638 = arith.constant 0 : index
    %c0_639 = arith.constant 0 : index
    %c32_640 = arith.constant 32 : index
    %169 = vector.load %arg5[%c3_637, %c0_638, %c0_639, %c32_640] : memref<4x6x8x100xbf16, #tpu.memory_space<vmem>>, vector<1x6x6x4xbf16>
    tpu.vector_store %arg5[%c3_637, %c0_638, %c0_639, %c32_640], %168 {strides = array<i32>} : memref<4x6x8x100xbf16, #tpu.memory_space<vmem>>, vector<1x6x6x4xbf16>,
    %c0_641 = arith.constant 0 : index
    %c9_642 = arith.constant 9 : index
    %c2_643 = arith.constant 2 : index
    %c0_644 = arith.constant 0 : index
    %170 = vector.load %arg1[%c0_641, %c9_642, %c2_643, %c0_644] : memref<1x32x8x4xbf16, #tpu.memory_space<vmem>>, vector<1x6x6x4xbf16>
    %c3_645 = arith.constant 3 : index
    %c0_646 = arith.constant 0 : index
    %c0_647 = arith.constant 0 : index
    %c36_648 = arith.constant 36 : index
    %171 = vector.load %arg5[%c3_645, %c0_646, %c0_647, %c36_648] : memref<4x6x8x100xbf16, #tpu.memory_space<vmem>>, vector<1x6x6x4xbf16>
    tpu.vector_store %arg5[%c3_645, %c0_646, %c0_647, %c36_648], %170 {strides = array<i32>} : memref<4x6x8x100xbf16, #tpu.memory_space<vmem>>, vector<1x6x6x4xbf16>,
    %c0_649 = arith.constant 0 : index
    %c25_650 = arith.constant 25 : index
    %c0_651 = arith.constant 0 : index
    %c0_652 = arith.constant 0 : index
    %172 = vector.load %arg1[%c0_649, %c25_650, %c0_651, %c0_652] : memref<1x32x8x4xbf16, #tpu.memory_space<vmem>>, vector<1x6x6x4xbf16>
    %c3_653 = arith.constant 3 : index
    %c0_654 = arith.constant 0 : index
    %c0_655 = arith.constant 0 : index
    %c40_656 = arith.constant 40 : index
    %173 = vector.load %arg5[%c3_653, %c0_654, %c0_655, %c40_656] : memref<4x6x8x100xbf16, #tpu.memory_space<vmem>>, vector<1x6x6x4xbf16>
    tpu.vector_store %arg5[%c3_653, %c0_654, %c0_655, %c40_656], %172 {strides = array<i32>} : memref<4x6x8x100xbf16, #tpu.memory_space<vmem>>, vector<1x6x6x4xbf16>,
    %c0_657 = arith.constant 0 : index
    %c17_658 = arith.constant 17 : index
    %c1_659 = arith.constant 1 : index
    %c0_660 = arith.constant 0 : index
    %174 = vector.load %arg1[%c0_657, %c17_658, %c1_659, %c0_660] : memref<1x32x8x4xbf16, #tpu.memory_space<vmem>>, vector<1x6x6x4xbf16>
    %c3_661 = arith.constant 3 : index
    %c0_662 = arith.constant 0 : index
    %c0_663 = arith.constant 0 : index
    %c44_664 = arith.constant 44 : index
    %175 = vector.load %arg5[%c3_661, %c0_662, %c0_663, %c44_664] : memref<4x6x8x100xbf16, #tpu.memory_space<vmem>>, vector<1x6x6x4xbf16>
    tpu.vector_store %arg5[%c3_661, %c0_662, %c0_663, %c44_664], %174 {strides = array<i32>} : memref<4x6x8x100xbf16, #tpu.memory_space<vmem>>, vector<1x6x6x4xbf16>,
    %c0_665 = arith.constant 0 : index
    %c25_666 = arith.constant 25 : index
    %c1_667 = arith.constant 1 : index
    %c0_668 = arith.constant 0 : index
    %176 = vector.load %arg1[%c0_665, %c25_666, %c1_667, %c0_668] : memref<1x32x8x4xbf16, #tpu.memory_space<vmem>>, vector<1x6x6x4xbf16>
    %c3_669 = arith.constant 3 : index
    %c0_670 = arith.constant 0 : index
    %c0_671 = arith.constant 0 : index
    %c48_672 = arith.constant 48 : index
    %177 = vector.load %arg5[%c3_669, %c0_670, %c0_671, %c48_672] : memref<4x6x8x100xbf16, #tpu.memory_space<vmem>>, vector<1x6x6x4xbf16>
    tpu.vector_store %arg5[%c3_669, %c0_670, %c0_671, %c48_672], %176 {strides = array<i32>} : memref<4x6x8x100xbf16, #tpu.memory_space<vmem>>, vector<1x6x6x4xbf16>,
    %c0_673 = arith.constant 0 : index
    %c17_674 = arith.constant 17 : index
    %c2_675 = arith.constant 2 : index
    %c0_676 = arith.constant 0 : index
    %178 = vector.load %arg1[%c0_673, %c17_674, %c2_675, %c0_676] : memref<1x32x8x4xbf16, #tpu.memory_space<vmem>>, vector<1x6x6x4xbf16>
    %c3_677 = arith.constant 3 : index
    %c0_678 = arith.constant 0 : index
    %c0_679 = arith.constant 0 : index
    %c52_680 = arith.constant 52 : index
    %179 = vector.load %arg5[%c3_677, %c0_678, %c0_679, %c52_680] : memref<4x6x8x100xbf16, #tpu.memory_space<vmem>>, vector<1x6x6x4xbf16>
    tpu.vector_store %arg5[%c3_677, %c0_678, %c0_679, %c52_680], %178 {strides = array<i32>} : memref<4x6x8x100xbf16, #tpu.memory_space<vmem>>, vector<1x6x6x4xbf16>,
    %c0_681 = arith.constant 0 : index
    %c25_682 = arith.constant 25 : index
    %c2_683 = arith.constant 2 : index
    %c0_684 = arith.constant 0 : index
    %180 = vector.load %arg1[%c0_681, %c25_682, %c2_683, %c0_684] : memref<1x32x8x4xbf16, #tpu.memory_space<vmem>>, vector<1x6x6x4xbf16>
    %c3_685 = arith.constant 3 : index
    %c0_686 = arith.constant 0 : index
    %c0_687 = arith.constant 0 : index
    %c56_688 = arith.constant 56 : index
    %181 = vector.load %arg5[%c3_685, %c0_686, %c0_687, %c56_688] : memref<4x6x8x100xbf16, #tpu.memory_space<vmem>>, vector<1x6x6x4xbf16>
    tpu.vector_store %arg5[%c3_685, %c0_686, %c0_687, %c56_688], %180 {strides = array<i32>} : memref<4x6x8x100xbf16, #tpu.memory_space<vmem>>, vector<1x6x6x4xbf16>,
    %c0_689 = arith.constant 0 : index
    %c10_690 = arith.constant 10 : index
    %c0_691 = arith.constant 0 : index
    %c0_692 = arith.constant 0 : index
    %182 = vector.load %arg1[%c0_689, %c10_690, %c0_691, %c0_692] : memref<1x32x8x4xbf16, #tpu.memory_space<vmem>>, vector<1x6x6x4xbf16>
    %c3_693 = arith.constant 3 : index
    %c0_694 = arith.constant 0 : index
    %c0_695 = arith.constant 0 : index
    %c60_696 = arith.constant 60 : index
    %183 = vector.load %arg5[%c3_693, %c0_694, %c0_695, %c60_696] : memref<4x6x8x100xbf16, #tpu.memory_space<vmem>>, vector<1x6x6x4xbf16>
    tpu.vector_store %arg5[%c3_693, %c0_694, %c0_695, %c60_696], %182 {strides = array<i32>} : memref<4x6x8x100xbf16, #tpu.memory_space<vmem>>, vector<1x6x6x4xbf16>,
    %c0_697 = arith.constant 0 : index
    %c2_698 = arith.constant 2 : index
    %c1_699 = arith.constant 1 : index
    %c0_700 = arith.constant 0 : index
    %184 = vector.load %arg1[%c0_697, %c2_698, %c1_699, %c0_700] : memref<1x32x8x4xbf16, #tpu.memory_space<vmem>>, vector<1x6x6x4xbf16>
    %c3_701 = arith.constant 3 : index
    %c0_702 = arith.constant 0 : index
    %c0_703 = arith.constant 0 : index
    %c64_704 = arith.constant 64 : index
    %185 = vector.load %arg5[%c3_701, %c0_702, %c0_703, %c64_704] : memref<4x6x8x100xbf16, #tpu.memory_space<vmem>>, vector<1x6x6x4xbf16>
    tpu.vector_store %arg5[%c3_701, %c0_702, %c0_703, %c64_704], %184 {strides = array<i32>} : memref<4x6x8x100xbf16, #tpu.memory_space<vmem>>, vector<1x6x6x4xbf16>,
    %c0_705 = arith.constant 0 : index
    %c10_706 = arith.constant 10 : index
    %c1_707 = arith.constant 1 : index
    %c0_708 = arith.constant 0 : index
    %186 = vector.load %arg1[%c0_705, %c10_706, %c1_707, %c0_708] : memref<1x32x8x4xbf16, #tpu.memory_space<vmem>>, vector<1x6x6x4xbf16>
    %c3_709 = arith.constant 3 : index
    %c0_710 = arith.constant 0 : index
    %c0_711 = arith.constant 0 : index
    %c68_712 = arith.constant 68 : index
    %187 = vector.load %arg5[%c3_709, %c0_710, %c0_711, %c68_712] : memref<4x6x8x100xbf16, #tpu.memory_space<vmem>>, vector<1x6x6x4xbf16>
    tpu.vector_store %arg5[%c3_709, %c0_710, %c0_711, %c68_712], %186 {strides = array<i32>} : memref<4x6x8x100xbf16, #tpu.memory_space<vmem>>, vector<1x6x6x4xbf16>,
    %c0_713 = arith.constant 0 : index
    %c2_714 = arith.constant 2 : index
    %c2_715 = arith.constant 2 : index
    %c0_716 = arith.constant 0 : index
    %188 = vector.load %arg1[%c0_713, %c2_714, %c2_715, %c0_716] : memref<1x32x8x4xbf16, #tpu.memory_space<vmem>>, vector<1x6x6x4xbf16>
    %c3_717 = arith.constant 3 : index
    %c0_718 = arith.constant 0 : index
    %c0_719 = arith.constant 0 : index
    %c72_720 = arith.constant 72 : index
    %189 = vector.load %arg5[%c3_717, %c0_718, %c0_719, %c72_720] : memref<4x6x8x100xbf16, #tpu.memory_space<vmem>>, vector<1x6x6x4xbf16>
    tpu.vector_store %arg5[%c3_717, %c0_718, %c0_719, %c72_720], %188 {strides = array<i32>} : memref<4x6x8x100xbf16, #tpu.memory_space<vmem>>, vector<1x6x6x4xbf16>,
    %c0_721 = arith.constant 0 : index
    %c10_722 = arith.constant 10 : index
    %c2_723 = arith.constant 2 : index
    %c0_724 = arith.constant 0 : index
    %190 = vector.load %arg1[%c0_721, %c10_722, %c2_723, %c0_724] : memref<1x32x8x4xbf16, #tpu.memory_space<vmem>>, vector<1x6x6x4xbf16>
    %c3_725 = arith.constant 3 : index
    %c0_726 = arith.constant 0 : index
    %c0_727 = arith.constant 0 : index
    %c76_728 = arith.constant 76 : index
    %191 = vector.load %arg5[%c3_725, %c0_726, %c0_727, %c76_728] : memref<4x6x8x100xbf16, #tpu.memory_space<vmem>>, vector<1x6x6x4xbf16>
    tpu.vector_store %arg5[%c3_725, %c0_726, %c0_727, %c76_728], %190 {strides = array<i32>} : memref<4x6x8x100xbf16, #tpu.memory_space<vmem>>, vector<1x6x6x4xbf16>,
    %c0_729 = arith.constant 0 : index
    %c26_730 = arith.constant 26 : index
    %c0_731 = arith.constant 0 : index
    %c0_732 = arith.constant 0 : index
    %192 = vector.load %arg1[%c0_729, %c26_730, %c0_731, %c0_732] : memref<1x32x8x4xbf16, #tpu.memory_space<vmem>>, vector<1x6x6x4xbf16>
    %c3_733 = arith.constant 3 : index
    %c0_734 = arith.constant 0 : index
    %c0_735 = arith.constant 0 : index
    %c80_736 = arith.constant 80 : index
    %193 = vector.load %arg5[%c3_733, %c0_734, %c0_735, %c80_736] : memref<4x6x8x100xbf16, #tpu.memory_space<vmem>>, vector<1x6x6x4xbf16>
    tpu.vector_store %arg5[%c3_733, %c0_734, %c0_735, %c80_736], %192 {strides = array<i32>} : memref<4x6x8x100xbf16, #tpu.memory_space<vmem>>, vector<1x6x6x4xbf16>,
    %c0_737 = arith.constant 0 : index
    %c18_738 = arith.constant 18 : index
    %c1_739 = arith.constant 1 : index
    %c0_740 = arith.constant 0 : index
    %194 = vector.load %arg1[%c0_737, %c18_738, %c1_739, %c0_740] : memref<1x32x8x4xbf16, #tpu.memory_space<vmem>>, vector<1x6x6x4xbf16>
    %c3_741 = arith.constant 3 : index
    %c0_742 = arith.constant 0 : index
    %c0_743 = arith.constant 0 : index
    %c84_744 = arith.constant 84 : index
    %195 = vector.load %arg5[%c3_741, %c0_742, %c0_743, %c84_744] : memref<4x6x8x100xbf16, #tpu.memory_space<vmem>>, vector<1x6x6x4xbf16>
    tpu.vector_store %arg5[%c3_741, %c0_742, %c0_743, %c84_744], %194 {strides = array<i32>} : memref<4x6x8x100xbf16, #tpu.memory_space<vmem>>, vector<1x6x6x4xbf16>,
    %c0_745 = arith.constant 0 : index
    %c26_746 = arith.constant 26 : index
    %c1_747 = arith.constant 1 : index
    %c0_748 = arith.constant 0 : index
    %196 = vector.load %arg1[%c0_745, %c26_746, %c1_747, %c0_748] : memref<1x32x8x4xbf16, #tpu.memory_space<vmem>>, vector<1x6x6x4xbf16>
    %c3_749 = arith.constant 3 : index
    %c0_750 = arith.constant 0 : index
    %c0_751 = arith.constant 0 : index
    %c88_752 = arith.constant 88 : index
    %197 = vector.load %arg5[%c3_749, %c0_750, %c0_751, %c88_752] : memref<4x6x8x100xbf16, #tpu.memory_space<vmem>>, vector<1x6x6x4xbf16>
    tpu.vector_store %arg5[%c3_749, %c0_750, %c0_751, %c88_752], %196 {strides = array<i32>} : memref<4x6x8x100xbf16, #tpu.memory_space<vmem>>, vector<1x6x6x4xbf16>,
    %c0_753 = arith.constant 0 : index
    %c18_754 = arith.constant 18 : index
    %c2_755 = arith.constant 2 : index
    %c0_756 = arith.constant 0 : index
    %198 = vector.load %arg1[%c0_753, %c18_754, %c2_755, %c0_756] : memref<1x32x8x4xbf16, #tpu.memory_space<vmem>>, vector<1x6x6x4xbf16>
    %c3_757 = arith.constant 3 : index
    %c0_758 = arith.constant 0 : index
    %c0_759 = arith.constant 0 : index
    %c92_760 = arith.constant 92 : index
    %199 = vector.load %arg5[%c3_757, %c0_758, %c0_759, %c92_760] : memref<4x6x8x100xbf16, #tpu.memory_space<vmem>>, vector<1x6x6x4xbf16>
    tpu.vector_store %arg5[%c3_757, %c0_758, %c0_759, %c92_760], %198 {strides = array<i32>} : memref<4x6x8x100xbf16, #tpu.memory_space<vmem>>, vector<1x6x6x4xbf16>,
    %c0_761 = arith.constant 0 : index
    %c26_762 = arith.constant 26 : index
    %c2_763 = arith.constant 2 : index
    %c0_764 = arith.constant 0 : index
    %200 = vector.load %arg1[%c0_761, %c26_762, %c2_763, %c0_764] : memref<1x32x8x4xbf16, #tpu.memory_space<vmem>>, vector<1x6x6x4xbf16>
    %c3_765 = arith.constant 3 : index
    %c0_766 = arith.constant 0 : index
    %c0_767 = arith.constant 0 : index
    %c96_768 = arith.constant 96 : index
    %201 = vector.load %arg5[%c3_765, %c0_766, %c0_767, %c96_768] : memref<4x6x8x100xbf16, #tpu.memory_space<vmem>>, vector<1x6x6x4xbf16>
    tpu.vector_store %arg5[%c3_765, %c0_766, %c0_767, %c96_768], %200 {strides = array<i32>} : memref<4x6x8x100xbf16, #tpu.memory_space<vmem>>, vector<1x6x6x4xbf16>,
    %c0_769 = arith.constant 0 : index
    %c0_770 = arith.constant 0 : index
    %c0_771 = arith.constant 0 : index
    %c0_772 = arith.constant 0 : index
    %202 = vector.load %arg5[%c0_769, %c0_770, %c0_771, %c0_772] : memref<4x6x8x100xbf16, #tpu.memory_space<vmem>>, vector<4x6x8x100xbf16>
    %203 = vector.shape_cast %202 : vector<4x6x8x100xbf16> to vector<192x100xbf16>
    %c0_773 = arith.constant 0 : index
    %c0_774 = arith.constant 0 : index
    %204 = vector.load %arg2[%c0_773, %c0_774] : memref<100x8xbf16, #tpu.memory_space<vmem>>, vector<100x8xbf16>
    %cst_775 = arith.constant dense<0.000000e+00> : vector<192x8xf32>
    %205 = tpu.matmul %203, %204, %cst_775 {dimension_numbers = #tpu.dot_dimension_numbers<[1], [0], [0], [1], [0, 0, 1, 1], [], []>} : vector<192x100xbf16>, vector<100x8xbf16>, vector<192x8xf32> -> vector<192x8xf32>
    %206 = vector.extract_strided_slice %205 {offsets = [0, 0], sizes = [48, 8], strides = [1, 1]} : vector<192x8xf32> to vector<48x8xf32>
    %207 = vector.extract_strided_slice %205 {offsets = [48, 0], sizes = [48, 8], strides = [1, 1]} : vector<192x8xf32> to vector<48x8xf32>
    %208 = arith.maximumf %206, %207 : vector<48x8xf32>
    %209 = vector.extract_strided_slice %205 {offsets = [96, 0], sizes = [48, 8], strides = [1, 1]} : vector<192x8xf32> to vector<48x8xf32>
    %210 = arith.maximumf %208, %209 : vector<48x8xf32>
    %211 = vector.extract_strided_slice %205 {offsets = [144, 0], sizes = [48, 8], strides = [1, 1]} : vector<192x8xf32> to vector<48x8xf32>
    %212 = arith.maximumf %210, %211 : vector<48x8xf32>
    %c0_776 = arith.constant 0 : index
    %c0_777 = arith.constant 0 : index
    %213 = vector.load %arg3[%c0_776, %c0_777] : memref<1x8xf32, #tpu.memory_space<vmem>>, vector<1x8xf32>
    %214 = vector.broadcast %213 : vector<1x8xf32> to vector<48x8xf32>
    %215 = arith.addf %212, %214 : vector<48x8xf32>
    %cst_778 = arith.constant 0.000000e+00 : f32
    %216 = vector.broadcast %cst_778 : f32 to vector<48x8xf32>
    %217 = arith.maximumf %215, %216 : vector<48x8xf32>
    %218 = vector.shape_cast %217 : vector<48x8xf32> to vector<1x6x8x8xf32>
    %219 = vector.extract_strided_slice %218 {offsets = [0, 0, 0, 0], sizes = [1, 6, 6, 8], strides = [1, 1, 1, 1]} : vector<1x6x8x8xf32> to vector<1x6x6x8xf32>
    %c0_779 = arith.constant 0 : index
    %c0_780 = arith.constant 0 : index
    %c0_781 = arith.constant 0 : index
    %c0_782 = arith.constant 0 : index
    %220 = vector.load %arg4[%c0_779, %c0_780, %c0_781, %c0_782] : memref<1x6x6x8xf32, #tpu.memory_space<vmem>>, vector<1x6x6x8xf32>
    tpu.vector_store %arg4[%c0_779, %c0_780, %c0_781, %c0_782], %219 {strides = array<i32>} : memref<1x6x6x8xf32, #tpu.memory_space<vmem>>, vector<1x6x6x8xf32>,
    return
  }
  func.func @transform_0(%arg0: i32) -> (i32, i32, i32, i32) {
    %c0_i32 = arith.constant 0 : i32
    %c0_i32_0 = arith.constant 0 : i32
    %c0_i32_1 = arith.constant 0 : i32
    %c0_i32_2 = arith.constant 0 : i32
    return %arg0, %c0_i32, %c0_i32_0, %c0_i32_1 : i32, i32, i32, i32
  }
  func.func @transform_1(%arg0: i32) -> (i32, i32) {
    %c0_i32 = arith.constant 0 : i32
    %c0_i32_0 = arith.constant 0 : i32
    %c0_i32_1 = arith.constant 0 : i32
    return %c0_i32, %c0_i32_0 : i32, i32
  }
  func.func @transform_2(%arg0: i32) -> (i32, i32) {
    %c0_i32 = arith.constant 0 : i32
    %c0_i32_0 = arith.constant 0 : i32
    %c0_i32_1 = arith.constant 0 : i32
    return %c0_i32, %c0_i32_0 : i32, i32
  }
  func.func @transform_3(%arg0: i32) -> (i32, i32, i32, i32) {
    %c0_i32 = arith.constant 0 : i32
    %c0_i32_0 = arith.constant 0 : i32
    %c0_i32_1 = arith.constant 0 : i32
    %c0_i32_2 = arith.constant 0 : i32
    return %arg0, %c0_i32, %c0_i32_0, %c0_i32_1 : i32, i32, i32, i32
  }
}

</mosaic_0001>

<bundles_post_ra>
// kernel: conv_layer_forward.1
= control target key start
LH: loop header
LB: loop body
LE: loop exit
PB: predicated region body
PF: predicated region fallthrough
CT: control target
= control target key end

     0   :  { %s7397_s12 = smov 0   ;;  %s9334_s0 = inlined_call_operand.vmem [shape: bf16[2,32,8,4], index: 0, kind: input, shape index: {}]   ;;  %s9335_s1 = inlined_call_operand.vmem [shape: bf16[100,8], index: 1, kind: input, shape index: {}]   ;;  %s9336_s2 = inlined_call_operand.vmem [shape: f32[1,8], index: 2, kind: input, shape index: {}]   ;;  %s9337_s3 = inlined_call_operand.vmem [shape: f32[2,6,6,8], index: 3, kind: output, shape index: {}]  }
   0x1 LB: > { %s6425_s13 = sadd.s32 4294967295, %s7350_s12   ;;  %p6429_p0 = scmp.ge.s32.totalorder %s7350_s12, 1  ;;  %s7350_s12 = sphi %s7397_s12, %s13_s12  }
   0x2   : > { %p137_p1 = scmp.lt.s32.totalorder %s7350_s12, 3 }
   0x4   : > { %p138_p2 = pnand %p6429_p0, %p137_p1 }
   0x5   : > { %p161_p3 = scmp.lt.s32.totalorder (!%p138_p2), %s6425_s13, 1  ;;  %s7352_s18 = smov (!%p138_p2), 4   ;;  %vm9340_vm0 = vcmask (!%p138_p2), 26624   ;;  %vm241_vm1 = vcmask (!%p138_p2), 59424   ;;  %vm326_vm2 = vcmask (!%p138_p2), 92224   ;;  %vm411_vm3 = vcmask (!%p138_p2), 125024  }
   0x6   : > { %141 = sbr.rel (%p138_p2) target bundleno = 1510 (0x5e6), region = 32  ;;  %s7353_s19 = smov (!%p138_p2), 8   ;;  %vm460_vm4 = vcmask (!%p138_p2), 157824   ;;  %vm498_vm5 = vcmask (!%p138_p2), 190624   ;;  %vm536_vm6 = vcmask (!%p138_p2), 223424   ;;  %vm621_vm7 = vcmask (!%p138_p2), 256224  }
   0x7   : > { %s7354_s20 = smov (!%p138_p2), 12   ;;  %s7355_s21 = smov (!%p138_p2), 16   ;;  %vm706_vm8 = vcmask (!%p138_p2), 289024   ;;  %vm755_vm9 = vcmask (!%p138_p2), 321824   ;;  %vm793_vm10 = vcmask (!%p138_p2), 354624   ;;  %vm9353_vm11 = vcmask (!%p138_p2), 387424  }
   0x8   : > { %s7356_s22 = smov (!%p138_p2), 20   ;;  %s7357_s23 = smov (!%p138_p2), 24   ;;  %vm9351_vm12 = vcmask (!%p138_p2), 420224   ;;  %vm9350_vm13 = vcmask (!%p138_p2), 453024   ;;  %vm172_vm14 = vcmask (!%p138_p2), 814083   ;;  %vm9352_vm15 = vcmask (!%p138_p2), 485824  }
   0x9   : > { %s7358_s24 = smov (!%p138_p2), 28   ;;  %s7359_s25 = smov (!%p138_p2), 32  }
   0xa   : > { %s7360_s26 = smov (!%p138_p2), 36   ;;  %s7361_s27 = smov (!%p138_p2), 40  }
   0xb   : > { %s7362_s28 = smov (!%p138_p2), 44   ;;  %s7363_s29 = smov (!%p138_p2), 48  }
   0xc   : > { %s7364_s30 = smov (!%p138_p2), 52   ;;  %s7365_s4 = smov (!%p138_p2), 56  }
   0xd   : > { %s9564_s13 = smov (!%p161_p3, %s6425_s13), 1  ;;  %s7366_s5 = smov 60  }
   0xe   : > { %s7217_s14 = sshll.u32 %s9564_s13, 7  ;;  %s7367_s6 = smov 64  }
   0xf   : > { %s7411_s17 = scalar_lea.vmem %s9334_s0, %s7217_s14  ;;  %s7368_s7 = smov 68  }
  0x10   : > { %v6435_v0 = vld [vmem:[%s7411_s17 + $0x28] sm:$0x7]  ;;  %v6433_v1 = vld [vmem:[%s7411_s17 + $0x20] sm:$0x7]  ;;  %v6436_v2 = vld [vmem:[%s7411_s17 + $0x2c] sm:$0x7] }
  0x11   : > { %227 = vrot.lane.b32.xlu1 %v6435_v0, %s7352_s18  ;;  %223 = vrot.lane.b32.xlu0 %v6433_v1, %s7352_s18  ;;  %v6434_v3 = vld [vmem:[%s7411_s17 + $0x24] sm:$0x7]  ;;  %v248_v5 = vld [vmem:[%s7411_s17] sm:$0xf]  ;;  %s7369_s8 = smov 72   ;;  %s7370_s9 = smov 76  }
  0x12   : > { %v249_v4 = vld [vmem:[%s7411_s17 + $0x4] sm:$0xf]  ;;  %v255_v8 = vshrl.u32 %v248_v5, 16  ;;  %v258_v9 = vshll.u32 %v248_v5, 16  ;;  %v251_v10 = vld [vmem:[%s7411_s17 + $0xc] sm:$0xf] }
  0x13   : > { %v264_v6 = vshrl.u32 %v249_v4, 16  ;;  %v267_v7 = vshll.u32 %v249_v4, 16  ;;  %v6438_v11 = vld [vmem:[%s7411_s17 + $0x34] sm:$0x7]  ;;  %v282_v12 = vshrl.u32 %v251_v10, 16  ;;  %v285_v13 = vshll.u32 %v251_v10, 16 }
  0x14   : > { %v250_v14 = vld [vmem:[%s7411_s17 + $0x8] sm:$0xf]  ;;  %v253_v15 = vld [vmem:[%s7411_s17 + $0x14] sm:$0xf]  ;;  %v257_v18 = vrot.slane %v255_v8, 4  ;;  %v260_v19 = vrot.slane %v258_v9, 5 }
  0x15   : > { %229 = vrot.lane.b32.xlu1 %v6436_v2, %s7352_s18  ;;  %225 = vrot.lane.b32.xlu0 %v6434_v3, %s7352_s18  ;;  %v266_v16 = vrot.slane %v264_v6, 4  ;;  %v269_v17 = vrot.slane %v267_v7, 5  ;;  %v252_v20 = vld [vmem:[%s7411_s17 + $0x10] sm:$0xf]  ;;  %v284_v22 = vrot.slane %v282_v12, 4  ;;  %v287_v23 = vrot.slane %v285_v13, 5 }
  0x16   : > { %v6437_v21 = vld [vmem:[%s7411_s17 + $0x30] sm:$0x7]  ;;  %v273_v24 = vshrl.u32 %v250_v14, 16  ;;  %v276_v25 = vshll.u32 %v250_v14, 16  ;;  %v261_v27 = vor.u32 %v260_v19, %v257_v18  ;;  %v300_v28 = vshrl.u32 %v253_v15, 16  ;;  %s7371_s10 = smov 80  }
  0x17   : > { %v270_v26 = vor.u32 %v269_v17, %v266_v16  ;;  %v303_v29 = vshll.u32 %v253_v15, 16  ;;  %v6440_v30 = vld [vmem:[%s7411_s17 + $0x24] sm:$0xf]  ;;  %v288_v31 = vor.u32 %v287_v23, %v284_v22  ;;  %v291_v34 = vshrl.u32 %v252_v20, 16  ;;  %v6439_v35 = vld [vmem:[%s7411_s17 + $0x20] sm:$0xf] }
  0x18   : > { %v275_v32 = vrot.slane %v273_v24, 4  ;;  %v278_v33 = vrot.slane %v276_v25, 5  ;;  %v262_v37 = vrot.slane %v261_v27, 4  ;;  %v302_v38 = vrot.slane %v300_v28, 4  ;;  %v6442_v40 = vld [vmem:[%s7411_s17 + $0x2c] sm:$0xf] }
  0x19   : > { %233 = vrot.lane.b32.xlu1 %v6438_v11, %s7352_s18  ;;  %231 = vrot.lane.b32.xlu0 %v6437_v21, %s7352_s18  ;;  %v271_v36 = vrot.slane %v270_v26, 4  ;;  %v305_v39 = vrot.slane %v303_v29, 5  ;;  %v293_v42 = vrot.slane %v291_v34, 4  ;;  %v294_v43 = vshll.u32 %v252_v20, 16  ;;  %v6441_v52 = vld [vmem:[%s7411_s17 + $0x28] sm:$0xf] }
  0x1a   : > { %v279_v41 = vor.u32 %v278_v33, %v275_v32  ;;  %v349_v45 = vshrl.u32 %v6440_v30, 16  ;;  %v352_v46 = vshll.u32 %v6440_v30, 16  ;;  %v340_v47 = vshrl.u32 %v6439_v35, 16  ;;  %v6444_v57 = vld [vmem:[%s7411_s17 + $0x34] sm:$0xf]  ;;  %s7372_s11 = smov 84  }
  0x1b   : > { %v306_v44 = vor.u32 %v305_v39, %v302_v38  ;;  %v289_v48 = vrot.slane %v288_v31, 4  ;;  %v296_v49 = vrot.slane %v294_v43, 5  ;;  %v343_v50 = vshll.u32 %v6439_v35, 16  ;;  %v6443_v1 = vld [vmem:[%s7411_s17 + $0x30] sm:$0xf]  ;;  %s9338_s15 = smov 88  }
  0x1c   : > { %v367_v51 = vshrl.u32 %v6442_v40, 16  ;;  %v280_v53 = vrot.slane %v279_v41, 4  ;;  %v351_v54 = vrot.slane %v349_v45, 4  ;;  %v354_v55 = vrot.slane %v352_v46, 5  ;;  %v419_v26 = vld [vmem:[%s7411_s17 + $0x4] sm:$0xe] }
  0x1d   : > { %310 = vrot.lane.b32.xlu1 %v271_v36, %s7353_s19  ;;  %308 = vrot.lane.b32.xlu0 %v262_v37, %s7353_s19  ;;  %v342_v56 = vrot.slane %v340_v47, 4  ;;  %v297_v58 = vor.u32 %v296_v49, %v293_v42  ;;  %v345_v59 = vrot.slane %v343_v50, 5  ;;  %v370_v60 = vshll.u32 %v6442_v40, 16  ;;  %v418_v27 = vld [vmem:[%s7411_s17] sm:$0xe]  ;;  %s7375_s16 = smov 92  }
  0x1e   : > { %v307_v61 = vrot.slane %v306_v44, 4  ;;  %v369_v62 = vrot.slane %v367_v51, 4  ;;  %v358_v63 = vshrl.u32 %v6441_v52, 16  ;;  %v361_v0 = vshll.u32 %v6441_v52, 16  ;;  %v421_v30 = vld [vmem:[%s7411_s17 + $0xc] sm:$0xe] }
  0x1f   : > { %v355_v2 = vor.u32 %v354_v55, %v351_v54  ;;  %v346_v3 = vor.u32 %v345_v59, %v342_v56  ;;  %v372_v4 = vrot.slane %v370_v60, 5  ;;  %v385_v5 = vshrl.u32 %v6444_v57, 16  ;;  %v420_v31 = vld [vmem:[%s7411_s17 + $0x8] sm:$0xe]  ;;  %v423_v34 = vld [vmem:[%s7411_s17 + $0x14] sm:$0xe] }
  0x20   : > { %v298_v6 = vrot.slane %v297_v58, 4  ;;  %v360_v7 = vrot.slane %v358_v63, 4  ;;  %v363_v8 = vrot.slane %v361_v0, 5  ;;  %v388_v9 = vshll.u32 %v6444_v57, 16  ;;  %v422_v35 = vld [vmem:[%s7411_s17 + $0x10] sm:$0xe] }
  0x21   : > { %314 = vrot.lane.b32.xlu1 %v289_v48, %s7353_s19  ;;  %312 = vrot.lane.b32.xlu0 %v280_v53, %s7353_s19  ;;  %v376_v10 = vshrl.u32 %v6443_v1, 16  ;;  %v379_v11 = vshll.u32 %v6443_v1, 16  ;;  %v356_v12 = vrot.slane %v355_v2, 4  ;;  %v347_v13 = vrot.slane %v346_v3, 4  ;;  %v199_v38 = vld [vmem:[%s7411_s17 + $0x8] sm:$0x7] }
  0x22   : > { %v373_v14 = vor.u32 %v372_v4, %v369_v62  ;;  %v387_v15 = vrot.slane %v385_v5, 4  ;;  %v364_v16 = vor.u32 %v363_v8, %v360_v7  ;;  %v390_v17 = vrot.slane %v388_v9, 5  ;;  %v197_v39 = vld [vmem:[%s7411_s17] sm:$0x7]  ;;  %v6452_v40 = vld [vmem:[%s7411_s17 + $0x44] sm:$0x7] }
  0x23   : > { %v378_v18 = vrot.slane %v376_v10, 4  ;;  %v381_v19 = vrot.slane %v379_v11, 5  ;;  %v6446_v28 = vrot.slane %v419_v26, 9  ;;  %v6445_v29 = vrot.slane %v418_v27, 9  ;;  %v6451_v41 = vld [vmem:[%s7411_s17 + $0x40] sm:$0x7] }
  0x24   : > { %v374_v20 = vrot.slane %v373_v14, 4  ;;  %v365_v21 = vrot.slane %v364_v16, 4  ;;  %v391_v22 = vor.u32 %v390_v17, %v387_v15  ;;  %v6448_v32 = vrot.slane %v421_v30, 9  ;;  %206 = vst.msk [vmem:[#allocation2 + $0x8] sm:$0x7] %vm9340_vm0, %v199_v38  ;;  %s9354_s14 = smov 88  }
  0x25   : > { %318 = vrot.lane.b32.xlu1 %v307_v61, %s7353_s19  ;;  %316 = vrot.lane.b32.xlu0 %v298_v6, %s7353_s19  ;;  %v382_v23 = vor.u32 %v381_v19, %v378_v18  ;;  %v6447_v33 = vrot.slane %v420_v31, 9  ;;  %v6450_v36 = vrot.slane %v423_v34, 9  ;;  %v6449_v37 = vrot.slane %v422_v35, 9  ;;  %204 = vst.msk [vmem:[#allocation2] sm:$0x7] %vm9340_vm0, %v197_v39 }
  0x26   : > { %v392_v24 = vrot.slane %v391_v22, 4  ;;  %v200_v42 = vld [vmem:[%s7411_s17 + $0xc] sm:$0x7]  ;;  %v198_v43 = vld [vmem:[%s7411_s17 + $0x4] sm:$0x7] }
  0x27   : > { %v383_v25 = vrot.slane %v382_v23, 4  ;;  %207 = vst.msk [vmem:[#allocation2 + $0xc] sm:$0x7] %vm9340_vm0, %v200_v42  ;;  %205 = vst.msk [vmem:[#allocation2 + $0x4] sm:$0x7] %vm9340_vm0, %v198_v43 }
  0x28   : > { %v202_v44 = vld [vmem:[%s7411_s17 + $0x14] sm:$0x7]  ;;  %v201_v45 = vld [vmem:[%s7411_s17 + $0x10] sm:$0x7]  ;;  %v6454_v46 = vld [vmem:[%s7411_s17 + $0x4c] sm:$0x7] }
  0x29   : > { %395 = vrot.lane.b32.xlu1 %v356_v12, %s7354_s20  ;;  %393 = vrot.lane.b32.xlu0 %v347_v13, %s7354_s20  ;;  %209 = vst.msk [vmem:[#allocation2 + $0x14] sm:$0x7] %vm9340_vm0, %v202_v44  ;;  %208 = vst.msk [vmem:[#allocation2 + $0x10] sm:$0x7] %vm9340_vm0, %v201_v45  ;;  %v6453_v47 = vld [vmem:[%s7411_s17 + $0x48] sm:$0x7] }
  0x2a   : > { %v6464_v48 = vld [vmem:[%s7411_s17 + $0x44] sm:$0xf]  ;;  %v6456_v49 = vld [vmem:[%s7411_s17 + $0x54] sm:$0x7]  ;;  %v6455_v50 = vld [vmem:[%s7411_s17 + $0x50] sm:$0x7] }
  0x2b   : > { %v6463_v51 = vld [vmem:[%s7411_s17 + $0x40] sm:$0xf]  ;;  %v559_v52 = vshrl.u32 %v6464_v48, 16  ;;  %v562_v53 = vshll.u32 %v6464_v48, 16  ;;  %v6466_v56 = vld [vmem:[%s7411_s17 + $0x4c] sm:$0xf] }
  0x2c   : > { %v550_v54 = vshrl.u32 %v6463_v51, 16  ;;  %v553_v55 = vshll.u32 %v6463_v51, 16  ;;  %v6458_v57 = vld [vmem:[%s7411_s17 + $0x64] sm:$0x7]  ;;  %v6457_v58 = vld [vmem:[%s7411_s17 + $0x60] sm:$0x7] }
  0x2d   : > { %399 = vrot.lane.b32.xlu1 %v374_v20, %s7354_s20  ;;  %397 = vrot.lane.b32.xlu0 %v365_v21, %s7354_s20  ;;  %v6465_v59 = vld [vmem:[%s7411_s17 + $0x48] sm:$0xf]  ;;  %v6468_v60 = vld [vmem:[%s7411_s17 + $0x54] sm:$0xf]  ;;  %v561_v61 = vrot.slane %v559_v52, 4  ;;  %v564_v62 = vrot.slane %v562_v53, 5 }
  0x2e   : > { %v577_v63 = vshrl.u32 %v6466_v56, 16  ;;  %v580_v0 = vshll.u32 %v6466_v56, 16  ;;  %v6467_v1 = vld [vmem:[%s7411_s17 + $0x50] sm:$0xf]  ;;  %v552_v2 = vrot.slane %v550_v54, 4  ;;  %v555_v3 = vrot.slane %v553_v55, 5 }
  0x2f   : > { %v568_v4 = vshrl.u32 %v6465_v59, 16  ;;  %v571_v5 = vshll.u32 %v6465_v59, 16  ;;  %v6460_v6 = vld [vmem:[%s7411_s17 + $0x6c] sm:$0x7]  ;;  %v6459_v7 = vld [vmem:[%s7411_s17 + $0x68] sm:$0x7]  ;;  %v565_v12 = vor.u32 %v564_v62, %v561_v61 }
  0x30   : > { %v595_v8 = vshrl.u32 %v6468_v60, 16  ;;  %v598_v9 = vshll.u32 %v6468_v60, 16  ;;  %v586_v10 = vshrl.u32 %v6467_v1, 16  ;;  %v589_v11 = vshll.u32 %v6467_v1, 16  ;;  %v6470_v14 = vld [vmem:[%s7411_s17 + $0x64] sm:$0xf] }
  0x31   : > { %403 = vrot.lane.b32.xlu1 %v392_v24, %s7354_s20  ;;  %401 = vrot.lane.b32.xlu0 %v383_v25, %s7354_s20  ;;  %v579_v13 = vrot.slane %v577_v63, 4  ;;  %v556_v15 = vor.u32 %v555_v3, %v552_v2  ;;  %v582_v16 = vrot.slane %v580_v0, 5  ;;  %v570_v17 = vrot.slane %v568_v4, 4  ;;  %v6469_v19 = vld [vmem:[%s7411_s17 + $0x60] sm:$0xf] }
  0x32   : > { %v573_v18 = vrot.slane %v571_v5, 5  ;;  %v6462_v20 = vld [vmem:[%s7411_s17 + $0x74] sm:$0x7]  ;;  %v6461_v21 = vld [vmem:[%s7411_s17 + $0x70] sm:$0x7]  ;;  %v597_v22 = vrot.slane %v595_v8, 4 }
  0x33   : > { %v600_v23 = vrot.slane %v598_v9, 5  ;;  %v588_v24 = vrot.slane %v586_v10, 4  ;;  %v591_v25 = vrot.slane %v589_v11, 5  ;;  %v644_v26 = vshrl.u32 %v6470_v14, 16  ;;  %v6472_v30 = vld [vmem:[%s7411_s17 + $0x6c] sm:$0xf] }
  0x34   : > { %v647_v27 = vshll.u32 %v6470_v14, 16  ;;  %v566_v31 = vrot.slane %v565_v12, 4  ;;  %v574_v34 = vor.u32 %v573_v18, %v570_v17  ;;  %v6471_v35 = vld [vmem:[%s7411_s17 + $0x68] sm:$0xf]  ;;  %v665_v43 = vshll.u32 %v6472_v30, 16 }
  0x35   : > { %444 = vrot.lane.b32.xlu1 %v6446_v28, %s7355_s21  ;;  %442 = vrot.lane.b32.xlu0 %v6445_v29, %s7355_s21  ;;  %v635_v28 = vshrl.u32 %v6469_v19, 16  ;;  %v638_v29 = vshll.u32 %v6469_v19, 16  ;;  %v646_v38 = vrot.slane %v644_v26, 4  ;;  %v653_v44 = vshrl.u32 %v6471_v35, 16  ;;  %v6474_v48 = vld [vmem:[%s7411_s17 + $0x74] sm:$0xf] }
  0x36   : > { %v649_v39 = vrot.slane %v647_v27, 5  ;;  %v667_v55 = vrot.slane %v665_v43, 5  ;;  %v683_v59 = vshll.u32 %v6474_v48, 16  ;;  %v6476_v12 = vld [vmem:[%s7411_s17 + $0x44] sm:$0xe] }
  0x37   : > { %v640_v42 = vrot.slane %v638_v29, 5  ;;  %v655_v56 = vrot.slane %v653_v44, 4  ;;  %v6482_v14 = vrot.slane %v6476_v12, 9  ;;  %v6477_v17 = vld [vmem:[%s7411_s17 + $0x48] sm:$0xe] }
  0x38   : > { %v650_v52 = vor.u32 %v649_v39, %v646_v38  ;;  %v685_v3 = vrot.slane %v683_v59, 5  ;;  %v6483_v19 = vrot.slane %v6477_v17, 9  ;;  %v6490_v26 = vld [vmem:[%s7411_s17 + $0x10] sm:$0x7]  ;;  %v6489_v27 = vld [vmem:[%s7411_s17 + $0xc] sm:$0x7] }
  0x39   : > { %448 = vrot.lane.b32.xlu1 %v6448_v32, %s7355_s21  ;;  %446 = vrot.lane.b32.xlu0 %v6447_v33, %s7355_s21  ;;  %v557_v32 = vrot.slane %v556_v15, 4  ;;  %v583_v33 = vor.u32 %v582_v16, %v579_v13  ;;  %v6475_v13 = vld [vmem:[%s7411_s17 + $0x40] sm:$0xe]  ;;  %v6478_v16 = vld [vmem:[%s7411_s17 + $0x4c] sm:$0xe] }
  0x3a   : > { %v651_v62 = vrot.slane %v650_v52, 4  ;;  %v6481_v15 = vrot.slane %v6475_v13, 9  ;;  %v6484_v18 = vrot.slane %v6478_v16, 9  ;;  %v6492_v29 = vld [vmem:[%s7411_s17 + $0x18] sm:$0x7] }
  0x3b   : > { %v584_v45 = vrot.slane %v583_v33, 4  ;;  %v6502_v38 = vld [vmem:[%s7411_s17 + $0x10] sm:$0xf]  ;;  %v6494_v39 = vld [vmem:[%s7411_s17 + $0x28] sm:$0x7] }
  0x3c   : > { %v6504_v44 = vld [vmem:[%s7411_s17 + $0x18] sm:$0xf] }
  0x3d   : > { %452 = vrot.lane.b32.xlu1 %v6450_v36, %s7355_s21  ;;  %450 = vrot.lane.b32.xlu0 %v6449_v37, %s7355_s21  ;;  %v601_v36 = vor.u32 %v600_v23, %v597_v22  ;;  %v592_v37 = vor.u32 %v591_v25, %v588_v24  ;;  %v6488_v24 = vld [vmem:[%s7411_s17 + $0x8] sm:$0x7]  ;;  %v6487_v25 = vld [vmem:[%s7411_s17 + $0x4] sm:$0x7] }
  0x3f   : > { %v593_v51 = vrot.slane %v592_v37, 4 }
  0x41   : > { %482 = vrot.lane.b32.xlu1 %v6452_v40, %s7356_s22  ;;  %480 = vrot.lane.b32.xlu0 %v6451_v41, %s7356_s22  ;;  %v662_v40 = vshrl.u32 %v6472_v30, 16  ;;  %v637_v41 = vrot.slane %v635_v28, 4  ;;  %v6500_v28 = vld [vmem:[%s7411_s17 + $0x8] sm:$0xf]  ;;  %v6491_v30 = vld [vmem:[%s7411_s17 + $0x14] sm:$0x7] }
  0x43   : > { %v664_v53 = vrot.slane %v662_v40, 4  ;;  %v641_v54 = vor.u32 %v640_v42, %v637_v41  ;;  %v6493_v40 = vld [vmem:[%s7411_s17 + $0x24] sm:$0x7]  ;;  %v6501_v41 = vld [vmem:[%s7411_s17 + $0xc] sm:$0xf] }
  0x44   : > { %v863_v52 = vshrl.u32 %v6501_v41, 16 }
  0x45   : > { %486 = vrot.lane.b32.xlu1 %v6454_v46, %s7356_s22  ;;  %484 = vrot.lane.b32.xlu0 %v6453_v47, %s7356_s22  ;;  %v575_v46 = vrot.slane %v574_v34, 4  ;;  %v656_v47 = vshll.u32 %v6471_v35, 16  ;;  %v642_v63 = vrot.slane %v641_v54, 4  ;;  %v668_v0 = vor.u32 %v667_v55, %v664_v53  ;;  %v6496_v54 = vld [vmem:[%s7411_s17 + $0x30] sm:$0x7] }
  0x46   : > { %v854_v34 = vshrl.u32 %v6500_v28, 16  ;;  %v857_v35 = vshll.u32 %v6500_v28, 16  ;;  %v866_v53 = vshll.u32 %v6501_v41, 16  ;;  %v6495_v55 = vld [vmem:[%s7411_s17 + $0x2c] sm:$0x7] }
  0x49   : > { %490 = vrot.lane.b32.xlu1 %v6456_v49, %s7356_s22  ;;  %488 = vrot.lane.b32.xlu0 %v6455_v50, %s7356_s22  ;;  %v6473_v49 = vld [vmem:[%s7411_s17 + $0x70] sm:$0xf]  ;;  %v602_v50 = vrot.slane %v601_v36, 4 }
  0x4a   : > { %v671_v60 = vshrl.u32 %v6473_v49, 16  ;;  %v674_v61 = vshll.u32 %v6473_v49, 16  ;;  %v6503_v49 = vld [vmem:[%s7411_s17 + $0x14] sm:$0xf] }
  0x4c   : > { %v673_v4 = vrot.slane %v671_v60, 4  ;;  %v676_v5 = vrot.slane %v674_v61, 5  ;;  %v881_v60 = vshrl.u32 %v6503_v49, 16  ;;  %v884_v61 = vshll.u32 %v6503_v49, 16 }
  0x4d   : > { %520 = vrot.lane.b32.xlu1 %v6458_v57, %s7357_s23  ;;  %518 = vrot.lane.b32.xlu0 %v6457_v58, %s7357_s23  ;;  %v680_v57 = vshrl.u32 %v6474_v48, 16  ;;  %v658_v58 = vrot.slane %v656_v47, 5  ;;  %v872_v47 = vshrl.u32 %v6502_v38, 16  ;;  %v875_v48 = vshll.u32 %v6502_v38, 16  ;;  %v6510_v38 = vld [vmem:[%s7411_s17 + $0x38] sm:$0xf] }
  0x4e   : > { %v677_v9 = vor.u32 %v676_v5, %v673_v4  ;;  %v868_v4 = vrot.slane %v866_v53, 5  ;;  %v6505_v5 = vld [vmem:[%s7411_s17 + $0x24] sm:$0xf]  ;;  %v883_v12 = vrot.slane %v881_v60, 4  ;;  %v886_v13 = vrot.slane %v884_v61, 5 }
  0x4f   : > { %v682_v1 = vrot.slane %v680_v57, 4  ;;  %v659_v2 = vor.u32 %v658_v58, %v655_v56  ;;  %v890_v56 = vshrl.u32 %v6504_v44, 16  ;;  %v893_v57 = vshll.u32 %v6504_v44, 16 }
  0x50   : > { %v678_v11 = vrot.slane %v677_v9, 4  ;;  %v930_v16 = vshrl.u32 %v6505_v5, 16  ;;  %v933_v17 = vshll.u32 %v6505_v5, 16  ;;  %v978_v49 = vshll.u32 %v6510_v38, 16 }
  0x51   : > { %524 = vrot.lane.b32.xlu1 %v6460_v6, %s7357_s23  ;;  %522 = vrot.lane.b32.xlu0 %v6459_v7, %s7357_s23  ;;  %v669_v6 = vrot.slane %v668_v0, 4  ;;  %v660_v7 = vrot.slane %v659_v2, 4  ;;  %v686_v8 = vor.u32 %v685_v3, %v682_v1  ;;  %v6506_v0 = vld [vmem:[%s7411_s17 + $0x28] sm:$0xf]  ;;  %v865_v3 = vrot.slane %v863_v52, 4 }
  0x52   : > { %v895_v9 = vrot.slane %v893_v57, 5  ;;  %v980_v61 = vrot.slane %v978_v49, 5  ;;  %v6530_v49 = vld [vmem:[%s7411_s17 + $0x68] sm:$0x7] }
  0x53   : > { %v687_v10 = vrot.slane %v686_v8, 4  ;;  %v892_v8 = vrot.slane %v890_v56, 4 }
  0x55   : > { %528 = vrot.lane.b32.xlu1 %v6462_v20, %s7357_s23  ;;  %526 = vrot.lane.b32.xlu0 %v6461_v21, %s7357_s23  ;;  %v6480_v20 = vld [vmem:[%s7411_s17 + $0x54] sm:$0xe]  ;;  %v6479_v21 = vld [vmem:[%s7411_s17 + $0x50] sm:$0xe] }
  0x56   : > { %v6486_v22 = vrot.slane %v6480_v20, 9  ;;  %v6485_v23 = vrot.slane %v6479_v21, 9 }
  0x59   : > { %605 = vrot.lane.b32.xlu1 %v566_v31, %s7358_s24  ;;  %603 = vrot.lane.b32.xlu0 %v557_v32, %s7358_s24  ;;  %v6499_v31 = vld [vmem:[%s7411_s17 + $0x4] sm:$0xf] }
  0x5a   : > { %v845_v36 = vshrl.u32 %v6499_v31, 16  ;;  %v848_v37 = vshll.u32 %v6499_v31, 16  ;;  %v932_v31 = vrot.slane %v930_v16, 4  ;;  %v6514_v16 = vld [vmem:[%s7411_s17 + $0x10] sm:$0xe] }
  0x5d   : > { %609 = vrot.lane.b32.xlu1 %v584_v45, %s7358_s24  ;;  %607 = vrot.lane.b32.xlu0 %v575_v46, %s7358_s24  ;;  %v856_v45 = vrot.slane %v854_v34, 4  ;;  %v859_v46 = vrot.slane %v857_v35, 5 }
  0x5f   : > { %v860_v1 = vor.u32 %v859_v46, %v856_v45 }
  0x61   : > { %613 = vrot.lane.b32.xlu1 %v602_v50, %s7358_s24  ;;  %611 = vrot.lane.b32.xlu0 %v593_v51, %s7358_s24  ;;  %v847_v50 = vrot.slane %v845_v36, 4  ;;  %v850_v51 = vrot.slane %v848_v37, 5 }
  0x63   : > { %v851_v2 = vor.u32 %v850_v51, %v847_v50 }
  0x65   : > { %690 = vrot.lane.b32.xlu1 %v651_v62, %s7359_s25  ;;  %688 = vrot.lane.b32.xlu0 %v642_v63, %s7359_s25  ;;  %v874_v62 = vrot.slane %v872_v47, 4  ;;  %v877_v63 = vrot.slane %v875_v48, 5  ;;  %v852_v20 = vrot.slane %v851_v2, 4  ;;  %v975_v48 = vshrl.u32 %v6510_v38, 16  ;;  %v6536_v38 = vld [vmem:[%s7411_s17 + $0x48] sm:$0xf] }
  0x67   : > { %v878_v21 = vor.u32 %v877_v63, %v874_v62 }
  0x69   : > { %694 = vrot.lane.b32.xlu1 %v669_v6, %s7359_s25  ;;  %692 = vrot.lane.b32.xlu0 %v660_v7, %s7359_s25  ;;  %v6498_v6 = vld [vmem:[%s7411_s17 + $0x38] sm:$0x7]  ;;  %v6497_v7 = vld [vmem:[%s7411_s17 + $0x34] sm:$0x7]  ;;  %v879_v34 = vrot.slane %v878_v21, 4 }
  0x6d   : > { %698 = vrot.lane.b32.xlu1 %v687_v10, %s7359_s25  ;;  %696 = vrot.lane.b32.xlu0 %v678_v11, %s7359_s25 }
  0x71   : > { %739 = vrot.lane.b32.xlu1 %v6482_v14, %s7360_s26  ;;  %737 = vrot.lane.b32.xlu0 %v6481_v15, %s7360_s26  ;;  %v939_v14 = vshrl.u32 %v6506_v0, 16  ;;  %v942_v15 = vshll.u32 %v6506_v0, 16 }
  0x73   : > { %v941_v28 = vrot.slane %v939_v14, 4 }
  0x75   : > { %743 = vrot.lane.b32.xlu1 %v6484_v18, %s7360_s26  ;;  %741 = vrot.lane.b32.xlu0 %v6483_v19, %s7360_s26  ;;  %v6508_v18 = vld [vmem:[%s7411_s17 + $0x30] sm:$0xf]  ;;  %v861_v19 = vrot.slane %v860_v1, 4 }
  0x79   : > { %747 = vrot.lane.b32.xlu1 %v6486_v22, %s7360_s26  ;;  %745 = vrot.lane.b32.xlu0 %v6485_v23, %s7360_s26  ;;  %v869_v22 = vor.u32 %v868_v4, %v865_v3  ;;  %v896_v23 = vor.u32 %v895_v9, %v892_v8 }
  0x7b   : > { %v870_v35 = vrot.slane %v869_v22, 4  ;;  %v6516_v22 = vld [vmem:[%s7411_s17 + $0x18] sm:$0xe] }
  0x7d   : > { %777 = vrot.lane.b32.xlu1 %v6488_v24, %s7361_s27  ;;  %775 = vrot.lane.b32.xlu0 %v6487_v25, %s7361_s27  ;;  %v6507_v24 = vld [vmem:[%s7411_s17 + $0x2c] sm:$0xf] }
  0x7e   : > { %v948_v36 = vshrl.u32 %v6507_v24, 16  ;;  %v951_v37 = vshll.u32 %v6507_v24, 16 }
  0x80   : > { %v950_v50 = vrot.slane %v948_v36, 4  ;;  %v953_v51 = vrot.slane %v951_v37, 5 }
  0x81   : > { %781 = vrot.lane.b32.xlu1 %v6490_v26, %s7361_s27  ;;  %779 = vrot.lane.b32.xlu0 %v6489_v27, %s7361_s27  ;;  %v887_v27 = vor.u32 %v886_v13, %v883_v12 }
  0x82   : > { %v954_v60 = vor.u32 %v953_v51, %v950_v50  ;;  %v6529_v50 = vld [vmem:[%s7411_s17 + $0x64] sm:$0x7]  ;;  %v6537_v51 = vld [vmem:[%s7411_s17 + $0x4c] sm:$0xf] }
  0x83   : > { %v228_v32 = vpop.permute.xlu1 %227  ;;  %v224_v33 = vpop.permute.xlu0 %223 }
  0x84   : > { %244 = vst.msk [vmem:[#allocation2 + $0x8] sm:$0x7] %vm241_vm1, %v228_v32  ;;  %242 = vst.msk [vmem:[#allocation2] sm:$0x7] %vm241_vm1, %v224_v33  ;;  %v935_v32 = vrot.slane %v933_v17, 5  ;;  %v960_v33 = vshll.u32 %v6508_v18, 16 }
  0x85   : > { %785 = vrot.lane.b32.xlu1 %v6492_v29, %s7361_s27  ;;  %783 = vrot.lane.b32.xlu0 %v6491_v30, %s7361_s27  ;;  %v944_v29 = vrot.slane %v942_v15, 5  ;;  %v957_v30 = vshrl.u32 %v6508_v18, 16  ;;  %v955_v3 = vrot.slane %v954_v60, 4  ;;  %v6513_v17 = vld [vmem:[%s7411_s17 + $0xc] sm:$0xe] }
  0x86   : > { %v936_v46 = vor.u32 %v935_v32, %v932_v31  ;;  %v962_v47 = vrot.slane %v960_v33, 5  ;;  %v6519_v21 = vrot.slane %v6513_v17, 9  ;;  %v6523_v31 = vld [vmem:[%s7411_s17 + $0x44] sm:$0x7]  ;;  %v6533_v17 = vld [vmem:[%s7411_s17 + $0x74] sm:$0x7] }
  0x87   : > { %v230_v42 = vpop.permute.xlu1 %229  ;;  %v226_v43 = vpop.permute.xlu0 %225  ;;  %v945_v44 = vor.u32 %v944_v29, %v941_v28  ;;  %v959_v45 = vrot.slane %v957_v30, 4  ;;  %v6524_v30 = vld [vmem:[%s7411_s17 + $0x48] sm:$0x7] }
  0x88   : > { %245 = vst.msk [vmem:[#allocation2 + $0xc] sm:$0x7] %vm241_vm1, %v230_v42  ;;  %243 = vst.msk [vmem:[#allocation2 + $0x4] sm:$0x7] %vm241_vm1, %v226_v43  ;;  %v897_v42 = vrot.slane %v896_v23, 4  ;;  %v888_v43 = vrot.slane %v887_v27, 4 }
  0x89   : > { %815 = vrot.lane.b32.xlu1 %v6494_v39, %s7362_s28  ;;  %813 = vrot.lane.b32.xlu0 %v6493_v40, %s7362_s28  ;;  %v6509_v39 = vld [vmem:[%s7411_s17 + $0x34] sm:$0xf]  ;;  %v946_v56 = vrot.slane %v945_v44, 4  ;;  %v937_v57 = vrot.slane %v936_v46, 4  ;;  %v1149_v44 = vshrl.u32 %v6536_v38, 16 }
  0x8a   : > { %v966_v52 = vshrl.u32 %v6509_v39, 16  ;;  %v969_v53 = vshll.u32 %v6509_v39, 16  ;;  %v6515_v23 = vld [vmem:[%s7411_s17 + $0x14] sm:$0xe]  ;;  %v6528_v39 = vld [vmem:[%s7411_s17 + $0x58] sm:$0x7] }
  0x8b   : > { %v234_v58 = vpop.permute.xlu1 %233  ;;  %v232_v59 = vpop.permute.xlu0 %231  ;;  %v6521_v27 = vrot.slane %v6515_v23, 9 }
  0x8c   : > { %247 = vst.msk [vmem:[#allocation2 + $0x14] sm:$0x7] %vm241_vm1, %v234_v58  ;;  %246 = vst.msk [vmem:[#allocation2 + $0x10] sm:$0x7] %vm241_vm1, %v232_v59  ;;  %v963_v58 = vor.u32 %v962_v47, %v959_v45  ;;  %v977_v59 = vrot.slane %v975_v48, 4  ;;  %v968_v62 = vrot.slane %v966_v52, 4 }
  0x8d   : > { %819 = vrot.lane.b32.xlu1 %v6496_v54, %s7362_s28  ;;  %817 = vrot.lane.b32.xlu0 %v6495_v55, %s7362_s28  ;;  %v971_v63 = vrot.slane %v969_v53, 5  ;;  %v1152_v45 = vshll.u32 %v6536_v38, 16  ;;  %v6538_v48 = vld [vmem:[%s7411_s17 + $0x50] sm:$0xf] }
  0x8e   : > { %v964_v2 = vrot.slane %v963_v58, 4  ;;  %v981_v4 = vor.u32 %v980_v61, %v977_v59  ;;  %v1170_v58 = vshll.u32 %v6538_v48, 16  ;;  %v6539_v59 = vld [vmem:[%s7411_s17 + $0x54] sm:$0xf] }
  0x8f   : > { %v311_v10 = vpop.permute.xlu1 %310  ;;  %v309_v11 = vpop.permute.xlu0 %308  ;;  %v972_v5 = vor.u32 %v971_v63, %v968_v62  ;;  %v1158_v62 = vshrl.u32 %v6537_v51, 16  ;;  %v1161_v63 = vshll.u32 %v6537_v51, 16 }
  0x90   : > { %328 = vst.msk [vmem:[#allocation2 + $0x4] sm:$0x7] %vm326_vm2, %v311_v10  ;;  %327 = vst.msk [vmem:[#allocation2] sm:$0x7] %vm326_vm2, %v309_v11  ;;  %v982_v8 = vrot.slane %v981_v4, 4 }
  0x91   : > { %823 = vrot.lane.b32.xlu1 %v6498_v6, %s7362_s28  ;;  %821 = vrot.lane.b32.xlu0 %v6497_v7, %s7362_s28  ;;  %v973_v9 = vrot.slane %v972_v5, 4  ;;  %v6512_v10 = vld [vmem:[%s7411_s17 + $0x8] sm:$0xe]  ;;  %v6511_v11 = vld [vmem:[%s7411_s17 + $0x4] sm:$0xe] }
  0x92   : > { %v6518_v14 = vrot.slane %v6512_v10, 9  ;;  %v6517_v15 = vrot.slane %v6511_v11, 9  ;;  %v6542_v10 = vld [vmem:[%s7411_s17 + $0x68] sm:$0xf] }
  0x93   : > { %v315_v25 = vpop.permute.xlu1 %314  ;;  %v313_v26 = vpop.permute.xlu0 %312 }
  0x94   : > { %330 = vst.msk [vmem:[#allocation2 + $0xc] sm:$0x7] %vm326_vm2, %v315_v25  ;;  %329 = vst.msk [vmem:[#allocation2 + $0x8] sm:$0x7] %vm326_vm2, %v313_v26  ;;  %v6522_v26 = vrot.slane %v6516_v22, 9 }
  0x95   : > { %900 = vrot.lane.b32.xlu1 %v861_v19, %s7363_s29  ;;  %898 = vrot.lane.b32.xlu0 %v852_v20, %s7363_s29  ;;  %v6520_v20 = vrot.slane %v6514_v16, 9  ;;  %v6534_v16 = vld [vmem:[%s7411_s17 + $0x78] sm:$0x7] }
  0x97   : > { %v319_v40 = vpop.permute.xlu1 %318  ;;  %v317_v41 = vpop.permute.xlu0 %316 }
  0x98   : > { %332 = vst.msk [vmem:[#allocation2 + $0x14] sm:$0x7] %vm326_vm2, %v319_v40  ;;  %331 = vst.msk [vmem:[#allocation2 + $0x10] sm:$0x7] %vm326_vm2, %v317_v41  ;;  %v6527_v40 = vld [vmem:[%s7411_s17 + $0x54] sm:$0x7] }
  0x99   : > { %904 = vrot.lane.b32.xlu1 %v879_v34, %s7363_s29  ;;  %902 = vrot.lane.b32.xlu0 %v870_v35, %s7363_s29  ;;  %v6526_v34 = vld [vmem:[%s7411_s17 + $0x50] sm:$0x7]  ;;  %v6525_v35 = vld [vmem:[%s7411_s17 + $0x4c] sm:$0x7] }
  0x9a   : > { %v6535_v41 = vld [vmem:[%s7411_s17 + $0x44] sm:$0xf] }
  0x9b   : > { %v396_v54 = vpop.permute.xlu1 %395  ;;  %v394_v55 = vpop.permute.xlu0 %393  ;;  %v1140_v46 = vshrl.u32 %v6535_v41, 16  ;;  %v1143_v47 = vshll.u32 %v6535_v41, 16 }
  0x9c   : > { %413 = vst.msk [vmem:[#allocation2 + $0x4] sm:$0x7] %vm411_vm3, %v396_v54  ;;  %412 = vst.msk [vmem:[#allocation2] sm:$0x7] %vm411_vm3, %v394_v55  ;;  %v6540_v54 = vld [vmem:[%s7411_s17 + $0x58] sm:$0xf] }
  0x9d   : > { %908 = vrot.lane.b32.xlu1 %v897_v42, %s7363_s29  ;;  %906 = vrot.lane.b32.xlu0 %v888_v43, %s7363_s29  ;;  %v1151_v55 = vrot.slane %v1149_v44, 4  ;;  %v1142_v60 = vrot.slane %v1140_v46, 4  ;;  %v1145_v61 = vrot.slane %v1143_v47, 5 }
  0x9f   : > { %v400_v0 = vpop.permute.xlu1 %399  ;;  %v398_v1 = vpop.permute.xlu0 %397 }
  0xa0   : > { %415 = vst.msk [vmem:[#allocation2 + $0xc] sm:$0x7] %vm411_vm3, %v400_v0  ;;  %414 = vst.msk [vmem:[#allocation2 + $0x8] sm:$0x7] %vm411_vm3, %v398_v1  ;;  %v6532_v0 = vld [vmem:[%s7411_s17 + $0x70] sm:$0x7] }
  0xa1   : > { %985 = vrot.lane.b32.xlu1 %v946_v56, %s7364_s30  ;;  %983 = vrot.lane.b32.xlu0 %v937_v57, %s7364_s30  ;;  %v1154_v56 = vrot.slane %v1152_v45, 5  ;;  %v1167_v57 = vshrl.u32 %v6538_v48, 16  ;;  %v6531_v1 = vld [vmem:[%s7411_s17 + $0x6c] sm:$0x7]  ;;  %v6546_v48 = vld [vmem:[%s7411_s17 + $0x78] sm:$0xf] }
  0xa3   : > { %v404_v6 = vpop.permute.xlu1 %403  ;;  %v402_v7 = vpop.permute.xlu0 %401  ;;  %v1155_v11 = vor.u32 %v1154_v56, %v1151_v55 }
  0xa4   : > { %417 = vst.msk [vmem:[#allocation2 + $0x14] sm:$0x7] %vm411_vm3, %v404_v6  ;;  %416 = vst.msk [vmem:[#allocation2 + $0x10] sm:$0x7] %vm411_vm3, %v402_v7  ;;  %v1176_v6 = vshrl.u32 %v6539_v59, 16  ;;  %v1179_v7 = vshll.u32 %v6539_v59, 16 }
  0xa5   : > { %989 = vrot.lane.b32.xlu1 %v964_v2, %s7364_s30  ;;  %987 = vrot.lane.b32.xlu0 %v955_v3, %s7364_s30  ;;  %v1185_v2 = vshrl.u32 %v6540_v54, 16  ;;  %v1188_v3 = vshll.u32 %v6540_v54, 16  ;;  %v1270_v59 = vshrl.u32 %v6546_v48, 16 }
  0xa6   : > { %v1178_v22 = vrot.slane %v1176_v6, 4  ;;  %v1181_v23 = vrot.slane %v1179_v7, 5 }
  0xa7   : > { %v445_v12 = vpop.permute.xlu1 %444  ;;  %v443_v13 = vpop.permute.xlu0 %442 }
  0xa8   : > { %462 = vst.msk [vmem:[#allocation2 + $0x4] sm:$0x7] %vm460_vm4, %v445_v12  ;;  %461 = vst.msk [vmem:[#allocation2] sm:$0x7] %vm460_vm4, %v443_v13  ;;  %v1146_v12 = vor.u32 %v1145_v61, %v1142_v60  ;;  %v1160_v13 = vrot.slane %v1158_v62, 4  ;;  %v1273_v61 = vshll.u32 %v6546_v48, 16 }
  0xa9   : > { %993 = vrot.lane.b32.xlu1 %v982_v8, %s7364_s30  ;;  %991 = vrot.lane.b32.xlu0 %v973_v9, %s7364_s30  ;;  %v1169_v8 = vrot.slane %v1167_v57, 4  ;;  %v1172_v9 = vrot.slane %v1170_v58, 5  ;;  %v6572_v48 = vld [vmem:[%s7411_s17 + $0xc] sm:$0xf] }
  0xaa   : > { %v1275_v7 = vrot.slane %v1273_v61, 5  ;;  %v6573_v61 = vld [vmem:[%s7411_s17 + $0x10] sm:$0xf] }
  0xab   : > { %v449_v18 = vpop.permute.xlu1 %448  ;;  %v447_v19 = vpop.permute.xlu0 %446 }
  0xac   : > { %464 = vst.msk [vmem:[#allocation2 + $0xc] sm:$0x7] %vm460_vm4, %v449_v18  ;;  %463 = vst.msk [vmem:[#allocation2 + $0x8] sm:$0x7] %vm460_vm4, %v447_v19  ;;  %v1187_v18 = vrot.slane %v1185_v2, 4  ;;  %v1190_v19 = vrot.slane %v1188_v3, 5 }
  0xad   : > { %1034 = vrot.lane.b32.xlu1 %v6518_v14, %s7365_s4  ;;  %1032 = vrot.lane.b32.xlu0 %v6517_v15, %s7365_s4  ;;  %v1163_v14 = vrot.slane %v1161_v63, 5  ;;  %v6541_v15 = vld [vmem:[%s7411_s17 + $0x64] sm:$0xf] }
  0xaf   : > { %v453_v24 = vpop.permute.xlu1 %452  ;;  %v451_v25 = vpop.permute.xlu0 %450 }
  0xb0   : > { %466 = vst.msk [vmem:[#allocation2 + $0x14] sm:$0x7] %vm460_vm4, %v453_v24  ;;  %465 = vst.msk [vmem:[#allocation2 + $0x10] sm:$0x7] %vm460_vm4, %v451_v25  ;;  %v1234_v24 = vshrl.u32 %v6542_v10, 16  ;;  %v1237_v25 = vshll.u32 %v6542_v10, 16 }
  0xb1   : > { %1038 = vrot.lane.b32.xlu1 %v6520_v20, %s7365_s4  ;;  %1036 = vrot.lane.b32.xlu0 %v6519_v21, %s7365_s4 }
  0xb2   : > { %v1236_v38 = vrot.slane %v1234_v24, 4 }
  0xb3   : > { %v483_v28 = vpop.permute.xlu1 %482  ;;  %v481_v29 = vpop.permute.xlu0 %480 }
  0xb4   : > { %500 = vst.msk [vmem:[#allocation2 + $0x4] sm:$0x7] %vm498_vm5, %v483_v28  ;;  %499 = vst.msk [vmem:[#allocation2] sm:$0x7] %vm498_vm5, %v481_v29  ;;  %v6544_v28 = vld [vmem:[%s7411_s17 + $0x70] sm:$0xf] }
  0xb5   : > { %1042 = vrot.lane.b32.xlu1 %v6522_v26, %s7365_s4  ;;  %1040 = vrot.lane.b32.xlu0 %v6521_v27, %s7365_s4  ;;  %v1225_v26 = vshrl.u32 %v6541_v15, 16  ;;  %v1228_v27 = vshll.u32 %v6541_v15, 16  ;;  %v1156_v29 = vrot.slane %v1155_v11, 4 }
  0xb7   : > { %v487_v32 = vpop.permute.xlu1 %486  ;;  %v485_v33 = vpop.permute.xlu0 %484  ;;  %v1227_v41 = vrot.slane %v1225_v26, 4  ;;  %v6550_v26 = vld [vmem:[%s7411_s17 + $0x50] sm:$0xe] }
  0xb8   : > { %502 = vst.msk [vmem:[#allocation2 + $0xc] sm:$0x7] %vm498_vm5, %v487_v32  ;;  %501 = vst.msk [vmem:[#allocation2 + $0x8] sm:$0x7] %vm498_vm5, %v485_v33  ;;  %v1164_v32 = vor.u32 %v1163_v14, %v1160_v13  ;;  %v6543_v33 = vld [vmem:[%s7411_s17 + $0x6c] sm:$0xf] }
  0xb9   : > { %1072 = vrot.lane.b32.xlu1 %v6524_v30, %s7366_s5  ;;  %1070 = vrot.lane.b32.xlu0 %v6523_v31, %s7366_s5  ;;  %v1147_v30 = vrot.slane %v1146_v12, 4  ;;  %v1173_v31 = vor.u32 %v1172_v9, %v1169_v8  ;;  %v1243_v44 = vshrl.u32 %v6543_v33, 16  ;;  %v1246_v47 = vshll.u32 %v6543_v33, 16  ;;  %v6551_v33 = vld [vmem:[%s7411_s17 + $0x54] sm:$0xe] }
  0xba   : > { %v1165_v46 = vrot.slane %v1164_v32, 4  ;;  %v6552_v32 = vld [vmem:[%s7411_s17 + $0x58] sm:$0xe] }
  0xbb   : > { %v491_v36 = vpop.permute.xlu1 %490  ;;  %v489_v37 = vpop.permute.xlu0 %488  ;;  %v1174_v45 = vrot.slane %v1173_v31, 4  ;;  %v1245_v58 = vrot.slane %v1243_v44, 4  ;;  %v1248_v60 = vrot.slane %v1246_v47, 5  ;;  %v6562_v44 = vld [vmem:[%s7411_s17 + $0x14] sm:$0x7] }
  0xbc   : > { %504 = vst.msk [vmem:[#allocation2 + $0x14] sm:$0x7] %vm498_vm5, %v491_v36  ;;  %503 = vst.msk [vmem:[#allocation2 + $0x10] sm:$0x7] %vm498_vm5, %v489_v37  ;;  %v1182_v37 = vor.u32 %v1181_v23, %v1178_v22 }
  0xbd   : > { %1076 = vrot.lane.b32.xlu1 %v6526_v34, %s7366_s5  ;;  %1074 = vrot.lane.b32.xlu0 %v6525_v35, %s7366_s5  ;;  %v1191_v34 = vor.u32 %v1190_v19, %v1187_v18  ;;  %v1249_v6 = vor.u32 %v1248_v60, %v1245_v58  ;;  %v6566_v58 = vld [vmem:[%s7411_s17 + $0x2c] sm:$0x7]  ;;  %v6574_v60 = vld [vmem:[%s7411_s17 + $0x14] sm:$0xf] }
  0xbf   : > { %v521_v42 = vpop.permute.xlu1 %520  ;;  %v519_v43 = vpop.permute.xlu0 %518  ;;  %v1250_v13 = vrot.slane %v1249_v6, 4  ;;  %v6568_v6 = vld [vmem:[%s7411_s17 + $0x34] sm:$0x7] }
  0xc0   : > { %538 = vst.msk [vmem:[#allocation2 + $0x4] sm:$0x7] %vm536_vm6, %v521_v42  ;;  %537 = vst.msk [vmem:[#allocation2] sm:$0x7] %vm536_vm6, %v519_v43  ;;  %v1230_v42 = vrot.slane %v1228_v27, 5  ;;  %v1255_v43 = vshll.u32 %v6544_v28, 16 }
  0xc1   : > { %1080 = vrot.lane.b32.xlu1 %v6528_v39, %s7366_s5  ;;  %1078 = vrot.lane.b32.xlu0 %v6527_v40, %s7366_s5  ;;  %v1239_v39 = vrot.slane %v1237_v25, 5  ;;  %v1252_v40 = vshrl.u32 %v6544_v28, 16  ;;  %v6549_v27 = vld [vmem:[%s7411_s17 + $0x4c] sm:$0xe] }
  0xc2   : > { %v1231_v56 = vor.u32 %v1230_v42, %v1227_v41  ;;  %v1257_v57 = vrot.slane %v1255_v43, 5  ;;  %v6555_v31 = vrot.slane %v6549_v27, 9  ;;  %v6559_v41 = vld [vmem:[%s7411_s17 + $0x8] sm:$0x7]  ;;  %v6569_v27 = vld [vmem:[%s7411_s17 + $0x38] sm:$0x7] }
  0xc3   : > { %v525_v52 = vpop.permute.xlu1 %524  ;;  %v523_v53 = vpop.permute.xlu0 %522  ;;  %v1240_v54 = vor.u32 %v1239_v39, %v1236_v38  ;;  %v1254_v55 = vrot.slane %v1252_v40, 4  ;;  %v6560_v40 = vld [vmem:[%s7411_s17 + $0xc] sm:$0x7] }
  0xc4   : > { %540 = vst.msk [vmem:[#allocation2 + $0xc] sm:$0x7] %vm536_vm6, %v525_v52  ;;  %539 = vst.msk [vmem:[#allocation2 + $0x8] sm:$0x7] %vm536_vm6, %v523_v53  ;;  %v1192_v52 = vrot.slane %v1191_v34, 4  ;;  %v1183_v53 = vrot.slane %v1182_v37, 4 }
  0xc5   : > { %1110 = vrot.lane.b32.xlu1 %v6530_v49, %s7367_s6  ;;  %1108 = vrot.lane.b32.xlu0 %v6529_v50, %s7367_s6  ;;  %v6545_v49 = vld [vmem:[%s7411_s17 + $0x74] sm:$0xf]  ;;  %v1241_v2 = vrot.slane %v1240_v54, 4  ;;  %v1232_v3 = vrot.slane %v1231_v56, 4  ;;  %v6557_v37 = vrot.slane %v6551_v33, 9  ;;  %v1444_v54 = vshrl.u32 %v6572_v48, 16 }
  0xc6   : > { %v1261_v62 = vshrl.u32 %v6545_v49, 16  ;;  %v1264_v63 = vshll.u32 %v6545_v49, 16  ;;  %v6571_v49 = vld [vmem:[%s7411_s17 + $0x8] sm:$0xf] }
  0xc7   : > { %v529_v4 = vpop.permute.xlu1 %528  ;;  %v527_v5 = vpop.permute.xlu0 %526  ;;  %v1435_v56 = vshrl.u32 %v6571_v49, 16 }
  0xc8   : > { %542 = vst.msk [vmem:[#allocation2 + $0x14] sm:$0x7] %vm536_vm6, %v529_v4  ;;  %541 = vst.msk [vmem:[#allocation2 + $0x10] sm:$0x7] %vm536_vm6, %v527_v5  ;;  %v1258_v4 = vor.u32 %v1257_v57, %v1254_v55  ;;  %v1272_v5 = vrot.slane %v1270_v59, 4  ;;  %v1263_v8 = vrot.slane %v1261_v62, 4 }
  0xc9   : > { %1114 = vrot.lane.b32.xlu1 %v6532_v0, %s7367_s6  ;;  %1112 = vrot.lane.b32.xlu0 %v6531_v1, %s7367_s6  ;;  %v1266_v9 = vrot.slane %v1264_v63, 5  ;;  %v1447_v55 = vshll.u32 %v6572_v48, 16  ;;  %v1438_v57 = vshll.u32 %v6571_v49, 16  ;;  %v6565_v59 = vld [vmem:[%s7411_s17 + $0x28] sm:$0x7] }
  0xca   : > { %v1259_v12 = vrot.slane %v1258_v4, 4  ;;  %v1276_v14 = vor.u32 %v1275_v7, %v1272_v5  ;;  %v1437_v4 = vrot.slane %v1435_v56, 4  ;;  %v1462_v7 = vshrl.u32 %v6574_v60, 16 }
  0xcb   : > { %v606_v20 = vpop.permute.xlu1 %605  ;;  %v604_v21 = vpop.permute.xlu0 %603  ;;  %v1267_v15 = vor.u32 %v1266_v9, %v1263_v8  ;;  %v1440_v5 = vrot.slane %v1438_v57, 5  ;;  %v1465_v8 = vshll.u32 %v6574_v60, 16  ;;  %v1453_v9 = vshrl.u32 %v6573_v61, 16  ;;  %v6582_v60 = vld [vmem:[%s7411_s17 + $0x3c] sm:$0xf] }
  0xcc   : > { %623 = vst.msk [vmem:[#allocation2 + $0x4] sm:$0x7] %vm621_vm7, %v606_v20  ;;  %622 = vst.msk [vmem:[#allocation2] sm:$0x7] %vm621_vm7, %v604_v21  ;;  %v1277_v18 = vrot.slane %v1276_v14, 4 }
  0xcd   : > { %1118 = vrot.lane.b32.xlu1 %v6534_v16, %s7367_s6  ;;  %1116 = vrot.lane.b32.xlu0 %v6533_v17, %s7367_s6  ;;  %v1268_v19 = vrot.slane %v1267_v15, 4  ;;  %v6548_v20 = vld [vmem:[%s7411_s17 + $0x48] sm:$0xe]  ;;  %v6547_v21 = vld [vmem:[%s7411_s17 + $0x44] sm:$0xe] }
  0xce   : > { %v6554_v24 = vrot.slane %v6548_v20, 9  ;;  %v6553_v25 = vrot.slane %v6547_v21, 9  ;;  %v6578_v20 = vld [vmem:[%s7411_s17 + $0x2c] sm:$0xf]  ;;  %v6577_v21 = vld [vmem:[%s7411_s17 + $0x28] sm:$0xf] }
  0xcf   : > { %v610_v35 = vpop.permute.xlu1 %609  ;;  %v608_v36 = vpop.permute.xlu0 %607 }
  0xd0   : > { %625 = vst.msk [vmem:[#allocation2 + $0xc] sm:$0x7] %vm621_vm7, %v610_v35  ;;  %624 = vst.msk [vmem:[#allocation2 + $0x8] sm:$0x7] %vm621_vm7, %v608_v36  ;;  %v6558_v36 = vrot.slane %v6552_v32, 9 }
  0xd1   : > { %1195 = vrot.lane.b32.xlu1 %v1156_v29, %s7368_s7  ;;  %1193 = vrot.lane.b32.xlu0 %v1147_v30, %s7368_s7  ;;  %v6556_v30 = vrot.slane %v6550_v26, 9 }
  0xd3   : > { %v614_v50 = vpop.permute.xlu1 %613  ;;  %v612_v51 = vpop.permute.xlu0 %611 }
  0xd4   : > { %627 = vst.msk [vmem:[#allocation2 + $0x14] sm:$0x7] %vm621_vm7, %v614_v50  ;;  %626 = vst.msk [vmem:[#allocation2 + $0x10] sm:$0x7] %vm621_vm7, %v612_v51  ;;  %v6564_v50 = vld [vmem:[%s7411_s17 + $0x1c] sm:$0x7] }
  0xd5   : > { %1199 = vrot.lane.b32.xlu1 %v1174_v45, %s7368_s7  ;;  %1197 = vrot.lane.b32.xlu0 %v1165_v46, %s7368_s7  ;;  %v6561_v45 = vld [vmem:[%s7411_s17 + $0x10] sm:$0x7]  ;;  %v6563_v51 = vld [vmem:[%s7411_s17 + $0x18] sm:$0x7] }
  0xd7   : > { %v691_v0 = vpop.permute.xlu1 %690  ;;  %v689_v1 = vpop.permute.xlu0 %688 }
  0xd8   : > { %708 = vst.msk [vmem:[#allocation2 + $0x4] sm:$0x7] %vm706_vm8, %v691_v0  ;;  %707 = vst.msk [vmem:[#allocation2] sm:$0x7] %vm706_vm8, %v689_v1  ;;  %v6576_v0 = vld [vmem:[%s7411_s17 + $0x1c] sm:$0xf] }
  0xd9   : > { %1203 = vrot.lane.b32.xlu1 %v1192_v52, %s7368_s7  ;;  %1201 = vrot.lane.b32.xlu0 %v1183_v53, %s7368_s7  ;;  %v6575_v1 = vld [vmem:[%s7411_s17 + $0x18] sm:$0xf] }
  0xda   : > { %v1471_v14 = vshrl.u32 %v6575_v1, 16  ;;  %v1474_v15 = vshll.u32 %v6575_v1, 16 }
  0xdb   : > { %v695_v10 = vpop.permute.xlu1 %694  ;;  %v693_v11 = vpop.permute.xlu0 %692 }
  0xdc   : > { %710 = vst.msk [vmem:[#allocation2 + $0xc] sm:$0x7] %vm706_vm8, %v695_v10  ;;  %709 = vst.msk [vmem:[#allocation2 + $0x8] sm:$0x7] %vm706_vm8, %v693_v11  ;;  %v1456_v10 = vshll.u32 %v6573_v61, 16 }
  0xdd   : > { %1280 = vrot.lane.b32.xlu1 %v1241_v2, %s7369_s8  ;;  %1278 = vrot.lane.b32.xlu0 %v1232_v3, %s7369_s8  ;;  %v1446_v2 = vrot.slane %v1444_v54, 4  ;;  %v1449_v3 = vrot.slane %v1447_v55, 5  ;;  %v6567_v11 = vld [vmem:[%s7411_s17 + $0x30] sm:$0x7]  ;;  %v6581_v61 = vld [vmem:[%s7411_s17 + $0x38] sm:$0xf] }
  0xde   : > { %v1458_v26 = vrot.slane %v1456_v10, 5  ;;  %v1568_v10 = vshll.u32 %v6582_v60, 16 }
  0xdf   : > { %v699_v16 = vpop.permute.xlu1 %698  ;;  %v697_v17 = vpop.permute.xlu0 %696 }
  0xe0   : > { %712 = vst.msk [vmem:[#allocation2 + $0x14] sm:$0x7] %vm706_vm8, %v699_v16  ;;  %711 = vst.msk [vmem:[#allocation2 + $0x10] sm:$0x7] %vm706_vm8, %v697_v17 }
  0xe1   : > { %1284 = vrot.lane.b32.xlu1 %v1259_v12, %s7369_s8  ;;  %1282 = vrot.lane.b32.xlu0 %v1250_v13, %s7369_s8  ;;  %v1480_v12 = vshrl.u32 %v6576_v0, 16  ;;  %v1483_v13 = vshll.u32 %v6576_v0, 16 }
  0xe3   : > { %v740_v22 = vpop.permute.xlu1 %739  ;;  %v738_v23 = vpop.permute.xlu0 %737 }
  0xe4   : > { %757 = vst.msk [vmem:[#allocation2 + $0x4] sm:$0x7] %vm755_vm9, %v740_v22  ;;  %756 = vst.msk [vmem:[#allocation2] sm:$0x7] %vm755_vm9, %v738_v23  ;;  %v6570_v22 = vld [vmem:[%s7411_s17 + $0x3c] sm:$0x7] }
  0xe5   : > { %1288 = vrot.lane.b32.xlu1 %v1277_v18, %s7369_s8  ;;  %1286 = vrot.lane.b32.xlu0 %v1268_v19, %s7369_s8  ;;  %v1450_v18 = vor.u32 %v1449_v3, %v1446_v2  ;;  %v1441_v19 = vor.u32 %v1440_v5, %v1437_v4  ;;  %v1464_v23 = vrot.slane %v1462_v7, 4  ;;  %v7327_v4 = vld [vmem:[%s9335_s1 + $0x10] sm:$0xff]  }
  0xe7   : > { %v744_v28 = vpop.permute.xlu1 %743  ;;  %v742_v29 = vpop.permute.xlu0 %741 }
  0xe8   : > { %759 = vst.msk [vmem:[#allocation2 + $0xc] sm:$0x7] %vm755_vm9, %v744_v28  ;;  %758 = vst.msk [vmem:[#allocation2 + $0x8] sm:$0x7] %vm755_vm9, %v742_v29  ;;  %v1482_v28 = vrot.slane %v1480_v12, 4  ;;  %v1485_v29 = vrot.slane %v1483_v13, 5 }
  0xe9   : > { %1329 = vrot.lane.b32.xlu1 %v6554_v24, %s7370_s9  ;;  %1327 = vrot.lane.b32.xlu0 %v6553_v25, %s7370_s9  ;;  %v1467_v24 = vrot.slane %v1465_v8, 5  ;;  %v1455_v25 = vrot.slane %v1453_v9, 4  ;;  %v1565_v9 = vshrl.u32 %v6582_v60, 16  ;;  %v1559_v12 = vshll.u32 %v6581_v61, 16  ;;  %v1665_v60 = vld [vmem:[%s7411_s17 + $0x14] sm:$0xf] }
  0xeb   : > { %v748_v34 = vpop.permute.xlu1 %747  ;;  %v746_v35 = vpop.permute.xlu0 %745 }
  0xec   : > { %761 = vst.msk [vmem:[#allocation2 + $0x14] sm:$0x7] %vm755_vm9, %v748_v34  ;;  %760 = vst.msk [vmem:[#allocation2 + $0x10] sm:$0x7] %vm755_vm9, %v746_v35  ;;  %v1529_v34 = vshrl.u32 %v6578_v20, 16  ;;  %v1532_v35 = vshll.u32 %v6578_v20, 16 }
  0xed   : > { %1333 = vrot.lane.b32.xlu1 %v6556_v30, %s7370_s9  ;;  %1331 = vrot.lane.b32.xlu0 %v6555_v31, %s7370_s9  ;;  %v1473_v30 = vrot.slane %v1471_v14, 4  ;;  %v1476_v31 = vrot.slane %v1474_v15, 5  ;;  %v7328_v15 = vld [vmem:[%s9335_s1 + $0x18] sm:$0xff]   ;;  %v1567_v20 = vrot.slane %v1565_v9, 4  ;;  %v1712_v9 = vshrl.u32 %v1665_v60, 16 }
  0xee   : > { %v1531_v49 = vrot.slane %v1529_v34, 4  ;;  %v7330_v34 = vld [vmem:[%s9335_s1 + $0x28] sm:$0xff]  }
  0xef   : > { %v778_v38 = vpop.permute.xlu1 %777  ;;  %v776_v39 = vpop.permute.xlu0 %775 }
  0xf0   : > { %795 = vst.msk [vmem:[#allocation2 + $0x4] sm:$0x7] %vm793_vm10, %v778_v38  ;;  %794 = vst.msk [vmem:[#allocation2] sm:$0x7] %vm793_vm10, %v776_v39  ;;  %v7325_v38 = vld [vmem:[%s9335_s1] sm:$0xff]   ;;  %v1451_v39 = vrot.slane %v1450_v18, 4 }
  0xf1   : > { %1337 = vrot.lane.b32.xlu1 %v6558_v36, %s7370_s9  ;;  %1335 = vrot.lane.b32.xlu0 %v6557_v37, %s7370_s9  ;;  %v1520_v36 = vshrl.u32 %v6577_v21, 16  ;;  %v1523_v37 = vshll.u32 %v6577_v21, 16  ;;  %v1570_v21 = vrot.slane %v1568_v10, 5  ;;  %v1715_v10 = vshll.u32 %v1665_v60, 16  ;;  %v6605_v60 = vld [vmem:[%s7411_s17 + $0x30] sm:$0xf] }
  0xf2   : > { %7237 = vmatprep.subr.bf16.mxu0 %v7325_v38  ;;  %7275 = vmatprep.subr.bf16.mxu1 %v7325_v38 }
  0xf3   : > { %v782_v42 = vpop.permute.xlu1 %781  ;;  %v780_v43 = vpop.permute.xlu0 %779  ;;  %7238 = vmatpush3.bf16.msra.mxu0 %v7325_v38  ;;  %7282 = vmatpush3.bf16.msra.mxu1 %v7325_v38  ;;  %v1660_v38 = vld [vmem:[%s7411_s17] sm:$0xf] }
  0xf4   : > { %797 = vst.msk [vmem:[#allocation2 + $0xc] sm:$0x7] %vm793_vm10, %v782_v42  ;;  %796 = vst.msk [vmem:[#allocation2 + $0x8] sm:$0x7] %vm793_vm10, %v780_v43  ;;  %v1459_v42 = vor.u32 %v1458_v26, %v1455_v25  ;;  %v6580_v43 = vld [vmem:[%s7411_s17 + $0x34] sm:$0xf] }
  0xf5   : > { %1367 = vrot.lane.b32.xlu1 %v6560_v40, %s7371_s10  ;;  %1365 = vrot.lane.b32.xlu0 %v6559_v41, %s7371_s10  ;;  %v1442_v40 = vrot.slane %v1441_v19, 4  ;;  %v1468_v41 = vor.u32 %v1467_v24, %v1464_v23  ;;  %v1547_v54 = vshrl.u32 %v6580_v43, 16  ;;  %v1550_v55 = vshll.u32 %v6580_v43, 16  ;;  %v7329_v26 = vld [vmem:[%s9335_s1 + $0x20] sm:$0xff]  }
  0xf6   : > { %v1561_v23 = vrot.slane %v1559_v12, 5 }
  0xf7   : > { %v786_v46 = vpop.permute.xlu1 %785  ;;  %v784_v47 = vpop.permute.xlu0 %783  ;;  %v7772_v5 = vrot.slane %v1547_v54, 4 }
  0xf8   : > { %799 = vst.msk [vmem:[#allocation2 + $0x14] sm:$0x7] %vm793_vm10, %v786_v46  ;;  %798 = vst.msk [vmem:[#allocation2 + $0x10] sm:$0x7] %vm793_vm10, %v784_v47  ;;  %v1477_v46 = vor.u32 %v1476_v31, %v1473_v30  ;;  %v1571_v30 = vor.u32 %v1570_v21, %v1567_v20  ;;  %v6602_v21 = vld [vmem:[%s7411_s17 + $0x24] sm:$0xf] }
  0xf9   : > { %1371 = vrot.lane.b32.xlu1 %v6562_v44, %s7371_s10  ;;  %1369 = vrot.lane.b32.xlu0 %v6561_v45, %s7371_s10  ;;  %v6579_v44 = vld [vmem:[%s7411_s17 + $0x30] sm:$0xf]  ;;  %v1486_v45 = vor.u32 %v1485_v29, %v1482_v28 }
  0xfa   : > { %v1538_v56 = vshrl.u32 %v6579_v44, 16  ;;  %v1541_v57 = vshll.u32 %v6579_v44, 16  ;;  %v1478_v1 = vrot.slane %v1477_v46, 4  ;;  %v7839_v44 = vld [vmem:[%s7411_s17 + $0x10] sm:$0xe] }
  0xfb   : > { %v816_v52 = vpop.permute.xlu1 %815  ;;  %v814_v53 = vpop.permute.xlu0 %813  ;;  %v1487_v0 = vrot.slane %v1486_v45, 4  ;;  %v7331_v46 = vld [vmem:[%s9335_s1 + $0x30] ss:$0 sps:$4 sm:$0x33]   ;;  %v6591_v54 = vrot.slane %v7839_v44, 9 }
  0xfc   : > { %833 = vst.msk [vmem:[#allocation2 + $0x4] sm:$0x7] %vm9353_vm11, %v816_v52  ;;  %832 = vst.msk [vmem:[#allocation2] sm:$0x7] %vm9353_vm11, %v814_v53  ;;  %v1525_v52 = vrot.slane %v1523_v37, 5  ;;  %v7326_v53 = vld [vmem:[%s9335_s1 + $0x8] sm:$0xff]  }
  0xfd   : > { %1375 = vrot.lane.b32.xlu1 %v6564_v50, %s7371_s10  ;;  %1373 = vrot.lane.b32.xlu0 %v6563_v51, %s7371_s10  ;;  %v1534_v50 = vrot.slane %v1532_v35, 5  ;;  %v1522_v51 = vrot.slane %v1520_v36, 4  ;;  %v7776_v7 = vrot.slane %v1538_v56, 4  ;;  %v7778_v8 = vrot.slane %v1541_v57, 5  ;;  %v1661_v35 = vld [vmem:[%s7411_s17 + $0x4] sm:$0xf] }
  0xfe   : > { %7239 = vmatprep.subr.bf16.mxu0 %v7326_v53  ;;  %7276 = vmatprep.subr.bf16.mxu1 %v7326_v53  ;;  %v1572_v36 = vrot.slane %v1571_v30, 4  ;;  %v1676_v45 = vshrl.u32 %v1661_v35, 16  ;;  %v6596_v57 = vld [vmem:[%s7411_s17 + $0x24] sm:$0x7]  ;;  %v6603_v44 = vld [vmem:[%s7411_s17 + $0x28] sm:$0xf] }
  0xff   : > { %v820_v62 = vpop.permute.xlu1 %819  ;;  %v818_v63 = vpop.permute.xlu0 %817  ;;  %v1535_v2 = vor.u32 %v1534_v50, %v1531_v49  ;;  %v1526_v3 = vor.u32 %v1525_v52, %v1522_v51  ;;  %7240 = vmatpush3.bf16.msra.mxu0 %v7326_v53  ;;  %7283 = vmatpush3.bf16.msra.mxu1 %v7326_v53  ;;  %v1544_v19 = vor.u32 %v7778_v8, %v7776_v7  ;;  %v1670_v49 = vshll.u32 %v1660_v38, 16  ;;  %v1663_v53 = vld [vmem:[%s7411_s17 + $0xc] sm:$0xf] }
 0x100   : > { %835 = vst.msk [vmem:[#allocation2 + $0xc] sm:$0x7] %vm9353_vm11, %v820_v62  ;;  %834 = vst.msk [vmem:[#allocation2 + $0x8] sm:$0x7] %vm9353_vm11, %v818_v63  ;;  %7241 = vmatprep.subr.bf16.mxu0 %v7327_v4  ;;  %7277 = vmatprep.subr.bf16.mxu1 %v7327_v4 }
 0x101   : > { %1405 = vrot.lane.b32.xlu1 %v6566_v58, %s7372_s11  ;;  %1403 = vrot.lane.b32.xlu0 %v6565_v59, %s7372_s11  ;;  %v1469_v58 = vrot.slane %v1468_v41, 4  ;;  %v1460_v59 = vrot.slane %v1459_v42, 4  ;;  %v1545_v29 = vrot.slane %v1544_v19, 4  ;;  %v7836_v41 = vld [vmem:[%s7411_s17 + $0x14] sm:$0xe] }
 0x102   : > { %v6592_v52 = vrot.slane %v7836_v41, 9  ;;  %1655 = vst.msk [vmem:[#allocation2 + $0x1c] sm:$0x7] %vm9340_vm0, %v6596_v57 }
 0x103   : > { %v824_v16 = vpop.permute.xlu1 %823  ;;  %v822_v17 = vpop.permute.xlu0 %821  ;;  %7242 = vmatpush3.bf16.msra.mxu0 %v7327_v4  ;;  %7284 = vmatpush3.bf16.msra.mxu1 %v7327_v4  ;;  %v6587_v4 = vld [vmem:[%s7411_s17 + $0x18] sm:$0xe] }
 0x104   : > { %837 = vst.msk [vmem:[#allocation2 + $0x14] sm:$0x7] %vm9353_vm11, %v824_v16  ;;  %836 = vst.msk [vmem:[#allocation2 + $0x10] sm:$0x7] %vm9353_vm11, %v822_v17  ;;  %v1536_v16 = vrot.slane %v1535_v2, 4  ;;  %v1527_v17 = vrot.slane %v1526_v3, 4  ;;  %7243 = vmatprep.subr.bf16.mxu0 %v7328_v15  ;;  %7278 = vmatprep.subr.bf16.mxu1 %v7328_v15 }
 0x105   : > { %1409 = vrot.lane.b32.xlu1 %v6568_v6, %s7372_s11  ;;  %1407 = vrot.lane.b32.xlu0 %v6567_v11, %s7372_s11  ;;  %v7774_v6 = vrot.slane %v1550_v55, 5  ;;  %v1556_v11 = vshrl.u32 %v6581_v61, 16  ;;  %v1662_v55 = vld [vmem:[%s7411_s17 + $0x8] sm:$0xf]  ;;  %v1664_v61 = vld [vmem:[%s7411_s17 + $0x10] sm:$0xf] }
 0x106   : > { %v1672_v3 = vrot.slane %v1670_v49, 5  ;;  %v1685_v7 = vshrl.u32 %v1662_v55, 16  ;;  %v1688_v8 = vshll.u32 %v1662_v55, 16  ;;  %v1706_v12 = vshll.u32 %v1664_v61, 16 }
 0x107   : > { %v901_v32 = vpop.permute.xlu1 %900  ;;  %v899_v33 = vpop.permute.xlu0 %898  ;;  %v1553_v18 = vor.u32 %v7774_v6, %v7772_v5  ;;  %7244 = vmatpush3.bf16.msra.mxu0 %v7328_v15  ;;  %7285 = vmatpush3.bf16.msra.mxu1 %v7328_v15  ;;  %v1694_v5 = vshrl.u32 %v1663_v53, 16  ;;  %v1697_v6 = vshll.u32 %v1663_v53, 16  ;;  %v1769_v55 = vshrl.u32 %v6603_v44, 16 }
 0x108   : > { %918 = vst.msk [vmem:[#allocation2 + $0x4] sm:$0x7] %vm9351_vm12, %v901_v32  ;;  %917 = vst.msk [vmem:[#allocation2] sm:$0x7] %vm9351_vm12, %v899_v33  ;;  %7245 = vmatprep.subr.bf16.mxu0 %v7329_v26  ;;  %7279 = vmatprep.subr.bf16.mxu1 %v7329_v26  ;;  %v1708_v30 = vrot.slane %v1706_v12, 5 }
 0x109   : > { %1413 = vrot.lane.b32.xlu1 %v6570_v22, %s7372_s11  ;;  %1411 = vrot.lane.b32.xlu0 %v6569_v27, %s7372_s11  ;;  %v1558_v22 = vrot.slane %v1556_v11, 4  ;;  %v7374_v27 = vmov 0   ;;  %v1554_v28 = vrot.slane %v1553_v18, 4  ;;  %v1703_v11 = vshrl.u32 %v1664_v61, 16 }
 0x10a   : > { %173 = vst.msk [vmem:[#allocation2] sm:$0x8] %vm172_vm14, %v7374_v27  ;;  %174 = vst.msk [vmem:[#allocation2 + $0x4] sm:$0x8] %vm172_vm14, %v7374_v27  ;;  %v6593_v18 = vrot.slane %v6587_v4, 9 }
 0x10b   : > { %v905_v47 = vpop.permute.xlu1 %904  ;;  %v903_v48 = vpop.permute.xlu0 %902  ;;  %175 = vst.msk [vmem:[#allocation2 + $0x8] sm:$0x8] %vm172_vm14, %v7374_v27  ;;  %176 = vst.msk [vmem:[#allocation2 + $0xc] sm:$0x8] %vm172_vm14, %v7374_v27  ;;  %v1562_v31 = vor.u32 %v1561_v23, %v1558_v22  ;;  %7246 = vmatpush3.bf16.msra.mxu0 %v7329_v26  ;;  %7286 = vmatpush3.bf16.msra.mxu1 %v7329_v26  ;;  %v6601_v22 = vld [vmem:[%s7411_s17 + $0x20] sm:$0xf] }
 0x10c   : > { %920 = vst.msk [vmem:[#allocation2 + $0xc] sm:$0x7] %vm9351_vm12, %v905_v47  ;;  %919 = vst.msk [vmem:[#allocation2 + $0x8] sm:$0x7] %vm9351_vm12, %v903_v48  ;;  %7247 = vmatprep.subr.bf16.mxu0 %v7330_v34  ;;  %7280 = vmatprep.subr.bf16.mxu1 %v7330_v34  ;;  %v1679_v47 = vshll.u32 %v1661_v35, 16  ;;  %v1667_v48 = vshrl.u32 %v1660_v38, 16 }
 0x10d   : > { %1490 = vrot.lane.b32.xlu1 %v1451_v39, %s9338_s15  ;;  %1488 = vrot.lane.b32.xlu0 %v1442_v40, %s9338_s15  ;;  %177 = vst.msk [vmem:[#allocation2 + $0x10] sm:$0x8] %vm172_vm14, %v7374_v27  ;;  %178 = vst.msk [vmem:[#allocation2 + $0x14] sm:$0x8] %vm172_vm14, %v7374_v27  ;;  %v1563_v37 = vrot.slane %v1562_v31, 4  ;;  %v1696_v23 = vrot.slane %v1694_v5, 4 }
 0x10e   : > { %179 = vst.msk [vmem:[#allocation2 + $0x18] sm:$0x8] %vm172_vm14, %v7374_v27  ;;  %180 = vst.msk [vmem:[#allocation2 + $0x1c] sm:$0x8] %vm172_vm14, %v7374_v27  ;;  %v6584_v39 = vld [vmem:[%s7411_s17 + $0xc] sm:$0xe] }
 0x10f   : > { %v909_v62 = vpop.permute.xlu1 %908  ;;  %v907_v63 = vpop.permute.xlu0 %906  ;;  %181 = vst.msk [vmem:[#allocation2 + $0x20] sm:$0x8] %vm172_vm14, %v7374_v27  ;;  %182 = vst.msk [vmem:[#allocation2 + $0x24] sm:$0x8] %vm172_vm14, %v7374_v27  ;;  %v6583_v40 = vld [vmem:[%s7411_s17 + $0x8] sm:$0xe]  ;;  %7248 = vmatpush3.bf16.msra.mxu0 %v7330_v34  ;;  %7287 = vmatpush3.bf16.msra.mxu1 %v7330_v34 }
 0x110   : > { %922 = vst.msk [vmem:[#allocation2 + $0x14] sm:$0x7] %vm9351_vm12, %v909_v62  ;;  %921 = vst.msk [vmem:[#allocation2 + $0x10] sm:$0x7] %vm9351_vm12, %v907_v63  ;;  %v6590_v50 = vrot.slane %v6584_v39, 9  ;;  %v6589_v51 = vrot.slane %v6583_v40, 9 }
 0x111   : > { %1494 = vrot.lane.b32.xlu1 %v1469_v58, %s9338_s15  ;;  %1492 = vrot.lane.b32.xlu0 %v1460_v59, %s9338_s15  ;;  %183 = vst.msk [vmem:[#allocation2 + $0x28] sm:$0x8] %vm172_vm14, %v7374_v27  ;;  %184 = vst.msk [vmem:[#allocation2 + $0x2c] sm:$0x8] %vm172_vm14, %v7374_v27  ;;  %v6595_v62 = vld [vmem:[%s7411_s17 + $0x20] sm:$0x7] }
 0x112   : > { %185 = vst.msk [vmem:[#allocation2 + $0x30] sm:$0x8] %vm172_vm14, %v7374_v27  ;;  %186 = vst.msk [vmem:[#allocation2 + $0x34] sm:$0x8] %vm172_vm14, %v7374_v27  ;;  %v6588_v63 = vld [vmem:[%s7411_s17 + $0x1c] sm:$0xe] }
 0x113   : > { %v986_v13 = vpop.permute.xlu1 %985  ;;  %v984_v14 = vpop.permute.xlu0 %983  ;;  %187 = vst.msk [vmem:[#allocation2 + $0x38] sm:$0x8] %vm172_vm14, %v7374_v27  ;;  %188 = vst.msk [vmem:[#allocation2 + $0x3c] sm:$0x8] %vm172_vm14, %v7374_v27  ;;  %v1669_v2 = vrot.slane %v1667_v48, 4  ;;  %v1690_v26 = vrot.slane %v1688_v8, 5 }
 0x114   : > { %1003 = vst.msk [vmem:[#allocation2 + $0x4] sm:$0x7] %vm9350_vm13, %v986_v13  ;;  %1002 = vst.msk [vmem:[#allocation2] sm:$0x7] %vm9350_vm13, %v984_v14  ;;  %v6598_v13 = vld [vmem:[%s7411_s17 + $0x2c] sm:$0x7] }
 0x115   : > { %1498 = vrot.lane.b32.xlu1 %v1487_v0, %s9338_s15  ;;  %1496 = vrot.lane.b32.xlu0 %v1478_v1, %s9338_s15  ;;  %189 = vst.msk [vmem:[#allocation2 + $0x40] sm:$0x8] %vm172_vm14, %v7374_v27  ;;  %190 = vst.msk [vmem:[#allocation2 + $0x44] sm:$0x8] %vm172_vm14, %v7374_v27  ;;  %v1678_v0 = vrot.slane %v1676_v45, 4  ;;  %v1681_v1 = vrot.slane %v1679_v47, 5  ;;  %v1673_v20 = vor.u32 %v1672_v3, %v1669_v2 }
 0x116   : > { %191 = vst.msk [vmem:[#allocation2 + $0x48] sm:$0x8] %vm172_vm14, %v7374_v27  ;;  %192 = vst.msk [vmem:[#allocation2 + $0x4c] sm:$0x8] %vm172_vm14, %v7374_v27  ;;  %s7376_s15 = smov 96   ;;  %v1760_v34 = vshrl.u32 %v6602_v21, 16 }
 0x117   : > { %v990_v24 = vpop.permute.xlu1 %989  ;;  %v988_v25 = vpop.permute.xlu0 %987  ;;  %193 = vst.msk [vmem:[#allocation2 + $0x50] sm:$0x8] %vm172_vm14, %v7374_v27  ;;  %194 = vst.msk [vmem:[#allocation2 + $0x54] sm:$0x8] %vm172_vm14, %v7374_v27  ;;  %v1682_v19 = vor.u32 %v1681_v1, %v1678_v0  ;;  %v6600_v31 = vld [vmem:[%s7411_s17 + $0x34] sm:$0x7] }
 0x118   : > { %1005 = vst.msk [vmem:[#allocation2 + $0xc] sm:$0x7] %vm9350_vm13, %v990_v24  ;;  %1004 = vst.msk [vmem:[#allocation2 + $0x8] sm:$0x7] %vm9350_vm13, %v988_v25  ;;  %v1699_v24 = vrot.slane %v1697_v6, 5  ;;  %v1687_v25 = vrot.slane %v1685_v7, 4 }
 0x119   : > { %195 = vst.msk [vmem:[#allocation2 + $0x58] sm:$0x8] %vm172_vm14, %v7374_v27  ;;  %196 = vst.msk [vmem:[#allocation2 + $0x5c] sm:$0x8] %vm172_vm14, %v7374_v27  ;;  %1575 = vrot.lane.b32.xlu1 %v1536_v16, %s7375_s16  ;;  %1573 = vrot.lane.b32.xlu0 %v1527_v17, %s7375_s16  ;;  %vm6193_vm14 = vcmask 1041408   ;;  %v6594_v17 = vrot.slane %v6588_v63, 9 }
 0x11a   : > { %7289 = vmatprep.subr.msk.bf16.mxu0 %vm6193_vm14, %v7331_v46  ;;  %v6195_v56 = vsel %vm6193_vm14, %v7331_v46, 0  ;;  %7290 = vmatprep.subr.msk.bf16.mxu1 %vm6193_vm14, %v7331_v46  ;;  %1654 = vst.msk [vmem:[#allocation2 + $0x18] sm:$0x7] %vm9340_vm0, %v6595_v62  ;;  %vm9341_vm14 = vcmask 518624   ;;  %1657 = vst.msk [vmem:[#allocation2 + $0x24] sm:$0x7] %vm9340_vm0, %v6598_v13  ;;  %v1700_v41 = vor.u32 %v1699_v24, %v1696_v23 }
 0x11b   : > { %v994_v32 = vpop.permute.xlu1 %993  ;;  %v992_v33 = vpop.permute.xlu0 %991  ;;  %7250 = vmatpush3.bf16.msra.mxu0 %v6195_v56  ;;  %7288 = vmatpush3.bf16.msra.mxu1 %v6195_v56  ;;  %v6597_v16 = vld [vmem:[%s7411_s17 + $0x28] sm:$0x7]  ;;  %v1714_v27 = vrot.slane %v1712_v9, 4  ;;  %v1763_v35 = vshll.u32 %v6602_v21, 16  ;;  %1659 = vst.msk [vmem:[#allocation2 + $0x2c] sm:$0x7] %vm9340_vm0, %v6600_v31 }
 0x11c   : > { %1007 = vst.msk [vmem:[#allocation2 + $0x14] sm:$0x7] %vm9350_vm13, %v994_v32  ;;  %1006 = vst.msk [vmem:[#allocation2 + $0x10] sm:$0x7] %vm9350_vm13, %v992_v33  ;;  %v6599_v38 = vld [vmem:[%s7411_s17 + $0x30] sm:$0x7] }
 0x11d   : > { %1579 = vrot.lane.b32.xlu1 %v1554_v28, %s7375_s16  ;;  %1577 = vrot.lane.b32.xlu0 %v1545_v29, %s7375_s16  ;;  %1656 = vst.msk [vmem:[#allocation2 + $0x20] sm:$0x7] %vm9340_vm0, %v6597_v16  ;;  %v1717_v28 = vrot.slane %v1715_v10, 5  ;;  %v1705_v29 = vrot.slane %v1703_v11, 4  ;;  %1658 = vst.msk [vmem:[#allocation2 + $0x28] sm:$0x7] %vm9340_vm0, %v6599_v38 }
 0x11e   : > { %v1683_v39 = vrot.slane %v1682_v19, 4  ;;  %v1674_v40 = vrot.slane %v1673_v20, 4  ;;  %v1762_v49 = vrot.slane %v1760_v34, 4  ;;  %v1772_v56 = vshll.u32 %v6603_v44, 16  ;;  %v1829_v31 = vld [vmem:[%s7411_s17 + $0x4] sm:$0xe] }
 0x11f   : > { %v1035_v42 = vpop.permute.xlu1 %1034  ;;  %v1033_v43 = vpop.permute.xlu0 %1032  ;;  %v1718_v45 = vor.u32 %v1717_v28, %v1714_v27  ;;  %v1709_v46 = vor.u32 %v1708_v30, %v1705_v29  ;;  %v1701_v57 = vrot.slane %v1700_v41, 4  ;;  %vm9342_vm0 = vcmask 551424   ;;  %v1830_v38 = vld [vmem:[%s7411_s17 + $0x8] sm:$0xe]  ;;  %v1832_v44 = vld [vmem:[%s7411_s17 + $0x10] sm:$0xe] }
 0x120   : > { %1052 = vst.msk [vmem:[#allocation2 + $0x4] sm:$0x7] %vm9352_vm15, %v1035_v42  ;;  %1051 = vst.msk [vmem:[#allocation2] sm:$0x7] %vm9352_vm15, %v1033_v43  ;;  %v1691_v42 = vor.u32 %v1690_v26, %v1687_v25  ;;  %v6604_v43 = vld [vmem:[%s7411_s17 + $0x2c] sm:$0xf] }
 0x121   : > { %1583 = vrot.lane.b32.xlu1 %v1572_v36, %s7375_s16  ;;  %1581 = vrot.lane.b32.xlu0 %v1563_v37, %s7375_s16  ;;  %v1751_v36 = vshrl.u32 %v6601_v22, 16  ;;  %v1754_v37 = vshll.u32 %v6601_v22, 16  ;;  %v1778_v53 = vshrl.u32 %v6604_v43, 16  ;;  %v1719_v63 = vrot.slane %v1718_v45, 4 }
 0x122   : > { %v1710_v0 = vrot.slane %v1709_v46, 4  ;;  %v1771_v5 = vrot.slane %v1769_v55, 4  ;;  %v1774_v6 = vrot.slane %v1772_v56, 5  ;;  %v1787_v9 = vshrl.u32 %v6605_v60, 16  ;;  %v6616_v55 = vld [vmem:[%s7411_s17 + $0x2c] sm:$0xe] }
 0x123   : > { %v1039_v58 = vpop.permute.xlu1 %1038  ;;  %v1037_v59 = vpop.permute.xlu0 %1036  ;;  %v1780_v3 = vrot.slane %v1778_v53, 4  ;;  %v1790_v10 = vshll.u32 %v6605_v60, 16  ;;  %v6615_v56 = vld [vmem:[%s7411_s17 + $0x28] sm:$0xe] }
 0x124   : > { %1054 = vst.msk [vmem:[#allocation2 + $0xc] sm:$0x7] %vm9352_vm15, %v1039_v58  ;;  %1053 = vst.msk [vmem:[#allocation2 + $0x8] sm:$0x7] %vm9352_vm15, %v1037_v59  ;;  %v1692_v58 = vrot.slane %v1691_v42, 4  ;;  %v1775_v16 = vor.u32 %v1774_v6, %v1771_v5  ;;  %v1789_v19 = vrot.slane %v1787_v9, 4 }
 0x125   : > { %1624 = vrot.lane.b32.xlu1 %v6590_v50, %s7376_s15  ;;  %1622 = vrot.lane.b32.xlu0 %v6589_v51, %s7376_s15  ;;  %v1765_v50 = vrot.slane %v1763_v35, 5  ;;  %v1753_v51 = vrot.slane %v1751_v36, 4  ;;  %v6606_v59 = vld [vmem:[%s7411_s17 + $0x34] sm:$0xf]  ;;  %v1792_v20 = vrot.slane %v1790_v10, 5  ;;  %v6608_v35 = vrot.slane %v1829_v31, 9 }
 0x126   : > { %v1796_v7 = vshrl.u32 %v6606_v59, 16  ;;  %v1799_v8 = vshll.u32 %v6606_v59, 16  ;;  %v1776_v24 = vrot.slane %v1775_v16, 4  ;;  %v6609_v42 = vrot.slane %v1830_v38, 9  ;;  %v6637_v38 = vld [vmem:[%s7411_s17 + $0x60] sm:$0xf] }
 0x127   : > { %v1043_v14 = vpop.permute.xlu1 %1042  ;;  %v1041_v15 = vpop.permute.xlu0 %1040  ;;  %v1766_v1 = vor.u32 %v1765_v50, %v1762_v49  ;;  %v1793_v26 = vor.u32 %v1792_v20, %v1789_v19  ;;  %v6614_v49 = vld [vmem:[%s7411_s17 + $0x24] sm:$0xe]  ;;  %v6613_v50 = vld [vmem:[%s7411_s17 + $0x20] sm:$0xe]  ;;  %v6622_v59 = vrot.slane %v6616_v55, 9  ;;  %v6621_v60 = vrot.slane %v6615_v56, 9 }
 0x128   : > { %1056 = vst.msk [vmem:[#allocation2 + $0x14] sm:$0x7] %vm9352_vm15, %v1043_v14  ;;  %1055 = vst.msk [vmem:[#allocation2 + $0x10] sm:$0x7] %vm9352_vm15, %v1041_v15  ;;  %v6620_v53 = vrot.slane %v6614_v49, 9 }
 0x129   : > { %1628 = vrot.lane.b32.xlu1 %v6592_v52, %s7376_s15  ;;  %1626 = vrot.lane.b32.xlu0 %v6591_v54, %s7376_s15  ;;  %v1756_v52 = vrot.slane %v1754_v37, 5  ;;  %v1781_v54 = vshll.u32 %v6604_v43, 16  ;;  %v1767_v13 = vrot.slane %v1766_v1, 4  ;;  %v1794_v30 = vrot.slane %v1793_v26, 4  ;;  %v1831_v37 = vld [vmem:[%s7411_s17 + $0xc] sm:$0xe] }
 0x12a   : > { %v6610_v41 = vrot.slane %v1831_v37, 9  ;;  %v1833_v43 = vld [vmem:[%s7411_s17 + $0x14] sm:$0xe]  ;;  %v6638_v37 = vld [vmem:[%s7411_s17 + $0x64] sm:$0xf] }
 0x12b   : > { %v1073_v32 = vpop.permute.xlu1 %1072  ;;  %v1071_v33 = vpop.permute.xlu0 %1070  ;;  %v1757_v2 = vor.u32 %v1756_v52, %v1753_v51  ;;  %v1783_v4 = vrot.slane %v1781_v54, 5  ;;  %v6619_v54 = vrot.slane %v6613_v50, 9 }
 0x12c   : > { %1090 = vst.msk [vmem:[#allocation2 + $0x4] sm:$0x7] %vm9341_vm14, %v1073_v32  ;;  %1089 = vst.msk [vmem:[#allocation2] sm:$0x7] %vm9341_vm14, %v1071_v33  ;;  %v1828_v32 = vld [vmem:[%s7411_s17] sm:$0xe] }
 0x12d   : > { %1632 = vrot.lane.b32.xlu1 %v6594_v17, %s7376_s15  ;;  %1630 = vrot.lane.b32.xlu0 %v6593_v18, %s7376_s15  ;;  %v1758_v14 = vrot.slane %v1757_v2, 4  ;;  %v1784_v15 = vor.u32 %v1783_v4, %v1780_v3  ;;  %v1798_v17 = vrot.slane %v1796_v7, 4  ;;  %v1801_v18 = vrot.slane %v1799_v8, 5  ;;  %v6632_v3 = vld [vmem:[%s7411_s17 + $0x44] sm:$0xf] }
 0x12e   : > { %v6607_v36 = vrot.slane %v1828_v32, 9  ;;  %v6631_v4 = vld [vmem:[%s7411_s17 + $0x40] sm:$0xf]  ;;  %v1976_v7 = vshrl.u32 %v6632_v3, 16  ;;  %v1979_v8 = vshll.u32 %v6632_v3, 16 }
 0x12f   : > { %v1077_v47 = vpop.permute.xlu1 %1076  ;;  %v1075_v48 = vpop.permute.xlu0 %1074  ;;  %v1785_v23 = vrot.slane %v1784_v15, 4  ;;  %v1802_v25 = vor.u32 %v1801_v18, %v1798_v17  ;;  %v1967_v9 = vshrl.u32 %v6631_v4, 16  ;;  %v1970_v10 = vshll.u32 %v6631_v4, 16  ;;  %v6636_v17 = vld [vmem:[%s7411_s17 + $0x54] sm:$0xf] }
 0x130   : > { %1092 = vst.msk [vmem:[#allocation2 + $0xc] sm:$0x7] %vm9341_vm14, %v1077_v47  ;;  %1091 = vst.msk [vmem:[#allocation2 + $0x8] sm:$0x7] %vm9341_vm14, %v1075_v48  ;;  %v6612_v47 = vrot.slane %v1833_v43, 9  ;;  %v6611_v48 = vrot.slane %v1832_v44, 9 }
 0x131   : > { %1722 = vrot.lane.b32.xlu1 %v1683_v39, %s7352_s18  ;;  %1720 = vrot.lane.b32.xlu0 %v1674_v40, %s7352_s18  ;;  %v1803_v29 = vrot.slane %v1802_v25, 4  ;;  %v6635_v18 = vld [vmem:[%s7411_s17 + $0x50] sm:$0xf]  ;;  %v1978_v19 = vrot.slane %v1976_v7, 4  ;;  %v1981_v20 = vrot.slane %v1979_v8, 5 }
 0x132   : > { %v2003_v31 = vshrl.u32 %v6635_v18, 16  ;;  %v2006_v32 = vshll.u32 %v6635_v18, 16  ;;  %v6629_v44 = vld [vmem:[%s7411_s17 + $0x70] sm:$0x7] }
 0x133   : > { %v1081_v61 = vpop.permute.xlu1 %1080  ;;  %v1079_v62 = vpop.permute.xlu0 %1078 }
 0x134   : > { %1094 = vst.msk [vmem:[#allocation2 + $0x14] sm:$0x7] %vm9341_vm14, %v1081_v61  ;;  %1093 = vst.msk [vmem:[#allocation2 + $0x10] sm:$0x7] %vm9341_vm14, %v1079_v62  ;;  %vm9343_vm14 = vcmask 584224  }
 0x135   : > { %1726 = vrot.lane.b32.xlu1 %v1701_v57, %s7352_s18  ;;  %1724 = vrot.lane.b32.xlu0 %v1692_v58, %s7352_s18  ;;  %v6618_v61 = vld [vmem:[%s7411_s17 + $0x34] sm:$0xe]  ;;  %v6617_v62 = vld [vmem:[%s7411_s17 + $0x30] sm:$0xe] }
 0x136   : > { %v6624_v1 = vrot.slane %v6618_v61, 9  ;;  %v6623_v2 = vrot.slane %v6617_v62, 9 }
 0x137   : > { %v1111_v11 = vpop.permute.xlu1 %1110  ;;  %v1109_v12 = vpop.permute.xlu0 %1108 }
 0x138   : > { %1128 = vst.msk [vmem:[#allocation2 + $0x4] sm:$0x7] %vm9342_vm0, %v1111_v11  ;;  %1127 = vst.msk [vmem:[#allocation2] sm:$0x7] %vm9342_vm0, %v1109_v12  ;;  %v6626_v11 = vld [vmem:[%s7411_s17 + $0x64] sm:$0x7] }
 0x139   : > { %1730 = vrot.lane.b32.xlu1 %v1719_v63, %s7352_s18  ;;  %1728 = vrot.lane.b32.xlu0 %v1710_v0, %s7352_s18  ;;  %v6625_v12 = vld [vmem:[%s7411_s17 + $0x60] sm:$0x7] }
 0x13b   : > { %v1115_v21 = vpop.permute.xlu1 %1114  ;;  %v1113_v22 = vpop.permute.xlu0 %1112 }
 0x13c   : > { %1130 = vst.msk [vmem:[#allocation2 + $0xc] sm:$0x7] %vm9342_vm0, %v1115_v21  ;;  %1129 = vst.msk [vmem:[#allocation2 + $0x8] sm:$0x7] %vm9342_vm0, %v1113_v22  ;;  %v1969_v21 = vrot.slane %v1967_v9, 4  ;;  %v1972_v22 = vrot.slane %v1970_v10, 5 }
 0x13d   : > { %1806 = vrot.lane.b32.xlu1 %v1767_v13, %s7353_s19  ;;  %1804 = vrot.lane.b32.xlu0 %v1758_v14, %s7353_s19  ;;  %v6634_v13 = vld [vmem:[%s7411_s17 + $0x4c] sm:$0xf]  ;;  %v6633_v14 = vld [vmem:[%s7411_s17 + $0x48] sm:$0xf] }
 0x13e   : > { %v1997_v25 = vshll.u32 %v6634_v13, 16  ;;  %v1985_v26 = vshrl.u32 %v6633_v14, 16 }
 0x13f   : > { %v1119_v27 = vpop.permute.xlu1 %1118  ;;  %v1117_v28 = vpop.permute.xlu0 %1116 }
 0x140   : > { %1132 = vst.msk [vmem:[#allocation2 + $0x14] sm:$0x7] %vm9342_vm0, %v1119_v27  ;;  %1131 = vst.msk [vmem:[#allocation2 + $0x10] sm:$0x7] %vm9342_vm0, %v1117_v28  ;;  %vm9344_vm0 = vcmask 617024   ;;  %v1988_v27 = vshll.u32 %v6633_v14, 16 }
 0x141   : > { %1810 = vrot.lane.b32.xlu1 %v1785_v23, %s7353_s19  ;;  %1808 = vrot.lane.b32.xlu0 %v1776_v24, %s7353_s19  ;;  %v6628_v23 = vld [vmem:[%s7411_s17 + $0x6c] sm:$0x7]  ;;  %v1994_v24 = vshrl.u32 %v6634_v13, 16  ;;  %v6627_v28 = vld [vmem:[%s7411_s17 + $0x68] sm:$0x7] }
 0x142   : > { %v1990_v43 = vrot.slane %v1988_v27, 5 }
 0x143   : > { %v1196_v33 = vpop.permute.xlu1 %1195  ;;  %v1194_v34 = vpop.permute.xlu0 %1193 }
 0x144   : > { %1213 = vst.msk [vmem:[#allocation2 + $0x4] sm:$0x7] %vm9343_vm14, %v1196_v33  ;;  %1212 = vst.msk [vmem:[#allocation2] sm:$0x7] %vm9343_vm14, %v1194_v34 }
 0x145   : > { %1814 = vrot.lane.b32.xlu1 %v1803_v29, %s7353_s19  ;;  %1812 = vrot.lane.b32.xlu0 %v1794_v30, %s7353_s19  ;;  %v2012_v29 = vshrl.u32 %v6636_v17, 16  ;;  %v2015_v30 = vshll.u32 %v6636_v17, 16 }
 0x147   : > { %v1200_v39 = vpop.permute.xlu1 %1199  ;;  %v1198_v40 = vpop.permute.xlu0 %1197 }
 0x148   : > { %1215 = vst.msk [vmem:[#allocation2 + $0xc] sm:$0x7] %vm9343_vm14, %v1200_v39  ;;  %1214 = vst.msk [vmem:[#allocation2 + $0x8] sm:$0x7] %vm9343_vm14, %v1198_v40  ;;  %v6630_v39 = vld [vmem:[%s7411_s17 + $0x74] sm:$0x7] }
 0x149   : > { %1854 = vrot.lane.b32.xlu1 %v6608_v35, %s7354_s20  ;;  %1852 = vrot.lane.b32.xlu0 %v6607_v36, %s7354_s20  ;;  %v1982_v35 = vor.u32 %v1981_v20, %v1978_v19  ;;  %v1973_v36 = vor.u32 %v1972_v22, %v1969_v21  ;;  %v1996_v40 = vrot.slane %v1994_v24, 4 }
 0x14b   : > { %v1204_v45 = vpop.permute.xlu1 %1203  ;;  %v1202_v46 = vpop.permute.xlu0 %1201  ;;  %v1983_v55 = vrot.slane %v1982_v35, 4  ;;  %v1974_v56 = vrot.slane %v1973_v36, 4 }
 0x14c   : > { %1217 = vst.msk [vmem:[#allocation2 + $0x14] sm:$0x7] %vm9343_vm14, %v1204_v45  ;;  %1216 = vst.msk [vmem:[#allocation2 + $0x10] sm:$0x7] %vm9343_vm14, %v1202_v46  ;;  %vm9345_vm14 = vcmask 649824   ;;  %v2014_v45 = vrot.slane %v2012_v29, 4 }
 0x14d   : > { %1858 = vrot.lane.b32.xlu1 %v6610_v41, %s7354_s20  ;;  %1856 = vrot.lane.b32.xlu0 %v6609_v42, %s7354_s20  ;;  %v1999_v41 = vrot.slane %v1997_v25, 5  ;;  %v1987_v42 = vrot.slane %v1985_v26, 4  ;;  %v2017_v46 = vrot.slane %v2015_v30, 5 }
 0x14f   : > { %v1281_v51 = vpop.permute.xlu1 %1280  ;;  %v1279_v52 = vpop.permute.xlu0 %1278  ;;  %v2018_v61 = vor.u32 %v2017_v46, %v2014_v45 }
 0x150   : > { %1298 = vst.msk [vmem:[#allocation2 + $0x4] sm:$0x7] %vm9344_vm0, %v1281_v51  ;;  %1297 = vst.msk [vmem:[#allocation2] sm:$0x7] %vm9344_vm0, %v1279_v52  ;;  %v2060_v51 = vshrl.u32 %v6638_v37, 16  ;;  %v2063_v52 = vshll.u32 %v6638_v37, 16 }
 0x151   : > { %1862 = vrot.lane.b32.xlu1 %v6612_v47, %s7354_s20  ;;  %1860 = vrot.lane.b32.xlu0 %v6611_v48, %s7354_s20  ;;  %v2005_v47 = vrot.slane %v2003_v31, 4  ;;  %v2008_v48 = vrot.slane %v2006_v32, 5 }
 0x153   : > { %v1285_v57 = vpop.permute.xlu1 %1284  ;;  %v1283_v58 = vpop.permute.xlu0 %1282  ;;  %v2009_v62 = vor.u32 %v2008_v48, %v2005_v47  ;;  %v6644_v47 = vld [vmem:[%s7411_s17 + $0x44] sm:$0xe]  ;;  %v6643_v48 = vld [vmem:[%s7411_s17 + $0x40] sm:$0xe] }
 0x154   : > { %1300 = vst.msk [vmem:[#allocation2 + $0xc] sm:$0x7] %vm9344_vm0, %v1285_v57  ;;  %1299 = vst.msk [vmem:[#allocation2 + $0x8] sm:$0x7] %vm9344_vm0, %v1283_v58  ;;  %v2000_v57 = vor.u32 %v1999_v41, %v1996_v40  ;;  %v1991_v58 = vor.u32 %v1990_v43, %v1987_v42 }
 0x155   : > { %1902 = vrot.lane.b32.xlu1 %v6620_v53, %s7355_s21  ;;  %1900 = vrot.lane.b32.xlu0 %v6619_v54, %s7355_s21  ;;  %v2051_v53 = vshrl.u32 %v6637_v38, 16  ;;  %v2054_v54 = vshll.u32 %v6637_v38, 16 }
 0x156   : > { %v2001_v9 = vrot.slane %v2000_v57, 4  ;;  %v1992_v10 = vrot.slane %v1991_v58, 4 }
 0x157   : > { %v1289_v63 = vpop.permute.xlu1 %1288  ;;  %v1287_v0 = vpop.permute.xlu0 %1286  ;;  %v2053_v3 = vrot.slane %v2051_v53, 4  ;;  %v2056_v4 = vrot.slane %v2054_v54, 5  ;;  %v6646_v53 = vld [vmem:[%s7411_s17 + $0x4c] sm:$0xe]  ;;  %v6645_v54 = vld [vmem:[%s7411_s17 + $0x48] sm:$0xe] }
 0x158   : > { %1302 = vst.msk [vmem:[#allocation2 + $0x14] sm:$0x7] %vm9344_vm0, %v1289_v63  ;;  %1301 = vst.msk [vmem:[#allocation2 + $0x10] sm:$0x7] %vm9344_vm0, %v1287_v0  ;;  %vm9346_vm0 = vcmask 682624   ;;  %v6652_v57 = vrot.slane %v6646_v53, 9 }
 0x159   : > { %1906 = vrot.lane.b32.xlu1 %v6622_v59, %s7355_s21  ;;  %1904 = vrot.lane.b32.xlu0 %v6621_v60, %s7355_s21  ;;  %v6640_v59 = vld [vmem:[%s7411_s17 + $0x6c] sm:$0xf]  ;;  %v6639_v60 = vld [vmem:[%s7411_s17 + $0x68] sm:$0xf]  ;;  %v2057_v18 = vor.u32 %v2056_v4, %v2053_v3  ;;  %v6651_v58 = vrot.slane %v6645_v54, 9 }
 0x15a   : > { %v2069_v7 = vshrl.u32 %v6639_v60, 16  ;;  %v2072_v8 = vshll.u32 %v6639_v60, 16  ;;  %v6647_v60 = vld [vmem:[%s7411_s17 + $0x50] sm:$0xe] }
 0x15b   : > { %v1330_v5 = vpop.permute.xlu1 %1329  ;;  %v1328_v6 = vpop.permute.xlu0 %1327  ;;  %v2058_v30 = vrot.slane %v2057_v18, 4  ;;  %v6673_v18 = vld [vmem:[%s7411_s17 + $0x4] sm:$0xf] }
 0x15c   : > { %1347 = vst.msk [vmem:[#allocation2 + $0x4] sm:$0x7] %vm9345_vm14, %v1330_v5  ;;  %1346 = vst.msk [vmem:[#allocation2] sm:$0x7] %vm9345_vm14, %v1328_v6  ;;  %v2078_v5 = vshrl.u32 %v6640_v59, 16  ;;  %v2081_v6 = vshll.u32 %v6640_v59, 16 }
 0x15d   : > { %1910 = vrot.lane.b32.xlu1 %v6624_v1, %s7355_s21  ;;  %1908 = vrot.lane.b32.xlu0 %v6623_v2, %s7355_s21  ;;  %v2062_v1 = vrot.slane %v2060_v51, 4  ;;  %v2065_v2 = vrot.slane %v2063_v52, 5  ;;  %v2071_v21 = vrot.slane %v2069_v7, 4  ;;  %v2074_v22 = vrot.slane %v2072_v8, 5  ;;  %v6648_v59 = vld [vmem:[%s7411_s17 + $0x54] sm:$0xe] }
 0x15e   : > { %v2080_v19 = vrot.slane %v2078_v5, 4  ;;  %v2083_v20 = vrot.slane %v2081_v6, 5  ;;  %v6650_v51 = vrot.slane %v6644_v47, 9  ;;  %v6649_v52 = vrot.slane %v6643_v48, 9  ;;  %v6658_v7 = vld [vmem:[%s7411_s17 + $0x6c] sm:$0xe] }
 0x15f   : > { %v1334_v15 = vpop.permute.xlu1 %1333  ;;  %v1332_v16 = vpop.permute.xlu0 %1331  ;;  %v2066_v17 = vor.u32 %v2065_v2, %v2062_v1  ;;  %v2075_v32 = vor.u32 %v2074_v22, %v2071_v21  ;;  %v6656_v1 = vld [vmem:[%s7411_s17 + $0x64] sm:$0xe]  ;;  %v6655_v2 = vld [vmem:[%s7411_s17 + $0x60] sm:$0xe]  ;;  %v6657_v8 = vld [vmem:[%s7411_s17 + $0x68] sm:$0xe] }
 0x160   : > { %1349 = vst.msk [vmem:[#allocation2 + $0xc] sm:$0x7] %vm9345_vm14, %v1334_v15  ;;  %1348 = vst.msk [vmem:[#allocation2 + $0x8] sm:$0x7] %vm9345_vm14, %v1332_v16  ;;  %v2019_v15 = vrot.slane %v2018_v61, 4  ;;  %v2010_v16 = vrot.slane %v2009_v62, 4  ;;  %v2084_v31 = vor.u32 %v2083_v20, %v2080_v19 }
 0x161   : > { %1938 = vrot.lane.b32.xlu1 %v6626_v11, %s7356_s22  ;;  %1936 = vrot.lane.b32.xlu0 %v6625_v12, %s7356_s22  ;;  %v6642_v11 = vld [vmem:[%s7411_s17 + $0x74] sm:$0xf]  ;;  %v6641_v12 = vld [vmem:[%s7411_s17 + $0x70] sm:$0xf]  ;;  %v2067_v29 = vrot.slane %v2066_v17, 4  ;;  %v2076_v40 = vrot.slane %v2075_v32, 4 }
 0x162   : > { %v2099_v24 = vshll.u32 %v6642_v11, 16  ;;  %v2087_v25 = vshrl.u32 %v6641_v12, 16  ;;  %v2090_v26 = vshll.u32 %v6641_v12, 16  ;;  %v6662_v5 = vrot.slane %v6656_v1, 9  ;;  %v6674_v17 = vld [vmem:[%s7411_s17 + $0x8] sm:$0xf] }
 0x163   : > { %v1338_v33 = vpop.permute.xlu1 %1337  ;;  %v1336_v34 = vpop.permute.xlu0 %1335  ;;  %v6661_v6 = vrot.slane %v6655_v2, 9  ;;  %v6663_v12 = vrot.slane %v6657_v8, 9  ;;  %v6677_v32 = vld [vmem:[%s7411_s17 + $0x14] sm:$0xf] }
 0x164   : > { %1351 = vst.msk [vmem:[#allocation2 + $0x14] sm:$0x7] %vm9345_vm14, %v1338_v33  ;;  %1350 = vst.msk [vmem:[#allocation2 + $0x10] sm:$0x7] %vm9345_vm14, %v1336_v34  ;;  %vm9347_vm14 = vcmask 715424   ;;  %v2101_v34 = vrot.slane %v2099_v24, 5 }
 0x165   : > { %1942 = vrot.lane.b32.xlu1 %v6628_v23, %s7356_s22  ;;  %1940 = vrot.lane.b32.xlu0 %v6627_v28, %s7356_s22  ;;  %v2096_v23 = vshrl.u32 %v6642_v11, 16  ;;  %v2089_v35 = vrot.slane %v2087_v25, 4  ;;  %v2092_v36 = vrot.slane %v2090_v26, 5  ;;  %v6664_v11 = vrot.slane %v6658_v7, 9  ;;  %v6668_v26 = vld [vmem:[%s7411_s17 + $0x28] sm:$0x7] }
 0x166   : > { %v2279_v24 = vshll.u32 %v6674_v17, 16  ;;  %v2267_v25 = vshrl.u32 %v6673_v18, 16  ;;  %v2303_v47 = vshrl.u32 %v6677_v32, 16  ;;  %v2306_v48 = vshll.u32 %v6677_v32, 16 }
 0x167   : > { %v1368_v49 = vpop.permute.xlu1 %1367  ;;  %v1366_v50 = vpop.permute.xlu0 %1365  ;;  %v2098_v33 = vrot.slane %v2096_v23, 4  ;;  %v2093_v42 = vor.u32 %v2092_v36, %v2089_v35  ;;  %v2276_v23 = vshrl.u32 %v6674_v17, 16 }
 0x168   : > { %1385 = vst.msk [vmem:[#allocation2 + $0x4] sm:$0x7] %vm9346_vm0, %v1368_v49  ;;  %1384 = vst.msk [vmem:[#allocation2] sm:$0x7] %vm9346_vm0, %v1366_v50  ;;  %v2281_v36 = vrot.slane %v2279_v24, 5  ;;  %v2308_v1 = vrot.slane %v2306_v48, 5 }
 0x169   : > { %1946 = vrot.lane.b32.xlu1 %v6630_v39, %s7356_s22  ;;  %1944 = vrot.lane.b32.xlu0 %v6629_v44, %s7356_s22  ;;  %v2085_v39 = vrot.slane %v2084_v31, 4  ;;  %v2102_v41 = vor.u32 %v2101_v34, %v2098_v33  ;;  %v2094_v46 = vrot.slane %v2093_v42, 4  ;;  %v6678_v31 = vld [vmem:[%s7411_s17 + $0x18] sm:$0xf]  ;;  %v2278_v35 = vrot.slane %v2276_v23, 4 }
 0x16b   : > { %v1372_v63 = vpop.permute.xlu1 %1371  ;;  %v1370_v0 = vpop.permute.xlu0 %1369  ;;  %v2103_v45 = vrot.slane %v2102_v41, 4  ;;  %v2282_v54 = vor.u32 %v2281_v36, %v2278_v35 }
 0x16c   : > { %1387 = vst.msk [vmem:[#allocation2 + $0xc] sm:$0x7] %vm9346_vm0, %v1372_v63  ;;  %1386 = vst.msk [vmem:[#allocation2 + $0x8] sm:$0x7] %vm9346_vm0, %v1370_v0  ;;  %v6654_v63 = vrot.slane %v6648_v59, 9  ;;  %v6653_v0 = vrot.slane %v6647_v60, 9 }
 0x16d   : > { %2022 = vrot.lane.b32.xlu1 %v1983_v55, %s7357_s23  ;;  %2020 = vrot.lane.b32.xlu0 %v1974_v56, %s7357_s23  ;;  %v6672_v59 = vld [vmem:[%s7411_s17 + $0x38] sm:$0x7] }
 0x16f   : > { %v1376_v13 = vpop.permute.xlu1 %1375  ;;  %v1374_v14 = vpop.permute.xlu0 %1373 }
 0x170   : > { %1389 = vst.msk [vmem:[#allocation2 + $0x14] sm:$0x7] %vm9346_vm0, %v1376_v13  ;;  %1388 = vst.msk [vmem:[#allocation2 + $0x10] sm:$0x7] %vm9346_vm0, %v1374_v14  ;;  %vm9348_vm0 = vcmask 748224  }
 0x171   : > { %2026 = vrot.lane.b32.xlu1 %v2001_v9, %s7357_s23  ;;  %2024 = vrot.lane.b32.xlu0 %v1992_v10, %s7357_s23  ;;  %v6660_v13 = vld [vmem:[%s7411_s17 + $0x74] sm:$0xe]  ;;  %v6659_v14 = vld [vmem:[%s7411_s17 + $0x70] sm:$0xe] }
 0x172   : > { %v6666_v19 = vrot.slane %v6660_v13, 9  ;;  %v6665_v20 = vrot.slane %v6659_v14, 9  ;;  %v6682_v13 = vld [vmem:[%s7411_s17 + $0x30] sm:$0xf]  ;;  %v6681_v14 = vld [vmem:[%s7411_s17 + $0x2c] sm:$0xf] }
 0x173   : > { %v1406_v27 = vpop.permute.xlu1 %1405  ;;  %v1404_v28 = vpop.permute.xlu0 %1403  ;;  %v2378_v24 = vshrl.u32 %v6682_v13, 16 }
 0x174   : > { %1423 = vst.msk [vmem:[#allocation2 + $0x4] sm:$0x7] %vm9347_vm14, %v1406_v27  ;;  %1422 = vst.msk [vmem:[#allocation2] sm:$0x7] %vm9347_vm14, %v1404_v28  ;;  %v2270_v27 = vshll.u32 %v6673_v18, 16 }
 0x175   : > { %2030 = vrot.lane.b32.xlu1 %v2019_v15, %s7357_s23  ;;  %2028 = vrot.lane.b32.xlu0 %v2010_v16, %s7357_s23  ;;  %v6676_v28 = vld [vmem:[%s7411_s17 + $0x10] sm:$0xf] }
 0x176   : > { %v2297_v41 = vshll.u32 %v6676_v28, 16 }
 0x177   : > { %v1410_v37 = vpop.permute.xlu1 %1409  ;;  %v1408_v38 = vpop.permute.xlu0 %1407 }
 0x178   : > { %1425 = vst.msk [vmem:[#allocation2 + $0xc] sm:$0x7] %vm9347_vm14, %v1410_v37  ;;  %1424 = vst.msk [vmem:[#allocation2 + $0x8] sm:$0x7] %vm9347_vm14, %v1408_v38  ;;  %v2269_v37 = vrot.slane %v2267_v25, 4  ;;  %v2381_v25 = vshll.u32 %v6682_v13, 16 }
 0x179   : > { %2106 = vrot.lane.b32.xlu1 %v2067_v29, %s7358_s24  ;;  %2104 = vrot.lane.b32.xlu0 %v2058_v30, %s7358_s24  ;;  %v6675_v29 = vld [vmem:[%s7411_s17 + $0xc] sm:$0xf]  ;;  %v6667_v30 = vld [vmem:[%s7411_s17 + $0x24] sm:$0x7] }
 0x17a   : > { %v6670_v38 = vld [vmem:[%s7411_s17 + $0x30] sm:$0x7]  ;;  %v2285_v42 = vshrl.u32 %v6675_v29, 16 }
 0x17b   : > { %v1414_v43 = vpop.permute.xlu1 %1413  ;;  %v1412_v44 = vpop.permute.xlu0 %1411 }
 0x17c   : > { %1427 = vst.msk [vmem:[#allocation2 + $0x14] sm:$0x7] %vm9347_vm14, %v1414_v43  ;;  %1426 = vst.msk [vmem:[#allocation2 + $0x10] sm:$0x7] %vm9347_vm14, %v1412_v44  ;;  %vm9349_vm14 = vcmask 781024   ;;  %v2288_v44 = vshll.u32 %v6675_v29, 16 }
 0x17d   : > { %2110 = vrot.lane.b32.xlu1 %v2085_v39, %s7358_s24  ;;  %2108 = vrot.lane.b32.xlu0 %v2076_v40, %s7358_s24  ;;  %v2272_v39 = vrot.slane %v2270_v27, 5  ;;  %v2294_v40 = vshrl.u32 %v6676_v28, 16  ;;  %v6669_v43 = vld [vmem:[%s7411_s17 + $0x2c] sm:$0x7]  ;;  %v2372_v27 = vshll.u32 %v6681_v14, 16 }
 0x17e   : > { %v2290_v60 = vrot.slane %v2288_v44, 5 }
 0x17f   : > { %v1491_v49 = vpop.permute.xlu1 %1490  ;;  %v1489_v50 = vpop.permute.xlu0 %1488 }
 0x180   : > { %1508 = vst.msk [vmem:[#allocation2 + $0x4] sm:$0x7] %vm9348_vm0, %v1491_v49  ;;  %1507 = vst.msk [vmem:[#allocation2] sm:$0x7] %vm9348_vm0, %v1489_v50  ;;  %v6680_v49 = vld [vmem:[%s7411_s17 + $0x28] sm:$0xf] }
 0x181   : > { %2114 = vrot.lane.b32.xlu1 %v2103_v45, %s7358_s24  ;;  %2112 = vrot.lane.b32.xlu0 %v2094_v46, %s7358_s24  ;;  %v2312_v45 = vshrl.u32 %v6678_v31, 16  ;;  %v2315_v46 = vshll.u32 %v6678_v31, 16  ;;  %v6679_v50 = vld [vmem:[%s7411_s17 + $0x24] sm:$0xf]  ;;  %v2360_v2 = vshrl.u32 %v6680_v49, 16 }
 0x182   : > { %v2354_v8 = vshll.u32 %v6679_v50, 16  ;;  %v6683_v31 = vld [vmem:[%s7411_s17 + $0x34] sm:$0xf] }
 0x183   : > { %v1495_v55 = vpop.permute.xlu1 %1494  ;;  %v1493_v56 = vpop.permute.xlu0 %1492  ;;  %v2387_v44 = vshrl.u32 %v6683_v31, 16 }
 0x184   : > { %1510 = vst.msk [vmem:[#allocation2 + $0xc] sm:$0x7] %vm9348_vm0, %v1495_v55  ;;  %1509 = vst.msk [vmem:[#allocation2 + $0x8] sm:$0x7] %vm9348_vm0, %v1493_v56  ;;  %v2273_v55 = vor.u32 %v2272_v39, %v2269_v37  ;;  %v2296_v56 = vrot.slane %v2294_v40, 4  ;;  %v2356_v23 = vrot.slane %v2354_v8, 5 }
 0x185   : > { %2154 = vrot.lane.b32.xlu1 %v6650_v51, %s7359_s25  ;;  %2152 = vrot.lane.b32.xlu0 %v6649_v52, %s7359_s25  ;;  %v2383_v39 = vrot.slane %v2381_v25, 5  ;;  %v6688_v8 = vld [vmem:[%s7411_s17 + $0x10] sm:$0xe] }
 0x187   : > { %v1499_v61 = vpop.permute.xlu1 %1498  ;;  %v1497_v62 = vpop.permute.xlu0 %1496 }
 0x188   : > { %1512 = vst.msk [vmem:[#allocation2 + $0x14] sm:$0x7] %vm9348_vm0, %v1499_v61  ;;  %1511 = vst.msk [vmem:[#allocation2 + $0x10] sm:$0x7] %vm9348_vm0, %v1497_v62  ;;  %vm1640_vm0 = vcmask 813824   ;;  %v2314_v61 = vrot.slane %v2312_v45, 4 }
 0x189   : > { %2158 = vrot.lane.b32.xlu1 %v6652_v57, %s7359_s25  ;;  %2156 = vrot.lane.b32.xlu0 %v6651_v58, %s7359_s25  ;;  %v2299_v57 = vrot.slane %v2297_v41, 5  ;;  %v2287_v58 = vrot.slane %v2285_v42, 4  ;;  %v2317_v62 = vrot.slane %v2315_v46, 5  ;;  %v2374_v41 = vrot.slane %v2372_v27, 5  ;;  %v6699_v27 = vld [vmem:[%s7411_s17 + $0x2c] sm:$0xe] }
 0x18a   : > { %v2390_v45 = vshll.u32 %v6683_v31, 16  ;;  %v6705_v31 = vrot.slane %v6699_v27, 9 }
 0x18b   : > { %v1576_v3 = vpop.permute.xlu1 %1575  ;;  %v1574_v4 = vpop.permute.xlu0 %1573 }
 0x18c   : > { %1593 = vst.msk [vmem:[#allocation2 + $0x4] sm:$0x7] %vm9349_vm14, %v1576_v3  ;;  %1592 = vst.msk [vmem:[#allocation2] sm:$0x7] %vm9349_vm14, %v1574_v4  ;;  %v2363_v3 = vshll.u32 %v6680_v49, 16  ;;  %v2351_v4 = vshrl.u32 %v6679_v50, 16 }
 0x18d   : > { %2162 = vrot.lane.b32.xlu1 %v6654_v63, %s7359_s25  ;;  %2160 = vrot.lane.b32.xlu0 %v6653_v0, %s7359_s25  ;;  %v2305_v63 = vrot.slane %v2303_v47, 4  ;;  %v6671_v0 = vld [vmem:[%s7411_s17 + $0x34] sm:$0x7] }
 0x18e   : > { %v2353_v17 = vrot.slane %v2351_v4, 4 }
 0x18f   : > { %v1580_v9 = vpop.permute.xlu1 %1579  ;;  %v1578_v10 = vpop.permute.xlu0 %1577 }
 0x190   : > { %1595 = vst.msk [vmem:[#allocation2 + $0xc] sm:$0x7] %vm9349_vm14, %v1580_v9  ;;  %1594 = vst.msk [vmem:[#allocation2 + $0x8] sm:$0x7] %vm9349_vm14, %v1578_v10  ;;  %v2283_v9 = vrot.slane %v2282_v54, 4  ;;  %v2274_v10 = vrot.slane %v2273_v55, 4  ;;  %v2357_v37 = vor.u32 %v2356_v23, %v2353_v17 }
 0x191   : > { %2202 = vrot.lane.b32.xlu1 %v6662_v5, %s7360_s26  ;;  %2200 = vrot.lane.b32.xlu0 %v6661_v6, %s7360_s26  ;;  %v2389_v54 = vrot.slane %v2387_v44, 4  ;;  %v2392_v55 = vrot.slane %v2390_v45, 5 }
 0x192   : > { %v2358_v49 = vrot.slane %v2357_v37, 4 }
 0x193   : > { %v1584_v15 = vpop.permute.xlu1 %1583  ;;  %v1582_v16 = vpop.permute.xlu0 %1581 }
 0x194   : > { %1597 = vst.msk [vmem:[#allocation2 + $0x14] sm:$0x7] %vm9349_vm14, %v1584_v15  ;;  %1596 = vst.msk [vmem:[#allocation2 + $0x10] sm:$0x7] %vm9349_vm14, %v1582_v16  ;;  %vm6156_vm14 = vcmask 818176   ;;  %v2362_v15 = vrot.slane %v2360_v2, 4 }
 0x195   : > { %2206 = vrot.lane.b32.xlu1 %v6664_v11, %s7360_s26  ;;  %2204 = vrot.lane.b32.xlu0 %v6663_v12, %s7360_s26  ;;  %v2300_v11 = vor.u32 %v2299_v57, %v2296_v56  ;;  %v2291_v12 = vor.u32 %v2290_v60, %v2287_v58  ;;  %v2365_v16 = vrot.slane %v2363_v3, 5  ;;  %v6686_v2 = vld [vmem:[%s7411_s17 + $0x8] sm:$0xe]  ;;  %v6685_v3 = vld [vmem:[%s7411_s17 + $0x4] sm:$0xe] }
 0x197   : > { %v1625_v21 = vpop.permute.xlu1 %1624  ;;  %v1623_v22 = vpop.permute.xlu0 %1622  ;;  %v2301_v28 = vrot.slane %v2300_v11, 4  ;;  %v2292_v29 = vrot.slane %v2291_v12, 4  ;;  %v2366_v36 = vor.u32 %v2365_v16, %v2362_v15  ;;  %v6694_v12 = vrot.slane %v6688_v8, 9  ;;  %v6689_v15 = vld [vmem:[%s7411_s17 + $0x14] sm:$0xe] }
 0x198   : > { %1642 = vst.msk [vmem:[#allocation2 + $0x4] sm:$0x7] %vm1640_vm0, %v1625_v21  ;;  %1641 = vst.msk [vmem:[#allocation2] sm:$0x7] %vm1640_vm0, %v1623_v22  ;;  %v2318_v21 = vor.u32 %v2317_v62, %v2314_v61  ;;  %v2309_v22 = vor.u32 %v2308_v1, %v2305_v63  ;;  %v2393_v61 = vor.u32 %v2392_v55, %v2389_v54  ;;  %v6722_v8 = vld [vmem:[%s7411_s17 + $0x68] sm:$0xf] }
 0x199   : > { %2210 = vrot.lane.b32.xlu1 %v6666_v19, %s7360_s26  ;;  %2208 = vrot.lane.b32.xlu0 %v6665_v20, %s7360_s26  ;;  %v2367_v48 = vrot.slane %v2366_v36, 4 }
 0x19a   : > { %v2310_v35 = vrot.slane %v2309_v22, 4  ;;  %v2394_v1 = vrot.slane %v2393_v61, 4 }
 0x19b   : > { %v1629_v33 = vpop.permute.xlu1 %1628  ;;  %v1627_v34 = vpop.permute.xlu0 %1626 }
 0x19c   : > { %1644 = vst.msk [vmem:[#allocation2 + $0xc] sm:$0x7] %vm1640_vm0, %v1629_v33  ;;  %1643 = vst.msk [vmem:[#allocation2 + $0x8] sm:$0x7] %vm1640_vm0, %v1627_v34  ;;  %v2319_v34 = vrot.slane %v2318_v21, 4 }
 0x19d   : > { %2238 = vrot.lane.b32.xlu1 %v6668_v26, %s7361_s27  ;;  %2236 = vrot.lane.b32.xlu0 %v6667_v30, %s7361_s27  ;;  %v2369_v26 = vshrl.u32 %v6681_v14, 16  ;;  %v6684_v30 = vld [vmem:[%s7411_s17 + $0x38] sm:$0xf]  ;;  %v6697_v21 = vld [vmem:[%s7411_s17 + $0x24] sm:$0xe] }
 0x19e   : > { %v2396_v42 = vshrl.u32 %v6684_v30, 16  ;;  %v6690_v14 = vld [vmem:[%s7411_s17 + $0x18] sm:$0xe]  ;;  %v6703_v25 = vrot.slane %v6697_v21, 9 }
 0x19f   : > { %v1633_v51 = vpop.permute.xlu1 %1632  ;;  %v1631_v52 = vpop.permute.xlu0 %1630  ;;  %v7332_v53 = vld [vmem:[#allocation2] sm:$0xff]   ;;  %v2371_v40 = vrot.slane %v2369_v26, 4  ;;  %v6700_v26 = vld [vmem:[%s7411_s17 + $0x30] sm:$0xe] }
 0x1a0   : > { %1646 = vst.msk [vmem:[#allocation2 + $0x14] sm:$0x7] %vm1640_vm0, %v1633_v51  ;;  %1645 = vst.msk [vmem:[#allocation2 + $0x10] sm:$0x7] %vm1640_vm0, %v1631_v52  ;;  %7251 = vmatprep.mubr.msk.bf16.mxu0 %vm6156_vm14, %v7332_v53  ;;  %v2398_v52 = vrot.slane %v2396_v42, 4 }
 0x1a1   : > { %2242 = vrot.lane.b32.xlu1 %v6670_v38, %s7361_s27  ;;  %2240 = vrot.lane.b32.xlu0 %v6669_v43, %s7361_s27  ;;  %v2380_v38 = vrot.slane %v2378_v24, 4  ;;  %v2399_v43 = vshll.u32 %v6684_v30, 16  ;;  %v2375_v51 = vor.u32 %v2374_v41, %v2371_v40  ;;  %v6706_v30 = vrot.slane %v6700_v26, 9 }
 0x1a3   : > { %v1723_v5 = vpop.permute.xlu1 %1722  ;;  %v1721_v6 = vpop.permute.xlu0 %1720  ;;  %v7333_v7 = vld [vmem:[#allocation2 + $0x8] sm:$0xff]   ;;  %v2384_v50 = vor.u32 %v2383_v39, %v2380_v38  ;;  %v2401_v53 = vrot.slane %v2399_v43, 5  ;;  %v6715_v39 = vld [vmem:[%s7411_s17 + $0x44] sm:$0xf] }
 0x1a4   : > { %1739 = vst.msk [vmem:[#allocation2 + $0x1c] sm:$0x7] %vm241_vm1, %v1723_v5  ;;  %1738 = vst.msk [vmem:[#allocation2 + $0x18] sm:$0x7] %vm241_vm1, %v1721_v6  ;;  %7252 = vmatmul.mubr.msk.bf16.vlgmr.msra.gmra.mrb[0].mxu0 %vm6156_vm14, %v7333_v7  ;;  %v6692_v6 = vrot.slane %v6686_v2, 9  ;;  %v6691_v7 = vrot.slane %v6685_v3, 9 }
 0x1a5   : > { %2246 = vrot.lane.b32.xlu1 %v6672_v59, %s7361_s27  ;;  %2244 = vrot.lane.b32.xlu0 %v6671_v0, %s7361_s27  ;;  %v2385_v58 = vrot.slane %v2384_v50, 4  ;;  %v2376_v59 = vrot.slane %v2375_v51, 4  ;;  %v2402_v60 = vor.u32 %v2401_v53, %v2398_v52  ;;  %v6716_v38 = vld [vmem:[%s7411_s17 + $0x48] sm:$0xf]  ;;  %v2567_v44 = vshrl.u32 %v6715_v39, 16 }
 0x1a6   : > { %v2576_v42 = vshrl.u32 %v6716_v38, 16  ;;  %v2579_v43 = vshll.u32 %v6716_v38, 16  ;;  %v2570_v45 = vshll.u32 %v6715_v39, 16  ;;  %v6720_v52 = vld [vmem:[%s7411_s17 + $0x58] sm:$0xf] }
 0x1a7   : > { %v1727_v18 = vpop.permute.xlu1 %1726  ;;  %v1725_v19 = vpop.permute.xlu0 %1724  ;;  %v7334_v20 = vld [vmem:[#allocation2 + $0x10] sm:$0xff]   ;;  %v2403_v0 = vrot.slane %v2402_v60, 4 }
 0x1a8   : > { %1741 = vst.msk [vmem:[#allocation2 + $0x24] sm:$0x7] %vm241_vm1, %v1727_v18  ;;  %1740 = vst.msk [vmem:[#allocation2 + $0x20] sm:$0x7] %vm241_vm1, %v1725_v19  ;;  %7255 = vmatprep.mubr.msk.bf16.mxu0 %vm6156_vm14, %v7334_v20  ;;  %v6696_v18 = vrot.slane %v6690_v14, 9  ;;  %v6695_v19 = vrot.slane %v6689_v15, 9 }
 0x1a9   : > { %2322 = vrot.lane.b32.xlu1 %v2283_v9, %s7362_s28  ;;  %2320 = vrot.lane.b32.xlu0 %v2274_v10, %s7362_s28  ;;  %v6687_v9 = vld [vmem:[%s7411_s17 + $0xc] sm:$0xe]  ;;  %v6698_v20 = vld [vmem:[%s7411_s17 + $0x28] sm:$0xe]  ;;  %v2578_v54 = vrot.slane %v2576_v42, 4  ;;  %v2581_v55 = vrot.slane %v2579_v43, 5 }
 0x1aa   : > { %v6693_v13 = vrot.slane %v6687_v9, 9  ;;  %v6704_v24 = vrot.slane %v6698_v20, 9  ;;  %v6719_v53 = vld [vmem:[%s7411_s17 + $0x54] sm:$0xf]  ;;  %v6721_v9 = vld [vmem:[%s7411_s17 + $0x64] sm:$0xf] }
 0x1ab   : > { %v1731_v32 = vpop.permute.xlu1 %1730  ;;  %v1729_v33 = vpop.permute.xlu0 %1728  ;;  %v2603_v2 = vshrl.u32 %v6719_v53, 16  ;;  %v2606_v3 = vshll.u32 %v6719_v53, 16  ;;  %v6713_v15 = vld [vmem:[%s7411_s17 + $0x74] sm:$0x7] }
 0x1ac   : > { %1743 = vst.msk [vmem:[#allocation2 + $0x2c] sm:$0x7] %vm241_vm1, %v1731_v32  ;;  %1742 = vst.msk [vmem:[#allocation2 + $0x28] sm:$0x7] %vm241_vm1, %v1729_v33  ;;  %v6702_v32 = vld [vmem:[%s7411_s17 + $0x38] sm:$0xe] }
 0x1ad   : > { %2326 = vrot.lane.b32.xlu1 %v2301_v28, %s7362_s28  ;;  %2324 = vrot.lane.b32.xlu0 %v2292_v29, %s7362_s28  ;;  %v6701_v33 = vld [vmem:[%s7411_s17 + $0x34] sm:$0xe]  ;;  %v6708_v36 = vrot.slane %v6702_v32, 9 }
 0x1ae   : > { %v6707_v37 = vrot.slane %v6701_v33, 9 }
 0x1af   : > { %v1807_v46 = vpop.permute.xlu1 %1806  ;;  %v1805_v47 = vpop.permute.xlu0 %1804 }
 0x1b0   : > { %1823 = vst.msk [vmem:[#allocation2 + $0x1c] sm:$0x7] %vm326_vm2, %v1807_v46  ;;  %1822 = vst.msk [vmem:[#allocation2 + $0x18] sm:$0x7] %vm326_vm2, %v1805_v47  ;;  %v6710_v46 = vld [vmem:[%s7411_s17 + $0x68] sm:$0x7] }
 0x1b1   : > { %2330 = vrot.lane.b32.xlu1 %v2319_v34, %s7362_s28  ;;  %2328 = vrot.lane.b32.xlu0 %v2310_v35, %s7362_s28  ;;  %v6709_v47 = vld [vmem:[%s7411_s17 + $0x64] sm:$0x7] }
 0x1b3   : > { %v1811_v56 = vpop.permute.xlu1 %1810  ;;  %v1809_v57 = vpop.permute.xlu0 %1808 }
 0x1b4   : > { %1825 = vst.msk [vmem:[#allocation2 + $0x24] sm:$0x7] %vm326_vm2, %v1811_v56  ;;  %1824 = vst.msk [vmem:[#allocation2 + $0x20] sm:$0x7] %vm326_vm2, %v1809_v57  ;;  %v2569_v56 = vrot.slane %v2567_v44, 4  ;;  %v2572_v57 = vrot.slane %v2570_v45, 5 }
 0x1b5   : > { %2406 = vrot.lane.b32.xlu1 %v2367_v48, %s7363_s29  ;;  %2404 = vrot.lane.b32.xlu0 %v2358_v49, %s7363_s29  ;;  %v6718_v48 = vld [vmem:[%s7411_s17 + $0x50] sm:$0xf]  ;;  %v6717_v49 = vld [vmem:[%s7411_s17 + $0x4c] sm:$0xf] }
 0x1b6   : > { %v2597_v60 = vshll.u32 %v6718_v48, 16  ;;  %v2585_v61 = vshrl.u32 %v6717_v49, 16 }
 0x1b7   : > { %v1815_v62 = vpop.permute.xlu1 %1814  ;;  %v1813_v63 = vpop.permute.xlu0 %1812 }
 0x1b8   : > { %1827 = vst.msk [vmem:[#allocation2 + $0x2c] sm:$0x7] %vm326_vm2, %v1815_v62  ;;  %1826 = vst.msk [vmem:[#allocation2 + $0x28] sm:$0x7] %vm326_vm2, %v1813_v63  ;;  %v2588_v62 = vshll.u32 %v6717_v49, 16 }
 0x1b9   : > { %2410 = vrot.lane.b32.xlu1 %v2385_v58, %s7363_s29  ;;  %2408 = vrot.lane.b32.xlu0 %v2376_v59, %s7363_s29  ;;  %v6712_v58 = vld [vmem:[%s7411_s17 + $0x70] sm:$0x7]  ;;  %v2594_v59 = vshrl.u32 %v6718_v48, 16  ;;  %v6711_v63 = vld [vmem:[%s7411_s17 + $0x6c] sm:$0x7] }
 0x1ba   : > { %v2590_v14 = vrot.slane %v2588_v62, 5 }
 0x1bb   : > { %v1855_v4 = vpop.permute.xlu1 %1854  ;;  %v1853_v5 = vpop.permute.xlu0 %1852 }
 0x1bc   : > { %1871 = vst.msk [vmem:[#allocation2 + $0x1c] sm:$0x7] %vm411_vm3, %v1855_v4  ;;  %1870 = vst.msk [vmem:[#allocation2 + $0x18] sm:$0x7] %vm411_vm3, %v1853_v5 }
 0x1bd   : > { %2414 = vrot.lane.b32.xlu1 %v2403_v0, %s7363_s29  ;;  %2412 = vrot.lane.b32.xlu0 %v2394_v1, %s7363_s29  ;;  %v2612_v0 = vshrl.u32 %v6720_v52, 16  ;;  %v2615_v1 = vshll.u32 %v6720_v52, 16 }
 0x1bf   : > { %v1859_v10 = vpop.permute.xlu1 %1858  ;;  %v1857_v11 = vpop.permute.xlu0 %1856 }
 0x1c0   : > { %1873 = vst.msk [vmem:[#allocation2 + $0x24] sm:$0x7] %vm411_vm3, %v1859_v10  ;;  %1872 = vst.msk [vmem:[#allocation2 + $0x20] sm:$0x7] %vm411_vm3, %v1857_v11  ;;  %v6714_v10 = vld [vmem:[%s7411_s17 + $0x78] sm:$0x7] }
 0x1c1   : > { %2454 = vrot.lane.b32.xlu1 %v6692_v6, %s7364_s30  ;;  %2452 = vrot.lane.b32.xlu0 %v6691_v7, %s7364_s30  ;;  %v2582_v6 = vor.u32 %v2581_v55, %v2578_v54  ;;  %v2573_v7 = vor.u32 %v2572_v57, %v2569_v56  ;;  %v2596_v11 = vrot.slane %v2594_v59, 4 }
 0x1c3   : > { %v1863_v16 = vpop.permute.xlu1 %1862  ;;  %v1861_v17 = vpop.permute.xlu0 %1860  ;;  %v2583_v26 = vrot.slane %v2582_v6, 4  ;;  %v2574_v27 = vrot.slane %v2573_v7, 4 }
 0x1c4   : > { %1875 = vst.msk [vmem:[#allocation2 + $0x2c] sm:$0x7] %vm411_vm3, %v1863_v16  ;;  %1874 = vst.msk [vmem:[#allocation2 + $0x28] sm:$0x7] %vm411_vm3, %v1861_v17  ;;  %v2614_v16 = vrot.slane %v2612_v0, 4  ;;  %v2617_v17 = vrot.slane %v2615_v1, 5 }
 0x1c5   : > { %2458 = vrot.lane.b32.xlu1 %v6694_v12, %s7364_s30  ;;  %2456 = vrot.lane.b32.xlu0 %v6693_v13, %s7364_s30  ;;  %v2599_v12 = vrot.slane %v2597_v60, 5  ;;  %v2587_v13 = vrot.slane %v2585_v61, 4 }
 0x1c6   : > { %v2618_v32 = vor.u32 %v2617_v17, %v2614_v16 }
 0x1c7   : > { %v1903_v22 = vpop.permute.xlu1 %1902  ;;  %v1901_v23 = vpop.permute.xlu0 %1900 }
 0x1c8   : > { %1919 = vst.msk [vmem:[#allocation2 + $0x1c] sm:$0x7] %vm460_vm4, %v1903_v22  ;;  %1918 = vst.msk [vmem:[#allocation2 + $0x18] sm:$0x7] %vm460_vm4, %v1901_v23  ;;  %v2660_v22 = vshrl.u32 %v6722_v8, 16  ;;  %v2663_v23 = vshll.u32 %v6722_v8, 16 }
 0x1c9   : > { %2462 = vrot.lane.b32.xlu1 %v6696_v18, %s7364_s30  ;;  %2460 = vrot.lane.b32.xlu0 %v6695_v19, %s7364_s30  ;;  %v2605_v18 = vrot.slane %v2603_v2, 4  ;;  %v2608_v19 = vrot.slane %v2606_v3, 5 }
 0x1cb   : > { %v1907_v28 = vpop.permute.xlu1 %1906  ;;  %v1905_v29 = vpop.permute.xlu0 %1904  ;;  %v2609_v33 = vor.u32 %v2608_v19, %v2605_v18  ;;  %v6728_v18 = vld [vmem:[%s7411_s17 + $0x48] sm:$0xe]  ;;  %v6727_v19 = vld [vmem:[%s7411_s17 + $0x44] sm:$0xe] }
 0x1cc   : > { %1921 = vst.msk [vmem:[#allocation2 + $0x24] sm:$0x7] %vm460_vm4, %v1907_v28  ;;  %1920 = vst.msk [vmem:[#allocation2 + $0x20] sm:$0x7] %vm460_vm4, %v1905_v29  ;;  %v2600_v28 = vor.u32 %v2599_v12, %v2596_v11  ;;  %v2591_v29 = vor.u32 %v2590_v14, %v2587_v13 }
 0x1cd   : > { %2502 = vrot.lane.b32.xlu1 %v6704_v24, %s7365_s4  ;;  %2500 = vrot.lane.b32.xlu0 %v6703_v25, %s7365_s4  ;;  %v2651_v24 = vshrl.u32 %v6721_v9, 16  ;;  %v2654_v25 = vshll.u32 %v6721_v9, 16 }
 0x1ce   : > { %v2601_v44 = vrot.slane %v2600_v28, 4  ;;  %v2592_v45 = vrot.slane %v2591_v29, 4 }
 0x1cf   : > { %v1911_v34 = vpop.permute.xlu1 %1910  ;;  %v1909_v35 = vpop.permute.xlu0 %1908  ;;  %v2653_v38 = vrot.slane %v2651_v24, 4  ;;  %v2656_v39 = vrot.slane %v2654_v25, 5  ;;  %v6730_v24 = vld [vmem:[%s7411_s17 + $0x50] sm:$0xe]  ;;  %v6729_v25 = vld [vmem:[%s7411_s17 + $0x4c] sm:$0xe] }
 0x1d0   : > { %1923 = vst.msk [vmem:[#allocation2 + $0x2c] sm:$0x7] %vm460_vm4, %v1911_v34  ;;  %1922 = vst.msk [vmem:[#allocation2 + $0x28] sm:$0x7] %vm460_vm4, %v1909_v35  ;;  %v6736_v28 = vrot.slane %v6730_v24, 9  ;;  %v6735_v29 = vrot.slane %v6729_v25, 9 }
 0x1d1   : > { %2506 = vrot.lane.b32.xlu1 %v6706_v30, %s7365_s4  ;;  %2504 = vrot.lane.b32.xlu0 %v6705_v31, %s7365_s4  ;;  %v6724_v30 = vld [vmem:[%s7411_s17 + $0x70] sm:$0xf]  ;;  %v6723_v31 = vld [vmem:[%s7411_s17 + $0x6c] sm:$0xf]  ;;  %v2657_v53 = vor.u32 %v2656_v39, %v2653_v38 }
 0x1d2   : > { %v2669_v42 = vshrl.u32 %v6723_v31, 16  ;;  %v2672_v43 = vshll.u32 %v6723_v31, 16  ;;  %v6731_v31 = vld [vmem:[%s7411_s17 + $0x54] sm:$0xe]  ;;  %v6763_v25 = vld [vmem:[%s7411_s17 + $0x28] sm:$0xf] }
 0x1d3   : > { %v1939_v40 = vpop.permute.xlu1 %1938  ;;  %v1937_v41 = vpop.permute.xlu0 %1936  ;;  %v2658_v1 = vrot.slane %v2657_v53, 4 }
 0x1d4   : > { %1955 = vst.msk [vmem:[#allocation2 + $0x1c] sm:$0x7] %vm498_vm5, %v1939_v40  ;;  %1954 = vst.msk [vmem:[#allocation2 + $0x18] sm:$0x7] %vm498_vm5, %v1937_v41  ;;  %v2678_v40 = vshrl.u32 %v6724_v30, 16  ;;  %v2681_v41 = vshll.u32 %v6724_v30, 16 }
 0x1d5   : > { %2510 = vrot.lane.b32.xlu1 %v6708_v36, %s7365_s4  ;;  %2508 = vrot.lane.b32.xlu0 %v6707_v37, %s7365_s4  ;;  %v2662_v36 = vrot.slane %v2660_v22, 4  ;;  %v2665_v37 = vrot.slane %v2663_v23, 5  ;;  %v2671_v56 = vrot.slane %v2669_v42, 4  ;;  %v2674_v57 = vrot.slane %v2672_v43, 5  ;;  %v6732_v30 = vld [vmem:[%s7411_s17 + $0x58] sm:$0xe] }
 0x1d6   : > { %v2680_v54 = vrot.slane %v2678_v40, 4  ;;  %v2683_v55 = vrot.slane %v2681_v41, 5  ;;  %v6734_v22 = vrot.slane %v6728_v18, 9  ;;  %v6733_v23 = vrot.slane %v6727_v19, 9  ;;  %v6742_v42 = vld [vmem:[%s7411_s17 + $0x70] sm:$0xe] }
 0x1d7   : > { %v1943_v50 = vpop.permute.xlu1 %1942  ;;  %v1941_v51 = vpop.permute.xlu0 %1940  ;;  %v2666_v52 = vor.u32 %v2665_v37, %v2662_v36  ;;  %v2675_v3 = vor.u32 %v2674_v57, %v2671_v56  ;;  %v6740_v36 = vld [vmem:[%s7411_s17 + $0x68] sm:$0xe]  ;;  %v6739_v37 = vld [vmem:[%s7411_s17 + $0x64] sm:$0xe]  ;;  %v6741_v43 = vld [vmem:[%s7411_s17 + $0x6c] sm:$0xe] }
 0x1d8   : > { %1957 = vst.msk [vmem:[#allocation2 + $0x24] sm:$0x7] %vm498_vm5, %v1943_v50  ;;  %1956 = vst.msk [vmem:[#allocation2 + $0x20] sm:$0x7] %vm498_vm5, %v1941_v51  ;;  %v2619_v50 = vrot.slane %v2618_v32, 4  ;;  %v2610_v51 = vrot.slane %v2609_v33, 4  ;;  %v2684_v2 = vor.u32 %v2683_v55, %v2680_v54 }
 0x1d9   : > { %2538 = vrot.lane.b32.xlu1 %v6710_v46, %s7366_s5  ;;  %2536 = vrot.lane.b32.xlu0 %v6709_v47, %s7366_s5  ;;  %v6726_v46 = vld [vmem:[%s7411_s17 + $0x78] sm:$0xf]  ;;  %v6725_v47 = vld [vmem:[%s7411_s17 + $0x74] sm:$0xf]  ;;  %v2667_v0 = vrot.slane %v2666_v52, 4  ;;  %v2676_v11 = vrot.slane %v2675_v3, 4 }
 0x1da   : > { %v2699_v59 = vshll.u32 %v6726_v46, 16  ;;  %v2687_v60 = vshrl.u32 %v6725_v47, 16  ;;  %v2690_v61 = vshll.u32 %v6725_v47, 16  ;;  %v6746_v40 = vrot.slane %v6740_v36, 9  ;;  %v6758_v54 = vld [vmem:[%s7411_s17 + $0xc] sm:$0xf] }
 0x1db   : > { %v1947_v4 = vpop.permute.xlu1 %1946  ;;  %v1945_v5 = vpop.permute.xlu0 %1944  ;;  %v6745_v41 = vrot.slane %v6739_v37, 9  ;;  %v6747_v47 = vrot.slane %v6741_v43, 9  ;;  %v6757_v55 = vld [vmem:[%s7411_s17 + $0x8] sm:$0xf] }
 0x1dc   : > { %1959 = vst.msk [vmem:[#allocation2 + $0x2c] sm:$0x7] %vm498_vm5, %v1947_v4  ;;  %1958 = vst.msk [vmem:[#allocation2 + $0x28] sm:$0x7] %vm498_vm5, %v1945_v5  ;;  %v2701_v5 = vrot.slane %v2699_v59, 5  ;;  %v2689_v6 = vrot.slane %v2687_v60, 4 }
 0x1dd   : > { %2542 = vrot.lane.b32.xlu1 %v6712_v58, %s7366_s5  ;;  %2540 = vrot.lane.b32.xlu0 %v6711_v63, %s7366_s5  ;;  %v2696_v58 = vshrl.u32 %v6726_v46, 16  ;;  %v2692_v7 = vrot.slane %v2690_v61, 5  ;;  %v6748_v46 = vrot.slane %v6742_v42, 9  ;;  %v2879_v59 = vshll.u32 %v6758_v54, 16  ;;  %v6766_v42 = vld [vmem:[%s7411_s17 + $0x34] sm:$0xf] }
 0x1de   : > { %v2867_v60 = vshrl.u32 %v6757_v55, 16  ;;  %v2870_v61 = vshll.u32 %v6757_v55, 16  ;;  %v2978_v55 = vshrl.u32 %v6766_v42, 16 }
 0x1df   : > { %v2023_v20 = vpop.permute.xlu1 %2022  ;;  %v2021_v21 = vpop.permute.xlu0 %2020  ;;  %v2698_v4 = vrot.slane %v2696_v58, 4  ;;  %v2693_v13 = vor.u32 %v2692_v7, %v2689_v6  ;;  %v2876_v58 = vshrl.u32 %v6758_v54, 16  ;;  %v2881_v6 = vrot.slane %v2879_v59, 5 }
 0x1e0   : > { %2039 = vst.msk [vmem:[#allocation2 + $0x1c] sm:$0x7] %vm536_vm6, %v2023_v20  ;;  %2038 = vst.msk [vmem:[#allocation2 + $0x18] sm:$0x7] %vm536_vm6, %v2021_v21  ;;  %v2869_v7 = vrot.slane %v2867_v60, 4 }
 0x1e1   : > { %2546 = vrot.lane.b32.xlu1 %v6714_v10, %s7366_s5  ;;  %2544 = vrot.lane.b32.xlu0 %v6713_v15, %s7366_s5  ;;  %v2685_v10 = vrot.slane %v2684_v2, 4  ;;  %v2702_v12 = vor.u32 %v2701_v5, %v2698_v4  ;;  %v2694_v17 = vrot.slane %v2693_v13, 4  ;;  %v6762_v4 = vld [vmem:[%s7411_s17 + $0x1c] sm:$0xf]  ;;  %v2878_v5 = vrot.slane %v2876_v58, 4 }
 0x1e3   : > { %v2027_v34 = vpop.permute.xlu1 %2026  ;;  %v2025_v35 = vpop.permute.xlu0 %2024  ;;  %v2703_v16 = vrot.slane %v2702_v12, 4 }
 0x1e4   : > { %2041 = vst.msk [vmem:[#allocation2 + $0x24] sm:$0x7] %vm536_vm6, %v2027_v34  ;;  %2040 = vst.msk [vmem:[#allocation2 + $0x20] sm:$0x7] %vm536_vm6, %v2025_v35  ;;  %v6738_v34 = vrot.slane %v6732_v30, 9  ;;  %v6737_v35 = vrot.slane %v6731_v31, 9 }
 0x1e5   : > { %2622 = vrot.lane.b32.xlu1 %v2583_v26, %s7367_s6  ;;  %2620 = vrot.lane.b32.xlu0 %v2574_v27, %s7367_s6  ;;  %v6755_v31 = vld [vmem:[%s7411_s17 + $0x38] sm:$0x7] }
 0x1e7   : > { %v2031_v48 = vpop.permute.xlu1 %2030  ;;  %v2029_v49 = vpop.permute.xlu0 %2028 }
 0x1e8   : > { %2043 = vst.msk [vmem:[#allocation2 + $0x2c] sm:$0x7] %vm536_vm6, %v2031_v48  ;;  %2042 = vst.msk [vmem:[#allocation2 + $0x28] sm:$0x7] %vm536_vm6, %v2029_v49  ;;  %v6744_v48 = vld [vmem:[%s7411_s17 + $0x78] sm:$0xe] }
 0x1e9   : > { %2626 = vrot.lane.b32.xlu1 %v2601_v44, %s7367_s6  ;;  %2624 = vrot.lane.b32.xlu0 %v2592_v45, %s7367_s6  ;;  %v6743_v49 = vld [vmem:[%s7411_s17 + $0x74] sm:$0xe]  ;;  %v6750_v52 = vrot.slane %v6744_v48, 9 }
 0x1ea   : > { %v6749_v53 = vrot.slane %v6743_v49, 9 }
 0x1eb   : > { %v2107_v62 = vpop.permute.xlu1 %2106  ;;  %v2105_v63 = vpop.permute.xlu0 %2104 }
 0x1ec   : > { %2123 = vst.msk [vmem:[#allocation2 + $0x1c] sm:$0x7] %vm621_vm7, %v2107_v62  ;;  %2122 = vst.msk [vmem:[#allocation2 + $0x18] sm:$0x7] %vm621_vm7, %v2105_v63  ;;  %v6752_v62 = vld [vmem:[%s7411_s17 + $0x2c] sm:$0x7] }
 0x1ed   : > { %2630 = vrot.lane.b32.xlu1 %v2619_v50, %s7367_s6  ;;  %2628 = vrot.lane.b32.xlu0 %v2610_v51, %s7367_s6  ;;  %v6751_v63 = vld [vmem:[%s7411_s17 + $0x28] sm:$0x7] }
 0x1ef   : > { %v2111_v8 = vpop.permute.xlu1 %2110  ;;  %v2109_v9 = vpop.permute.xlu0 %2108 }
 0x1f0   : > { %2125 = vst.msk [vmem:[#allocation2 + $0x24] sm:$0x7] %vm621_vm7, %v2111_v8  ;;  %2124 = vst.msk [vmem:[#allocation2 + $0x20] sm:$0x7] %vm621_vm7, %v2109_v9  ;;  %v2872_v8 = vrot.slane %v2870_v61, 5 }
 0x1f1   : > { %2706 = vrot.lane.b32.xlu1 %v2667_v0, %s7368_s7  ;;  %2704 = vrot.lane.b32.xlu0 %v2658_v1, %s7368_s7  ;;  %v6760_v0 = vld [vmem:[%s7411_s17 + $0x14] sm:$0xf]  ;;  %v6759_v1 = vld [vmem:[%s7411_s17 + $0x10] sm:$0xf] }
 0x1f2   : > { %v6761_v9 = vld [vmem:[%s7411_s17 + $0x18] sm:$0xf]  ;;  %v2885_v12 = vshrl.u32 %v6759_v1, 16  ;;  %v2888_v13 = vshll.u32 %v6759_v1, 16  ;;  %v2873_v24 = vor.u32 %v2872_v8, %v2869_v7 }
 0x1f3   : > { %v2115_v14 = vpop.permute.xlu1 %2114  ;;  %v2113_v15 = vpop.permute.xlu0 %2112 }
 0x1f4   : > { %2127 = vst.msk [vmem:[#allocation2 + $0x2c] sm:$0x7] %vm621_vm7, %v2115_v14  ;;  %2126 = vst.msk [vmem:[#allocation2 + $0x28] sm:$0x7] %vm621_vm7, %v2113_v15  ;;  %v6754_v14 = vld [vmem:[%s7411_s17 + $0x34] sm:$0x7] }
 0x1f5   : > { %2710 = vrot.lane.b32.xlu1 %v2685_v10, %s7368_s7  ;;  %2708 = vrot.lane.b32.xlu0 %v2676_v11, %s7368_s7  ;;  %v2894_v10 = vshrl.u32 %v6760_v0, 16  ;;  %v2897_v11 = vshll.u32 %v6760_v0, 16  ;;  %v6753_v15 = vld [vmem:[%s7411_s17 + $0x30] sm:$0x7]  ;;  %v2890_v30 = vrot.slane %v2888_v13, 5 }
 0x1f7   : > { %v2155_v20 = vpop.permute.xlu1 %2154  ;;  %v2153_v21 = vpop.permute.xlu0 %2152 }
 0x1f8   : > { %2171 = vst.msk [vmem:[#allocation2 + $0x1c] sm:$0x7] %vm706_vm8, %v2155_v20  ;;  %2170 = vst.msk [vmem:[#allocation2 + $0x18] sm:$0x7] %vm706_vm8, %v2153_v21  ;;  %v2903_v20 = vshrl.u32 %v6761_v9, 16  ;;  %v2906_v21 = vshll.u32 %v6761_v9, 16 }
 0x1f9   : > { %2714 = vrot.lane.b32.xlu1 %v2703_v16, %s7368_s7  ;;  %2712 = vrot.lane.b32.xlu0 %v2694_v17, %s7368_s7  ;;  %v2912_v16 = vshrl.u32 %v6762_v4, 16  ;;  %v2915_v17 = vshll.u32 %v6762_v4, 16 }
 0x1fa   : > { %v2905_v37 = vrot.slane %v2903_v20, 4 }
 0x1fb   : > { %v2159_v26 = vpop.permute.xlu1 %2158  ;;  %v2157_v27 = vpop.permute.xlu0 %2156 }
 0x1fc   : > { %2173 = vst.msk [vmem:[#allocation2 + $0x24] sm:$0x7] %vm706_vm8, %v2159_v26  ;;  %2172 = vst.msk [vmem:[#allocation2 + $0x20] sm:$0x7] %vm706_vm8, %v2157_v27  ;;  %v6756_v26 = vld [vmem:[%s7411_s17 + $0x3c] sm:$0x7] }
 0x1fd   : > { %2754 = vrot.lane.b32.xlu1 %v6734_v22, %s7369_s8  ;;  %2752 = vrot.lane.b32.xlu0 %v6733_v23, %s7369_s8  ;;  %v6764_v22 = vld [vmem:[%s7411_s17 + $0x2c] sm:$0xf]  ;;  %v2882_v23 = vor.u32 %v2881_v6, %v2878_v5  ;;  %v2896_v27 = vrot.slane %v2894_v10, 4  ;;  %v2980_v5 = vrot.slane %v2978_v55, 4 }
 0x1ff   : > { %v2163_v32 = vpop.permute.xlu1 %2162  ;;  %v2161_v33 = vpop.permute.xlu0 %2160  ;;  %v2883_v43 = vrot.slane %v2882_v23, 4 }
 0x200   : > { %2175 = vst.msk [vmem:[#allocation2 + $0x2c] sm:$0x7] %vm706_vm8, %v2163_v32  ;;  %2174 = vst.msk [vmem:[#allocation2 + $0x28] sm:$0x7] %vm706_vm8, %v2161_v33  ;;  %v2914_v32 = vrot.slane %v2912_v16, 4  ;;  %v2917_v33 = vrot.slane %v2915_v17, 5 }
 0x201   : > { %2758 = vrot.lane.b32.xlu1 %v6736_v28, %s7369_s8  ;;  %2756 = vrot.lane.b32.xlu0 %v6735_v29, %s7369_s8  ;;  %v2899_v28 = vrot.slane %v2897_v11, 5  ;;  %v2887_v29 = vrot.slane %v2885_v12, 4 }
 0x202   : > { %v2918_v48 = vor.u32 %v2917_v33, %v2914_v32 }
 0x203   : > { %v2203_v38 = vpop.permute.xlu1 %2202  ;;  %v2201_v39 = vpop.permute.xlu0 %2200 }
 0x204   : > { %2219 = vst.msk [vmem:[#allocation2 + $0x1c] sm:$0x7] %vm755_vm9, %v2203_v38  ;;  %2218 = vst.msk [vmem:[#allocation2 + $0x18] sm:$0x7] %vm755_vm9, %v2201_v39  ;;  %v2908_v38 = vrot.slane %v2906_v21, 5  ;;  %v2963_v39 = vshll.u32 %v6764_v22, 16 }
 0x205   : > { %2762 = vrot.lane.b32.xlu1 %v6738_v34, %s7369_s8  ;;  %2760 = vrot.lane.b32.xlu0 %v6737_v35, %s7369_s8  ;;  %v2960_v34 = vshrl.u32 %v6764_v22, 16 }
 0x207   : > { %v2207_v44 = vpop.permute.xlu1 %2206  ;;  %v2205_v45 = vpop.permute.xlu0 %2204  ;;  %v2962_v49 = vrot.slane %v2960_v34, 4  ;;  %v6770_v34 = vld [vmem:[%s7411_s17 + $0xc] sm:$0xe] }
 0x208   : > { %2221 = vst.msk [vmem:[#allocation2 + $0x24] sm:$0x7] %vm755_vm9, %v2207_v44  ;;  %2220 = vst.msk [vmem:[#allocation2 + $0x20] sm:$0x7] %vm755_vm9, %v2205_v45  ;;  %v2874_v44 = vrot.slane %v2873_v24, 4  ;;  %v2900_v45 = vor.u32 %v2899_v28, %v2896_v27 }
 0x209   : > { %2802 = vrot.lane.b32.xlu1 %v6746_v40, %s7370_s9  ;;  %2800 = vrot.lane.b32.xlu0 %v6745_v41, %s7370_s9  ;;  %v2951_v40 = vshrl.u32 %v6763_v25, 16  ;;  %v2954_v41 = vshll.u32 %v6763_v25, 16 }
 0x20a   : > { %v2901_v60 = vrot.slane %v2900_v45, 4 }
 0x20b   : > { %v2211_v50 = vpop.permute.xlu1 %2210  ;;  %v2209_v51 = vpop.permute.xlu0 %2208  ;;  %v2953_v54 = vrot.slane %v2951_v40, 4  ;;  %v6772_v40 = vld [vmem:[%s7411_s17 + $0x14] sm:$0xe] }
 0x20c   : > { %2223 = vst.msk [vmem:[#allocation2 + $0x2c] sm:$0x7] %vm755_vm9, %v2211_v50  ;;  %2222 = vst.msk [vmem:[#allocation2 + $0x28] sm:$0x7] %vm755_vm9, %v2209_v51 }
 0x20d   : > { %2806 = vrot.lane.b32.xlu1 %v6748_v46, %s7370_s9  ;;  %2804 = vrot.lane.b32.xlu0 %v6747_v47, %s7370_s9  ;;  %v2891_v46 = vor.u32 %v2890_v30, %v2887_v29  ;;  %v6765_v47 = vld [vmem:[%s7411_s17 + $0x30] sm:$0xf] }
 0x20e   : > { %v2969_v58 = vshrl.u32 %v6765_v47, 16  ;;  %v2972_v59 = vshll.u32 %v6765_v47, 16  ;;  %v6773_v47 = vld [vmem:[%s7411_s17 + $0x18] sm:$0xe] }
 0x20f   : > { %v2239_v56 = vpop.permute.xlu1 %2238  ;;  %v2237_v57 = vpop.permute.xlu0 %2236  ;;  %v2892_v61 = vrot.slane %v2891_v46, 4  ;;  %v6774_v46 = vld [vmem:[%s7411_s17 + $0x1c] sm:$0xe] }
 0x210   : > { %2255 = vst.msk [vmem:[#allocation2 + $0x1c] sm:$0x7] %vm793_vm10, %v2239_v56  ;;  %2254 = vst.msk [vmem:[#allocation2 + $0x18] sm:$0x7] %vm793_vm10, %v2237_v57  ;;  %v2956_v56 = vrot.slane %v2954_v41, 5  ;;  %v2981_v57 = vshll.u32 %v6766_v42, 16 }
 0x211   : > { %2810 = vrot.lane.b32.xlu1 %v6750_v52, %s7370_s9  ;;  %2808 = vrot.lane.b32.xlu0 %v6749_v53, %s7370_s9  ;;  %v2909_v52 = vor.u32 %v2908_v38, %v2905_v37  ;;  %v2965_v53 = vrot.slane %v2963_v39, 5  ;;  %v2971_v8 = vrot.slane %v2969_v58, 4  ;;  %v2974_v9 = vrot.slane %v2972_v59, 5  ;;  %v6771_v41 = vld [vmem:[%s7411_s17 + $0x10] sm:$0xe] }
 0x212   : > { %v2957_v6 = vor.u32 %v2956_v56, %v2953_v54  ;;  %v2983_v7 = vrot.slane %v2981_v57, 5  ;;  %v6776_v38 = vrot.slane %v6770_v34, 9  ;;  %v6777_v45 = vrot.slane %v6771_v41, 9  ;;  %v6784_v58 = vld [vmem:[%s7411_s17 + $0x34] sm:$0xe] }
 0x213   : > { %v2243_v2 = vpop.permute.xlu1 %2242  ;;  %v2241_v3 = vpop.permute.xlu0 %2240  ;;  %v2966_v4 = vor.u32 %v2965_v53, %v2962_v49  ;;  %v6781_v53 = vld [vmem:[%s7411_s17 + $0x28] sm:$0xe]  ;;  %v6783_v59 = vld [vmem:[%s7411_s17 + $0x30] sm:$0xe] }
 0x214   : > { %2257 = vst.msk [vmem:[#allocation2 + $0x24] sm:$0x7] %vm793_vm10, %v2243_v2  ;;  %2256 = vst.msk [vmem:[#allocation2 + $0x20] sm:$0x7] %vm793_vm10, %v2241_v3  ;;  %v2919_v2 = vrot.slane %v2918_v48, 4  ;;  %v2910_v3 = vrot.slane %v2909_v52, 4 }
 0x215   : > { %2838 = vrot.lane.b32.xlu1 %v6752_v62, %s7371_s10  ;;  %2836 = vrot.lane.b32.xlu0 %v6751_v63, %s7371_s10  ;;  %v6768_v62 = vld [vmem:[%s7411_s17 + $0x3c] sm:$0xf]  ;;  %v6767_v63 = vld [vmem:[%s7411_s17 + $0x38] sm:$0xf]  ;;  %v2967_v16 = vrot.slane %v2966_v4, 4  ;;  %v2958_v17 = vrot.slane %v2957_v6, 4 }
 0x216   : > { %v2996_v10 = vshrl.u32 %v6768_v62, 16  ;;  %v2999_v11 = vshll.u32 %v6768_v62, 16  ;;  %v2987_v12 = vshrl.u32 %v6767_v63, 16  ;;  %v2990_v13 = vshll.u32 %v6767_v63, 16  ;;  %v6782_v52 = vld [vmem:[%s7411_s17 + $0x2c] sm:$0xe] }
 0x217   : > { %v2247_v18 = vpop.permute.xlu1 %2246  ;;  %v2245_v19 = vpop.permute.xlu0 %2244  ;;  %v6788_v56 = vrot.slane %v6782_v52, 9  ;;  %v6787_v57 = vrot.slane %v6781_v53, 9  ;;  %v6793_v63 = vld [vmem:[%s7411_s17 + $0x40] sm:$0x7]  ;;  %v6796_v4 = vld [vmem:[%s7411_s17 + $0x4c] sm:$0x7] }
 0x218   : > { %2259 = vst.msk [vmem:[#allocation2 + $0x2c] sm:$0x7] %vm793_vm10, %v2247_v18  ;;  %2258 = vst.msk [vmem:[#allocation2 + $0x28] sm:$0x7] %vm793_vm10, %v2245_v19  ;;  %v2984_v18 = vor.u32 %v2983_v7, %v2980_v5  ;;  %v2975_v19 = vor.u32 %v2974_v9, %v2971_v8  ;;  %v2998_v20 = vrot.slane %v2996_v10, 4  ;;  %v3001_v21 = vrot.slane %v2999_v11, 5 }
 0x219   : > { %2842 = vrot.lane.b32.xlu1 %v6754_v14, %s7371_s10  ;;  %2840 = vrot.lane.b32.xlu0 %v6753_v15, %s7371_s10  ;;  %v2989_v22 = vrot.slane %v2987_v12, 4  ;;  %v2992_v23 = vrot.slane %v2990_v13, 5  ;;  %v6795_v7 = vld [vmem:[%s7411_s17 + $0x48] sm:$0x7]  ;;  %v6806_v10 = vld [vmem:[%s7411_s17 + $0x44] sm:$0xf] }
 0x21a   : > { %v2976_v27 = vrot.slane %v2975_v19, 4  ;;  %v3002_v28 = vor.u32 %v3001_v21, %v2998_v20  ;;  %v6805_v11 = vld [vmem:[%s7411_s17 + $0x40] sm:$0xf]  ;;  %v6798_v12 = vld [vmem:[%s7411_s17 + $0x54] sm:$0x7] }
 0x21b   : > { %v2323_v35 = vpop.permute.xlu1 %2322  ;;  %v2321_v36 = vpop.permute.xlu0 %2320  ;;  %v2993_v29 = vor.u32 %v2992_v23, %v2989_v22  ;;  %v6797_v19 = vld [vmem:[%s7411_s17 + $0x50] sm:$0x7]  ;;  %v6800_v20 = vld [vmem:[%s7411_s17 + $0x64] sm:$0x7]  ;;  %v6799_v21 = vld [vmem:[%s7411_s17 + $0x60] sm:$0x7] }
 0x21c   : > { %2339 = vst.msk [vmem:[#allocation2 + $0x1c] sm:$0x7] %vm9353_vm11, %v2323_v35  ;;  %2338 = vst.msk [vmem:[#allocation2 + $0x18] sm:$0x7] %vm9353_vm11, %v2321_v36  ;;  %v3003_v32 = vrot.slane %v3002_v28, 4 }
 0x21d   : > { %2846 = vrot.lane.b32.xlu1 %v6756_v26, %s7371_s10  ;;  %2844 = vrot.lane.b32.xlu0 %v6755_v31, %s7371_s10  ;;  %v2985_v26 = vrot.slane %v2984_v18, 4  ;;  %v2994_v33 = vrot.slane %v2993_v29, 4  ;;  %v6769_v35 = vld [vmem:[%s7411_s17 + $0x8] sm:$0xe]  ;;  %v3183_v18 = vshll.u32 %v6805_v11, 16 }
 0x21e   : > { %v6775_v39 = vrot.slane %v6769_v35, 9  ;;  %v6808_v22 = vld [vmem:[%s7411_s17 + $0x4c] sm:$0xf]  ;;  %v6807_v23 = vld [vmem:[%s7411_s17 + $0x48] sm:$0xf] }
 0x21f   : > { %v2327_v50 = vpop.permute.xlu1 %2326  ;;  %v2325_v51 = vpop.permute.xlu0 %2324  ;;  %v3210_v34 = vshll.u32 %v6808_v22, 16  ;;  %v3198_v35 = vshrl.u32 %v6807_v23, 16  ;;  %v6803_v53 = vld [vmem:[%s7411_s17 + $0x70] sm:$0x7] }
 0x220   : > { %2341 = vst.msk [vmem:[#allocation2 + $0x24] sm:$0x7] %vm9353_vm11, %v2327_v50  ;;  %2340 = vst.msk [vmem:[#allocation2 + $0x20] sm:$0x7] %vm9353_vm11, %v2325_v51  ;;  %v6780_v50 = vrot.slane %v6774_v46, 9  ;;  %v6779_v51 = vrot.slane %v6773_v47, 9 }
 0x221   : > { %2922 = vrot.lane.b32.xlu1 %v2883_v43, %s7372_s11  ;;  %2920 = vrot.lane.b32.xlu0 %v2874_v44, %s7372_s11  ;;  %v6778_v44 = vrot.slane %v6772_v40, 9  ;;  %v6812_v46 = vld [vmem:[%s7411_s17 + $0x64] sm:$0xf]  ;;  %v6811_v47 = vld [vmem:[%s7411_s17 + $0x60] sm:$0xf] }
 0x223   : > { %v2331_v0 = vpop.permute.xlu1 %2330  ;;  %v2329_v1 = vpop.permute.xlu0 %2328 }
 0x224   : > { %2343 = vst.msk [vmem:[#allocation2 + $0x2c] sm:$0x7] %vm9353_vm11, %v2331_v0  ;;  %2342 = vst.msk [vmem:[#allocation2 + $0x28] sm:$0x7] %vm9353_vm11, %v2329_v1  ;;  %v6790_v0 = vrot.slane %v6784_v58, 9  ;;  %v6789_v1 = vrot.slane %v6783_v59, 9 }
 0x225   : > { %2926 = vrot.lane.b32.xlu1 %v2901_v60, %s7372_s11  ;;  %2924 = vrot.lane.b32.xlu0 %v2892_v61, %s7372_s11  ;;  %v6794_v60 = vld [vmem:[%s7411_s17 + $0x44] sm:$0x7] }
 0x227   : > { %v2407_v14 = vpop.permute.xlu1 %2406  ;;  %v2405_v15 = vpop.permute.xlu0 %2404 }
 0x228   : > { %2423 = vst.msk [vmem:[#allocation2 + $0x1c] sm:$0x7] %vm9351_vm12, %v2407_v14  ;;  %2422 = vst.msk [vmem:[#allocation2 + $0x18] sm:$0x7] %vm9351_vm12, %v2405_v15  ;;  %v3189_v15 = vshrl.u32 %v6806_v10, 16 }
 0x229   : > { %2930 = vrot.lane.b32.xlu1 %v2919_v2, %s7372_s11  ;;  %2928 = vrot.lane.b32.xlu0 %v2910_v3, %s7372_s11  ;;  %v6786_v2 = vld [vmem:[%s7411_s17 + $0x3c] sm:$0xe]  ;;  %v6785_v3 = vld [vmem:[%s7411_s17 + $0x38] sm:$0xe] }
 0x22a   : > { %v6792_v8 = vrot.slane %v6786_v2, 9  ;;  %v6791_v9 = vrot.slane %v6785_v3, 9  ;;  %v3191_v28 = vrot.slane %v3189_v15, 4 }
 0x22b   : > { %v2411_v24 = vpop.permute.xlu1 %2410  ;;  %v2409_v25 = vpop.permute.xlu0 %2408 }
 0x22c   : > { %2425 = vst.msk [vmem:[#allocation2 + $0x24] sm:$0x7] %vm9351_vm12, %v2411_v24  ;;  %2424 = vst.msk [vmem:[#allocation2 + $0x20] sm:$0x7] %vm9351_vm12, %v2409_v25 }
 0x22d   : > { %3006 = vrot.lane.b32.xlu1 %v2967_v16, %s9354_s14  ;;  %3004 = vrot.lane.b32.xlu0 %v2958_v17, %s9354_s14  ;;  %v3192_v16 = vshll.u32 %v6806_v10, 16  ;;  %v3180_v17 = vshrl.u32 %v6805_v11, 16 }
 0x22f   : > { %v2415_v30 = vpop.permute.xlu1 %2414  ;;  %v2413_v31 = vpop.permute.xlu0 %2412  ;;  %v3194_v29 = vrot.slane %v3192_v16, 5 }
 0x230   : > { %2427 = vst.msk [vmem:[#allocation2 + $0x2c] sm:$0x7] %vm9351_vm12, %v2415_v30  ;;  %2426 = vst.msk [vmem:[#allocation2 + $0x28] sm:$0x7] %vm9351_vm12, %v2413_v31  ;;  %v3182_v30 = vrot.slane %v3180_v17, 4  ;;  %v3185_v31 = vrot.slane %v3183_v18, 5 }
 0x231   : > { %3010 = vrot.lane.b32.xlu1 %v2985_v26, %s9354_s14  ;;  %3008 = vrot.lane.b32.xlu0 %v2976_v27, %s9354_s14  ;;  %v6810_v26 = vld [vmem:[%s7411_s17 + $0x54] sm:$0xf]  ;;  %v6809_v27 = vld [vmem:[%s7411_s17 + $0x50] sm:$0xf] }
 0x232   : > { %v3216_v40 = vshrl.u32 %v6809_v27, 16  ;;  %v3219_v41 = vshll.u32 %v6809_v27, 16 }
 0x233   : > { %v2455_v36 = vpop.permute.xlu1 %2454  ;;  %v2453_v37 = vpop.permute.xlu0 %2452 }
 0x234   : > { %2471 = vst.msk [vmem:[#allocation2 + $0x1c] sm:$0x7] %vm9350_vm13, %v2455_v36  ;;  %2470 = vst.msk [vmem:[#allocation2 + $0x18] sm:$0x7] %vm9350_vm13, %v2453_v37  ;;  %v3201_v36 = vshll.u32 %v6807_v23, 16 }
 0x235   : > { %3014 = vrot.lane.b32.xlu1 %v3003_v32, %s9354_s14  ;;  %3012 = vrot.lane.b32.xlu0 %v2994_v33, %s9354_s14  ;;  %v6802_v32 = vld [vmem:[%s7411_s17 + $0x6c] sm:$0x7]  ;;  %v3207_v33 = vshrl.u32 %v6808_v22, 16  ;;  %v6801_v37 = vld [vmem:[%s7411_s17 + $0x68] sm:$0x7] }
 0x236   : > { %v3203_v52 = vrot.slane %v3201_v36, 5 }
 0x237   : > { %v2459_v42 = vpop.permute.xlu1 %2458  ;;  %v2457_v43 = vpop.permute.xlu0 %2456 }
 0x238   : > { %2473 = vst.msk [vmem:[#allocation2 + $0x24] sm:$0x7] %vm9350_vm13, %v2459_v42  ;;  %2472 = vst.msk [vmem:[#allocation2 + $0x20] sm:$0x7] %vm9350_vm13, %v2457_v43 }
 0x239   : > { %3054 = vrot.lane.b32.xlu1 %v6776_v38, %s7375_s16  ;;  %3052 = vrot.lane.b32.xlu0 %v6775_v39, %s7375_s16  ;;  %v3225_v38 = vshrl.u32 %v6810_v26, 16  ;;  %v3228_v39 = vshll.u32 %v6810_v26, 16 }
 0x23b   : > { %v2463_v48 = vpop.permute.xlu1 %2462  ;;  %v2461_v49 = vpop.permute.xlu0 %2460 }
 0x23c   : > { %2475 = vst.msk [vmem:[#allocation2 + $0x2c] sm:$0x7] %vm9350_vm13, %v2463_v48  ;;  %2474 = vst.msk [vmem:[#allocation2 + $0x28] sm:$0x7] %vm9350_vm13, %v2461_v49  ;;  %vm9355_vm13 = vcmask 26624   ;;  %v3209_v49 = vrot.slane %v3207_v33, 4 }
 0x23d   : > { %3058 = vrot.lane.b32.xlu1 %v6778_v44, %s7375_s16  ;;  %3056 = vrot.lane.b32.xlu0 %v6777_v45, %s7375_s16  ;;  %3132 = vst.msk [vmem:[#allocation2 + $0x34] sm:$0x7] %vm9355_vm13, %v6794_v60  ;;  %vm9356_vm12 = vmmov %vm9355_vm13  ;;  %v3195_v44 = vor.u32 %v3194_v29, %v3191_v28  ;;  %v3186_v45 = vor.u32 %v3185_v31, %v3182_v30  ;;  %v6804_v48 = vld [vmem:[%s7411_s17 + $0x74] sm:$0x7]  ;;  %v3273_v60 = vshrl.u32 %v6812_v46, 16 }
 0x23e   : > { %3131 = vst.msk [vmem:[#allocation2 + $0x30] sm:$0x7] %vm9356_vm12, %v6793_v63  ;;  %vm9357_vm13 = vmmov %vm9356_vm12  ;;  %v3267_v63 = vshll.u32 %v6811_v47, 16 }
 0x23f   : > { %v2503_v54 = vpop.permute.xlu1 %2502  ;;  %v2501_v55 = vpop.permute.xlu0 %2500  ;;  %3134 = vst.msk [vmem:[#allocation2 + $0x3c] sm:$0x7] %vm9357_vm13, %v6796_v4  ;;  %vm9358_vm13 = vmmov %vm9356_vm12  ;;  %v6814_v4 = vld [vmem:[%s7411_s17 + $0x6c] sm:$0xf]  ;;  %v3275_v10 = vrot.slane %v3273_v60, 4 }
 0x240   : > { %2519 = vst.msk [vmem:[#allocation2 + $0x1c] sm:$0x7] %vm9352_vm15, %v2503_v54  ;;  %2518 = vst.msk [vmem:[#allocation2 + $0x18] sm:$0x7] %vm9352_vm15, %v2501_v55  ;;  %v3227_v54 = vrot.slane %v3225_v38, 4  ;;  %v3230_v55 = vrot.slane %v3228_v39, 5 }
 0x241   : > { %3062 = vrot.lane.b32.xlu1 %v6780_v50, %s7375_s16  ;;  %3060 = vrot.lane.b32.xlu0 %v6779_v51, %s7375_s16  ;;  %3133 = vst.msk [vmem:[#allocation2 + $0x38] sm:$0x7] %vm9356_vm12, %v6795_v7  ;;  %3135 = vst.msk [vmem:[#allocation2 + $0x40] sm:$0x7] %vm9356_vm12, %v6797_v19  ;;  %v3212_v50 = vrot.slane %v3210_v34, 5  ;;  %v3200_v51 = vrot.slane %v3198_v35, 4 }
 0x242   : > { %3136 = vst.msk [vmem:[#allocation2 + $0x44] sm:$0x7] %vm9358_vm13, %v6798_v12  ;;  %v3294_v15 = vshll.u32 %v6814_v4, 16 }
 0x243   : > { %v2507_v61 = vpop.permute.xlu1 %2506  ;;  %v2505_v62 = vpop.permute.xlu0 %2504  ;;  %v3213_v2 = vor.u32 %v3212_v50, %v3209_v49  ;;  %v3204_v3 = vor.u32 %v3203_v52, %v3200_v51 }
 0x244   : > { %2521 = vst.msk [vmem:[#allocation2 + $0x24] sm:$0x7] %vm9352_vm15, %v2507_v61  ;;  %2520 = vst.msk [vmem:[#allocation2 + $0x20] sm:$0x7] %vm9352_vm15, %v2505_v62  ;;  %v3276_v61 = vshll.u32 %v6812_v46, 16  ;;  %v3264_v62 = vshrl.u32 %v6811_v47, 16 }
 0x245   : > { %3102 = vrot.lane.b32.xlu1 %v6788_v56, %s7376_s15  ;;  %3100 = vrot.lane.b32.xlu0 %v6787_v57, %s7376_s15  ;;  %v3218_v56 = vrot.slane %v3216_v40, 4  ;;  %v3221_v57 = vrot.slane %v3219_v41, 5  ;;  %v3214_v18 = vrot.slane %v3213_v2, 4  ;;  %v3205_v19 = vrot.slane %v3204_v3, 4 }
 0x246   : > { %v3278_v11 = vrot.slane %v3276_v61, 5  ;;  %v3266_v12 = vrot.slane %v3264_v62, 4  ;;  %v3296_v29 = vrot.slane %v3294_v15, 5  ;;  %v6820_v62 = vld [vmem:[%s7411_s17 + $0x4c] sm:$0xe] }
 0x247   : > { %v2511_v5 = vpop.permute.xlu1 %2510  ;;  %v2509_v6 = vpop.permute.xlu0 %2508  ;;  %v3222_v7 = vor.u32 %v3221_v57, %v3218_v56  ;;  %v6818_v56 = vld [vmem:[%s7411_s17 + $0x44] sm:$0xe]  ;;  %v6817_v57 = vld [vmem:[%s7411_s17 + $0x40] sm:$0xe]  ;;  %v6826_v2 = vrot.slane %v6820_v62, 9 }
 0x248   : > { %2523 = vst.msk [vmem:[#allocation2 + $0x2c] sm:$0x7] %vm9352_vm15, %v2511_v5  ;;  %2522 = vst.msk [vmem:[#allocation2 + $0x28] sm:$0x7] %vm9352_vm15, %v2509_v6  ;;  %vm9359_vm15 = vcmask 518624   ;;  %v3231_v6 = vor.u32 %v3230_v55, %v3227_v54  ;;  %v3279_v26 = vor.u32 %v3278_v11, %v3275_v10  ;;  %v6824_v60 = vrot.slane %v6818_v56, 9 }
 0x249   : > { %3106 = vrot.lane.b32.xlu1 %v6790_v0, %s7376_s15  ;;  %3104 = vrot.lane.b32.xlu0 %v6789_v1, %s7376_s15  ;;  %vm9360_vm11 = vmmov %vm9359_vm15  ;;  %v3196_v0 = vrot.slane %v3195_v44, 4  ;;  %v3187_v1 = vrot.slane %v3186_v45, 4  ;;  %v6813_v5 = vld [vmem:[%s7411_s17 + $0x68] sm:$0xf]  ;;  %v6823_v61 = vrot.slane %v6817_v57, 9 }
 0x24a   : > { %vm9362_vm13 = vmmov %vm9360_vm11  ;;  %v3282_v16 = vshrl.u32 %v6813_v5, 16  ;;  %v3285_v17 = vshll.u32 %v6813_v5, 16  ;;  %v3280_v38 = vrot.slane %v3279_v26, 4  ;;  %v6821_v5 = vld [vmem:[%s7411_s17 + $0x50] sm:$0xe] }
 0x24b   : > { %v2539_v13 = vpop.permute.xlu1 %2538  ;;  %v2537_v14 = vpop.permute.xlu0 %2536  ;;  %vm9363_vm12 = vmmov %vm9360_vm11  ;;  %v6827_v10 = vrot.slane %v6821_v5, 9  ;;  %v6834_v26 = vld [vmem:[%s7411_s17 + $0x18] sm:$0x7] }
 0x24c   : > { %2555 = vst.msk [vmem:[#allocation2 + $0x1c] sm:$0x7] %vm9359_vm15, %v2539_v13  ;;  %vm9361_vm15 = vmmov %vm9360_vm11  ;;  %v3269_v13 = vrot.slane %v3267_v63, 5  ;;  %v3284_v30 = vrot.slane %v3282_v16, 4  ;;  %v3287_v31 = vrot.slane %v3285_v17, 5 }
 0x24d   : > { %2554 = vst.msk [vmem:[#allocation2 + $0x18] sm:$0x7] %vm9360_vm11, %v2537_v14  ;;  %3110 = vrot.lane.b32.xlu1 %v6792_v8, %s7376_s15  ;;  %3108 = vrot.lane.b32.xlu0 %v6791_v9, %s7376_s15  ;;  %v3291_v14 = vshrl.u32 %v6814_v4, 16  ;;  %v6819_v63 = vld [vmem:[%s7411_s17 + $0x48] sm:$0xe] }
 0x24e   : > { %v3270_v27 = vor.u32 %v3269_v13, %v3266_v12  ;;  %v3288_v41 = vor.u32 %v3287_v31, %v3284_v30  ;;  %v6825_v3 = vrot.slane %v6819_v63, 9  ;;  %v6822_v4 = vld [vmem:[%s7411_s17 + $0x54] sm:$0xe]  ;;  %v6830_v16 = vld [vmem:[%s7411_s17 + $0x8] sm:$0x7] }
 0x24f   : > { %v2543_v24 = vpop.permute.xlu1 %2542  ;;  %v2541_v25 = vpop.permute.xlu0 %2540  ;;  %v3293_v28 = vrot.slane %v3291_v14, 4  ;;  %v6829_v17 = vld [vmem:[%s7411_s17 + $0x4] sm:$0x7]  ;;  %v6840_v62 = vld [vmem:[%s7411_s17 + $0x38] sm:$0x7] }
 0x250   : > { %2557 = vst.msk [vmem:[#allocation2 + $0x24] sm:$0x7] %vm9360_vm11, %v2543_v24  ;;  %vm9364_vm11 = vcmask 551424   ;;  %v3232_v24 = vrot.slane %v3231_v6, 4  ;;  %v3271_v39 = vrot.slane %v3270_v27, 4  ;;  %v3289_v49 = vrot.slane %v3288_v41, 4 }
 0x251   : > { %2556 = vst.msk [vmem:[#allocation2 + $0x20] sm:$0x7] %vm9361_vm15, %v2541_v25  ;;  %3151 = vrot.lane.b32.xlu1 %v6800_v20, %s7352_s18  ;;  %3149 = vrot.lane.b32.xlu0 %v6799_v21, %s7352_s18  ;;  %vm9365_vm15 = vmmov %vm9364_vm11  ;;  %v6816_v20 = vld [vmem:[%s7411_s17 + $0x74] sm:$0xf]  ;;  %v6815_v21 = vld [vmem:[%s7411_s17 + $0x70] sm:$0xf]  ;;  %v3297_v40 = vor.u32 %v3296_v29, %v3293_v28 }
 0x252   : > { %v3223_v25 = vrot.slane %v3222_v7, 4  ;;  %v3312_v33 = vshll.u32 %v6816_v20, 16  ;;  %v3300_v34 = vshrl.u32 %v6815_v21, 16  ;;  %v3303_v35 = vshll.u32 %v6815_v21, 16  ;;  %v6831_v21 = vld [vmem:[%s7411_s17 + $0xc] sm:$0x7] }
 0x253   : > { %v2547_v42 = vpop.permute.xlu1 %2546  ;;  %v2545_v43 = vpop.permute.xlu0 %2544  ;;  %v6833_v27 = vld [vmem:[%s7411_s17 + $0x14] sm:$0x7] }
 0x254   : > { %2559 = vst.msk [vmem:[#allocation2 + $0x2c] sm:$0x7] %vm9362_vm13, %v2547_v42  ;;  %vm9366_vm13 = vmmov %vm9364_vm11  ;;  %v3302_v44 = vrot.slane %v3300_v34, 4  ;;  %v3305_v45 = vrot.slane %v3303_v35, 5  ;;  %v6836_v34 = vld [vmem:[%s7411_s17 + $0x28] sm:$0x7] }
 0x255   : > { %2558 = vst.msk [vmem:[#allocation2 + $0x28] sm:$0x7] %vm9363_vm12, %v2545_v43  ;;  %3155 = vrot.lane.b32.xlu1 %v6802_v32, %s7352_s18  ;;  %3153 = vrot.lane.b32.xlu0 %v6801_v37, %s7352_s18  ;;  %vm9367_vm12 = vmmov %vm9364_vm11  ;;  %v3309_v32 = vshrl.u32 %v6816_v20, 16  ;;  %v3314_v43 = vrot.slane %v3312_v33, 5  ;;  %v6832_v20 = vld [vmem:[%s7411_s17 + $0x10] sm:$0x7] }
 0x256   : > { %v3306_v51 = vor.u32 %v3305_v45, %v3302_v44  ;;  %v6835_v35 = vld [vmem:[%s7411_s17 + $0x24] sm:$0x7]  ;;  %v6845_v41 = vld [vmem:[%s7411_s17 + $0x14] sm:$0xf] }
 0x257   : > { %v2623_v58 = vpop.permute.xlu1 %2622  ;;  %v2621_v59 = vpop.permute.xlu0 %2620  ;;  %v3311_v42 = vrot.slane %v3309_v32, 4 }
 0x258   : > { %2639 = vst.msk [vmem:[#allocation2 + $0x1c] sm:$0x7] %vm9364_vm11, %v2623_v58  ;;  %v3307_v55 = vrot.slane %v3306_v51, 4  ;;  %v6837_v51 = vld [vmem:[%s7411_s17 + $0x2c] sm:$0x7] }
 0x259   : > { %2638 = vst.msk [vmem:[#allocation2 + $0x18] sm:$0x7] %vm9365_vm15, %v2621_v59  ;;  %3159 = vrot.lane.b32.xlu1 %v6804_v48, %s7352_s18  ;;  %3157 = vrot.lane.b32.xlu0 %v6803_v53, %s7352_s18  ;;  %vm9368_vm15 = vmmov %vm9364_vm11  ;;  %v3298_v48 = vrot.slane %v3297_v40, 4  ;;  %v3315_v50 = vor.u32 %v3314_v43, %v3311_v42  ;;  %v6846_v40 = vld [vmem:[%s7411_s17 + $0x18] sm:$0xf] }
 0x25b   : > { %v2627_v8 = vpop.permute.xlu1 %2626  ;;  %v2625_v9 = vpop.permute.xlu0 %2624  ;;  %v3316_v54 = vrot.slane %v3315_v50, 4 }
 0x25c   : > { %2641 = vst.msk [vmem:[#allocation2 + $0x24] sm:$0x7] %vm9366_vm13, %v2627_v8  ;;  %vm9369_vm13 = vcmask 584224  }
 0x25d   : > { %2640 = vst.msk [vmem:[#allocation2 + $0x20] sm:$0x7] %vm9367_vm12, %v2625_v9  ;;  %3235 = vrot.lane.b32.xlu1 %v3196_v0, %s7353_s19  ;;  %3233 = vrot.lane.b32.xlu0 %v3187_v1, %s7353_s19  ;;  %vm9370_vm12 = vmmov %vm9369_vm13  ;;  %v6828_v9 = vrot.slane %v6822_v4, 9 }
 0x25f   : > { %v2631_v22 = vpop.permute.xlu1 %2630  ;;  %v2629_v23 = vpop.permute.xlu0 %2628 }
 0x260   : > { %2643 = vst.msk [vmem:[#allocation2 + $0x2c] sm:$0x7] %vm9364_vm11, %v2631_v22  ;;  %vm9371_vm11 = vmmov %vm9370_vm12 }
 0x261   : > { %2642 = vst.msk [vmem:[#allocation2 + $0x28] sm:$0x7] %vm9368_vm15, %v2629_v23  ;;  %3239 = vrot.lane.b32.xlu1 %v3214_v18, %s7353_s19  ;;  %3237 = vrot.lane.b32.xlu0 %v3205_v19, %s7353_s19  ;;  %vm9372_vm15 = vmmov %vm9371_vm11 }
 0x263   : > { %v2707_v36 = vpop.permute.xlu1 %2706  ;;  %v2705_v37 = vpop.permute.xlu0 %2704 }
 0x264   : > { %2723 = vst.msk [vmem:[#allocation2 + $0x1c] sm:$0x7] %vm9369_vm13, %v2707_v36  ;;  %vm9373_vm13 = vmmov %vm9371_vm11  ;;  %v6844_v36 = vld [vmem:[%s7411_s17 + $0x10] sm:$0xf] }
 0x265   : > { %2722 = vst.msk [vmem:[#allocation2 + $0x18] sm:$0x7] %vm9370_vm12, %v2705_v37  ;;  %3243 = vrot.lane.b32.xlu1 %v3232_v24, %s7353_s19  ;;  %3241 = vrot.lane.b32.xlu0 %v3223_v25, %s7353_s19  ;;  %vm9374_vm12 = vmmov %vm9371_vm11  ;;  %v6842_v24 = vld [vmem:[%s7411_s17 + $0x8] sm:$0xf]  ;;  %v6841_v25 = vld [vmem:[%s7411_s17 + $0x4] sm:$0xf] }
 0x266   : > { %v3477_v30 = vshrl.u32 %v6842_v24, 16  ;;  %v3480_v31 = vshll.u32 %v6842_v24, 16  ;;  %v3468_v32 = vshrl.u32 %v6841_v25, 16  ;;  %v3471_v33 = vshll.u32 %v6841_v25, 16  ;;  %v6843_v37 = vld [vmem:[%s7411_s17 + $0xc] sm:$0xf] }
 0x267   : > { %v2711_v46 = vpop.permute.xlu1 %2710  ;;  %v2709_v47 = vpop.permute.xlu0 %2708  ;;  %v3489_v50 = vshll.u32 %v6843_v37, 16 }
 0x268   : > { %2725 = vst.msk [vmem:[#allocation2 + $0x24] sm:$0x7] %vm9371_vm11, %v2711_v46  ;;  %vm9375_vm11 = vcmask 617024   ;;  %v3479_v42 = vrot.slane %v3477_v30, 4  ;;  %v3482_v43 = vrot.slane %v3480_v31, 5  ;;  %v3470_v44 = vrot.slane %v3468_v32, 4 }
 0x269   : > { %2724 = vst.msk [vmem:[#allocation2 + $0x20] sm:$0x7] %vm9372_vm15, %v2709_v47  ;;  %3319 = vrot.lane.b32.xlu1 %v3280_v38, %s7354_s20  ;;  %3317 = vrot.lane.b32.xlu0 %v3271_v39, %s7354_s20  ;;  %vm9376_vm15 = vmmov %vm9375_vm11  ;;  %v3473_v45 = vrot.slane %v3471_v33, 5  ;;  %v6838_v46 = vld [vmem:[%s7411_s17 + $0x30] sm:$0x7]  ;;  %v3495_v47 = vshrl.u32 %v6844_v36, 16 }
 0x26b   : > { %v2715_v52 = vpop.permute.xlu1 %2714  ;;  %v2713_v53 = vpop.permute.xlu0 %2712  ;;  %v3497_v63 = vrot.slane %v3495_v47, 4 }
 0x26c   : > { %2727 = vst.msk [vmem:[#allocation2 + $0x2c] sm:$0x7] %vm9373_vm13, %v2715_v52  ;;  %vm9377_vm13 = vmmov %vm9375_vm11  ;;  %v3513_v52 = vshrl.u32 %v6846_v40, 16 }
 0x26d   : > { %2726 = vst.msk [vmem:[#allocation2 + $0x28] sm:$0x7] %vm9374_vm12, %v2713_v53  ;;  %3323 = vrot.lane.b32.xlu1 %v3298_v48, %s7354_s20  ;;  %3321 = vrot.lane.b32.xlu0 %v3289_v49, %s7354_s20  ;;  %vm9378_vm12 = vmmov %vm9375_vm11  ;;  %v3498_v48 = vshll.u32 %v6844_v36, 16  ;;  %v3486_v49 = vshrl.u32 %v6843_v37, 16  ;;  %v3516_v53 = vshll.u32 %v6846_v40, 16 }
 0x26e   : > { %v3515_v4 = vrot.slane %v3513_v52, 4 }
 0x26f   : > { %v2755_v58 = vpop.permute.xlu1 %2754  ;;  %v2753_v59 = vpop.permute.xlu0 %2752  ;;  %v3518_v5 = vrot.slane %v3516_v53, 5 }
 0x270   : > { %2771 = vst.msk [vmem:[#allocation2 + $0x1c] sm:$0x7] %vm9375_vm11, %v2755_v58  ;;  %v3483_v58 = vor.u32 %v3482_v43, %v3479_v42 }
 0x271   : > { %2770 = vst.msk [vmem:[#allocation2 + $0x18] sm:$0x7] %vm9376_vm15, %v2753_v59  ;;  %3327 = vrot.lane.b32.xlu1 %v3316_v54, %s7354_s20  ;;  %3325 = vrot.lane.b32.xlu0 %v3307_v55, %s7354_s20  ;;  %vm9379_vm15 = vmmov %vm9375_vm11  ;;  %v3504_v54 = vshrl.u32 %v6845_v41, 16  ;;  %v3507_v55 = vshll.u32 %v6845_v41, 16  ;;  %v3474_v59 = vor.u32 %v3473_v45, %v3470_v44  ;;  %v3519_v24 = vor.u32 %v3518_v5, %v3515_v4 }
 0x273   : > { %v2759_v0 = vpop.permute.xlu1 %2758  ;;  %v2757_v1 = vpop.permute.xlu0 %2756  ;;  %v3520_v42 = vrot.slane %v3519_v24, 4 }
 0x274   : > { %2773 = vst.msk [vmem:[#allocation2 + $0x24] sm:$0x7] %vm9377_vm13, %v2759_v0  ;;  %vm9380_vm13 = vcmask 649824   ;;  %v3500_v0 = vrot.slane %v3498_v48, 5 }
 0x275   : > { %2772 = vst.msk [vmem:[#allocation2 + $0x20] sm:$0x7] %vm9378_vm12, %v2757_v1  ;;  %3367 = vrot.lane.b32.xlu1 %v6824_v60, %s7355_s21  ;;  %3365 = vrot.lane.b32.xlu0 %v6823_v61, %s7355_s21  ;;  %vm9381_vm12 = vmmov %vm9380_vm13  ;;  %v6848_v60 = vld [vmem:[%s7411_s17 + $0x28] sm:$0xf]  ;;  %v6847_v61 = vld [vmem:[%s7411_s17 + $0x24] sm:$0xf] }
 0x276   : > { %v3488_v1 = vrot.slane %v3486_v49, 4 }
 0x277   : > { %v2763_v6 = vpop.permute.xlu1 %2762  ;;  %v2761_v7 = vpop.permute.xlu0 %2760 }
 0x278   : > { %2775 = vst.msk [vmem:[#allocation2 + $0x2c] sm:$0x7] %vm9375_vm11, %v2763_v6  ;;  %v8389_v8 = vpop.f32.mrb[0].mxu0  ;;  %vm9382_vm11 = vmmov %vm9381_vm12  ;;  %v3506_v6 = vrot.slane %v3504_v54, 4 }
 0x279   : > { %2774 = vst.msk [vmem:[#allocation2 + $0x28] sm:$0x7] %vm9379_vm15, %v2761_v7  ;;  %3371 = vrot.lane.b32.xlu1 %v6826_v2, %s7355_s21  ;;  %3369 = vrot.lane.b32.xlu0 %v6825_v3, %s7355_s21  ;;  %v8391_v11 = vpop.f32.mrb[1].mxu0  ;;  %vm9383_vm15 = vmmov %vm9382_vm11  ;;  %v3491_v2 = vrot.slane %v3489_v50, 5  ;;  %v6839_v3 = vld [vmem:[%s7411_s17 + $0x34] sm:$0x7] }
 0x27a   : > { %v8395_v14 = vpop.f32.mrb[2].mxu0  ;;  %v3509_v7 = vrot.slane %v3507_v55, 5 }
 0x27b   : > { %v2803_v12 = vpop.permute.xlu1 %2802  ;;  %v2801_v13 = vpop.permute.xlu0 %2800 }
 0x27c   : > { %2819 = vst.msk [vmem:[#allocation2 + $0x1c] sm:$0x7] %vm9380_vm13, %v2803_v12  ;;  %v8397_v15 = vpop.f32.mrb[3].mxu0  ;;  %vm9384_vm13 = vmmov %vm9382_vm11  ;;  %v3561_v12 = vshrl.u32 %v6848_v60, 16  ;;  %v3510_v25 = vor.u32 %v3509_v7, %v3506_v6 }
 0x27d   : > { %2818 = vst.msk [vmem:[#allocation2 + $0x18] sm:$0x7] %vm9381_vm12, %v2801_v13  ;;  %3375 = vrot.lane.b32.xlu1 %v6828_v9, %s7355_s21  ;;  %3373 = vrot.lane.b32.xlu0 %v6827_v10, %s7355_s21  ;;  %vm9385_vm12 = vmmov %vm9382_vm11  ;;  %v3564_v13 = vshll.u32 %v6848_v60, 16 }
 0x27e   : > { %v3511_v43 = vrot.slane %v3510_v25, 4 }
 0x27f   : > { %v2807_v18 = vpop.permute.xlu1 %2806  ;;  %v2805_v19 = vpop.permute.xlu0 %2804 }
 0x280   : > { %2821 = vst.msk [vmem:[#allocation2 + $0x24] sm:$0x7] %vm9382_vm11, %v2807_v18  ;;  %vm9386_vm11 = vcmask 682624   ;;  %v3484_v18 = vrot.slane %v3483_v58, 4 }
 0x281   : > { %2820 = vst.msk [vmem:[#allocation2 + $0x20] sm:$0x7] %vm9383_vm15, %v2805_v19  ;;  %3403 = vrot.lane.b32.xlu1 %v6830_v16, %s7356_s22  ;;  %3401 = vrot.lane.b32.xlu0 %v6829_v17, %s7356_s22  ;;  %vm9387_vm15 = vmmov %vm9386_vm11  ;;  %v3552_v16 = vshrl.u32 %v6847_v61, 16  ;;  %v3555_v17 = vshll.u32 %v6847_v61, 16  ;;  %v3475_v19 = vrot.slane %v3474_v59, 4 }
 0x283   : > { %v2811_v22 = vpop.permute.xlu1 %2810  ;;  %v2809_v23 = vpop.permute.xlu0 %2808  ;;  %v3554_v30 = vrot.slane %v3552_v16, 4  ;;  %v3557_v31 = vrot.slane %v3555_v17, 5 }
 0x284   : > { %2823 = vst.msk [vmem:[#allocation2 + $0x2c] sm:$0x7] %vm9384_vm13, %v2811_v22  ;;  %vm9388_vm13 = vmmov %vm9386_vm11  ;;  %v6850_v22 = vld [vmem:[%s7411_s17 + $0x30] sm:$0xf] }
 0x285   : > { %2822 = vst.msk [vmem:[#allocation2 + $0x28] sm:$0x7] %vm9385_vm12, %v2809_v23  ;;  %3407 = vrot.lane.b32.xlu1 %v6832_v20, %s7356_s22  ;;  %3405 = vrot.lane.b32.xlu0 %v6831_v21, %s7356_s22  ;;  %vm9389_vm12 = vmmov %vm9386_vm11  ;;  %v3501_v20 = vor.u32 %v3500_v0, %v3497_v63  ;;  %v3492_v21 = vor.u32 %v3491_v2, %v3488_v1  ;;  %v6849_v23 = vld [vmem:[%s7411_s17 + $0x2c] sm:$0xf]  ;;  %v3579_v32 = vshrl.u32 %v6850_v22, 16  ;;  %v3582_v33 = vshll.u32 %v6850_v22, 16 }
 0x286   : > { %v3558_v45 = vor.u32 %v3557_v31, %v3554_v30 }
 0x287   : > { %v2839_v28 = vpop.permute.xlu1 %2838  ;;  %v2837_v29 = vpop.permute.xlu0 %2836  ;;  %v3502_v36 = vrot.slane %v3501_v20, 4  ;;  %v3493_v37 = vrot.slane %v3492_v21, 4  ;;  %v3584_v47 = vrot.slane %v3582_v33, 5  ;;  %v6856_v20 = vld [vmem:[%s7411_s17 + $0x10] sm:$0xe] }
 0x288   : > { %2855 = vst.msk [vmem:[#allocation2 + $0x1c] sm:$0x7] %vm9386_vm11, %v2839_v28  ;;  %v3563_v28 = vrot.slane %v3561_v12, 4  ;;  %v6854_v12 = vld [vmem:[%s7411_s17 + $0x8] sm:$0xe]  ;;  %v6862_v24 = vrot.slane %v6856_v20, 9 }
 0x289   : > { %2854 = vst.msk [vmem:[#allocation2 + $0x18] sm:$0x7] %vm9387_vm15, %v2837_v29  ;;  %3411 = vrot.lane.b32.xlu1 %v6834_v26, %s7356_s22  ;;  %3409 = vrot.lane.b32.xlu0 %v6833_v27, %s7356_s22  ;;  %vm9390_vm15 = vmmov %vm9386_vm11  ;;  %v3566_v29 = vrot.slane %v3564_v13, 5  ;;  %v6853_v13 = vld [vmem:[%s7411_s17 + $0x4] sm:$0xe] }
 0x28a   : > { %v6855_v21 = vld [vmem:[%s7411_s17 + $0xc] sm:$0xe] }
 0x28b   : > { %v2843_v38 = vpop.permute.xlu1 %2842  ;;  %v2841_v39 = vpop.permute.xlu0 %2840  ;;  %v3567_v44 = vor.u32 %v3566_v29, %v3563_v28  ;;  %v6861_v25 = vrot.slane %v6855_v21, 9  ;;  %v6884_v21 = vld [vmem:[%s7411_s17 + $0x68] sm:$0xf] }
 0x28c   : > { %2857 = vst.msk [vmem:[#allocation2 + $0x24] sm:$0x7] %vm9388_vm13, %v2843_v38  ;;  %vm9391_vm13 = vcmask 715424   ;;  %v6852_v38 = vld [vmem:[%s7411_s17 + $0x38] sm:$0xf] }
 0x28d   : > { %2856 = vst.msk [vmem:[#allocation2 + $0x20] sm:$0x7] %vm9389_vm12, %v2841_v39  ;;  %3439 = vrot.lane.b32.xlu1 %v6836_v34, %s7357_s23  ;;  %3437 = vrot.lane.b32.xlu0 %v6835_v35, %s7357_s23  ;;  %vm9392_vm12 = vmmov %vm9391_vm13  ;;  %v3570_v34 = vshrl.u32 %v6849_v23, 16  ;;  %v3573_v35 = vshll.u32 %v6849_v23, 16  ;;  %v6851_v39 = vld [vmem:[%s7411_s17 + $0x34] sm:$0xf] }
 0x28e   : > { %v3597_v50 = vshrl.u32 %v6852_v38, 16  ;;  %v3588_v52 = vshrl.u32 %v6851_v39, 16  ;;  %v3591_v53 = vshll.u32 %v6851_v39, 16  ;;  %v6867_v39 = vld [vmem:[%s7411_s17 + $0x4c] sm:$0x7] }
 0x28f   : > { %v2847_v56 = vpop.permute.xlu1 %2846  ;;  %v2845_v57 = vpop.permute.xlu0 %2844  ;;  %v3572_v48 = vrot.slane %v3570_v34, 4  ;;  %v3575_v49 = vrot.slane %v3573_v35, 5  ;;  %v6866_v34 = vld [vmem:[%s7411_s17 + $0x48] sm:$0x7]  ;;  %v6865_v35 = vld [vmem:[%s7411_s17 + $0x44] sm:$0x7] }
 0x290   : > { %2859 = vst.msk [vmem:[#allocation2 + $0x2c] sm:$0x7] %vm9386_vm11, %v2847_v56  ;;  %vm9393_vm11 = vmmov %vm9392_vm12  ;;  %v3568_v56 = vrot.slane %v3567_v44, 4  ;;  %v3599_v60 = vrot.slane %v3597_v50, 4  ;;  %v3593_v63 = vrot.slane %v3591_v53, 5 }
 0x291   : > { %2858 = vst.msk [vmem:[#allocation2 + $0x28] sm:$0x7] %vm9390_vm15, %v2845_v57  ;;  %3443 = vrot.lane.b32.xlu1 %v6838_v46, %s7357_s23  ;;  %3441 = vrot.lane.b32.xlu0 %v6837_v51, %s7357_s23  ;;  %vm9394_vm15 = vmmov %vm9393_vm11  ;;  %v3581_v46 = vrot.slane %v3579_v32, 4  ;;  %v3600_v51 = vshll.u32 %v6852_v38, 16  ;;  %v3559_v57 = vrot.slane %v3558_v45, 4  ;;  %v3576_v59 = vor.u32 %v3575_v49, %v3572_v48 }
 0x292   : > { %v6868_v38 = vld [vmem:[%s7411_s17 + $0x50] sm:$0x7]  ;;  %v6877_v44 = vld [vmem:[%s7411_s17 + $0x44] sm:$0xf]  ;;  %v6870_v45 = vld [vmem:[%s7411_s17 + $0x58] sm:$0x7] }
 0x293   : > { %v2923_v9 = vpop.permute.xlu1 %2922  ;;  %v2921_v10 = vpop.permute.xlu0 %2920  ;;  %v3585_v58 = vor.u32 %v3584_v47, %v3581_v46  ;;  %v3602_v61 = vrot.slane %v3600_v51, 5  ;;  %v6869_v46 = vld [vmem:[%s7411_s17 + $0x54] sm:$0x7]  ;;  %v6872_v50 = vld [vmem:[%s7411_s17 + $0x68] sm:$0x7]  ;;  %v3756_v53 = vshrl.u32 %v6877_v44, 16 }
 0x294   : > { %2939 = vst.msk [vmem:[#allocation2 + $0x1c] sm:$0x7] %vm9391_vm13, %v2923_v9  ;;  %vm9395_vm13 = vmmov %vm9393_vm11 }
 0x295   : > { %2938 = vst.msk [vmem:[#allocation2 + $0x18] sm:$0x7] %vm9392_vm12, %v2921_v10  ;;  %3447 = vrot.lane.b32.xlu1 %v6840_v62, %s7357_s23  ;;  %3445 = vrot.lane.b32.xlu0 %v6839_v3, %s7357_s23  ;;  %vm9396_vm12 = vmmov %vm9393_vm11  ;;  %v3590_v62 = vrot.slane %v3588_v52, 4  ;;  %v3586_v2 = vrot.slane %v3585_v58, 4  ;;  %v3577_v3 = vrot.slane %v3576_v59, 4  ;;  %v3603_v4 = vor.u32 %v3602_v61, %v3599_v60 }
 0x296   : > { %v6882_v58 = vld [vmem:[%s7411_s17 + $0x58] sm:$0xf]  ;;  %v6881_v59 = vld [vmem:[%s7411_s17 + $0x54] sm:$0xf] }
 0x297   : > { %v2927_v26 = vpop.permute.xlu1 %2926  ;;  %v2925_v27 = vpop.permute.xlu0 %2924  ;;  %v3594_v5 = vor.u32 %v3593_v63, %v3590_v62  ;;  %v3604_v9 = vrot.slane %v3603_v4, 4 }
 0x298   : > { %2941 = vst.msk [vmem:[#allocation2 + $0x24] sm:$0x7] %vm9393_vm11, %v2927_v26  ;;  %vm9397_vm11 = vcmask 748224   ;;  %v6858_v26 = vld [vmem:[%s7411_s17 + $0x18] sm:$0xe] }
 0x299   : > { %2940 = vst.msk [vmem:[#allocation2 + $0x20] sm:$0x7] %vm9394_vm15, %v2925_v27  ;;  %3523 = vrot.lane.b32.xlu1 %v3484_v18, %s7358_s24  ;;  %3521 = vrot.lane.b32.xlu0 %v3475_v19, %s7358_s24  ;;  %vm9398_vm15 = vmmov %vm9397_vm11  ;;  %v3595_v10 = vrot.slane %v3594_v5, 4  ;;  %v6860_v18 = vrot.slane %v6854_v12, 9  ;;  %v6859_v19 = vrot.slane %v6853_v13, 9  ;;  %v6864_v30 = vrot.slane %v6858_v26, 9 }
 0x29a   : > { %v6857_v27 = vld [vmem:[%s7411_s17 + $0x14] sm:$0xe]  ;;  %v3804_v12 = vshll.u32 %v6882_v58, 16  ;;  %v3792_v13 = vshrl.u32 %v6881_v59, 16 }
 0x29b   : > { %v2931_v40 = vpop.permute.xlu1 %2930  ;;  %v2929_v41 = vpop.permute.xlu0 %2928  ;;  %v6863_v31 = vrot.slane %v6857_v27, 9 }
 0x29c   : > { %2943 = vst.msk [vmem:[#allocation2 + $0x2c] sm:$0x7] %vm9395_vm13, %v2931_v40  ;;  %vm9399_vm13 = vmmov %vm9397_vm11 }
 0x29d   : > { %2942 = vst.msk [vmem:[#allocation2 + $0x28] sm:$0x7] %vm9396_vm12, %v2929_v41  ;;  %3527 = vrot.lane.b32.xlu1 %v3502_v36, %s7358_s24  ;;  %3525 = vrot.lane.b32.xlu0 %v3493_v37, %s7358_s24  ;;  %vm9400_vm12 = vmmov %vm9397_vm11 }
 0x29f   : > { %v3007_v54 = vpop.permute.xlu1 %3006  ;;  %v3005_v55 = vpop.permute.xlu0 %3004 }
 0x2a0   : > { %3023 = vst.msk [vmem:[#allocation2 + $0x1c] sm:$0x7] %vm9397_vm11, %v3007_v54  ;;  %v3759_v54 = vshll.u32 %v6877_v44, 16  ;;  %v6885_v44 = vld [vmem:[%s7411_s17 + $0x6c] sm:$0xf] }
 0x2a1   : > { %3022 = vst.msk [vmem:[#allocation2 + $0x18] sm:$0x7] %vm9398_vm15, %v3005_v55  ;;  %3531 = vrot.lane.b32.xlu1 %v3520_v42, %s7358_s24  ;;  %3529 = vrot.lane.b32.xlu0 %v3511_v43, %s7358_s24  ;;  %vm9401_vm15 = vmmov %vm9397_vm11  ;;  %v6878_v43 = vld [vmem:[%s7411_s17 + $0x48] sm:$0xf]  ;;  %v6871_v55 = vld [vmem:[%s7411_s17 + $0x64] sm:$0x7] }
 0x2a2   : > { %v3765_v51 = vshrl.u32 %v6878_v43, 16  ;;  %v3768_v52 = vshll.u32 %v6878_v43, 16  ;;  %v6886_v43 = vld [vmem:[%s7411_s17 + $0x70] sm:$0xf] }
 0x2a3   : > { %v3011_v0 = vpop.permute.xlu1 %3010  ;;  %v3009_v1 = vpop.permute.xlu0 %3008 }
 0x2a4   : > { %3025 = vst.msk [vmem:[#allocation2 + $0x24] sm:$0x7] %vm9399_vm13, %v3011_v0  ;;  %vm9402_vm13 = vcmask 781024   ;;  %v3767_v63 = vrot.slane %v3765_v51, 4  ;;  %v3770_v0 = vrot.slane %v3768_v52, 5 }
 0x2a5   : > { %3024 = vst.msk [vmem:[#allocation2 + $0x20] sm:$0x7] %vm9400_vm12, %v3009_v1  ;;  %3607 = vrot.lane.b32.xlu1 %v3568_v56, %s7359_s25  ;;  %3605 = vrot.lane.b32.xlu0 %v3559_v57, %s7359_s25  ;;  %vm9403_vm12 = vmmov %vm9402_vm13  ;;  %v6880_v56 = vld [vmem:[%s7411_s17 + $0x50] sm:$0xf]  ;;  %v6879_v57 = vld [vmem:[%s7411_s17 + $0x4c] sm:$0xf] }
 0x2a6   : > { %v3758_v1 = vrot.slane %v3756_v53, 4  ;;  %v3783_v4 = vshrl.u32 %v6880_v56, 16  ;;  %v3786_v5 = vshll.u32 %v6880_v56, 16  ;;  %v3867_v53 = vshrl.u32 %v6886_v43, 16 }
 0x2a7   : > { %v3015_v6 = vpop.permute.xlu1 %3014  ;;  %v3013_v7 = vpop.permute.xlu0 %3012  ;;  %v3861_v56 = vshll.u32 %v6885_v44, 16 }
 0x2a8   : > { %3027 = vst.msk [vmem:[#allocation2 + $0x2c] sm:$0x7] %vm9397_vm11, %v3015_v6  ;;  %vm9404_vm11 = vmmov %vm9403_vm12  ;;  %v3774_v6 = vshrl.u32 %v6879_v57, 16 }
 0x2a9   : > { %3026 = vst.msk [vmem:[#allocation2 + $0x28] sm:$0x7] %vm9401_vm15, %v3013_v7  ;;  %3611 = vrot.lane.b32.xlu1 %v3586_v2, %s7359_s25  ;;  %3609 = vrot.lane.b32.xlu0 %v3577_v3, %s7359_s25  ;;  %vm9405_vm15 = vmmov %vm9404_vm11  ;;  %v3761_v2 = vrot.slane %v3759_v54, 5  ;;  %v6874_v3 = vld [vmem:[%s7411_s17 + $0x70] sm:$0x7]  ;;  %v3777_v7 = vshll.u32 %v6879_v57, 16 }
 0x2aa   : > { %v3776_v26 = vrot.slane %v3774_v6, 4  ;;  %v3870_v54 = vshll.u32 %v6886_v43, 16  ;;  %v3863_v6 = vrot.slane %v3861_v56, 5  ;;  %v6901_v56 = vld [vmem:[%s7411_s17 + $0x8] sm:$0x7] }
 0x2ab   : > { %v3055_v16 = vpop.permute.xlu1 %3054  ;;  %v3053_v17 = vpop.permute.xlu0 %3052  ;;  %v3762_v20 = vor.u32 %v3761_v2, %v3758_v1  ;;  %v3779_v27 = vrot.slane %v3777_v7, 5 }
 0x2ac   : > { %3071 = vst.msk [vmem:[#allocation2 + $0x1c] sm:$0x7] %vm9402_vm13, %v3055_v16  ;;  %vm9406_vm13 = vmmov %vm9404_vm11  ;;  %v3795_v16 = vshll.u32 %v6881_v59, 16  ;;  %v6888_v59 = vld [vmem:[%s7411_s17 + $0x78] sm:$0xf] }
 0x2ad   : > { %3070 = vst.msk [vmem:[#allocation2 + $0x18] sm:$0x7] %vm9403_vm12, %v3053_v17  ;;  %3615 = vrot.lane.b32.xlu1 %v3604_v9, %s7359_s25  ;;  %3613 = vrot.lane.b32.xlu0 %v3595_v10, %s7359_s25  ;;  %vm9407_vm12 = vmmov %vm9404_vm11  ;;  %v6873_v9 = vld [vmem:[%s7411_s17 + $0x6c] sm:$0x7]  ;;  %v3801_v10 = vshrl.u32 %v6882_v58, 16  ;;  %v3885_v7 = vshrl.u32 %v6888_v59, 16 }
 0x2af   : > { %v3059_v22 = vpop.permute.xlu1 %3058  ;;  %v3057_v23 = vpop.permute.xlu0 %3056 }
 0x2b0   : > { %3073 = vst.msk [vmem:[#allocation2 + $0x24] sm:$0x7] %vm9404_vm11, %v3059_v22  ;;  %v6883_v22 = vld [vmem:[%s7411_s17 + $0x64] sm:$0xf]  ;;  %vm9408_vm11 = vcmask 387424  }
 0x2b1   : > { %3072 = vst.msk [vmem:[#allocation2 + $0x20] sm:$0x7] %vm9405_vm15, %v3057_v23  ;;  %3655 = vrot.lane.b32.xlu1 %v6860_v18, %s7360_s26  ;;  %3653 = vrot.lane.b32.xlu0 %v6859_v19, %s7360_s26  ;;  %v3771_v19 = vor.u32 %v3770_v0, %v3767_v63  ;;  %v6876_v23 = vld [vmem:[%s7411_s17 + $0x78] sm:$0x7]  ;;  %vm9409_vm15 = vmmov %vm9408_vm11 }
 0x2b3   : > { %v3063_v28 = vpop.permute.xlu1 %3062  ;;  %v3061_v29 = vpop.permute.xlu0 %3060 }
 0x2b4   : > { %3075 = vst.msk [vmem:[#allocation2 + $0x2c] sm:$0x7] %vm9406_vm13, %v3063_v28  ;;  %v6875_v28 = vld [vmem:[%s7411_s17 + $0x74] sm:$0x7]  ;;  %vm9410_vm13 = vmmov %vm9408_vm11 }
 0x2b5   : > { %3074 = vst.msk [vmem:[#allocation2 + $0x28] sm:$0x7] %vm9407_vm12, %v3061_v29  ;;  %3659 = vrot.lane.b32.xlu1 %v6862_v24, %s7360_s26  ;;  %3657 = vrot.lane.b32.xlu0 %v6861_v25, %s7360_s26  ;;  %v3785_v24 = vrot.slane %v3783_v4, 4  ;;  %v3788_v25 = vrot.slane %v3786_v5, 5  ;;  %v3803_v29 = vrot.slane %v3801_v10, 4  ;;  %v3872_v4 = vrot.slane %v3870_v54, 5  ;;  %vm9411_vm12 = vmmov %vm9408_vm11 }
 0x2b7   : > { %v3103_v32 = vpop.permute.xlu1 %3102  ;;  %v3101_v33 = vpop.permute.xlu0 %3100 }
 0x2b8   : > { %3119 = vst.msk [vmem:[#allocation2 + $0x1c] sm:$0x7] %vm1640_vm0, %v3103_v32  ;;  %3118 = vst.msk [vmem:[#allocation2 + $0x18] sm:$0x7] %vm1640_vm0, %v3101_v33  ;;  %v3797_v32 = vrot.slane %v3795_v16, 5 }
 0x2b9   : > { %3663 = vrot.lane.b32.xlu1 %v6864_v30, %s7360_s26  ;;  %3661 = vrot.lane.b32.xlu0 %v6863_v31, %s7360_s26  ;;  %v3806_v30 = vrot.slane %v3804_v12, 5  ;;  %v3794_v31 = vrot.slane %v3792_v13, 4 }
 0x2bb   : > { %v3107_v36 = vpop.permute.xlu1 %3106  ;;  %v3105_v37 = vpop.permute.xlu0 %3104 }
 0x2bc   : > { %3121 = vst.msk [vmem:[#allocation2 + $0x24] sm:$0x7] %vm1640_vm0, %v3107_v36  ;;  %3120 = vst.msk [vmem:[#allocation2 + $0x20] sm:$0x7] %vm1640_vm0, %v3105_v37  ;;  %v3852_v36 = vshll.u32 %v6884_v21, 16  ;;  %v3840_v37 = vshrl.u32 %v6883_v22, 16 }
 0x2bd   : > { %3691 = vrot.lane.b32.xlu1 %v6866_v34, %s7361_s27  ;;  %3689 = vrot.lane.b32.xlu0 %v6865_v35, %s7361_s27  ;;  %v3849_v35 = vshrl.u32 %v6884_v21, 16  ;;  %v3887_v21 = vrot.slane %v3885_v7, 4 }
 0x2be   : > { %v3842_v51 = vrot.slane %v3840_v37, 4 }
 0x2bf   : > { %v3111_v40 = vpop.permute.xlu1 %3110  ;;  %v3109_v41 = vpop.permute.xlu0 %3108  ;;  %v7335_v42 = vld [vmem:[#allocation2 + $0x18] sm:$0xff]  }
 0x2c0   : > { %3123 = vst.msk [vmem:[#allocation2 + $0x2c] sm:$0x7] %vm1640_vm0, %v3111_v40  ;;  %3122 = vst.msk [vmem:[#allocation2 + $0x28] sm:$0x7] %vm1640_vm0, %v3109_v41  ;;  %7256 = vmatmul.mubr.msk.bf16.gmra.mrb[4].mxu0 %vm6156_vm14, %v7335_v42  ;;  %v3763_v40 = vrot.slane %v3762_v20, 4  ;;  %v3789_v41 = vor.u32 %v3788_v25, %v3785_v24  ;;  %v3780_v42 = vor.u32 %v3779_v27, %v3776_v26 }
 0x2c1   : > { %3695 = vrot.lane.b32.xlu1 %v6868_v38, %s7361_s27  ;;  %3693 = vrot.lane.b32.xlu0 %v6867_v39, %s7361_s27  ;;  %v3843_v38 = vshll.u32 %v6883_v22, 16  ;;  %v3772_v39 = vrot.slane %v3771_v19, 4 }
 0x2c2   : > { %v3790_v57 = vrot.slane %v3789_v41, 4  ;;  %v3781_v58 = vrot.slane %v3780_v42, 4  ;;  %v6892_v41 = vld [vmem:[%s7411_s17 + $0x50] sm:$0xe]  ;;  %v6891_v42 = vld [vmem:[%s7411_s17 + $0x4c] sm:$0xe] }
 0x2c3   : > { %v3152_v47 = vpop.permute.xlu1 %3151  ;;  %v3150_v48 = vpop.permute.xlu0 %3149  ;;  %v7336_v49 = vld [vmem:[#allocation2 + $0x20] sm:$0xff]   ;;  %v3845_v52 = vrot.slane %v3843_v38, 5 }
 0x2c4   : > { %3168 = vst.msk [vmem:[#allocation2 + $0x34] sm:$0x7] %vm241_vm1, %v3152_v47  ;;  %3167 = vst.msk [vmem:[#allocation2 + $0x30] sm:$0x7] %vm241_vm1, %v3150_v48  ;;  %7259 = vmatprep.mubr.msk.bf16.mxu0 %vm6156_vm14, %v7336_v49  ;;  %v3851_v49 = vrot.slane %v3849_v35, 4 }
 0x2c5   : > { %3699 = vrot.lane.b32.xlu1 %v6870_v45, %s7361_s27  ;;  %3697 = vrot.lane.b32.xlu0 %v6869_v46, %s7361_s27  ;;  %v3807_v45 = vor.u32 %v3806_v30, %v3803_v29  ;;  %v3798_v46 = vor.u32 %v3797_v32, %v3794_v31  ;;  %v3846_v2 = vor.u32 %v3845_v52, %v3842_v51  ;;  %v6890_v35 = vld [vmem:[%s7411_s17 + $0x48] sm:$0xe] }
 0x2c7   : > { %v3156_v60 = vpop.permute.xlu1 %3155  ;;  %v3154_v61 = vpop.permute.xlu0 %3153  ;;  %v7337_v62 = vld [vmem:[#allocation2 + $0x28] sm:$0xff]   ;;  %v3808_v63 = vrot.slane %v3807_v45, 4  ;;  %v3799_v0 = vrot.slane %v3798_v46, 4  ;;  %v6898_v45 = vrot.slane %v6892_v41, 9  ;;  %v6897_v46 = vrot.slane %v6891_v42, 9 }
 0x2c8   : > { %3170 = vst.msk [vmem:[#allocation2 + $0x3c] sm:$0x7] %vm241_vm1, %v3156_v60  ;;  %3169 = vst.msk [vmem:[#allocation2 + $0x38] sm:$0x7] %vm241_vm1, %v3154_v61  ;;  %7260 = vmatmul.mubr.msk.bf16.gmra.mrb[8].mxu0 %vm6156_vm14, %v7337_v62  ;;  %v6887_v60 = vld [vmem:[%s7411_s17 + $0x74] sm:$0xf] }
 0x2c9   : > { %3727 = vrot.lane.b32.xlu1 %v6872_v50, %s7362_s28  ;;  %3725 = vrot.lane.b32.xlu0 %v6871_v55, %s7362_s28  ;;  %v3854_v50 = vrot.slane %v3852_v36, 5  ;;  %v3858_v55 = vshrl.u32 %v6885_v44, 16  ;;  %v3876_v10 = vshrl.u32 %v6887_v60, 16  ;;  %v3879_v12 = vshll.u32 %v6887_v60, 16  ;;  %v6889_v36 = vld [vmem:[%s7411_s17 + $0x44] sm:$0xe] }
 0x2ca   : > { %v6903_v60 = vld [vmem:[%s7411_s17 + $0x10] sm:$0x7]  ;;  %v6912_v41 = vld [vmem:[%s7411_s17 + $0x3c] sm:$0x7] }
 0x2cb   : > { %v3160_v17 = vpop.permute.xlu1 %3159  ;;  %v3158_v18 = vpop.permute.xlu0 %3157  ;;  %v3855_v1 = vor.u32 %v3854_v50, %v3851_v49  ;;  %v3860_v5 = vrot.slane %v3858_v55, 4  ;;  %v3881_v24 = vrot.slane %v3879_v12, 5  ;;  %v6902_v55 = vld [vmem:[%s7411_s17 + $0xc] sm:$0x7]  ;;  %v6907_v12 = vld [vmem:[%s7411_s17 + $0x28] sm:$0x7] }
 0x2cc   : > { %3172 = vst.msk [vmem:[#allocation2 + $0x44] sm:$0x7] %vm241_vm1, %v3160_v17  ;;  %3171 = vst.msk [vmem:[#allocation2 + $0x40] sm:$0x7] %vm241_vm1, %v3158_v18  ;;  %v3847_v18 = vrot.slane %v3846_v2, 4 }
 0x2cd   : > { %3731 = vrot.lane.b32.xlu1 %v6874_v3, %s7362_s28  ;;  %3729 = vrot.lane.b32.xlu0 %v6873_v9, %s7362_s28  ;;  %v3869_v3 = vrot.slane %v3867_v53, 4  ;;  %v3888_v9 = vshll.u32 %v6888_v59, 16  ;;  %v3856_v17 = vrot.slane %v3855_v1, 4  ;;  %v3864_v20 = vor.u32 %v3863_v6, %v3860_v5  ;;  %v6904_v59 = vld [vmem:[%s7411_s17 + $0x14] sm:$0x7] }
 0x2ce   : > { %v6906_v1 = vld [vmem:[%s7411_s17 + $0x1c] sm:$0x7]  ;;  %v6905_v2 = vld [vmem:[%s7411_s17 + $0x18] sm:$0x7] }
 0x2cf   : > { %v3236_v33 = vpop.permute.xlu1 %3235  ;;  %v3234_v34 = vpop.permute.xlu0 %3233  ;;  %v3873_v19 = vor.u32 %v3872_v4, %v3869_v3  ;;  %v3890_v22 = vrot.slane %v3888_v9, 5 }
 0x2d0   : > { %3252 = vst.msk [vmem:[#allocation2 + $0x34] sm:$0x7] %vm326_vm2, %v3236_v33  ;;  %3251 = vst.msk [vmem:[#allocation2 + $0x30] sm:$0x7] %vm326_vm2, %v3234_v34 }
 0x2d1   : > { %3735 = vrot.lane.b32.xlu1 %v6876_v23, %s7362_s28  ;;  %3733 = vrot.lane.b32.xlu0 %v6875_v28, %s7362_s28  ;;  %v3878_v23 = vrot.slane %v3876_v10, 4  ;;  %v3874_v27 = vrot.slane %v3873_v19, 4  ;;  %v3865_v28 = vrot.slane %v3864_v20, 4  ;;  %v3891_v29 = vor.u32 %v3890_v22, %v3887_v21  ;;  %v6908_v10 = vld [vmem:[%s7411_s17 + $0x2c] sm:$0x7] }
 0x2d2   : > { %v6918_v19 = vld [vmem:[%s7411_s17 + $0x1c] sm:$0xf]  ;;  %v6917_v20 = vld [vmem:[%s7411_s17 + $0x18] sm:$0xf] }
 0x2d3   : > { %v3240_v47 = vpop.permute.xlu1 %3239  ;;  %v3238_v48 = vpop.permute.xlu0 %3237  ;;  %v3882_v30 = vor.u32 %v3881_v24, %v3878_v23  ;;  %v3892_v33 = vrot.slane %v3891_v29, 4 }
 0x2d4   : > { %3254 = vst.msk [vmem:[#allocation2 + $0x3c] sm:$0x7] %vm326_vm2, %v3240_v47  ;;  %3253 = vst.msk [vmem:[#allocation2 + $0x38] sm:$0x7] %vm326_vm2, %v3238_v48  ;;  %v6894_v47 = vld [vmem:[%s7411_s17 + $0x58] sm:$0xe] }
 0x2d5   : > { %3811 = vrot.lane.b32.xlu1 %v3772_v39, %s7363_s29  ;;  %3809 = vrot.lane.b32.xlu0 %v3763_v40, %s7363_s29  ;;  %v3883_v34 = vrot.slane %v3882_v30, 4  ;;  %v6896_v39 = vrot.slane %v6890_v35, 9  ;;  %v6895_v40 = vrot.slane %v6889_v36, 9  ;;  %v6893_v48 = vld [vmem:[%s7411_s17 + $0x54] sm:$0xe]  ;;  %v6900_v51 = vrot.slane %v6894_v47, 9 }
 0x2d6   : > { %v6899_v52 = vrot.slane %v6893_v48, 9  ;;  %v6909_v30 = vld [vmem:[%s7411_s17 + $0x30] sm:$0x7] }
 0x2d7   : > { %v3244_v61 = vpop.permute.xlu1 %3243  ;;  %v3242_v62 = vpop.permute.xlu0 %3241 }
 0x2d8   : > { %3256 = vst.msk [vmem:[#allocation2 + $0x44] sm:$0x7] %vm326_vm2, %v3244_v61  ;;  %3255 = vst.msk [vmem:[#allocation2 + $0x40] sm:$0x7] %vm326_vm2, %v3242_v62 }
 0x2d9   : > { %3815 = vrot.lane.b32.xlu1 %v3790_v57, %s7363_s29  ;;  %3813 = vrot.lane.b32.xlu0 %v3781_v58, %s7363_s29 }
 0x2db   : > { %v3320_v13 = vpop.permute.xlu1 %3319  ;;  %v3318_v16 = vpop.permute.xlu0 %3317 }
 0x2dc   : > { %3336 = vst.msk [vmem:[#allocation2 + $0x34] sm:$0x7] %vm411_vm3, %v3320_v13  ;;  %3335 = vst.msk [vmem:[#allocation2 + $0x30] sm:$0x7] %vm411_vm3, %v3318_v16  ;;  %v6916_v13 = vld [vmem:[%s7411_s17 + $0x14] sm:$0xf] }
 0x2dd   : > { %3819 = vrot.lane.b32.xlu1 %v3808_v63, %s7363_s29  ;;  %3817 = vrot.lane.b32.xlu0 %v3799_v0, %s7363_s29  ;;  %v6914_v63 = vld [vmem:[%s7411_s17 + $0xc] sm:$0xf]  ;;  %v6913_v0 = vld [vmem:[%s7411_s17 + $0x8] sm:$0xf] }
 0x2de   : > { %v4053_v5 = vshrl.u32 %v6914_v63, 16  ;;  %v4056_v6 = vshll.u32 %v6914_v63, 16  ;;  %v4044_v7 = vshrl.u32 %v6913_v0, 16  ;;  %v4047_v9 = vshll.u32 %v6913_v0, 16  ;;  %v6915_v16 = vld [vmem:[%s7411_s17 + $0x10] sm:$0xf] }
 0x2df   : > { %v3324_v25 = vpop.permute.xlu1 %3323  ;;  %v3322_v26 = vpop.permute.xlu0 %3321  ;;  %v4065_v29 = vshll.u32 %v6915_v16, 16 }
 0x2e0   : > { %3338 = vst.msk [vmem:[#allocation2 + $0x3c] sm:$0x7] %vm411_vm3, %v3324_v25  ;;  %3337 = vst.msk [vmem:[#allocation2 + $0x38] sm:$0x7] %vm411_vm3, %v3322_v26  ;;  %v4055_v21 = vrot.slane %v4053_v5, 4  ;;  %v4058_v22 = vrot.slane %v4056_v6, 5 }
 0x2e1   : > { %3895 = vrot.lane.b32.xlu1 %v3856_v17, %s7364_s30  ;;  %3893 = vrot.lane.b32.xlu0 %v3847_v18, %s7364_s30  ;;  %v4046_v23 = vrot.slane %v4044_v7, 4  ;;  %v4049_v24 = vrot.slane %v4047_v9, 5  ;;  %v6910_v25 = vld [vmem:[%s7411_s17 + $0x34] sm:$0x7]  ;;  %v4071_v26 = vshrl.u32 %v6916_v13, 16 }
 0x2e3   : > { %v3328_v31 = vpop.permute.xlu1 %3327  ;;  %v3326_v32 = vpop.permute.xlu0 %3325  ;;  %v4073_v42 = vrot.slane %v4071_v26, 4 }
 0x2e4   : > { %3340 = vst.msk [vmem:[#allocation2 + $0x44] sm:$0x7] %vm411_vm3, %v3328_v31  ;;  %3339 = vst.msk [vmem:[#allocation2 + $0x40] sm:$0x7] %vm411_vm3, %v3326_v32  ;;  %v4089_v31 = vshrl.u32 %v6918_v19, 16  ;;  %v4092_v32 = vshll.u32 %v6918_v19, 16 }
 0x2e5   : > { %3899 = vrot.lane.b32.xlu1 %v3874_v27, %s7364_s30  ;;  %3897 = vrot.lane.b32.xlu0 %v3865_v28, %s7364_s30  ;;  %v4074_v27 = vshll.u32 %v6916_v13, 16  ;;  %v4062_v28 = vshrl.u32 %v6915_v16, 16 }
 0x2e6   : > { %v4091_v47 = vrot.slane %v4089_v31, 4  ;;  %v4094_v48 = vrot.slane %v4092_v32, 5 }
 0x2e7   : > { %v3368_v37 = vpop.permute.xlu1 %3367  ;;  %v3366_v38 = vpop.permute.xlu0 %3365 }
 0x2e8   : > { %3384 = vst.msk [vmem:[#allocation2 + $0x34] sm:$0x7] %vm460_vm4, %v3368_v37  ;;  %3383 = vst.msk [vmem:[#allocation2 + $0x30] sm:$0x7] %vm460_vm4, %v3366_v38  ;;  %v4059_v37 = vor.u32 %v4058_v22, %v4055_v21  ;;  %v4050_v38 = vor.u32 %v4049_v24, %v4046_v23  ;;  %v4095_v63 = vor.u32 %v4094_v48, %v4091_v47 }
 0x2e9   : > { %3903 = vrot.lane.b32.xlu1 %v3892_v33, %s7364_s30  ;;  %3901 = vrot.lane.b32.xlu0 %v3883_v34, %s7364_s30  ;;  %v4080_v33 = vshrl.u32 %v6917_v20, 16  ;;  %v4083_v34 = vshll.u32 %v6917_v20, 16 }
 0x2ea   : > { %v4096_v21 = vrot.slane %v4095_v63, 4 }
 0x2eb   : > { %v3372_v43 = vpop.permute.xlu1 %3371  ;;  %v3370_v44 = vpop.permute.xlu0 %3369 }
 0x2ec   : > { %3386 = vst.msk [vmem:[#allocation2 + $0x3c] sm:$0x7] %vm460_vm4, %v3372_v43  ;;  %3385 = vst.msk [vmem:[#allocation2 + $0x38] sm:$0x7] %vm460_vm4, %v3370_v44  ;;  %v4076_v43 = vrot.slane %v4074_v27, 5  ;;  %v4064_v44 = vrot.slane %v4062_v28, 4 }
 0x2ed   : > { %3943 = vrot.lane.b32.xlu1 %v6896_v39, %s7365_s4  ;;  %3941 = vrot.lane.b32.xlu0 %v6895_v40, %s7365_s4  ;;  %v6920_v39 = vld [vmem:[%s7411_s17 + $0x2c] sm:$0xf]  ;;  %v6919_v40 = vld [vmem:[%s7411_s17 + $0x28] sm:$0xf] }
 0x2ef   : > { %v3376_v49 = vpop.permute.xlu1 %3375  ;;  %v3374_v50 = vpop.permute.xlu0 %3373 }
 0x2f0   : > { %3388 = vst.msk [vmem:[#allocation2 + $0x44] sm:$0x7] %vm460_vm4, %v3376_v49  ;;  %3387 = vst.msk [vmem:[#allocation2 + $0x40] sm:$0x7] %vm460_vm4, %v3374_v50  ;;  %v4082_v49 = vrot.slane %v4080_v33, 4  ;;  %v4085_v50 = vrot.slane %v4083_v34, 5 }
 0x2f1   : > { %3947 = vrot.lane.b32.xlu1 %v6898_v45, %s7365_s4  ;;  %3945 = vrot.lane.b32.xlu0 %v6897_v46, %s7365_s4  ;;  %v4067_v45 = vrot.slane %v4065_v29, 5  ;;  %v6911_v46 = vld [vmem:[%s7411_s17 + $0x38] sm:$0x7] }
 0x2f2   : > { %v4086_v0 = vor.u32 %v4085_v50, %v4082_v49 }
 0x2f3   : > { %v3404_v53 = vpop.permute.xlu1 %3403  ;;  %v3402_v54 = vpop.permute.xlu0 %3401 }
 0x2f4   : > { %3420 = vst.msk [vmem:[#allocation2 + $0x34] sm:$0x7] %vm498_vm5, %v3404_v53  ;;  %3419 = vst.msk [vmem:[#allocation2 + $0x30] sm:$0x7] %vm498_vm5, %v3402_v54  ;;  %v4137_v53 = vshrl.u32 %v6920_v39, 16  ;;  %v4140_v54 = vshll.u32 %v6920_v39, 16 }
 0x2f5   : > { %3951 = vrot.lane.b32.xlu1 %v6900_v51, %s7365_s4  ;;  %3949 = vrot.lane.b32.xlu0 %v6899_v52, %s7365_s4  ;;  %v4087_v22 = vrot.slane %v4086_v0, 4 }
 0x2f7   : > { %v3408_v57 = vpop.permute.xlu1 %3407  ;;  %v3406_v58 = vpop.permute.xlu0 %3405 }
 0x2f8   : > { %3422 = vst.msk [vmem:[#allocation2 + $0x3c] sm:$0x7] %vm498_vm5, %v3408_v57  ;;  %3421 = vst.msk [vmem:[#allocation2 + $0x38] sm:$0x7] %vm498_vm5, %v3406_v58  ;;  %v4060_v57 = vrot.slane %v4059_v37, 4  ;;  %v4051_v58 = vrot.slane %v4050_v38, 4 }
 0x2f9   : > { %3979 = vrot.lane.b32.xlu1 %v6902_v55, %s7366_s5  ;;  %3977 = vrot.lane.b32.xlu0 %v6901_v56, %s7366_s5  ;;  %v4128_v55 = vshrl.u32 %v6919_v40, 16  ;;  %v4131_v56 = vshll.u32 %v6919_v40, 16 }
 0x2fb   : > { %v3412_v61 = vpop.permute.xlu1 %3411  ;;  %v3410_v62 = vpop.permute.xlu0 %3409  ;;  %v4130_v5 = vrot.slane %v4128_v55, 4  ;;  %v4133_v6 = vrot.slane %v4131_v56, 5 }
 0x2fc   : > { %3424 = vst.msk [vmem:[#allocation2 + $0x44] sm:$0x7] %vm498_vm5, %v3412_v61  ;;  %3423 = vst.msk [vmem:[#allocation2 + $0x40] sm:$0x7] %vm498_vm5, %v3410_v62  ;;  %v6922_v61 = vld [vmem:[%s7411_s17 + $0x34] sm:$0xf] }
 0x2fd   : > { %3983 = vrot.lane.b32.xlu1 %v6904_v59, %s7366_s5  ;;  %3981 = vrot.lane.b32.xlu0 %v6903_v60, %s7366_s5  ;;  %v4077_v59 = vor.u32 %v4076_v43, %v4073_v42  ;;  %v4068_v60 = vor.u32 %v4067_v45, %v4064_v44  ;;  %v6921_v62 = vld [vmem:[%s7411_s17 + $0x30] sm:$0xf]  ;;  %v4155_v7 = vshrl.u32 %v6922_v61, 16  ;;  %v4158_v9 = vshll.u32 %v6922_v61, 16 }
 0x2fe   : > { %v4134_v24 = vor.u32 %v4133_v6, %v4130_v5 }
 0x2ff   : > { %v3440_v3 = vpop.permute.xlu1 %3439  ;;  %v3438_v4 = vpop.permute.xlu0 %3437  ;;  %v4078_v13 = vrot.slane %v4077_v59, 4  ;;  %v4069_v16 = vrot.slane %v4068_v60, 4  ;;  %v4160_v26 = vrot.slane %v4158_v9, 5  ;;  %v6928_v59 = vld [vmem:[%s7411_s17 + $0x14] sm:$0xe] }
 0x300   : > { %3456 = vst.msk [vmem:[#allocation2 + $0x34] sm:$0x7] %vm536_vm6, %v3440_v3  ;;  %3455 = vst.msk [vmem:[#allocation2 + $0x30] sm:$0x7] %vm536_vm6, %v3438_v4  ;;  %v4139_v3 = vrot.slane %v4137_v53, 4  ;;  %v4142_v4 = vrot.slane %v4140_v54, 5 }
 0x301   : > { %3987 = vrot.lane.b32.xlu1 %v6906_v1, %s7366_s5  ;;  %3985 = vrot.lane.b32.xlu0 %v6905_v2, %s7366_s5  ;;  %v6926_v53 = vld [vmem:[%s7411_s17 + $0xc] sm:$0xe]  ;;  %v6925_v54 = vld [vmem:[%s7411_s17 + $0x8] sm:$0xe]  ;;  %v6934_v63 = vrot.slane %v6928_v59, 9 }
 0x302   : > { %v4143_v23 = vor.u32 %v4142_v4, %v4139_v3  ;;  %v6927_v60 = vld [vmem:[%s7411_s17 + $0x10] sm:$0xe] }
 0x303   : > { %v3444_v17 = vpop.permute.xlu1 %3443  ;;  %v3442_v18 = vpop.permute.xlu0 %3441  ;;  %v6933_v0 = vrot.slane %v6927_v60, 9 }
 0x304   : > { %3458 = vst.msk [vmem:[#allocation2 + $0x3c] sm:$0x7] %vm536_vm6, %v3444_v17  ;;  %3457 = vst.msk [vmem:[#allocation2 + $0x38] sm:$0x7] %vm536_vm6, %v3442_v18  ;;  %v6924_v17 = vld [vmem:[%s7411_s17 + $0x3c] sm:$0xf] }
 0x305   : > { %4015 = vrot.lane.b32.xlu1 %v6908_v10, %s7367_s6  ;;  %4013 = vrot.lane.b32.xlu0 %v6907_v12, %s7367_s6  ;;  %v4146_v10 = vshrl.u32 %v6921_v62, 16  ;;  %v4149_v12 = vshll.u32 %v6921_v62, 16  ;;  %v6923_v18 = vld [vmem:[%s7411_s17 + $0x38] sm:$0xf]  ;;  %v4173_v29 = vshrl.u32 %v6924_v17, 16 }
 0x306   : > { %v4164_v31 = vshrl.u32 %v6923_v18, 16  ;;  %v4167_v32 = vshll.u32 %v6923_v18, 16  ;;  %v6939_v18 = vld [vmem:[%s7411_s17 + $0x50] sm:$0x7] }
 0x307   : > { %v3448_v35 = vpop.permute.xlu1 %3447  ;;  %v3446_v36 = vpop.permute.xlu0 %3445  ;;  %v4148_v27 = vrot.slane %v4146_v10, 4  ;;  %v4151_v28 = vrot.slane %v4149_v12, 5  ;;  %v4175_v39 = vrot.slane %v4173_v29, 4  ;;  %v6938_v10 = vld [vmem:[%s7411_s17 + $0x4c] sm:$0x7] }
 0x308   : > { %3460 = vst.msk [vmem:[#allocation2 + $0x44] sm:$0x7] %vm536_vm6, %v3448_v35  ;;  %3459 = vst.msk [vmem:[#allocation2 + $0x40] sm:$0x7] %vm536_vm6, %v3446_v36  ;;  %v4144_v35 = vrot.slane %v4143_v23, 4  ;;  %v4135_v36 = vrot.slane %v4134_v24, 4 }
 0x309   : > { %4019 = vrot.lane.b32.xlu1 %v6910_v25, %s7367_s6  ;;  %4017 = vrot.lane.b32.xlu0 %v6909_v30, %s7367_s6  ;;  %v4157_v25 = vrot.slane %v4155_v7, 4  ;;  %v4176_v30 = vshll.u32 %v6924_v17, 16  ;;  %v4152_v38 = vor.u32 %v4151_v28, %v4148_v27  ;;  %v4169_v42 = vrot.slane %v4167_v32, 5  ;;  %v6937_v12 = vld [vmem:[%s7411_s17 + $0x48] sm:$0x7] }
 0x30a   : > { %v6940_v17 = vld [vmem:[%s7411_s17 + $0x54] sm:$0x7]  ;;  %v6942_v23 = vld [vmem:[%s7411_s17 + $0x5c] sm:$0x7]  ;;  %v6941_v24 = vld [vmem:[%s7411_s17 + $0x58] sm:$0x7] }
 0x30b   : > { %v3524_v51 = vpop.permute.xlu1 %3523  ;;  %v3522_v52 = vpop.permute.xlu0 %3521  ;;  %v4161_v37 = vor.u32 %v4160_v26, %v4157_v25  ;;  %v4178_v40 = vrot.slane %v4176_v30, 5  ;;  %v6979_v32 = vld [vmem:[%s7411_s17 + $0x40] sm:$0xf] }
 0x30c   : > { %3540 = vst.msk [vmem:[#allocation2 + $0x34] sm:$0x7] %vm621_vm7, %v3524_v51  ;;  %3539 = vst.msk [vmem:[#allocation2 + $0x30] sm:$0x7] %vm621_vm7, %v3522_v52 }
 0x30d   : > { %4023 = vrot.lane.b32.xlu1 %v6912_v41, %s7367_s6  ;;  %4021 = vrot.lane.b32.xlu0 %v6911_v46, %s7367_s6  ;;  %v4166_v41 = vrot.slane %v4164_v31, 4  ;;  %v4162_v45 = vrot.slane %v4161_v37, 4  ;;  %v4153_v46 = vrot.slane %v4152_v38, 4  ;;  %v4179_v47 = vor.u32 %v4178_v40, %v4175_v39  ;;  %v6980_v31 = vld [vmem:[%s7411_s17 + $0x44] sm:$0xf] }
 0x30f   : > { %v3528_v1 = vpop.permute.xlu1 %3527  ;;  %v3526_v2 = vpop.permute.xlu0 %3525  ;;  %v4170_v48 = vor.u32 %v4169_v42, %v4166_v41  ;;  %v4180_v51 = vrot.slane %v4179_v47, 4  ;;  %v4572_v41 = vshrl.u32 %v6980_v31, 16  ;;  %v4575_v42 = vshll.u32 %v6980_v31, 16  ;;  %v6945_v47 = vld [vmem:[%s7411_s17 + $0x70] sm:$0x7] }
 0x310   : > { %3542 = vst.msk [vmem:[#allocation2 + $0x3c] sm:$0x7] %vm621_vm7, %v3528_v1  ;;  %3541 = vst.msk [vmem:[#allocation2 + $0x38] sm:$0x7] %vm621_vm7, %v3526_v2  ;;  %v6930_v1 = vld [vmem:[%s7411_s17 + $0x1c] sm:$0xe] }
 0x311   : > { %4099 = vrot.lane.b32.xlu1 %v4060_v57, %s7368_s7  ;;  %4097 = vrot.lane.b32.xlu0 %v4051_v58, %s7368_s7  ;;  %v4171_v52 = vrot.slane %v4170_v48, 4  ;;  %v6932_v57 = vrot.slane %v6926_v53, 9  ;;  %v6931_v58 = vrot.slane %v6925_v54, 9  ;;  %v6929_v2 = vld [vmem:[%s7411_s17 + $0x18] sm:$0xe]  ;;  %v6936_v5 = vrot.slane %v6930_v1, 9 }
 0x312   : > { %v6935_v6 = vrot.slane %v6929_v2, 9  ;;  %v6986_v48 = vld [vmem:[%s7411_s17 + $0x64] sm:$0xf]  ;;  %v4574_v54 = vrot.slane %v4572_v41, 4 }
 0x313   : > { %v3532_v19 = vpop.permute.xlu1 %3531  ;;  %v3530_v20 = vpop.permute.xlu0 %3529  ;;  %v4656_v59 = vshrl.u32 %v6986_v48, 16  ;;  %v4659_v60 = vshll.u32 %v6986_v48, 16 }
 0x314   : > { %3544 = vst.msk [vmem:[#allocation2 + $0x44] sm:$0x7] %vm621_vm7, %v3532_v19  ;;  %3543 = vst.msk [vmem:[#allocation2 + $0x40] sm:$0x7] %vm621_vm7, %v3530_v20 }
 0x315   : > { %4103 = vrot.lane.b32.xlu1 %v4078_v13, %s7368_s7  ;;  %4101 = vrot.lane.b32.xlu0 %v4069_v16, %s7368_s7 }
 0x317   : > { %v3608_v33 = vpop.permute.xlu1 %3607  ;;  %v3606_v34 = vpop.permute.xlu0 %3605 }
 0x318   : > { %3624 = vst.msk [vmem:[#allocation2 + $0x34] sm:$0x7] %vm706_vm8, %v3608_v33  ;;  %3623 = vst.msk [vmem:[#allocation2 + $0x30] sm:$0x7] %vm706_vm8, %v3606_v34  ;;  %v6944_v33 = vld [vmem:[%s7411_s17 + $0x6c] sm:$0x7] }
 0x319   : > { %4107 = vrot.lane.b32.xlu1 %v4096_v21, %s7368_s7  ;;  %4105 = vrot.lane.b32.xlu0 %v4087_v22, %s7368_s7  ;;  %v6950_v21 = vld [vmem:[%s7411_s17 + $0x4c] sm:$0xf]  ;;  %v6949_v22 = vld [vmem:[%s7411_s17 + $0x48] sm:$0xf] }
 0x31a   : > { %v4343_v27 = vshrl.u32 %v6950_v21, 16  ;;  %v4346_v28 = vshll.u32 %v6950_v21, 16  ;;  %v4334_v29 = vshrl.u32 %v6949_v22, 16  ;;  %v4337_v30 = vshll.u32 %v6949_v22, 16  ;;  %v6943_v34 = vld [vmem:[%s7411_s17 + $0x68] sm:$0x7] }
 0x31b   : > { %v3612_v43 = vpop.permute.xlu1 %3611  ;;  %v3610_v44 = vpop.permute.xlu0 %3609 }
 0x31c   : > { %3626 = vst.msk [vmem:[#allocation2 + $0x3c] sm:$0x7] %vm706_vm8, %v3612_v43  ;;  %3625 = vst.msk [vmem:[#allocation2 + $0x38] sm:$0x7] %vm706_vm8, %v3610_v44  ;;  %v4345_v37 = vrot.slane %v4343_v27, 4  ;;  %v4348_v38 = vrot.slane %v4346_v28, 5 }
 0x31d   : > { %4183 = vrot.lane.b32.xlu1 %v4144_v35, %s7369_s8  ;;  %4181 = vrot.lane.b32.xlu0 %v4135_v36, %s7369_s8  ;;  %v4336_v39 = vrot.slane %v4334_v29, 4  ;;  %v4339_v40 = vrot.slane %v4337_v30, 5  ;;  %v4563_v43 = vshrl.u32 %v6979_v32, 16  ;;  %v4566_v44 = vshll.u32 %v6979_v32, 16  ;;  %v6992_v27 = vld [vmem:[%s7411_s17 + $0x44] sm:$0xe] }
 0x31e   : > { %v6991_v28 = vld [vmem:[%s7411_s17 + $0x40] sm:$0xe] }
 0x31f   : > { %v3616_v49 = vpop.permute.xlu1 %3615  ;;  %v3614_v50 = vpop.permute.xlu0 %3613  ;;  %v4340_v53 = vor.u32 %v4339_v40, %v4336_v39  ;;  %v7004_v39 = vld [vmem:[%s7411_s17 + $0x64] sm:$0xe]  ;;  %v7003_v40 = vld [vmem:[%s7411_s17 + $0x60] sm:$0xe] }
 0x320   : > { %3628 = vst.msk [vmem:[#allocation2 + $0x44] sm:$0x7] %vm706_vm8, %v3616_v49  ;;  %3627 = vst.msk [vmem:[#allocation2 + $0x40] sm:$0x7] %vm706_vm8, %v3614_v50  ;;  %v6985_v49 = vld [vmem:[%s7411_s17 + $0x60] sm:$0xf] }
 0x321   : > { %4187 = vrot.lane.b32.xlu1 %v4162_v45, %s7369_s8  ;;  %4185 = vrot.lane.b32.xlu0 %v4153_v46, %s7369_s8  ;;  %v6946_v45 = vld [vmem:[%s7411_s17 + $0x74] sm:$0x7]  ;;  %v6974_v46 = vld [vmem:[%s7411_s17 + $0x64] sm:$0x7] }
 0x323   : > { %v3656_v55 = vpop.permute.xlu1 %3655  ;;  %v3654_v56 = vpop.permute.xlu0 %3653 }
 0x324   : > { %3672 = vst.msk [vmem:[#allocation2 + $0x34] sm:$0x7] %vm755_vm9, %v3656_v55  ;;  %3671 = vst.msk [vmem:[#allocation2 + $0x30] sm:$0x7] %vm755_vm9, %v3654_v56  ;;  %v4577_v55 = vrot.slane %v4575_v42, 5  ;;  %v4565_v56 = vrot.slane %v4563_v43, 4 }
 0x325   : > { %4191 = vrot.lane.b32.xlu1 %v4180_v51, %s7369_s8  ;;  %4189 = vrot.lane.b32.xlu0 %v4171_v52, %s7369_s8  ;;  %v4349_v52 = vor.u32 %v4348_v38, %v4345_v37  ;;  %v7028_v37 = vld [vmem:[%s7411_s17 + $0x28] sm:$0xf]  ;;  %v7027_v38 = vld [vmem:[%s7411_s17 + $0x24] sm:$0xf] }
 0x326   : > { %v4959_v48 = vshll.u32 %v7028_v37, 16 }
 0x327   : > { %v3660_v61 = vpop.permute.xlu1 %3659  ;;  %v3658_v62 = vpop.permute.xlu0 %3657 }
 0x328   : > { %3674 = vst.msk [vmem:[#allocation2 + $0x3c] sm:$0x7] %vm755_vm9, %v3660_v61  ;;  %3673 = vst.msk [vmem:[#allocation2 + $0x38] sm:$0x7] %vm755_vm9, %v3658_v62  ;;  %v4647_v61 = vshrl.u32 %v6985_v49, 16  ;;  %v4650_v62 = vshll.u32 %v6985_v49, 16 }
 0x329   : > { %4231 = vrot.lane.b32.xlu1 %v6932_v57, %s7370_s9  ;;  %4229 = vrot.lane.b32.xlu0 %v6931_v58, %s7370_s9  ;;  %v4568_v57 = vrot.slane %v4566_v44, 5  ;;  %v6973_v58 = vld [vmem:[%s7411_s17 + $0x60] sm:$0x7]  ;;  %v4947_v49 = vshrl.u32 %v7027_v38, 16 }
 0x32b   : > { %v3664_v3 = vpop.permute.xlu1 %3663  ;;  %v3662_v4 = vpop.permute.xlu0 %3661 }
 0x32c   : > { %3676 = vst.msk [vmem:[#allocation2 + $0x44] sm:$0x7] %vm755_vm9, %v3664_v3  ;;  %3675 = vst.msk [vmem:[#allocation2 + $0x40] sm:$0x7] %vm755_vm9, %v3662_v4  ;;  %v4350_v3 = vrot.slane %v4349_v52, 4  ;;  %v4341_v4 = vrot.slane %v4340_v53, 4 }
 0x32d   : > { %4235 = vrot.lane.b32.xlu1 %v6934_v63, %s7370_s9  ;;  %4233 = vrot.lane.b32.xlu0 %v6933_v0, %s7370_s9  ;;  %v6948_v63 = vld [vmem:[%s7411_s17 + $0x7c] sm:$0x7]  ;;  %v6947_v0 = vld [vmem:[%s7411_s17 + $0x78] sm:$0x7]  ;;  %v7009_v52 = vrot.slane %v7003_v40, 9 }
 0x32e   : > { %v6982_v53 = vld [vmem:[%s7411_s17 + $0x4c] sm:$0xf] }
 0x32f   : > { %v3692_v7 = vpop.permute.xlu1 %3691  ;;  %v3690_v9 = vpop.permute.xlu0 %3689 }
 0x330   : > { %3708 = vst.msk [vmem:[#allocation2 + $0x34] sm:$0x7] %vm793_vm10, %v3692_v7  ;;  %3707 = vst.msk [vmem:[#allocation2 + $0x30] sm:$0x7] %vm793_vm10, %v3690_v9  ;;  %v4658_v7 = vrot.slane %v4656_v59, 4  ;;  %v4661_v9 = vrot.slane %v4659_v60, 5 }
 0x331   : > { %4239 = vrot.lane.b32.xlu1 %v6936_v5, %s7370_s9  ;;  %4237 = vrot.lane.b32.xlu0 %v6935_v6, %s7370_s9  ;;  %v4578_v5 = vor.u32 %v4577_v55, %v4574_v54  ;;  %v4569_v6 = vor.u32 %v4568_v57, %v4565_v56  ;;  %v6981_v54 = vld [vmem:[%s7411_s17 + $0x48] sm:$0xf]  ;;  %v4961_v60 = vrot.slane %v4959_v48, 5 }
 0x333   : > { %v3696_v13 = vpop.permute.xlu1 %3695  ;;  %v3694_v16 = vpop.permute.xlu0 %3693 }
 0x334   : > { %3710 = vst.msk [vmem:[#allocation2 + $0x3c] sm:$0x7] %vm793_vm10, %v3696_v13  ;;  %3709 = vst.msk [vmem:[#allocation2 + $0x38] sm:$0x7] %vm793_vm10, %v3694_v16 }
 0x335   : > { %4268 = vrot.lane.b32.xlu1 %v6938_v10, %s7371_s10  ;;  %4266 = vrot.lane.b32.xlu0 %v6937_v12, %s7371_s10  ;;  %v4649_v10 = vrot.slane %v4647_v61, 4  ;;  %v4652_v12 = vrot.slane %v4650_v62, 5  ;;  %v4949_v61 = vrot.slane %v4947_v49, 4  ;;  %v7034_v49 = vld [vmem:[%s7411_s17 + $0x8] sm:$0xe] }
 0x337   : > { %v3700_v19 = vpop.permute.xlu1 %3699  ;;  %v3698_v20 = vpop.permute.xlu0 %3697 }
 0x338   : > { %3712 = vst.msk [vmem:[#allocation2 + $0x44] sm:$0x7] %vm793_vm10, %v3700_v19  ;;  %3711 = vst.msk [vmem:[#allocation2 + $0x40] sm:$0x7] %vm793_vm10, %v3698_v20  ;;  %v4662_v19 = vor.u32 %v4661_v9, %v4658_v7  ;;  %v4653_v20 = vor.u32 %v4652_v12, %v4649_v10 }
 0x339   : > { %4272 = vrot.lane.b32.xlu1 %v6940_v17, %s7371_s10  ;;  %4270 = vrot.lane.b32.xlu0 %v6939_v18, %s7371_s10  ;;  %v4579_v17 = vrot.slane %v4578_v5, 4  ;;  %v4570_v18 = vrot.slane %v4569_v6, 4  ;;  %v7015_v5 = vld [vmem:[%s7411_s17 + $0x24] sm:$0x7] }
 0x33b   : > { %v3728_v25 = vpop.permute.xlu1 %3727  ;;  %v3726_v26 = vpop.permute.xlu0 %3725 }
 0x33c   : > { %3744 = vst.msk [vmem:[#allocation2 + $0x34] sm:$0x7] %vm9408_vm11, %v3728_v25  ;;  %vm9412_vm11 = vcmask 26624   ;;  %v4663_v25 = vrot.slane %v4662_v19, 4 }
 0x33d   : > { %3743 = vst.msk [vmem:[#allocation2 + $0x30] sm:$0x7] %vm9409_vm15, %v3726_v26  ;;  %4276 = vrot.lane.b32.xlu1 %v6942_v23, %s7371_s10  ;;  %4274 = vrot.lane.b32.xlu0 %v6941_v24, %s7371_s10  ;;  %vm9413_vm15 = vmmov %vm9411_vm12  ;;  %v7022_v23 = vld [vmem:[%s7411_s17 + $0x8] sm:$0xf]  ;;  %v7021_v24 = vld [vmem:[%s7411_s17 + $0x4] sm:$0xf] }
 0x33e   : > { %4551 = vst.msk [vmem:[#allocation2 + $0x4c] sm:$0x7] %vm9412_vm11, %v6974_v46  ;;  %v4654_v26 = vrot.slane %v4653_v20, 4  ;;  %v4872_v31 = vshrl.u32 %v7022_v23, 16  ;;  %v4875_v32 = vshll.u32 %v7022_v23, 16 }
 0x33f   : > { %v3732_v35 = vpop.permute.xlu1 %3731  ;;  %v3730_v36 = vpop.permute.xlu0 %3729 }
 0x340   : > { %3746 = vst.msk [vmem:[#allocation2 + $0x3c] sm:$0x7] %vm9410_vm13, %v3732_v35  ;;  %vm9414_vm13 = vmmov %vm9411_vm12  ;;  %v6998_v35 = vrot.slane %v6992_v27, 9  ;;  %v4874_v43 = vrot.slane %v4872_v31, 4  ;;  %v4877_v44 = vrot.slane %v4875_v32, 5 }
 0x341   : > { %3745 = vst.msk [vmem:[#allocation2 + $0x38] sm:$0x7] %vm9411_vm12, %v3730_v36  ;;  %4305 = vrot.lane.b32.xlu1 %v6944_v33, %s7372_s11  ;;  %4303 = vrot.lane.b32.xlu0 %v6943_v34, %s7372_s11  ;;  %vm9415_vm12 = vmmov %vm9412_vm11  ;;  %vm9416_vm11 = vcmask 420224   ;;  %v4863_v33 = vshrl.u32 %v7021_v24, 16  ;;  %v4866_v34 = vshll.u32 %v7021_v24, 16  ;;  %v6997_v36 = vrot.slane %v6991_v28, 9 }
 0x342   : > { %4550 = vst.msk [vmem:[#allocation2 + $0x48] sm:$0x7] %vm9415_vm12, %v6973_v58  ;;  %vm9419_vm12 = vmmov %vm9416_vm11  ;;  %v4878_v57 = vor.u32 %v4877_v44, %v4874_v43 }
 0x343   : > { %v3736_v50 = vpop.permute.xlu1 %3735  ;;  %v3734_v51 = vpop.permute.xlu0 %3733  ;;  %v4868_v46 = vrot.slane %v4866_v34, 5  ;;  %v6987_v34 = vld [vmem:[%s7411_s17 + $0x68] sm:$0xf] }
 0x344   : > { %3748 = vst.msk [vmem:[#allocation2 + $0x44] sm:$0x7] %vm9413_vm15, %v3736_v50  ;;  %vm9417_vm15 = vmmov %vm9416_vm11  ;;  %v4950_v50 = vshll.u32 %v7027_v38, 16  ;;  %v4879_v9 = vrot.slane %v4878_v57, 4  ;;  %v4665_v44 = vshrl.u32 %v6987_v34, 16 }
 0x345   : > { %3747 = vst.msk [vmem:[#allocation2 + $0x40] sm:$0x7] %vm9414_vm13, %v3734_v51  ;;  %4309 = vrot.lane.b32.xlu1 %v6946_v45, %s7372_s11  ;;  %4307 = vrot.lane.b32.xlu0 %v6945_v47, %s7372_s11  ;;  %vm9418_vm13 = vmmov %vm9416_vm11  ;;  %v4865_v45 = vrot.slane %v4863_v33, 4  ;;  %v4956_v47 = vshrl.u32 %v7028_v37, 16  ;;  %v7010_v51 = vrot.slane %v7004_v39, 9 }
 0x346   : > { %v4952_v62 = vrot.slane %v4950_v50, 5  ;;  %v7033_v50 = vld [vmem:[%s7411_s17 + $0x4] sm:$0xe]  ;;  %v4667_v57 = vrot.slane %v4665_v44, 4  ;;  %v6995_v44 = vld [vmem:[%s7411_s17 + $0x50] sm:$0xe] }
 0x347   : > { %v3812_v1 = vpop.permute.xlu1 %3811  ;;  %v3810_v2 = vpop.permute.xlu0 %3809  ;;  %v4869_v58 = vor.u32 %v4868_v46, %v4865_v45  ;;  %v4958_v59 = vrot.slane %v4956_v47, 4  ;;  %v4668_v45 = vshll.u32 %v6987_v34, 16  ;;  %v6977_v46 = vld [vmem:[%s7411_s17 + $0x70] sm:$0x7]  ;;  %v6993_v34 = vld [vmem:[%s7411_s17 + $0x48] sm:$0xe] }
 0x348   : > { %3828 = vst.msk [vmem:[#allocation2 + $0x34] sm:$0x7] %vm9416_vm11, %v3812_v1  ;;  %v4581_v1 = vshrl.u32 %v6981_v54, 16 }
 0x349   : > { %3827 = vst.msk [vmem:[#allocation2 + $0x30] sm:$0x7] %vm9417_vm15, %v3810_v2  ;;  %4313 = vrot.lane.b32.xlu1 %v6948_v63, %s7372_s11  ;;  %4311 = vrot.lane.b32.xlu0 %v6947_v0, %s7372_s11  ;;  %vm9420_vm15 = vmmov %vm9416_vm11  ;;  %v4590_v63 = vshrl.u32 %v6982_v53, 16  ;;  %v4593_v0 = vshll.u32 %v6982_v53, 16  ;;  %v4584_v2 = vshll.u32 %v6981_v54, 16  ;;  %v4870_v10 = vrot.slane %v4869_v58, 4 }
 0x34a   : > { %v4962_v12 = vor.u32 %v4961_v60, %v4958_v59  ;;  %v4670_v58 = vrot.slane %v4668_v45, 5  ;;  %v7040_v59 = vrot.slane %v7034_v49, 9  ;;  %v7039_v60 = vrot.slane %v7033_v50, 9  ;;  %v7058_v49 = vld [vmem:[%s7411_s17 + $0x68] sm:$0x7] }
 0x34b   : > { %v3816_v13 = vpop.permute.xlu1 %3815  ;;  %v3814_v16 = vpop.permute.xlu0 %3813  ;;  %v4592_v19 = vrot.slane %v4590_v63, 4  ;;  %v4595_v20 = vrot.slane %v4593_v0, 5  ;;  %v7057_v50 = vld [vmem:[%s7411_s17 + $0x64] sm:$0x7] }
 0x34c   : > { %3830 = vst.msk [vmem:[#allocation2 + $0x3c] sm:$0x7] %vm9418_vm13, %v3816_v13  ;;  %vm9421_vm13 = vcmask 453024   ;;  %v4953_v13 = vor.u32 %v4952_v62, %v4949_v61  ;;  %v6990_v61 = vld [vmem:[%s7411_s17 + $0x74] sm:$0xf] }
 0x34d   : > { %3829 = vst.msk [vmem:[#allocation2 + $0x38] sm:$0x7] %vm9419_vm12, %v3814_v16  ;;  %4389 = vrot.lane.b32.xlu1 %v4350_v3, %s9354_s14  ;;  %4387 = vrot.lane.b32.xlu0 %v4341_v4, %s9354_s14  ;;  %vm9422_vm12 = vmmov %vm9421_vm13  ;;  %v6976_v3 = vld [vmem:[%s7411_s17 + $0x6c] sm:$0x7]  ;;  %v7016_v4 = vld [vmem:[%s7411_s17 + $0x28] sm:$0x7]  ;;  %v4596_v32 = vor.u32 %v4595_v20, %v4592_v19 }
 0x34e   : > { %v6984_v16 = vld [vmem:[%s7411_s17 + $0x54] sm:$0xf]  ;;  %v4954_v31 = vrot.slane %v4953_v13, 4  ;;  %v6989_v62 = vld [vmem:[%s7411_s17 + $0x70] sm:$0xf] }
 0x34f   : > { %v3820_v21 = vpop.permute.xlu1 %3819  ;;  %v3818_v22 = vpop.permute.xlu0 %3817  ;;  %v4597_v47 = vrot.slane %v4596_v32, 4 }
 0x350   : > { %3832 = vst.msk [vmem:[#allocation2 + $0x44] sm:$0x7] %vm9416_vm11, %v3820_v21  ;;  %vm9423_vm11 = vmmov %vm9422_vm12  ;;  %v4583_v21 = vrot.slane %v4581_v1, 4 }
 0x351   : > { %3831 = vst.msk [vmem:[#allocation2 + $0x40] sm:$0x7] %vm9420_vm15, %v3818_v22  ;;  %4618 = vrot.lane.b32.xlu1 %v4579_v17, %s7352_s18  ;;  %4616 = vrot.lane.b32.xlu0 %v4570_v18, %s7352_s18  ;;  %vm9424_vm15 = vmmov %vm9423_vm11  ;;  %v6983_v17 = vld [vmem:[%s7411_s17 + $0x50] sm:$0xf]  ;;  %v6975_v18 = vld [vmem:[%s7411_s17 + $0x68] sm:$0x7] }
 0x352   : > { %v4586_v22 = vrot.slane %v4584_v2, 5  ;;  %v4599_v27 = vshrl.u32 %v6983_v17, 16  ;;  %v4602_v28 = vshll.u32 %v6983_v17, 16 }
 0x353   : > { %v3896_v29 = vpop.permute.xlu1 %3895  ;;  %v3894_v30 = vpop.permute.xlu0 %3893 }
 0x354   : > { %3912 = vst.msk [vmem:[#allocation2 + $0x34] sm:$0x7] %vm9421_vm13, %v3896_v29  ;;  %vm9425_vm13 = vmmov %vm9423_vm11  ;;  %v6988_v29 = vld [vmem:[%s7411_s17 + $0x6c] sm:$0xf]  ;;  %v4587_v33 = vor.u32 %v4586_v22, %v4583_v21  ;;  %v4601_v40 = vrot.slane %v4599_v27, 4 }
 0x355   : > { %3911 = vst.msk [vmem:[#allocation2 + $0x30] sm:$0x7] %vm9422_vm12, %v3894_v30  ;;  %4702 = vrot.lane.b32.xlu1 %v4663_v25, %s7353_s19  ;;  %4700 = vrot.lane.b32.xlu0 %v4654_v26, %s7353_s19  ;;  %vm9426_vm12 = vmmov %vm9423_vm11  ;;  %v4608_v25 = vshrl.u32 %v6984_v16, 16  ;;  %v4611_v26 = vshll.u32 %v6984_v16, 16  ;;  %v4963_v30 = vrot.slane %v4962_v12, 4  ;;  %v4677_v43 = vshll.u32 %v6988_v29, 16 }
 0x356   : > { %v4588_v48 = vrot.slane %v4587_v33, 4  ;;  %v7046_v21 = vld [vmem:[%s7411_s17 + $0x28] sm:$0xe]  ;;  %v7045_v22 = vld [vmem:[%s7411_s17 + $0x24] sm:$0xe] }
 0x357   : > { %v3900_v41 = vpop.permute.xlu1 %3899  ;;  %v3898_v42 = vpop.permute.xlu0 %3897  ;;  %v4610_v38 = vrot.slane %v4608_v25, 4  ;;  %v4613_v39 = vrot.slane %v4611_v26, 5  ;;  %v7052_v25 = vrot.slane %v7046_v21, 9  ;;  %v7051_v26 = vrot.slane %v7045_v22, 9  ;;  %v6994_v33 = vld [vmem:[%s7411_s17 + $0x4c] sm:$0xe] }
 0x358   : > { %3914 = vst.msk [vmem:[#allocation2 + $0x3c] sm:$0x7] %vm9423_vm11, %v3900_v41  ;;  %vm9427_vm11 = vcmask 26624   ;;  %v4604_v41 = vrot.slane %v4602_v28, 5 }
 0x359   : > { %3913 = vst.msk [vmem:[#allocation2 + $0x38] sm:$0x7] %vm9424_vm15, %v3898_v42  ;;  %4750 = vrot.lane.b32.xlu1 %v6998_v35, %s7354_s20  ;;  %4748 = vrot.lane.b32.xlu0 %v6997_v36, %s7354_s20  ;;  %vm9428_vm15 = vcmask 485824   ;;  %v6978_v35 = vld [vmem:[%s7411_s17 + $0x74] sm:$0x7]  ;;  %v4674_v42 = vshrl.u32 %v6988_v29, 16  ;;  %v4614_v53 = vor.u32 %v4613_v39, %v4610_v38 }
 0x35a   : > { %4553 = vst.msk [vmem:[#allocation2 + $0x54] sm:$0x7] %vm9427_vm11, %v6976_v3  ;;  %v4605_v54 = vor.u32 %v4604_v41, %v4601_v40  ;;  %v6999_v38 = vrot.slane %v6993_v34, 9  ;;  %v7064_v39 = vld [vmem:[%s7411_s17 + $0x48] sm:$0xf] }
 0x35b   : > { %v3904_v55 = vpop.permute.xlu1 %3903  ;;  %v3902_v56 = vpop.permute.xlu0 %3901  ;;  %v4615_v1 = vrot.slane %v4614_v53, 4  ;;  %v7063_v40 = vld [vmem:[%s7411_s17 + $0x44] sm:$0xf]  ;;  %v5172_v45 = vshrl.u32 %v7064_v39, 16 }
 0x35c   : > { %3916 = vst.msk [vmem:[#allocation2 + $0x44] sm:$0x7] %vm9425_vm13, %v3904_v55  ;;  %vm9429_vm13 = vmmov %vm9428_vm15  ;;  %v4676_v55 = vrot.slane %v4674_v42, 4  ;;  %v4606_v2 = vrot.slane %v4605_v54, 4  ;;  %v7001_v54 = vrot.slane %v6995_v44, 9 }
 0x35d   : > { %3915 = vst.msk [vmem:[#allocation2 + $0x40] sm:$0x7] %vm9426_vm12, %v3902_v56  ;;  %4798 = vrot.lane.b32.xlu1 %v7010_v51, %s7355_s21  ;;  %4796 = vrot.lane.b32.xlu0 %v7009_v52, %s7355_s21  ;;  %vm9430_vm12 = vmmov %vm9427_vm11  ;;  %v4679_v56 = vrot.slane %v4677_v43, 5  ;;  %v6996_v43 = vld [vmem:[%s7411_s17 + $0x54] sm:$0xe] }
 0x35e   : > { %4552 = vst.msk [vmem:[#allocation2 + $0x50] sm:$0x7] %vm9430_vm12, %v6975_v18  ;;  %vm9431_vm11 = vmmov %vm9429_vm13  ;;  %v7002_v53 = vrot.slane %v6996_v43, 9  ;;  %v7018_v43 = vld [vmem:[%s7411_s17 + $0x30] sm:$0x7] }
 0x35f   : > { %v3944_v6 = vpop.permute.xlu1 %3943  ;;  %v3942_v7 = vpop.permute.xlu0 %3941  ;;  %v4680_v3 = vor.u32 %v4679_v56, %v4676_v55  ;;  %v5174_v55 = vrot.slane %v5172_v45, 4  ;;  %v7017_v44 = vld [vmem:[%s7411_s17 + $0x2c] sm:$0x7]  ;;  %v6952_v45 = vld [vmem:[%s7411_s17 + $0x54] sm:$0xf] }
 0x360   : > { %3960 = vst.msk [vmem:[#allocation2 + $0x34] sm:$0x7] %vm9428_vm15, %v3944_v6  ;;  %vm9432_vm15 = vmmov %vm9431_vm11  ;;  %v4695_v6 = vshll.u32 %v6990_v61, 16 }
 0x361   : > { %3959 = vst.msk [vmem:[#allocation2 + $0x30] sm:$0x7] %vm9429_vm13, %v3942_v7  ;;  %4834 = vrot.lane.b32.xlu1 %v7016_v4, %s7356_s22  ;;  %4832 = vrot.lane.b32.xlu0 %v7015_v5, %s7356_s22  ;;  %vm9433_vm13 = vmmov %vm9430_vm12  ;;  %v4671_v4 = vor.u32 %v4670_v58, %v4667_v57  ;;  %v4692_v5 = vshrl.u32 %v6990_v61, 16  ;;  %v4683_v7 = vshrl.u32 %v6989_v62, 16  ;;  %v4681_v13 = vrot.slane %v4680_v3, 4 }
 0x362   : > { %4555 = vst.msk [vmem:[#allocation2 + $0x5c] sm:$0x7] %vm9433_vm13, %v6978_v35  ;;  %vm9434_vm12 = vmmov %vm9431_vm11  ;;  %v4697_v18 = vrot.slane %v4695_v6, 5  ;;  %v7070_v3 = vld [vmem:[%s7411_s17 + $0x68] sm:$0xf] }
 0x363   : > { %v3948_v23 = vpop.permute.xlu1 %3947  ;;  %v3946_v24 = vpop.permute.xlu0 %3945  ;;  %v4672_v16 = vrot.slane %v4671_v4, 4  ;;  %v4694_v17 = vrot.slane %v4692_v5, 4  ;;  %v4685_v19 = vrot.slane %v4683_v7, 4  ;;  %v7069_v4 = vld [vmem:[%s7411_s17 + $0x64] sm:$0xf]  ;;  %v5256_v7 = vshrl.u32 %v7070_v3, 16 }
 0x364   : > { %3962 = vst.msk [vmem:[#allocation2 + $0x3c] sm:$0x7] %vm9431_vm11, %v3948_v23 }
 0x365   : > { %3961 = vst.msk [vmem:[#allocation2 + $0x38] sm:$0x7] %vm9432_vm15, %v3946_v24  ;;  %4918 = vrot.lane.b32.xlu1 %v4879_v9, %s7357_s23  ;;  %4916 = vrot.lane.b32.xlu0 %v4870_v10, %s7357_s23  ;;  %vm9435_vm15 = vmmov %vm9433_vm13  ;;  %vm9436_vm13 = vcmask 518624   ;;  %v4686_v9 = vshll.u32 %v6989_v62, 16  ;;  %v4698_v27 = vor.u32 %v4697_v18, %v4694_v17  ;;  %v7008_v17 = vld [vmem:[%s7411_s17 + $0x74] sm:$0xe] }
 0x366   : > { %4554 = vst.msk [vmem:[#allocation2 + $0x58] sm:$0x7] %vm9435_vm15, %v6977_v46  ;;  %v5175_v46 = vshll.u32 %v7064_v39, 16  ;;  %v7007_v18 = vld [vmem:[%s7411_s17 + $0x70] sm:$0xe]  ;;  %v5258_v21 = vrot.slane %v5256_v7, 4 }
 0x367   : > { %v3952_v36 = vpop.permute.xlu1 %3951  ;;  %v3950_v37 = vpop.permute.xlu0 %3949  ;;  %v4688_v20 = vrot.slane %v4686_v9, 5  ;;  %v5259_v9 = vshll.u32 %v7070_v3, 16  ;;  %v6955_v3 = vld [vmem:[%s7411_s17 + $0x68] sm:$0xf] }
 0x368   : > { %3964 = vst.msk [vmem:[#allocation2 + $0x44] sm:$0x7] %vm9434_vm12, %v3952_v36  ;;  %vm9437_vm12 = vmmov %vm9436_vm13  ;;  %v5177_v56 = vrot.slane %v5175_v46, 5 }
 0x369   : > { %3963 = vst.msk [vmem:[#allocation2 + $0x40] sm:$0x7] %vm9431_vm11, %v3950_v37  ;;  %5002 = vrot.lane.b32.xlu1 %v4963_v30, %s7358_s24  ;;  %5000 = vrot.lane.b32.xlu0 %v4954_v31, %s7358_s24  ;;  %vm9438_vm11 = vmmov %vm9437_vm12  ;;  %v4689_v28 = vor.u32 %v4688_v20, %v4685_v19  ;;  %v4699_v31 = vrot.slane %v4698_v27, 4  ;;  %v7000_v37 = vrot.slane %v6994_v33, 9  ;;  %v5261_v22 = vrot.slane %v5259_v9, 5 }
 0x36a   : > { %vm9439_vm15 = vmmov %vm9438_vm11  ;;  %v7013_v27 = vrot.slane %v7007_v18, 9 }
 0x36b   : > { %v3980_v51 = vpop.permute.xlu1 %3979  ;;  %v3978_v52 = vpop.permute.xlu0 %3977  ;;  %v4690_v32 = vrot.slane %v4689_v28, 4  ;;  %v7024_v28 = vld [vmem:[%s7411_s17 + $0x10] sm:$0xf] }
 0x36c   : > { %3996 = vst.msk [vmem:[#allocation2 + $0x34] sm:$0x7] %vm9436_vm13, %v3980_v51  ;;  %vm9440_vm13 = vmmov %vm9438_vm11 }
 0x36d   : > { %3995 = vst.msk [vmem:[#allocation2 + $0x30] sm:$0x7] %vm9437_vm12, %v3978_v52  ;;  %4622 = vrot.lane.b32.xlu1 %v4597_v47, %s7352_s18  ;;  %4620 = vrot.lane.b32.xlu0 %v4588_v48, %s7352_s18  ;;  %vm9441_vm12 = vmmov %vm9438_vm11  ;;  %v5163_v47 = vshrl.u32 %v7063_v40, 16  ;;  %v5166_v48 = vshll.u32 %v7063_v40, 16  ;;  %v4893_v40 = vshll.u32 %v7024_v28, 16 }
 0x36f   : > { %v3984_v63 = vpop.permute.xlu1 %3983  ;;  %v3982_v0 = vpop.permute.xlu0 %3981  ;;  %v5165_v57 = vrot.slane %v5163_v47, 4  ;;  %v5168_v58 = vrot.slane %v5166_v48, 5  ;;  %v6951_v48 = vld [vmem:[%s7411_s17 + $0x50] sm:$0xf] }
 0x370   : > { %3998 = vst.msk [vmem:[#allocation2 + $0x3c] sm:$0x7] %vm9438_vm11, %v3984_v63  ;;  %vm9442_vm11 = vcmask 551424  }
 0x371   : > { %3997 = vst.msk [vmem:[#allocation2 + $0x38] sm:$0x7] %vm9439_vm15, %v3982_v0  ;;  %5050 = vrot.lane.b32.xlu1 %v7040_v59, %s7359_s25  ;;  %5048 = vrot.lane.b32.xlu0 %v7039_v60, %s7359_s25  ;;  %vm9443_vm15 = vmmov %vm9442_vm11  ;;  %v7006_v59 = vld [vmem:[%s7411_s17 + $0x6c] sm:$0xe]  ;;  %v7005_v60 = vld [vmem:[%s7411_s17 + $0x68] sm:$0xe] }
 0x372   : > { %v7012_v63 = vrot.slane %v7006_v59, 9  ;;  %v7011_v0 = vrot.slane %v7005_v60, 9  ;;  %v4364_v59 = vshll.u32 %v6952_v45, 16  ;;  %v4352_v60 = vshrl.u32 %v6951_v48, 16 }
 0x373   : > { %v3988_v10 = vpop.permute.xlu1 %3987  ;;  %v3986_v12 = vpop.permute.xlu0 %3985 }
 0x374   : > { %4000 = vst.msk [vmem:[#allocation2 + $0x44] sm:$0x7] %vm9440_vm13, %v3988_v10  ;;  %vm9444_vm13 = vmmov %vm9442_vm11  ;;  %v5247_v10 = vshrl.u32 %v7069_v4, 16 }
 0x375   : > { %3999 = vst.msk [vmem:[#allocation2 + $0x40] sm:$0x7] %vm9441_vm12, %v3986_v12  ;;  %4626 = vrot.lane.b32.xlu1 %v4615_v1, %s7352_s18  ;;  %4624 = vrot.lane.b32.xlu0 %v4606_v2, %s7352_s18  ;;  %vm9445_vm12 = vmmov %vm9442_vm11  ;;  %v5178_v1 = vor.u32 %v5177_v56, %v5174_v55  ;;  %v5169_v2 = vor.u32 %v5168_v58, %v5165_v57  ;;  %v5250_v12 = vshll.u32 %v7069_v4, 16  ;;  %v4361_v56 = vshrl.u32 %v6952_v45, 16 }
 0x377   : > { %v4016_v23 = vpop.permute.xlu1 %4015  ;;  %v4014_v24 = vpop.permute.xlu0 %4013 }
 0x378   : > { %4032 = vst.msk [vmem:[#allocation2 + $0x34] sm:$0x7] %vm9442_vm11, %v4016_v23  ;;  %v5249_v23 = vrot.slane %v5247_v10, 4  ;;  %v4363_v10 = vrot.slane %v4361_v56, 4 }
 0x379   : > { %4031 = vst.msk [vmem:[#allocation2 + $0x30] sm:$0x7] %vm9443_vm15, %v4014_v24  ;;  %4706 = vrot.lane.b32.xlu1 %v4681_v13, %s7353_s19  ;;  %4704 = vrot.lane.b32.xlu0 %v4672_v16, %s7353_s19  ;;  %vm9446_vm15 = vmmov %vm9442_vm11  ;;  %v5179_v13 = vrot.slane %v5178_v1, 4  ;;  %v5170_v16 = vrot.slane %v5169_v2, 4  ;;  %v5252_v24 = vrot.slane %v5250_v12, 5 }
 0x37a   : > { %v6956_v2 = vld [vmem:[%s7411_s17 + $0x6c] sm:$0xf] }
 0x37b   : > { %v4020_v29 = vpop.permute.xlu1 %4019  ;;  %v4018_v30 = vpop.permute.xlu0 %4017 }
 0x37c   : > { %4034 = vst.msk [vmem:[#allocation2 + $0x3c] sm:$0x7] %vm9444_vm13, %v4020_v29  ;;  %vm9447_vm13 = vcmask 584224  }
 0x37d   : > { %4033 = vst.msk [vmem:[#allocation2 + $0x38] sm:$0x7] %vm9445_vm12, %v4018_v30  ;;  %5098 = vrot.lane.b32.xlu1 %v7052_v25, %s7360_s26  ;;  %5096 = vrot.lane.b32.xlu0 %v7051_v26, %s7360_s26  ;;  %vm9448_vm12 = vmmov %vm9447_vm13  ;;  %v7014_v26 = vrot.slane %v7008_v17, 9  ;;  %v4354_v17 = vrot.slane %v4352_v60, 4 }
 0x37f   : > { %v4024_v35 = vpop.permute.xlu1 %4023  ;;  %v4022_v36 = vpop.permute.xlu0 %4021 }
 0x380   : > { %4036 = vst.msk [vmem:[#allocation2 + $0x44] sm:$0x7] %vm9442_vm11, %v4024_v35  ;;  %vm9449_vm11 = vmmov %vm9448_vm12  ;;  %v5262_v35 = vor.u32 %v5261_v22, %v5258_v21  ;;  %v4427_v21 = vshrl.u32 %v6956_v2, 16  ;;  %v4430_v22 = vshll.u32 %v6956_v2, 16 }
 0x381   : > { %4035 = vst.msk [vmem:[#allocation2 + $0x40] sm:$0x7] %vm9446_vm15, %v4022_v36  ;;  %4710 = vrot.lane.b32.xlu1 %v4699_v31, %s7353_s19  ;;  %4708 = vrot.lane.b32.xlu0 %v4690_v32, %s7353_s19  ;;  %vm9450_vm15 = vmmov %vm9449_vm11  ;;  %v7023_v31 = vld [vmem:[%s7411_s17 + $0xc] sm:$0xf]  ;;  %v5253_v36 = vor.u32 %v5252_v24, %v5249_v23  ;;  %v4418_v23 = vshrl.u32 %v6955_v3, 16  ;;  %v4421_v24 = vshll.u32 %v6955_v3, 16 }
 0x383   : > { %v4100_v41 = vpop.permute.xlu1 %4099  ;;  %v4098_v42 = vpop.permute.xlu0 %4097 }
 0x384   : > { %4116 = vst.msk [vmem:[#allocation2 + $0x34] sm:$0x7] %vm9447_vm13, %v4100_v41  ;;  %vm9451_vm13 = vmmov %vm9449_vm11  ;;  %v4881_v41 = vshrl.u32 %v7023_v31, 16 }
 0x385   : > { %4115 = vst.msk [vmem:[#allocation2 + $0x30] sm:$0x7] %vm9448_vm12, %v4098_v42  ;;  %4754 = vrot.lane.b32.xlu1 %v7000_v37, %s7354_s20  ;;  %4752 = vrot.lane.b32.xlu0 %v6999_v38, %s7354_s20  ;;  %vm9452_vm12 = vmmov %vm9449_vm11  ;;  %v4890_v37 = vshrl.u32 %v7024_v28, 16  ;;  %v4884_v42 = vshll.u32 %v7023_v31, 16  ;;  %v7026_v28 = vld [vmem:[%s7411_s17 + $0x18] sm:$0xf] }
 0x386   : > { %v7076_v31 = vld [vmem:[%s7411_s17 + $0x48] sm:$0xe]  ;;  %v4908_v45 = vshrl.u32 %v7026_v28, 16 }
 0x387   : > { %v4104_v51 = vpop.permute.xlu1 %4103  ;;  %v4102_v52 = vpop.permute.xlu0 %4101  ;;  %v4886_v55 = vrot.slane %v4884_v42, 5  ;;  %v4432_v42 = vrot.slane %v4430_v22, 5 }
 0x388   : > { %4118 = vst.msk [vmem:[#allocation2 + $0x3c] sm:$0x7] %vm9449_vm11, %v4104_v51  ;;  %vm9453_vm11 = vcmask 617024   ;;  %v4892_v51 = vrot.slane %v4890_v37, 4 }
 0x389   : > { %4117 = vst.msk [vmem:[#allocation2 + $0x38] sm:$0x7] %vm9450_vm15, %v4102_v52  ;;  %5134 = vrot.lane.b32.xlu1 %v7058_v49, %s7361_s27  ;;  %5132 = vrot.lane.b32.xlu0 %v7057_v50, %s7361_s27  ;;  %vm9454_vm15 = vmmov %vm9453_vm11  ;;  %v5263_v49 = vrot.slane %v5262_v35, 4  ;;  %v5254_v50 = vrot.slane %v5253_v36, 4  ;;  %v7025_v36 = vld [vmem:[%s7411_s17 + $0x14] sm:$0xf] }
 0x38b   : > { %v4108_v61 = vpop.permute.xlu1 %4107  ;;  %v4106_v62 = vpop.permute.xlu0 %4105 }
 0x38c   : > { %4120 = vst.msk [vmem:[#allocation2 + $0x44] sm:$0x7] %vm9451_vm13, %v4108_v61  ;;  %vm9455_vm13 = vmmov %vm9453_vm11  ;;  %v4355_v61 = vshll.u32 %v6951_v48, 16 }
 0x38d   : > { %4119 = vst.msk [vmem:[#allocation2 + $0x40] sm:$0x7] %vm9452_vm12, %v4106_v62  ;;  %4758 = vrot.lane.b32.xlu1 %v7002_v53, %s7354_s20  ;;  %4756 = vrot.lane.b32.xlu0 %v7001_v54, %s7354_s20  ;;  %vm9456_vm12 = vmmov %vm9453_vm11  ;;  %v4895_v53 = vrot.slane %v4893_v40, 5  ;;  %v4883_v54 = vrot.slane %v4881_v41, 4  ;;  %v4429_v41 = vrot.slane %v4427_v21, 4 }
 0x38e   : > { %v4357_v18 = vrot.slane %v4355_v61, 5 }
 0x38f   : > { %v4184_v5 = vpop.permute.xlu1 %4183  ;;  %v4182_v6 = vpop.permute.xlu0 %4181  ;;  %v4896_v7 = vor.u32 %v4895_v53, %v4892_v51  ;;  %v4887_v9 = vor.u32 %v4886_v55, %v4883_v54  ;;  %v7030_v51 = vld [vmem:[%s7411_s17 + $0x30] sm:$0xf]  ;;  %v7029_v53 = vld [vmem:[%s7411_s17 + $0x2c] sm:$0xf]  ;;  %v4433_v60 = vor.u32 %v4432_v42, %v4429_v41 }
 0x390   : > { %4200 = vst.msk [vmem:[#allocation2 + $0x34] sm:$0x7] %vm9453_vm11, %v4184_v5  ;;  %v4358_v35 = vor.u32 %v4357_v18, %v4354_v17  ;;  %v4974_v2 = vshrl.u32 %v7030_v51, 16  ;;  %v4977_v3 = vshll.u32 %v7030_v51, 16  ;;  %v7088_v51 = vld [vmem:[%s7411_s17 + $0x68] sm:$0xe] }
 0x391   : > { %4199 = vst.msk [vmem:[#allocation2 + $0x30] sm:$0x7] %vm9454_vm15, %v4182_v6  ;;  %4802 = vrot.lane.b32.xlu1 %v7012_v63, %s7355_s21  ;;  %4800 = vrot.lane.b32.xlu0 %v7011_v0, %s7355_s21  ;;  %vm9457_vm15 = vmmov %vm9453_vm11  ;;  %v7020_v6 = vld [vmem:[%s7411_s17 + $0x38] sm:$0x7]  ;;  %v4434_v17 = vrot.slane %v4433_v60, 4  ;;  %v7094_v60 = vrot.slane %v7088_v51, 9 }
 0x392   : > { %v6964_v51 = vld [vmem:[%s7411_s17 + $0x54] sm:$0xe] }
 0x393   : > { %v4188_v19 = vpop.permute.xlu1 %4187  ;;  %v4186_v20 = vpop.permute.xlu0 %4185 }
 0x394   : > { %4202 = vst.msk [vmem:[#allocation2 + $0x3c] sm:$0x7] %vm9455_vm13, %v4188_v19  ;;  %v8840_v25 = vpop.f32.mrb[4].mxu0  ;;  %vm9458_vm13 = vcmask 649824  }
 0x395   : > { %4201 = vst.msk [vmem:[#allocation2 + $0x38] sm:$0x7] %vm9456_vm12, %v4186_v20  ;;  %5218 = vrot.lane.b32.xlu1 %v5179_v13, %s7362_s28  ;;  %5216 = vrot.lane.b32.xlu0 %v5170_v16, %s7362_s28  ;;  %v6326_v29 = vmax.f32 %v8391_v11, %v8840_v25  ;;  %v8845_v30 = vpop.f32.mrb[5].mxu0  ;;  %vm9459_vm12 = vmmov %vm9458_vm13  ;;  %v7019_v13 = vld [vmem:[%s7411_s17 + $0x34] sm:$0x7]  ;;  %v4366_v16 = vrot.slane %v4364_v59, 5 }
 0x396   : > { %v8850_v34 = vpop.f32.mrb[6].mxu0  ;;  %v4359_v59 = vrot.slane %v4358_v35, 4 }
 0x397   : > { %v4192_v32 = vpop.permute.xlu1 %4191  ;;  %v4190_v33 = vpop.permute.xlu0 %4189  ;;  %v6327_v38 = vmax.f32 %v8397_v15, %v8850_v34 }
 0x398   : > { %4204 = vst.msk [vmem:[#allocation2 + $0x44] sm:$0x7] %vm9453_vm11, %v4192_v32  ;;  %v8854_v39 = vpop.f32.mrb[7].mxu0  ;;  %vm9460_vm11 = vmmov %vm9459_vm12  ;;  %v7075_v32 = vld [vmem:[%s7411_s17 + $0x44] sm:$0xe] }
 0x399   : > { %4203 = vst.msk [vmem:[#allocation2 + $0x40] sm:$0x7] %vm9457_vm15, %v4190_v33  ;;  %4806 = vrot.lane.b32.xlu1 %v7014_v26, %s7355_s21  ;;  %4804 = vrot.lane.b32.xlu0 %v7013_v27, %s7355_s21  ;;  %vm9461_vm15 = vmmov %vm9460_vm11  ;;  %v4897_v26 = vrot.slane %v4896_v7, 4  ;;  %v4888_v27 = vrot.slane %v4887_v9, 4  ;;  %v4367_v33 = vor.u32 %v4366_v16, %v4363_v10  ;;  %v7081_v48 = vrot.slane %v7075_v32, 9 }
 0x39a   : > { %v4965_v9 = vshrl.u32 %v7029_v53, 16  ;;  %v4968_v10 = vshll.u32 %v7029_v53, 16  ;;  %v7087_v53 = vld [vmem:[%s7411_s17 + $0x64] sm:$0xe] }
 0x39b   : > { %v4232_v46 = vpop.permute.xlu1 %4231  ;;  %v4230_v47 = vpop.permute.xlu0 %4229  ;;  %v4368_v56 = vrot.slane %v4367_v33, 4 }
 0x39c   : > { %4248 = vst.msk [vmem:[#allocation2 + $0x34] sm:$0x7] %vm9458_vm13, %v4232_v46  ;;  %v8866_v52 = vpop.f32.mrb[8].mxu0  ;;  %vm9462_vm13 = vmmov %vm9460_vm11  ;;  %v4911_v46 = vshll.u32 %v7026_v28, 16 }
 0x39d   : > { %4247 = vst.msk [vmem:[#allocation2 + $0x30] sm:$0x7] %vm9459_vm12, %v4230_v47  ;;  %4838 = vrot.lane.b32.xlu1 %v7018_v43, %s7356_s22  ;;  %4836 = vrot.lane.b32.xlu0 %v7017_v44, %s7356_s22  ;;  %v6330_v57 = vmax.f32 %v8845_v30, %v8866_v52  ;;  %v8870_v58 = vpop.f32.mrb[9].mxu0  ;;  %vm9463_vm12 = vmmov %vm9460_vm11  ;;  %v4420_v43 = vrot.slane %v4418_v23, 4  ;;  %v4423_v44 = vrot.slane %v4421_v24, 5  ;;  %v7082_v47 = vrot.slane %v7076_v31, 9 }
 0x39e   : > { %v6328_v62 = vmax.f32 %v8389_v8, %v8870_v58  ;;  %v8876_v1 = vpop.f32.mrb[10].mxu0  ;;  %v4967_v23 = vrot.slane %v4965_v9, 4  ;;  %v4970_v24 = vrot.slane %v4968_v10, 5  ;;  %v7214_v8 = vld [vmem:[%s9336_s2] ss:$0 sm:$0xff] }
 0x39f   : > { %v4236_v63 = vpop.permute.xlu1 %4235  ;;  %v4234_v0 = vpop.permute.xlu0 %4233  ;;  %v6331_v4 = vmax.f32 %v8854_v39, %v8876_v1  ;;  %v4424_v61 = vor.u32 %v4423_v44, %v4420_v43 }
 0x3a0   : > { %4250 = vst.msk [vmem:[#allocation2 + $0x3c] sm:$0x7] %vm9460_vm11, %v4236_v63  ;;  %v8882_v5 = vpop.f32.mrb[11].mxu0  ;;  %vm9464_vm11 = vcmask 682624   ;;  %v4910_v63 = vrot.slane %v4908_v45, 4  ;;  %v4971_v42 = vor.u32 %v4970_v24, %v4967_v23 }
 0x3a1   : > { %4249 = vst.msk [vmem:[#allocation2 + $0x38] sm:$0x7] %vm9461_vm15, %v4234_v0  ;;  %5302 = vrot.lane.b32.xlu1 %v5263_v49, %s7363_s29  ;;  %5300 = vrot.lane.b32.xlu0 %v5254_v50, %s7363_s29  ;;  %v6329_v12 = vmax.f32 %v8395_v14, %v8882_v5  ;;  %vm9465_vm15 = vmmov %vm9464_vm11  ;;  %v4899_v49 = vshrl.u32 %v7025_v36, 16  ;;  %v4902_v50 = vshll.u32 %v7025_v36, 16  ;;  %v4913_v0 = vrot.slane %v4911_v46, 5 }
 0x3a2   : > { %v4425_v18 = vrot.slane %v4424_v61, 4  ;;  %v7093_v61 = vrot.slane %v7087_v53, 9  ;;  %v6963_v53 = vld [vmem:[%s7411_s17 + $0x50] sm:$0xe] }
 0x3a3   : > { %v4240_v19 = vpop.permute.xlu1 %4239  ;;  %v4238_v20 = vpop.permute.xlu0 %4237  ;;  %v4904_v7 = vrot.slane %v4902_v50, 5  ;;  %v4914_v21 = vor.u32 %v4913_v0, %v4910_v63  ;;  %v4972_v50 = vrot.slane %v4971_v42, 4 }
 0x3a4   : > { %4252 = vst.msk [vmem:[#allocation2 + $0x44] sm:$0x7] %vm9462_vm13, %v4240_v19  ;;  %vm9466_vm13 = vmmov %vm9464_vm11  ;;  %v4976_v19 = vrot.slane %v4974_v2, 4 }
 0x3a5   : > { %4251 = vst.msk [vmem:[#allocation2 + $0x40] sm:$0x7] %vm9463_vm12, %v4238_v20  ;;  %4842 = vrot.lane.b32.xlu1 %v7020_v6, %s7356_s22  ;;  %4840 = vrot.lane.b32.xlu0 %v7019_v13, %s7356_s22  ;;  %vm9467_vm12 = vmmov %vm9464_vm11  ;;  %v4901_v6 = vrot.slane %v4899_v49, 4  ;;  %v4979_v20 = vrot.slane %v4977_v3, 5 }
 0x3a7   : > { %v4269_v37 = vpop.permute.xlu1 %4268  ;;  %v4267_v40 = vpop.permute.xlu0 %4266  ;;  %v4905_v22 = vor.u32 %v4904_v7, %v4901_v6  ;;  %v4980_v41 = vor.u32 %v4979_v20, %v4976_v19 }
 0x3a8   : > { %4285 = vst.msk [vmem:[#allocation2 + $0x34] sm:$0x7] %vm9464_vm11, %v4269_v37  ;;  %v4915_v37 = vrot.slane %v4914_v21, 4  ;;  %v6962_v21 = vld [vmem:[%s7411_s17 + $0x4c] sm:$0xe] }
 0x3a9   : > { %4284 = vst.msk [vmem:[#allocation2 + $0x30] sm:$0x7] %vm9465_vm15, %v4267_v40  ;;  %4922 = vrot.lane.b32.xlu1 %v4897_v26, %s7357_s23  ;;  %4920 = vrot.lane.b32.xlu0 %v4888_v27, %s7357_s23  ;;  %vm9468_vm15 = vmmov %vm9464_vm11  ;;  %v6958_v26 = vld [vmem:[%s7411_s17 + $0x74] sm:$0xf]  ;;  %v6957_v27 = vld [vmem:[%s7411_s17 + $0x70] sm:$0xf] }
 0x3aa   : > { %v4445_v32 = vshrl.u32 %v6958_v26, 16  ;;  %v4448_v33 = vshll.u32 %v6958_v26, 16  ;;  %v4436_v35 = vshrl.u32 %v6957_v27, 16  ;;  %v4439_v36 = vshll.u32 %v6957_v27, 16 }
 0x3ab   : > { %v4273_v54 = vpop.permute.xlu1 %4272  ;;  %v4271_v55 = vpop.permute.xlu0 %4270  ;;  %v4906_v40 = vrot.slane %v4905_v22, 4  ;;  %v4981_v49 = vrot.slane %v4980_v41, 4  ;;  %v6961_v22 = vld [vmem:[%s7411_s17 + $0x48] sm:$0xe]  ;;  %v6968_v26 = vrot.slane %v6962_v21, 9 }
 0x3ac   : > { %4287 = vst.msk [vmem:[#allocation2 + $0x3c] sm:$0x7] %vm9466_vm13, %v4273_v54  ;;  %vm9469_vm13 = vcmask 715424   ;;  %v4447_v45 = vrot.slane %v4445_v32, 4  ;;  %v4450_v46 = vrot.slane %v4448_v33, 5  ;;  %v6967_v27 = vrot.slane %v6961_v22, 9 }
 0x3ad   : > { %4286 = vst.msk [vmem:[#allocation2 + $0x38] sm:$0x7] %vm9467_vm12, %v4271_v55  ;;  %5350 = vrot.lane.b32.xlu1 %v7082_v47, %s7364_s30  ;;  %5348 = vrot.lane.b32.xlu0 %v7081_v48, %s7364_s30  ;;  %vm9470_vm12 = vmmov %vm9469_vm13  ;;  %v4438_v47 = vrot.slane %v4436_v35, 4  ;;  %v4441_v48 = vrot.slane %v4439_v36, 5  ;;  %v7032_v54 = vld [vmem:[%s7411_s17 + $0x38] sm:$0xf] }
 0x3ae   : > { %v7031_v55 = vld [vmem:[%s7411_s17 + $0x34] sm:$0xf]  ;;  %v4451_v63 = vor.u32 %v4450_v46, %v4447_v45  ;;  %v4992_v2 = vshrl.u32 %v7032_v54, 16  ;;  %v4995_v3 = vshll.u32 %v7032_v54, 16 }
 0x3af   : > { %v4277_v13 = vpop.permute.xlu1 %4276  ;;  %v4275_v16 = vpop.permute.xlu0 %4274  ;;  %v4442_v0 = vor.u32 %v4441_v48, %v4438_v47  ;;  %v4983_v6 = vshrl.u32 %v7031_v55, 16  ;;  %v4986_v7 = vshll.u32 %v7031_v55, 16  ;;  %v7100_v47 = vld [vmem:[%s7411_s17 + $0x2c] sm:$0x7] }
 0x3b0   : > { %4289 = vst.msk [vmem:[#allocation2 + $0x44] sm:$0x7] %vm9464_vm11, %v4277_v13  ;;  %vm9471_vm11 = vmmov %vm9470_vm12  ;;  %v4452_v13 = vrot.slane %v4451_v63, 4  ;;  %v7106_v48 = vld [vmem:[%s7411_s17 + $0xc] sm:$0xf]  ;;  %v6970_v63 = vrot.slane %v6964_v51, 9 }
 0x3b1   : > { %4288 = vst.msk [vmem:[#allocation2 + $0x40] sm:$0x7] %vm9468_vm15, %v4275_v16  ;;  %4393 = vrot.lane.b32.xlu1 %v4368_v56, %s9354_s14  ;;  %4391 = vrot.lane.b32.xlu0 %v4359_v59, %s9354_s14  ;;  %vm9472_vm15 = vmmov %vm9471_vm11  ;;  %v4443_v16 = vrot.slane %v4442_v0, 4  ;;  %v4985_v19 = vrot.slane %v4983_v6, 4  ;;  %v4988_v20 = vrot.slane %v4986_v7, 5  ;;  %v6969_v0 = vrot.slane %v6963_v53, 9 }
 0x3b3   : > { %v4306_v28 = vpop.permute.xlu1 %4305  ;;  %v4304_v31 = vpop.permute.xlu0 %4303 }
 0x3b4   : > { %4322 = vst.msk [vmem:[#allocation2 + $0x34] sm:$0x7] %vm9469_vm13, %v4306_v28  ;;  %vm9473_vm13 = vmmov %vm9471_vm11 }
 0x3b5   : > { %4321 = vst.msk [vmem:[#allocation2 + $0x30] sm:$0x7] %vm9470_vm12, %v4304_v31  ;;  %4473 = vrot.lane.b32.xlu1 %v4434_v17, %s7375_s16  ;;  %4471 = vrot.lane.b32.xlu0 %v4425_v18, %s7375_s16  ;;  %vm9474_vm12 = vmmov %vm9471_vm11  ;;  %v4994_v17 = vrot.slane %v4992_v2, 4  ;;  %v4997_v18 = vrot.slane %v4995_v3, 5  ;;  %v4989_v31 = vor.u32 %v4988_v20, %v4985_v19  ;;  %v7038_v2 = vld [vmem:[%s7411_s17 + $0x18] sm:$0xe] }
 0x3b6   : > { %v7037_v3 = vld [vmem:[%s7411_s17 + $0x14] sm:$0xe]  ;;  %v7048_v19 = vld [vmem:[%s7411_s17 + $0x30] sm:$0xe]  ;;  %v7047_v20 = vld [vmem:[%s7411_s17 + $0x2c] sm:$0xe] }
 0x3b7   : > { %v4310_v43 = vpop.permute.xlu1 %4309  ;;  %v4308_v44 = vpop.permute.xlu0 %4307  ;;  %v4998_v28 = vor.u32 %v4997_v18, %v4994_v17  ;;  %v4990_v36 = vrot.slane %v4989_v31, 4  ;;  %v7044_v17 = vrot.slane %v7038_v2, 9  ;;  %v7043_v18 = vrot.slane %v7037_v3, 9  ;;  %v7111_v31 = vld [vmem:[%s7411_s17 + $0x28] sm:$0xf] }
 0x3b8   : > { %4324 = vst.msk [vmem:[#allocation2 + $0x3c] sm:$0x7] %vm9471_vm11, %v4310_v43  ;;  %vm9475_vm11 = vcmask 748224  }
 0x3b9   : > { %4323 = vst.msk [vmem:[#allocation2 + $0x38] sm:$0x7] %vm9472_vm15, %v4308_v44  ;;  %4926 = vrot.lane.b32.xlu1 %v4915_v37, %s7357_s23  ;;  %4924 = vrot.lane.b32.xlu0 %v4906_v40, %s7357_s23  ;;  %vm9476_vm15 = vmmov %vm9475_vm11  ;;  %v4999_v35 = vrot.slane %v4998_v28, 4  ;;  %v7036_v37 = vld [vmem:[%s7411_s17 + $0x10] sm:$0xe] }
 0x3ba   : > { %v7035_v40 = vld [vmem:[%s7411_s17 + $0xc] sm:$0xe]  ;;  %v7042_v43 = vrot.slane %v7036_v37, 9  ;;  %v7050_v37 = vld [vmem:[%s7411_s17 + $0x38] sm:$0xe] }
 0x3bb   : > { %v4314_v56 = vpop.permute.xlu1 %4313  ;;  %v4312_v59 = vpop.permute.xlu0 %4311  ;;  %v7041_v44 = vrot.slane %v7035_v40, 9  ;;  %v7112_v28 = vld [vmem:[%s7411_s17 + $0x2c] sm:$0xf]  ;;  %v7049_v40 = vld [vmem:[%s7411_s17 + $0x34] sm:$0xe] }
 0x3bc   : > { %4326 = vst.msk [vmem:[#allocation2 + $0x44] sm:$0x7] %vm9473_vm13, %v4314_v56  ;;  %v5472_v56 = vshrl.u32 %v7106_v48, 16 }
 0x3bd   : > { %4325 = vst.msk [vmem:[#allocation2 + $0x40] sm:$0x7] %vm9474_vm12, %v4312_v59  ;;  %5006 = vrot.lane.b32.xlu1 %v4981_v49, %s7358_s24  ;;  %5004 = vrot.lane.b32.xlu0 %v4972_v50, %s7358_s24  ;;  %v7105_v49 = vld [vmem:[%s7411_s17 + $0x8] sm:$0xf]  ;;  %v5475_v59 = vshll.u32 %v7106_v48, 16  ;;  %v7055_v48 = vrot.slane %v7049_v40, 9  ;;  %vm9483_vm12 = vmmov %vm9475_vm11 }
 0x3be   : > { %v7099_v50 = vld [vmem:[%s7411_s17 + $0x28] sm:$0x7]  ;;  %v7071_v40 = vld [vmem:[%s7411_s17 + $0x6c] sm:$0xf] }
 0x3bf   : > { %v4390_v9 = vpop.permute.xlu1 %4389  ;;  %v4388_v10 = vpop.permute.xlu0 %4387 }
 0x3c0   : > { %4406 = vst.msk [vmem:[#allocation2 + $0x34] sm:$0x7] %vm9475_vm11, %v4390_v9  ;;  %v5474_v9 = vrot.slane %v5472_v56, 4 }
 0x3c1   : > { %4405 = vst.msk [vmem:[#allocation2 + $0x30] sm:$0x7] %vm9476_vm15, %v4388_v10  ;;  %5398 = vrot.lane.b32.xlu1 %v7094_v60, %s7365_s4  ;;  %5396 = vrot.lane.b32.xlu0 %v7093_v61, %s7365_s4  ;;  %v5463_v60 = vshrl.u32 %v7105_v49, 16  ;;  %v5466_v61 = vshll.u32 %v7105_v49, 16  ;;  %v5477_v10 = vrot.slane %v5475_v59, 5  ;;  %vm9484_vm15 = vcmask 781024  }
 0x3c2   : > { %v7066_v49 = vld [vmem:[%s7411_s17 + $0x50] sm:$0xf] }
 0x3c3   : > { %v4619_v23 = vpop.permute.xlu1 %4618  ;;  %v4617_v24 = vpop.permute.xlu0 %4616 }
 0x3c4   : > { %4635 = vst.msk [vmem:[#allocation2 + $0x4c] sm:$0x7] %vm241_vm1, %v4619_v23  ;;  %4634 = vst.msk [vmem:[#allocation2 + $0x48] sm:$0x7] %vm241_vm1, %v4617_v24  ;;  %v5478_v23 = vor.u32 %v5477_v10, %v5474_v9 }
 0x3c5   : > { %4477 = vrot.lane.b32.xlu1 %v4452_v13, %s7375_s16  ;;  %4475 = vrot.lane.b32.xlu0 %v4443_v16, %s7375_s16  ;;  %v5465_v13 = vrot.slane %v5463_v60, 4  ;;  %v5468_v16 = vrot.slane %v5466_v61, 5  ;;  %v5190_v60 = vshrl.u32 %v7066_v49, 16  ;;  %v5193_v61 = vshll.u32 %v7066_v49, 16 }
 0x3c7   : > { %v4703_v32 = vpop.permute.xlu1 %4702  ;;  %v4701_v33 = vpop.permute.xlu0 %4700  ;;  %v5469_v24 = vor.u32 %v5468_v16, %v5465_v13  ;;  %v5192_v13 = vrot.slane %v5190_v60, 4  ;;  %v5195_v16 = vrot.slane %v5193_v61, 5 }
 0x3c8   : > { %4719 = vst.msk [vmem:[#allocation2 + $0x4c] sm:$0x7] %vm326_vm2, %v4703_v32  ;;  %4718 = vst.msk [vmem:[#allocation2 + $0x48] sm:$0x7] %vm326_vm2, %v4701_v33 }
 0x3c9   : > { %4521 = vrot.lane.b32.xlu1 %v6968_v26, %s7376_s15  ;;  %4519 = vrot.lane.b32.xlu0 %v6967_v27, %s7376_s15  ;;  %v7054_v26 = vrot.slane %v7048_v19, 9  ;;  %v7053_v27 = vrot.slane %v7047_v20, 9 }
 0x3cb   : > { %v4751_v41 = vpop.permute.xlu1 %4750  ;;  %v4749_v42 = vpop.permute.xlu0 %4748 }
 0x3cc   : > { %4767 = vst.msk [vmem:[#allocation2 + $0x4c] sm:$0x7] %vm411_vm3, %v4751_v41  ;;  %4766 = vst.msk [vmem:[#allocation2 + $0x48] sm:$0x7] %vm411_vm3, %v4749_v42  ;;  %v5556_v41 = vshrl.u32 %v7112_v28, 16  ;;  %v5559_v42 = vshll.u32 %v7112_v28, 16 }
 0x3cd   : > { %5010 = vrot.lane.b32.xlu1 %v4999_v35, %s7358_s24  ;;  %5008 = vrot.lane.b32.xlu0 %v4990_v36, %s7358_s24  ;;  %v5479_v35 = vrot.slane %v5478_v23, 4  ;;  %v5470_v36 = vrot.slane %v5469_v24, 4 }
 0x3ce   : > { %v5558_v51 = vrot.slane %v5556_v41, 4  ;;  %v5561_v53 = vrot.slane %v5559_v42, 5 }
 0x3cf   : > { %v4799_v45 = vpop.permute.xlu1 %4798  ;;  %v4797_v46 = vpop.permute.xlu0 %4796 }
 0x3d0   : > { %4815 = vst.msk [vmem:[#allocation2 + $0x4c] sm:$0x7] %vm460_vm4, %v4799_v45  ;;  %4814 = vst.msk [vmem:[#allocation2 + $0x48] sm:$0x7] %vm460_vm4, %v4797_v46  ;;  %v5562_v2 = vor.u32 %v5561_v53, %v5558_v51 }
 0x3d1   : > { %5054 = vrot.lane.b32.xlu1 %v7042_v43, %s7359_s25  ;;  %5052 = vrot.lane.b32.xlu0 %v7041_v44, %s7359_s25  ;;  %v5547_v43 = vshrl.u32 %v7111_v31, 16  ;;  %v5550_v44 = vshll.u32 %v7111_v31, 16 }
 0x3d2   : > { %v5563_v19 = vrot.slane %v5562_v2, 4 }
 0x3d3   : > { %v4835_v54 = vpop.permute.xlu1 %4834  ;;  %v4833_v55 = vpop.permute.xlu0 %4832 }
 0x3d4   : > { %4851 = vst.msk [vmem:[#allocation2 + $0x4c] sm:$0x7] %vm498_vm5, %v4835_v54  ;;  %4850 = vst.msk [vmem:[#allocation2 + $0x48] sm:$0x7] %vm498_vm5, %v4833_v55  ;;  %v5549_v54 = vrot.slane %v5547_v43, 4  ;;  %v5552_v55 = vrot.slane %v5550_v44, 5 }
 0x3d5   : > { %5434 = vrot.lane.b32.xlu1 %v7100_v47, %s7366_s5  ;;  %5432 = vrot.lane.b32.xlu0 %v7099_v50, %s7366_s5  ;;  %v7056_v47 = vrot.slane %v7050_v37, 9  ;;  %v7065_v50 = vld [vmem:[%s7411_s17 + $0x4c] sm:$0xf]  ;;  %v7061_v37 = vld [vmem:[%s7411_s17 + $0x74] sm:$0x7] }
 0x3d6   : > { %v5553_v3 = vor.u32 %v5552_v55, %v5549_v54  ;;  %v5265_v54 = vshrl.u32 %v7071_v40, 16  ;;  %v5268_v55 = vshll.u32 %v7071_v40, 16  ;;  %v7129_v40 = vld [vmem:[%s7411_s17 + $0x28] sm:$0xe] }
 0x3d7   : > { %v4919_v6 = vpop.permute.xlu1 %4918  ;;  %v4917_v7 = vpop.permute.xlu0 %4916 }
 0x3d8   : > { %4935 = vst.msk [vmem:[#allocation2 + $0x4c] sm:$0x7] %vm536_vm6, %v4919_v6  ;;  %4934 = vst.msk [vmem:[#allocation2 + $0x48] sm:$0x7] %vm536_vm6, %v4917_v7  ;;  %v7060_v6 = vld [vmem:[%s7411_s17 + $0x70] sm:$0x7] }
 0x3d9   : > { %4525 = vrot.lane.b32.xlu1 %v6970_v63, %s7376_s15  ;;  %4523 = vrot.lane.b32.xlu0 %v6969_v0, %s7376_s15  ;;  %v5181_v63 = vshrl.u32 %v7065_v50, 16  ;;  %v5184_v0 = vshll.u32 %v7065_v50, 16  ;;  %v7059_v7 = vld [vmem:[%s7411_s17 + $0x6c] sm:$0x7]  ;;  %v5554_v20 = vrot.slane %v5553_v3, 4 }
 0x3da   : > { %v7117_v50 = vld [vmem:[%s7411_s17 + $0x8] sm:$0xe] }
 0x3db   : > { %v5003_v21 = vpop.permute.xlu1 %5002  ;;  %v5001_v22 = vpop.permute.xlu0 %5000  ;;  %v7123_v61 = vrot.slane %v7117_v50, 9 }
 0x3dc   : > { %5019 = vst.msk [vmem:[#allocation2 + $0x4c] sm:$0x7] %vm621_vm7, %v5003_v21  ;;  %5018 = vst.msk [vmem:[#allocation2 + $0x48] sm:$0x7] %vm621_vm7, %v5001_v22  ;;  %v7068_v21 = vld [vmem:[%s7411_s17 + $0x58] sm:$0xf] }
 0x3dd   : > { %5058 = vrot.lane.b32.xlu1 %v7044_v17, %s7359_s25  ;;  %5056 = vrot.lane.b32.xlu0 %v7043_v18, %s7359_s25  ;;  %v5183_v17 = vrot.slane %v5181_v63, 4  ;;  %v5186_v18 = vrot.slane %v5184_v0, 5  ;;  %v7067_v22 = vld [vmem:[%s7411_s17 + $0x54] sm:$0xf]  ;;  %v5208_v28 = vshrl.u32 %v7068_v21, 16  ;;  %v5211_v31 = vshll.u32 %v7068_v21, 16 }
 0x3df   : > { %v4623_v32 = vpop.permute.xlu1 %4622  ;;  %v4621_v33 = vpop.permute.xlu0 %4620 }
 0x3e0   : > { %4637 = vst.msk [vmem:[#allocation2 + $0x54] sm:$0x7] %vm241_vm1, %v4623_v32  ;;  %4636 = vst.msk [vmem:[#allocation2 + $0x50] sm:$0x7] %vm241_vm1, %v4621_v33  ;;  %v5199_v32 = vshrl.u32 %v7067_v22, 16  ;;  %v5202_v33 = vshll.u32 %v7067_v22, 16 }
 0x3e1   : > { %5102 = vrot.lane.b32.xlu1 %v7054_v26, %s7360_s26  ;;  %5100 = vrot.lane.b32.xlu0 %v7053_v27, %s7360_s26  ;;  %v5196_v26 = vor.u32 %v5195_v16, %v5192_v13  ;;  %v5187_v27 = vor.u32 %v5186_v18, %v5183_v17 }
 0x3e2   : > { %v5201_v51 = vrot.slane %v5199_v32, 4  ;;  %v5204_v53 = vrot.slane %v5202_v33, 5 }
 0x3e3   : > { %v5051_v45 = vpop.permute.xlu1 %5050  ;;  %v5049_v46 = vpop.permute.xlu0 %5048  ;;  %v5197_v43 = vrot.slane %v5196_v26, 4  ;;  %v5188_v44 = vrot.slane %v5187_v27, 4 }
 0x3e4   : > { %5067 = vst.msk [vmem:[#allocation2 + $0x4c] sm:$0x7] %vm706_vm8, %v5051_v45  ;;  %5066 = vst.msk [vmem:[#allocation2 + $0x48] sm:$0x7] %vm706_vm8, %v5049_v46  ;;  %v7118_v45 = vld [vmem:[%s7411_s17 + $0xc] sm:$0xe]  ;;  %v5205_v3 = vor.u32 %v5204_v53, %v5201_v51 }
 0x3e5   : > { %5518 = vrot.lane.b32.xlu1 %v5479_v35, %s7367_s6  ;;  %5516 = vrot.lane.b32.xlu0 %v5470_v36, %s7367_s6  ;;  %v7072_v35 = vld [vmem:[%s7411_s17 + $0x70] sm:$0xf]  ;;  %v7062_v36 = vld [vmem:[%s7411_s17 + $0x78] sm:$0x7]  ;;  %v5210_v46 = vrot.slane %v5208_v28, 4  ;;  %v7124_v60 = vrot.slane %v7118_v45, 9 }
 0x3e6   : > { %v5277_v49 = vshll.u32 %v7072_v35, 16  ;;  %v5206_v22 = vrot.slane %v5205_v3, 4 }
 0x3e7   : > { %v4627_v56 = vpop.permute.xlu1 %4626  ;;  %v4625_v59 = vpop.permute.xlu0 %4624 }
 0x3e8   : > { %4639 = vst.msk [vmem:[#allocation2 + $0x5c] sm:$0x7] %vm241_vm1, %v4627_v56  ;;  %4638 = vst.msk [vmem:[#allocation2 + $0x58] sm:$0x7] %vm241_vm1, %v4625_v59  ;;  %v5279_v0 = vrot.slane %v5277_v49, 5  ;;  %vm9477_vm1 = vcmask 387424  }
 0x3e9   : > { %5106 = vrot.lane.b32.xlu1 %v7056_v47, %s7360_s26  ;;  %5104 = vrot.lane.b32.xlu0 %v7055_v48, %s7360_s26  ;;  %v5213_v47 = vrot.slane %v5211_v31, 5  ;;  %v5274_v48 = vshrl.u32 %v7072_v35, 16 }
 0x3eb   : > { %v4707_v9 = vpop.permute.xlu1 %4706  ;;  %v4705_v10 = vpop.permute.xlu0 %4704  ;;  %v5276_v63 = vrot.slane %v5274_v48, 4  ;;  %v5214_v2 = vor.u32 %v5213_v47, %v5210_v46  ;;  %v7135_v46 = vrot.slane %v7129_v40, 9  ;;  %v6954_v47 = vld [vmem:[%s7411_s17 + $0x5c] sm:$0xf]  ;;  %v6953_v48 = vld [vmem:[%s7411_s17 + $0x58] sm:$0xf] }
 0x3ec   : > { %4721 = vst.msk [vmem:[#allocation2 + $0x54] sm:$0x7] %vm326_vm2, %v4707_v9  ;;  %4720 = vst.msk [vmem:[#allocation2 + $0x50] sm:$0x7] %vm326_vm2, %v4705_v10  ;;  %v7074_v9 = vld [vmem:[%s7411_s17 + $0x78] sm:$0xf] }
 0x3ed   : > { %5138 = vrot.lane.b32.xlu1 %v7060_v6, %s7361_s27  ;;  %5136 = vrot.lane.b32.xlu0 %v7059_v7, %s7361_s27  ;;  %v5267_v6 = vrot.slane %v5265_v54, 4  ;;  %v5270_v7 = vrot.slane %v5268_v55, 5  ;;  %v7073_v10 = vld [vmem:[%s7411_s17 + $0x74] sm:$0xf]  ;;  %v5292_v17 = vshrl.u32 %v7074_v9, 16  ;;  %v5295_v18 = vshll.u32 %v7074_v9, 16 }
 0x3ee   : > { %v5215_v21 = vrot.slane %v5214_v2, 4  ;;  %v7078_v54 = vld [vmem:[%s7411_s17 + $0x50] sm:$0xe]  ;;  %v7077_v55 = vld [vmem:[%s7411_s17 + $0x4c] sm:$0xe] }
 0x3ef   : > { %v5099_v23 = vpop.permute.xlu1 %5098  ;;  %v5097_v24 = vpop.permute.xlu0 %5096  ;;  %v5294_v28 = vrot.slane %v5292_v17, 4  ;;  %v5297_v31 = vrot.slane %v5295_v18, 5  ;;  %v7084_v2 = vrot.slane %v7078_v54, 9  ;;  %v7083_v3 = vrot.slane %v7077_v55, 9  ;;  %v6959_v40 = vld [vmem:[%s7411_s17 + $0x78] sm:$0xf] }
 0x3f0   : > { %5115 = vst.msk [vmem:[#allocation2 + $0x4c] sm:$0x7] %vm755_vm9, %v5099_v23  ;;  %5114 = vst.msk [vmem:[#allocation2 + $0x48] sm:$0x7] %vm755_vm9, %v5097_v24  ;;  %v5280_v23 = vor.u32 %v5279_v0, %v5276_v63  ;;  %v5271_v24 = vor.u32 %v5270_v7, %v5267_v6  ;;  %v4454_v54 = vshrl.u32 %v6959_v40, 16  ;;  %v4457_v55 = vshll.u32 %v6959_v40, 16 }
 0x3f1   : > { %5602 = vrot.lane.b32.xlu1 %v5563_v19, %s7368_s7  ;;  %5600 = vrot.lane.b32.xlu0 %v5554_v20, %s7368_s7  ;;  %v5283_v19 = vshrl.u32 %v7073_v10, 16  ;;  %v5286_v20 = vshll.u32 %v7073_v10, 16 }
 0x3f2   : > { %v5281_v35 = vrot.slane %v5280_v23, 4 }
 0x3f3   : > { %v4711_v41 = vpop.permute.xlu1 %4710  ;;  %v4709_v42 = vpop.permute.xlu0 %4708  ;;  %v5285_v32 = vrot.slane %v5283_v19, 4  ;;  %v5288_v33 = vrot.slane %v5286_v20, 5  ;;  %v7148_v19 = vld [vmem:[%s7411_s17 + $0x4c] sm:$0xf]  ;;  %v7147_v20 = vld [vmem:[%s7411_s17 + $0x48] sm:$0xf] }
 0x3f4   : > { %4723 = vst.msk [vmem:[#allocation2 + $0x5c] sm:$0x7] %vm326_vm2, %v4711_v41  ;;  %4722 = vst.msk [vmem:[#allocation2 + $0x58] sm:$0x7] %vm326_vm2, %v4709_v42 }
 0x3f5   : > { %5142 = vrot.lane.b32.xlu1 %v7062_v36, %s7361_s27  ;;  %5140 = vrot.lane.b32.xlu0 %v7061_v37, %s7361_s27  ;;  %v5272_v36 = vrot.slane %v5271_v24, 4  ;;  %v7130_v37 = vld [vmem:[%s7411_s17 + $0x2c] sm:$0xe]  ;;  %vm9478_vm2 = vmmov %vm9477_vm1 }
 0x3f6   : > { %v7136_v45 = vrot.slane %v7130_v37, 9  ;;  %v6960_v37 = vld [vmem:[%s7411_s17 + $0x7c] sm:$0xf] }
 0x3f7   : > { %v4755_v56 = vpop.permute.xlu1 %4754  ;;  %v4753_v59 = vpop.permute.xlu0 %4752 }
 0x3f8   : > { %4769 = vst.msk [vmem:[#allocation2 + $0x54] sm:$0x7] %vm411_vm3, %v4755_v56  ;;  %4768 = vst.msk [vmem:[#allocation2 + $0x50] sm:$0x7] %vm411_vm3, %v4753_v59  ;;  %v4379_v56 = vshrl.u32 %v6954_v47, 16  ;;  %v4382_v59 = vshll.u32 %v6954_v47, 16 }
 0x3f9   : > { %5222 = vrot.lane.b32.xlu1 %v5197_v43, %s7362_s28  ;;  %5220 = vrot.lane.b32.xlu0 %v5188_v44, %s7362_s28  ;;  %v5298_v43 = vor.u32 %v5297_v31, %v5294_v28  ;;  %v5289_v44 = vor.u32 %v5288_v33, %v5285_v32  ;;  %v5772_v28 = vshrl.u32 %v7148_v19, 16  ;;  %v5775_v31 = vshll.u32 %v7148_v19, 16  ;;  %v7154_v19 = vld [vmem:[%s7411_s17 + $0x6c] sm:$0xf] }
 0x3fa   : > { %v4381_v6 = vrot.slane %v4379_v56, 4  ;;  %v4384_v7 = vrot.slane %v4382_v59, 5  ;;  %v5763_v32 = vshrl.u32 %v7147_v20, 16  ;;  %v5766_v33 = vshll.u32 %v7147_v20, 16  ;;  %v7153_v20 = vld [vmem:[%s7411_s17 + $0x68] sm:$0xf] }
 0x3fb   : > { %v5135_v13 = vpop.permute.xlu1 %5134  ;;  %v5133_v16 = vpop.permute.xlu0 %5132  ;;  %v5299_v51 = vrot.slane %v5298_v43, 4  ;;  %v5290_v53 = vrot.slane %v5289_v44, 4  ;;  %v5777_v47 = vrot.slane %v5775_v31, 5 }
 0x3fc   : > { %5151 = vst.msk [vmem:[#allocation2 + $0x4c] sm:$0x7] %vm793_vm10, %v5135_v13  ;;  %5150 = vst.msk [vmem:[#allocation2 + $0x48] sm:$0x7] %vm793_vm10, %v5133_v16  ;;  %v4385_v17 = vor.u32 %v4384_v7, %v4381_v6  ;;  %v4456_v6 = vrot.slane %v4454_v54, 4  ;;  %v4459_v7 = vrot.slane %v4457_v55, 5 }
 0x3fd   : > { %5650 = vrot.lane.b32.xlu1 %v7124_v60, %s7369_s8  ;;  %5648 = vrot.lane.b32.xlu0 %v7123_v61, %s7369_s8  ;;  %v4370_v60 = vshrl.u32 %v6953_v48, 16  ;;  %v4373_v61 = vshll.u32 %v6953_v48, 16  ;;  %v5765_v48 = vrot.slane %v5763_v32, 4  ;;  %v7092_v32 = vld [vmem:[%s7411_s17 + $0x78] sm:$0xe] }
 0x3ff   : > { %v4759_v26 = vpop.permute.xlu1 %4758  ;;  %v4757_v27 = vpop.permute.xlu0 %4756  ;;  %v4372_v9 = vrot.slane %v4370_v60, 4  ;;  %v4375_v10 = vrot.slane %v4373_v61, 5 }
 0x400   : > { %4771 = vst.msk [vmem:[#allocation2 + $0x5c] sm:$0x7] %vm411_vm3, %v4759_v26  ;;  %4770 = vst.msk [vmem:[#allocation2 + $0x58] sm:$0x7] %vm411_vm3, %v4757_v27  ;;  %v7080_v26 = vld [vmem:[%s7411_s17 + $0x58] sm:$0xe] }
 0x401   : > { %5226 = vrot.lane.b32.xlu1 %v5215_v21, %s7362_s28  ;;  %5224 = vrot.lane.b32.xlu0 %v5206_v22, %s7362_s28  ;;  %v4376_v18 = vor.u32 %v4375_v10, %v4372_v9  ;;  %v7142_v21 = vld [vmem:[%s7411_s17 + $0x6c] sm:$0x7]  ;;  %v7141_v22 = vld [vmem:[%s7411_s17 + $0x68] sm:$0x7]  ;;  %vm9479_vm3 = vcmask 420224   ;;  %v7086_v43 = vrot.slane %v7080_v26, 9 }
 0x402   : > { %v7079_v27 = vld [vmem:[%s7411_s17 + $0x54] sm:$0xe]  ;;  %v5847_v26 = vshrl.u32 %v7153_v20, 16 }
 0x403   : > { %v4803_v41 = vpop.permute.xlu1 %4802  ;;  %v4801_v42 = vpop.permute.xlu0 %4800  ;;  %v7085_v44 = vrot.slane %v7079_v27, 9  ;;  %v5850_v27 = vshll.u32 %v7153_v20, 16 }
 0x404   : > { %4817 = vst.msk [vmem:[#allocation2 + $0x54] sm:$0x7] %vm460_vm4, %v4803_v41  ;;  %4816 = vst.msk [vmem:[#allocation2 + $0x50] sm:$0x7] %vm460_vm4, %v4801_v42 }
 0x405   : > { %5306 = vrot.lane.b32.xlu1 %v5281_v35, %s7363_s29  ;;  %5304 = vrot.lane.b32.xlu0 %v5272_v36, %s7363_s29  ;;  %v4386_v35 = vrot.slane %v4385_v17, 4  ;;  %v4377_v36 = vrot.slane %v4376_v18, 4  ;;  %v4460_v18 = vor.u32 %v4459_v7, %v4456_v6 }
 0x407   : > { %v5219_v49 = vpop.permute.xlu1 %5218  ;;  %v5217_v50 = vpop.permute.xlu0 %5216  ;;  %v4461_v31 = vrot.slane %v4460_v18, 4 }
 0x408   : > { %5235 = vst.msk [vmem:[#allocation2 + $0x4c] sm:$0x7] %vm9477_vm1, %v5219_v49  ;;  %v5768_v49 = vrot.slane %v5766_v33, 5  ;;  %v7091_v33 = vld [vmem:[%s7411_s17 + $0x74] sm:$0xe]  ;;  %vm9485_vm1 = vmmov %vm9484_vm15 }
 0x409   : > { %5234 = vst.msk [vmem:[#allocation2 + $0x48] sm:$0x7] %vm9478_vm2, %v5217_v50  ;;  %5698 = vrot.lane.b32.xlu1 %v7136_v45, %s7370_s9  ;;  %5696 = vrot.lane.b32.xlu0 %v7135_v46, %s7370_s9  ;;  %v7090_v45 = vld [vmem:[%s7411_s17 + $0x70] sm:$0xe]  ;;  %v5774_v46 = vrot.slane %v5772_v28, 4 }
 0x40a   : > { %v7089_v50 = vld [vmem:[%s7411_s17 + $0x6c] sm:$0xe]  ;;  %v7096_v60 = vrot.slane %v7090_v45, 9 }
 0x40b   : > { %v4807_v63 = vpop.permute.xlu1 %4806  ;;  %v4805_v0 = vpop.permute.xlu0 %4804  ;;  %v7095_v61 = vrot.slane %v7089_v50, 9  ;;  %v7101_v50 = vld [vmem:[%s7411_s17 + $0x30] sm:$0x7] }
 0x40c   : > { %4819 = vst.msk [vmem:[#allocation2 + $0x5c] sm:$0x7] %vm460_vm4, %v4807_v63  ;;  %4818 = vst.msk [vmem:[#allocation2 + $0x58] sm:$0x7] %vm460_vm4, %v4805_v0  ;;  %v5778_v63 = vor.u32 %v5777_v47, %v5774_v46  ;;  %v5769_v0 = vor.u32 %v5768_v49, %v5765_v48  ;;  %v7102_v49 = vld [vmem:[%s7411_s17 + $0x34] sm:$0x7] }
 0x40d   : > { %5310 = vrot.lane.b32.xlu1 %v5299_v51, %s7363_s29  ;;  %5308 = vrot.lane.b32.xlu0 %v5290_v53, %s7363_s29  ;;  %vm9480_vm4 = vmmov %vm9479_vm3  ;;  %v4463_v51 = vshrl.u32 %v6960_v37, 16  ;;  %v4466_v53 = vshll.u32 %v6960_v37, 16 }
 0x40f   : > { %v4839_v13 = vpop.permute.xlu1 %4838  ;;  %v4837_v16 = vpop.permute.xlu0 %4836 }
 0x410   : > { %4853 = vst.msk [vmem:[#allocation2 + $0x54] sm:$0x7] %vm498_vm5, %v4839_v13  ;;  %4852 = vst.msk [vmem:[#allocation2 + $0x50] sm:$0x7] %vm498_vm5, %v4837_v16  ;;  %v5779_v13 = vrot.slane %v5778_v63, 4  ;;  %v5770_v16 = vrot.slane %v5769_v0, 4 }
 0x411   : > { %5354 = vrot.lane.b32.xlu1 %v7084_v2, %s7364_s30  ;;  %5352 = vrot.lane.b32.xlu0 %v7083_v3, %s7364_s30  ;;  %v4465_v2 = vrot.slane %v4463_v51, 4  ;;  %v4468_v3 = vrot.slane %v4466_v53, 5  ;;  %v7108_v51 = vld [vmem:[%s7411_s17 + $0x14] sm:$0xf]  ;;  %v7107_v53 = vld [vmem:[%s7411_s17 + $0x10] sm:$0xf] }
 0x412   : > { %v5490_v63 = vshrl.u32 %v7108_v51, 16  ;;  %v5493_v0 = vshll.u32 %v7108_v51, 16  ;;  %v7160_v51 = vld [vmem:[%s7411_s17 + $0x4c] sm:$0xe] }
 0x413   : > { %v5303_v23 = vpop.permute.xlu1 %5302  ;;  %v5301_v24 = vpop.permute.xlu0 %5300  ;;  %v4469_v17 = vor.u32 %v4468_v3, %v4465_v2  ;;  %v5481_v2 = vshrl.u32 %v7107_v53, 16  ;;  %v5484_v3 = vshll.u32 %v7107_v53, 16  ;;  %v7159_v53 = vld [vmem:[%s7411_s17 + $0x48] sm:$0xe] }
 0x414   : > { %5319 = vst.msk [vmem:[#allocation2 + $0x4c] sm:$0x7] %vm9479_vm3, %v5303_v23  ;;  %v5856_v23 = vshrl.u32 %v7154_v19, 16  ;;  %v5495_v18 = vrot.slane %v5493_v0, 5  ;;  %vm9488_vm3 = vmmov %vm9485_vm1 }
 0x415   : > { %5318 = vst.msk [vmem:[#allocation2 + $0x48] sm:$0x7] %vm9480_vm4, %v5301_v24  ;;  %5734 = vrot.lane.b32.xlu1 %v7142_v21, %s7371_s10  ;;  %5732 = vrot.lane.b32.xlu0 %v7141_v22, %s7371_s10  ;;  %v5859_v24 = vshll.u32 %v7154_v19, 16  ;;  %v4470_v28 = vrot.slane %v4469_v17, 4  ;;  %v5492_v17 = vrot.slane %v5490_v63, 4  ;;  %v5483_v19 = vrot.slane %v5481_v2, 4  ;;  %vm9489_vm4 = vmmov %vm9485_vm1 }
 0x416   : > { %v5858_v37 = vrot.slane %v5856_v23, 4  ;;  %v5486_v20 = vrot.slane %v5484_v3, 5  ;;  %v7166_v2 = vrot.slane %v7160_v51, 9  ;;  %v7165_v3 = vrot.slane %v7159_v53, 9  ;;  %v7119_v51 = vld [vmem:[%s7411_s17 + $0x10] sm:$0xe] }
 0x417   : > { %v4843_v41 = vpop.permute.xlu1 %4842  ;;  %v4841_v42 = vpop.permute.xlu0 %4840  ;;  %v5861_v40 = vrot.slane %v5859_v24, 5 }
 0x418   : > { %4855 = vst.msk [vmem:[#allocation2 + $0x5c] sm:$0x7] %vm498_vm5, %v4843_v41  ;;  %4854 = vst.msk [vmem:[#allocation2 + $0x58] sm:$0x7] %vm498_vm5, %v4841_v42  ;;  %vm9481_vm5 = vcmask 453024   ;;  %v5849_v41 = vrot.slane %v5847_v26, 4 }
 0x419   : > { %4397 = vrot.lane.b32.xlu1 %v4386_v35, %s9354_s14  ;;  %4395 = vrot.lane.b32.xlu0 %v4377_v36, %s9354_s14  ;;  %vm9482_vm13 = vmmov %vm9481_vm5  ;;  %v5852_v42 = vrot.slane %v5850_v27, 5  ;;  %v5862_v47 = vor.u32 %v5861_v40, %v5858_v37 }
 0x41b   : > { %v4923_v56 = vpop.permute.xlu1 %4922  ;;  %v4921_v59 = vpop.permute.xlu0 %4920  ;;  %v5853_v48 = vor.u32 %v5852_v42, %v5849_v41 }
 0x41c   : > { %4937 = vst.msk [vmem:[#allocation2 + $0x54] sm:$0x7] %vm536_vm6, %v4923_v56  ;;  %4936 = vst.msk [vmem:[#allocation2 + $0x50] sm:$0x7] %vm536_vm6, %v4921_v59  ;;  %v5863_v56 = vrot.slane %v5862_v47, 4 }
 0x41d   : > { %5358 = vrot.lane.b32.xlu1 %v7086_v43, %s7364_s30  ;;  %5356 = vrot.lane.b32.xlu0 %v7085_v44, %s7364_s30  ;;  %v7098_v43 = vrot.slane %v7092_v32, 9  ;;  %v7097_v44 = vrot.slane %v7091_v33, 9  ;;  %v5854_v59 = vrot.slane %v5853_v48, 4  ;;  %v7114_v32 = vld [vmem:[%s7411_s17 + $0x34] sm:$0xf] }
 0x41e   : > { %v7113_v33 = vld [vmem:[%s7411_s17 + $0x30] sm:$0xf] }
 0x41f   : > { %v5351_v9 = vpop.permute.xlu1 %5350  ;;  %v5349_v10 = vpop.permute.xlu0 %5348  ;;  %v5565_v47 = vshrl.u32 %v7113_v33, 16  ;;  %v5568_v48 = vshll.u32 %v7113_v33, 16 }
 0x420   : > { %5367 = vst.msk [vmem:[#allocation2 + $0x4c] sm:$0x7] %vm9481_vm5, %v5351_v9 }
 0x421   : > { %5366 = vst.msk [vmem:[#allocation2 + $0x48] sm:$0x7] %vm9482_vm13, %v5349_v10  ;;  %5402 = vrot.lane.b32.xlu1 %v7096_v60, %s7365_s4  ;;  %5400 = vrot.lane.b32.xlu0 %v7095_v61, %s7365_s4  ;;  %v6966_v60 = vld [vmem:[%s7411_s17 + $0x5c] sm:$0xe]  ;;  %v6965_v61 = vld [vmem:[%s7411_s17 + $0x58] sm:$0xe] }
 0x422   : > { %v6972_v9 = vrot.slane %v6966_v60, 9  ;;  %v6971_v10 = vrot.slane %v6965_v61, 9  ;;  %v5567_v63 = vrot.slane %v5565_v47, 4  ;;  %v5570_v0 = vrot.slane %v5568_v48, 5 }
 0x423   : > { %v4394_v21 = vpop.permute.xlu1 %4393  ;;  %v4392_v22 = vpop.permute.xlu0 %4391 }
 0x424   : > { %4408 = vst.msk [vmem:[#allocation2 + $0x3c] sm:$0x7] %vm9483_vm12, %v4394_v21 }
 0x425   : > { %4407 = vst.msk [vmem:[#allocation2 + $0x38] sm:$0x7] %vm9475_vm11, %v4392_v22  ;;  %5818 = vrot.lane.b32.xlu1 %v5779_v13, %s7372_s11  ;;  %5816 = vrot.lane.b32.xlu0 %v5770_v16, %s7372_s11  ;;  %v7110_v13 = vld [vmem:[%s7411_s17 + $0x1c] sm:$0xf]  ;;  %v7109_v16 = vld [vmem:[%s7411_s17 + $0x18] sm:$0xf] }
 0x426   : > { %v5508_v23 = vshrl.u32 %v7110_v13, 16  ;;  %v5511_v24 = vshll.u32 %v7110_v13, 16  ;;  %v5499_v26 = vshrl.u32 %v7109_v16, 16  ;;  %v5502_v27 = vshll.u32 %v7109_v16, 16 }
 0x427   : > { %v4474_v35 = vpop.permute.xlu1 %4473  ;;  %v4472_v36 = vpop.permute.xlu0 %4471  ;;  %vm9496_vm11 = vcmask 387424  }
 0x428   : > { %4490 = vst.msk [vmem:[#allocation2 + $0x34] sm:$0x7] %vm9484_vm15, %v4474_v35  ;;  %v7104_v35 = vld [vmem:[%s7411_s17 + $0x3c] sm:$0x7]  ;;  %v5510_v41 = vrot.slane %v5508_v23, 4  ;;  %v5513_v42 = vrot.slane %v5511_v24, 5 }
 0x429   : > { %4489 = vst.msk [vmem:[#allocation2 + $0x30] sm:$0x7] %vm9485_vm1, %v4472_v36  ;;  %4481 = vrot.lane.b32.xlu1 %v4470_v28, %s7375_s16  ;;  %4479 = vrot.lane.b32.xlu0 %v4461_v31, %s7375_s16  ;;  %v5496_v28 = vor.u32 %v5495_v18, %v5492_v17  ;;  %v5487_v31 = vor.u32 %v5486_v20, %v5483_v19  ;;  %v7103_v36 = vld [vmem:[%s7411_s17 + $0x38] sm:$0x7]  ;;  %vm9498_vm15 = vcmask 617024  }
 0x42a   : > { %v5571_v19 = vor.u32 %v5570_v0, %v5567_v63  ;;  %vm9499_vm1 = vmmov %vm9498_vm15 }
 0x42b   : > { %v4927_v45 = vpop.permute.xlu1 %4926  ;;  %v4925_v46 = vpop.permute.xlu0 %4924 }
 0x42c   : > { %4939 = vst.msk [vmem:[#allocation2 + $0x5c] sm:$0x7] %vm536_vm6, %v4927_v45  ;;  %4938 = vst.msk [vmem:[#allocation2 + $0x58] sm:$0x7] %vm536_vm6, %v4925_v46  ;;  %vm9486_vm6 = vcmask 485824   ;;  %v5574_v45 = vshrl.u32 %v7114_v32, 16 }
 0x42d   : > { %5406 = vrot.lane.b32.xlu1 %v7098_v43, %s7365_s4  ;;  %5404 = vrot.lane.b32.xlu0 %v7097_v44, %s7365_s4  ;;  %vm9487_vm2 = vmmov %vm9486_vm6  ;;  %v5501_v43 = vrot.slane %v5499_v26, 4  ;;  %v5504_v44 = vrot.slane %v5502_v27, 5  ;;  %v5577_v46 = vshll.u32 %v7114_v32, 16 }
 0x42e   : > { %v5576_v60 = vrot.slane %v5574_v45, 4 }
 0x42f   : > { %v5007_v54 = vpop.permute.xlu1 %5006  ;;  %v5005_v55 = vpop.permute.xlu0 %5004  ;;  %v5579_v61 = vrot.slane %v5577_v46, 5 }
 0x430   : > { %5021 = vst.msk [vmem:[#allocation2 + $0x54] sm:$0x7] %vm621_vm7, %v5007_v54  ;;  %5020 = vst.msk [vmem:[#allocation2 + $0x50] sm:$0x7] %vm621_vm7, %v5005_v55 }
 0x431   : > { %5438 = vrot.lane.b32.xlu1 %v7102_v49, %s7366_s5  ;;  %5436 = vrot.lane.b32.xlu0 %v7101_v50, %s7366_s5  ;;  %v5497_v49 = vrot.slane %v5496_v28, 4  ;;  %v5488_v50 = vrot.slane %v5487_v31, 4  ;;  %v5580_v18 = vor.u32 %v5579_v61, %v5576_v60  ;;  %v5572_v28 = vrot.slane %v5571_v19, 4  ;;  %v7122_v60 = vld [vmem:[%s7411_s17 + $0x1c] sm:$0xe] }
 0x432   : > { %v7121_v61 = vld [vmem:[%s7411_s17 + $0x18] sm:$0xe]  ;;  %v7134_v19 = vld [vmem:[%s7411_s17 + $0x3c] sm:$0xe] }
 0x433   : > { %v5399_v6 = vpop.permute.xlu1 %5398  ;;  %v5397_v7 = vpop.permute.xlu0 %5396  ;;  %v5581_v27 = vrot.slane %v5580_v18, 4 }
 0x434   : > { %5415 = vst.msk [vmem:[#allocation2 + $0x4c] sm:$0x7] %vm9486_vm6, %v5399_v6  ;;  %v7116_v6 = vld [vmem:[%s7411_s17 + $0x3c] sm:$0xf] }
 0x435   : > { %5414 = vst.msk [vmem:[#allocation2 + $0x48] sm:$0x7] %vm9487_vm2, %v5397_v7  ;;  %5902 = vrot.lane.b32.xlu1 %v5863_v56, %s9354_s14  ;;  %5900 = vrot.lane.b32.xlu0 %v5854_v59, %s9354_s14  ;;  %v5514_v56 = vor.u32 %v5513_v42, %v5510_v41  ;;  %v5505_v59 = vor.u32 %v5504_v44, %v5501_v43  ;;  %v7115_v7 = vld [vmem:[%s7411_s17 + $0x38] sm:$0xf]  ;;  %v5592_v20 = vshrl.u32 %v7116_v6, 16 }
 0x436   : > { %v5586_v23 = vshll.u32 %v7115_v7, 16 }
 0x437   : > { %v4478_v21 = vpop.permute.xlu1 %4477  ;;  %v4476_v22 = vpop.permute.xlu0 %4475  ;;  %v5515_v16 = vrot.slane %v5514_v56, 4  ;;  %v5506_v17 = vrot.slane %v5505_v59, 4  ;;  %v5594_v31 = vrot.slane %v5592_v20, 4  ;;  %v7125_v59 = vrot.slane %v7119_v51, 9  ;;  %v7133_v20 = vld [vmem:[%s7411_s17 + $0x38] sm:$0xe] }
 0x438   : > { %4492 = vst.msk [vmem:[#allocation2 + $0x3c] sm:$0x7] %vm9488_vm3, %v4478_v21  ;;  %v5595_v21 = vshll.u32 %v7116_v6, 16  ;;  %v7132_v6 = vld [vmem:[%s7411_s17 + $0x34] sm:$0xe]  ;;  %vm9502_vm3 = vcmask 420224  }
 0x439   : > { %4491 = vst.msk [vmem:[#allocation2 + $0x38] sm:$0x7] %vm9489_vm4, %v4476_v22  ;;  %4529 = vrot.lane.b32.xlu1 %v6972_v9, %s7376_s15  ;;  %4527 = vrot.lane.b32.xlu0 %v6971_v10, %s7376_s15  ;;  %v5583_v22 = vshrl.u32 %v7115_v7, 16  ;;  %v7131_v7 = vld [vmem:[%s7411_s17 + $0x30] sm:$0xe]  ;;  %vm9503_vm4 = vmmov %vm9502_vm3 }
 0x43a   : > { %v5597_v32 = vrot.slane %v5595_v21, 5  ;;  %v7137_v18 = vrot.slane %v7131_v7, 9  ;;  %v7145_v7 = vld [vmem:[%s7411_s17 + $0x78] sm:$0x7] }
 0x43b   : > { %v4522_v37 = vpop.permute.xlu1 %4521  ;;  %v4520_v40 = vpop.permute.xlu0 %4519  ;;  %v5585_v33 = vrot.slane %v5583_v22, 4 }
 0x43c   : > { %4538 = vst.msk [vmem:[#allocation2 + $0x34] sm:$0x7] %vm1640_vm0, %v4522_v37  ;;  %4537 = vst.msk [vmem:[#allocation2 + $0x30] sm:$0x7] %vm1640_vm0, %v4520_v40  ;;  %v7171_v37 = vld [vmem:[%s7411_s17 + $0x68] sm:$0xe]  ;;  %v5598_v44 = vor.u32 %v5597_v32, %v5594_v31 }
 0x43d   : > { %5442 = vrot.lane.b32.xlu1 %v7104_v35, %s7366_s5  ;;  %5440 = vrot.lane.b32.xlu0 %v7103_v36, %s7366_s5  ;;  %v5588_v35 = vrot.slane %v5586_v23, 5  ;;  %v7172_v36 = vld [vmem:[%s7411_s17 + $0x6c] sm:$0xe]  ;;  %v7177_v43 = vrot.slane %v7171_v37, 9  ;;  %v7151_v31 = vld [vmem:[%s7411_s17 + $0x58] sm:$0xf] }
 0x43e   : > { %v7178_v42 = vrot.slane %v7172_v36, 9  ;;  %v5599_v48 = vrot.slane %v5598_v44, 4  ;;  %v7140_v32 = vrot.slane %v7134_v19, 9 }
 0x43f   : > { %v5011_v54 = vpop.permute.xlu1 %5010  ;;  %v5009_v55 = vpop.permute.xlu0 %5008  ;;  %v5589_v45 = vor.u32 %v5588_v35, %v5585_v33  ;;  %v7139_v33 = vrot.slane %v7133_v20, 9 }
 0x440   : > { %5023 = vst.msk [vmem:[#allocation2 + $0x5c] sm:$0x7] %vm621_vm7, %v5011_v54  ;;  %5022 = vst.msk [vmem:[#allocation2 + $0x58] sm:$0x7] %vm621_vm7, %v5009_v55  ;;  %vm9490_vm7 = vcmask 518624  }
 0x441   : > { %5522 = vrot.lane.b32.xlu1 %v5497_v49, %s7367_s6  ;;  %5520 = vrot.lane.b32.xlu0 %v5488_v50, %s7367_s6  ;;  %vm9491_vm5 = vmmov %vm9490_vm7  ;;  %v5590_v49 = vrot.slane %v5589_v45, 4  ;;  %v7120_v50 = vld [vmem:[%s7411_s17 + $0x14] sm:$0xe]  ;;  %v5799_v45 = vshrl.u32 %v7151_v31, 16 }
 0x442   : > { %v7126_v56 = vrot.slane %v7120_v50, 9  ;;  %v7143_v50 = vld [vmem:[%s7411_s17 + $0x70] sm:$0x7] }
 0x443   : > { %v5055_v9 = vpop.permute.xlu1 %5054  ;;  %v5053_v10 = vpop.permute.xlu0 %5052  ;;  %v7338_v13 = vld [vmem:[#allocation2 + $0x30] sm:$0xff]  }
 0x444   : > { %5069 = vst.msk [vmem:[#allocation2 + $0x54] sm:$0x7] %vm706_vm8, %v5055_v9  ;;  %5068 = vst.msk [vmem:[#allocation2 + $0x50] sm:$0x7] %vm706_vm8, %v5053_v10  ;;  %7263 = vmatprep.mubr.msk.bf16.mxu1 %vm6156_vm14, %v7338_v13  ;;  %v7150_v13 = vld [vmem:[%s7411_s17 + $0x54] sm:$0xf] }
 0x445   : > { %5950 = vrot.lane.b32.xlu1 %v7166_v2, %s7375_s16  ;;  %5948 = vrot.lane.b32.xlu0 %v7165_v3, %s7375_s16  ;;  %v7128_v2 = vrot.slane %v7122_v60, 9  ;;  %v7127_v3 = vrot.slane %v7121_v61, 9  ;;  %v5790_v21 = vshrl.u32 %v7150_v13, 16  ;;  %v5793_v22 = vshll.u32 %v7150_v13, 16 }
 0x446   : > { %v5801_v60 = vrot.slane %v5799_v45, 4 }
 0x447   : > { %v5435_v24 = vpop.permute.xlu1 %5434  ;;  %v5433_v26 = vpop.permute.xlu0 %5432  ;;  %v5792_v35 = vrot.slane %v5790_v21, 4  ;;  %v5795_v36 = vrot.slane %v5793_v22, 5 }
 0x448   : > { %5451 = vst.msk [vmem:[#allocation2 + $0x4c] sm:$0x7] %vm9490_vm7, %v5435_v24  ;;  %vm9504_vm7 = vcmask 649824  }
 0x449   : > { %5450 = vst.msk [vmem:[#allocation2 + $0x48] sm:$0x7] %vm9491_vm5, %v5433_v26  ;;  %5526 = vrot.lane.b32.xlu1 %v5515_v16, %s7367_s6  ;;  %5524 = vrot.lane.b32.xlu0 %v5506_v17, %s7367_s6  ;;  %v7149_v16 = vld [vmem:[%s7411_s17 + $0x50] sm:$0xf]  ;;  %v7138_v17 = vrot.slane %v7132_v6, 9  ;;  %v5796_v51 = vor.u32 %v5795_v36, %v5792_v35  ;;  %vm9505_vm5 = vmmov %vm9504_vm7 }
 0x44a   : > { %v5781_v23 = vshrl.u32 %v7149_v16, 16  ;;  %v5784_v24 = vshll.u32 %v7149_v16, 16  ;;  %v7146_v6 = vld [vmem:[%s7411_s17 + $0x7c] sm:$0x7] }
 0x44b   : > { %v4526_v40 = vpop.permute.xlu1 %4525  ;;  %v4524_v41 = vpop.permute.xlu0 %4523 }
 0x44c   : > { %4540 = vst.msk [vmem:[#allocation2 + $0x3c] sm:$0x7] %vm1640_vm0, %v4526_v40  ;;  %4539 = vst.msk [vmem:[#allocation2 + $0x38] sm:$0x7] %vm1640_vm0, %v4524_v41  ;;  %v5783_v37 = vrot.slane %v5781_v23, 4  ;;  %v5786_v40 = vrot.slane %v5784_v24, 5 }
 0x44d   : > { %5606 = vrot.lane.b32.xlu1 %v5581_v27, %s7368_s7  ;;  %5604 = vrot.lane.b32.xlu0 %v5572_v28, %s7368_s7  ;;  %v7152_v28 = vld [vmem:[%s7411_s17 + $0x5c] sm:$0xf] }
 0x44e   : > { %v5811_v44 = vshll.u32 %v7152_v28, 16 }
 0x44f   : > { %v5059_v46 = vpop.permute.xlu1 %5058  ;;  %v5057_v47 = vpop.permute.xlu0 %5056 }
 0x450   : > { %5071 = vst.msk [vmem:[#allocation2 + $0x5c] sm:$0x7] %vm706_vm8, %v5059_v46  ;;  %5070 = vst.msk [vmem:[#allocation2 + $0x58] sm:$0x7] %vm706_vm8, %v5057_v47  ;;  %vm9492_vm8 = vcmask 551424   ;;  %v5802_v46 = vshll.u32 %v7151_v31, 16 }
 0x451   : > { %5998 = vrot.lane.b32.xlu1 %v7178_v42, %s7376_s15  ;;  %5996 = vrot.lane.b32.xlu0 %v7177_v43, %s7376_s15  ;;  %vm9493_vm13 = vmmov %vm9492_vm8  ;;  %v5808_v43 = vshrl.u32 %v7152_v28, 16  ;;  %v7156_v47 = vld [vmem:[%s7411_s17 + $0x74] sm:$0xf] }
 0x452   : > { %v5804_v61 = vrot.slane %v5802_v46, 5 }
 0x453   : > { %v5103_v53 = vpop.permute.xlu1 %5102  ;;  %v5101_v54 = vpop.permute.xlu0 %5100  ;;  %v7339_v55 = vld [vmem:[#allocation2 + $0x38] sm:$0xff]  }
 0x454   : > { %5117 = vst.msk [vmem:[#allocation2 + $0x54] sm:$0x7] %vm755_vm9, %v5103_v53  ;;  %5116 = vst.msk [vmem:[#allocation2 + $0x50] sm:$0x7] %vm755_vm9, %v5101_v54  ;;  %7264 = vmatmul.mubr.msk.bf16.vlgmr.msra.gmra.mrb[0].mxu1 %vm6156_vm14, %v7339_v55  ;;  %v5787_v53 = vor.u32 %v5786_v40, %v5783_v37  ;;  %v5805_v20 = vor.u32 %v5804_v61, %v5801_v60 }
 0x455   : > { %5610 = vrot.lane.b32.xlu1 %v5599_v48, %s7368_s7  ;;  %5608 = vrot.lane.b32.xlu0 %v5590_v49, %s7368_s7  ;;  %v7155_v48 = vld [vmem:[%s7411_s17 + $0x70] sm:$0xf]  ;;  %v7144_v49 = vld [vmem:[%s7411_s17 + $0x74] sm:$0x7] }
 0x456   : > { %v5806_v36 = vrot.slane %v5805_v20, 4 }
 0x457   : > { %v5519_v63 = vpop.permute.xlu1 %5518  ;;  %v5517_v0 = vpop.permute.xlu0 %5516 }
 0x458   : > { %5535 = vst.msk [vmem:[#allocation2 + $0x4c] sm:$0x7] %vm9492_vm8, %v5519_v63  ;;  %v5874_v63 = vshrl.u32 %v7156_v47, 16  ;;  %vm9506_vm8 = vmmov %vm9502_vm3 }
 0x459   : > { %5534 = vst.msk [vmem:[#allocation2 + $0x48] sm:$0x7] %vm9493_vm13, %v5517_v0  ;;  %5654 = vrot.lane.b32.xlu1 %v7126_v56, %s7369_s8  ;;  %5652 = vrot.lane.b32.xlu0 %v7125_v59, %s7369_s8  ;;  %v5810_v56 = vrot.slane %v5808_v43, 4  ;;  %v5813_v59 = vrot.slane %v5811_v44, 5  ;;  %v5877_v0 = vshll.u32 %v7156_v47, 16  ;;  %vm9507_vm13 = vmmov %vm9502_vm3 }
 0x45a   : > { %v5876_v21 = vrot.slane %v5874_v63, 4 }
 0x45b   : > { %v5107_v9 = vpop.permute.xlu1 %5106  ;;  %v5105_v10 = vpop.permute.xlu0 %5104  ;;  %v5814_v19 = vor.u32 %v5813_v59, %v5810_v56  ;;  %v5879_v22 = vrot.slane %v5877_v0, 5  ;;  %v7162_v56 = vld [vmem:[%s7411_s17 + $0x54] sm:$0xe]  ;;  %v7161_v59 = vld [vmem:[%s7411_s17 + $0x50] sm:$0xe] }
 0x45c   : > { %5119 = vst.msk [vmem:[#allocation2 + $0x5c] sm:$0x7] %vm755_vm9, %v5107_v9  ;;  %5118 = vst.msk [vmem:[#allocation2 + $0x58] sm:$0x7] %vm755_vm9, %v5105_v10  ;;  %vm9494_vm9 = vcmask 584224   ;;  %v7168_v63 = vrot.slane %v7162_v56, 9 }
 0x45d   : > { %5658 = vrot.lane.b32.xlu1 %v7128_v2, %s7369_s8  ;;  %5656 = vrot.lane.b32.xlu0 %v7127_v3, %s7369_s8  ;;  %vm9495_vm12 = vmmov %vm9494_vm9  ;;  %v5865_v2 = vshrl.u32 %v7155_v48, 16  ;;  %v5868_v3 = vshll.u32 %v7155_v48, 16  ;;  %v7158_v9 = vld [vmem:[%s7411_s17 + $0x7c] sm:$0xf]  ;;  %v7157_v10 = vld [vmem:[%s7411_s17 + $0x78] sm:$0xf]  ;;  %v5880_v37 = vor.u32 %v5879_v22, %v5876_v21 }
 0x45e   : > { %v5883_v28 = vshrl.u32 %v7157_v10, 16  ;;  %v5886_v31 = vshll.u32 %v7157_v10, 16  ;;  %v5815_v35 = vrot.slane %v5814_v19, 4  ;;  %v7167_v0 = vrot.slane %v7161_v59, 9  ;;  %v7176_v21 = vld [vmem:[%s7411_s17 + $0x7c] sm:$0xe] }
 0x45f   : > { %v5139_v26 = vpop.permute.xlu1 %5138  ;;  %v5137_v27 = vpop.permute.xlu0 %5136  ;;  %v5867_v23 = vrot.slane %v5865_v2, 4  ;;  %v5870_v24 = vrot.slane %v5868_v3, 5  ;;  %v5881_v47 = vrot.slane %v5880_v37, 4  ;;  %v7164_v2 = vld [vmem:[%s7411_s17 + $0x5c] sm:$0xe] }
 0x460   : > { %5153 = vst.msk [vmem:[#allocation2 + $0x54] sm:$0x7] %vm793_vm10, %v5139_v26  ;;  %5152 = vst.msk [vmem:[#allocation2 + $0x50] sm:$0x7] %vm793_vm10, %v5137_v27  ;;  %v5892_v26 = vshrl.u32 %v7158_v9, 16  ;;  %v5895_v27 = vshll.u32 %v7158_v9, 16 }
 0x461   : > { %5702 = vrot.lane.b32.xlu1 %v7138_v17, %s7370_s9  ;;  %5700 = vrot.lane.b32.xlu0 %v7137_v18, %s7370_s9  ;;  %v5797_v17 = vrot.slane %v5796_v51, 4  ;;  %v5788_v18 = vrot.slane %v5787_v53, 4  ;;  %v5871_v40 = vor.u32 %v5870_v24, %v5867_v23  ;;  %v5885_v43 = vrot.slane %v5883_v28, 4  ;;  %v7163_v3 = vld [vmem:[%s7411_s17 + $0x58] sm:$0xe] }
 0x462   : > { %v5888_v44 = vrot.slane %v5886_v31, 5  ;;  %v7170_v9 = vrot.slane %v7164_v2, 9  ;;  %v7169_v10 = vrot.slane %v7163_v3, 9  ;;  %v7175_v22 = vld [vmem:[%s7411_s17 + $0x78] sm:$0xe] }
 0x463   : > { %v5603_v41 = vpop.permute.xlu1 %5602  ;;  %v5601_v42 = vpop.permute.xlu0 %5600  ;;  %v5872_v48 = vrot.slane %v5871_v40, 4 }
 0x464   : > { %5619 = vst.msk [vmem:[#allocation2 + $0x4c] sm:$0x7] %vm9494_vm9, %v5603_v41  ;;  %v5894_v41 = vrot.slane %v5892_v26, 4  ;;  %vm9508_vm9 = vcmask 453024   ;;  %v7182_v26 = vrot.slane %v7176_v21, 9 }
 0x465   : > { %5618 = vst.msk [vmem:[#allocation2 + $0x48] sm:$0x7] %vm9495_vm12, %v5601_v42  ;;  %5706 = vrot.lane.b32.xlu1 %v7140_v32, %s7370_s9  ;;  %5704 = vrot.lane.b32.xlu0 %v7139_v33, %s7370_s9  ;;  %v5897_v42 = vrot.slane %v5895_v27, 5  ;;  %vm9509_vm12 = vmmov %vm9508_vm9  ;;  %v7181_v27 = vrot.slane %v7175_v22, 9 }
 0x467   : > { %v5143_v54 = vpop.permute.xlu1 %5142  ;;  %v5141_v55 = vpop.permute.xlu0 %5140 }
 0x468   : > { %5155 = vst.msk [vmem:[#allocation2 + $0x5c] sm:$0x7] %vm793_vm10, %v5143_v54  ;;  %5154 = vst.msk [vmem:[#allocation2 + $0x58] sm:$0x7] %vm793_vm10, %v5141_v55 }
 0x469   : > { %5738 = vrot.lane.b32.xlu1 %v7144_v49, %s7371_s10  ;;  %5736 = vrot.lane.b32.xlu0 %v7143_v50, %s7371_s10  ;;  %vm9497_vm10 = vmmov %vm9496_vm11  ;;  %v5898_v49 = vor.u32 %v5897_v42, %v5894_v41  ;;  %v5889_v50 = vor.u32 %v5888_v44, %v5885_v43 }
 0x46a   : > { %vm9500_vm6 = vmmov %vm9497_vm10 }
 0x46b   : > { %v5223_v13 = vpop.permute.xlu1 %5222  ;;  %v5221_v16 = vpop.permute.xlu0 %5220  ;;  %vm9501_vm2 = vmmov %vm9500_vm6  ;;  %v5899_v54 = vrot.slane %v5898_v49, 4  ;;  %v5890_v55 = vrot.slane %v5889_v50, 4 }
 0x46c   : > { %5237 = vst.msk [vmem:[#allocation2 + $0x54] sm:$0x7] %vm9496_vm11, %v5223_v13  ;;  %v7174_v13 = vld [vmem:[%s7411_s17 + $0x74] sm:$0xe]  ;;  %vm9510_vm11 = vcmask 682624  }
 0x46d   : > { %5236 = vst.msk [vmem:[#allocation2 + $0x50] sm:$0x7] %vm9497_vm10, %v5221_v16  ;;  %5742 = vrot.lane.b32.xlu1 %v7146_v6, %s7371_s10  ;;  %5740 = vrot.lane.b32.xlu0 %v7145_v7, %s7371_s10  ;;  %v7173_v16 = vld [vmem:[%s7411_s17 + $0x70] sm:$0xe]  ;;  %v7180_v19 = vrot.slane %v7174_v13, 9  ;;  %vm9511_vm10 = vmmov %vm9510_vm11  ;;  %s7291_s17 = smul.u32 48, %s9564_s13 }
 0x46e   : > { %v7179_v20 = vrot.slane %v7173_v16, 9 }
 0x46f   : > { %v5651_v32 = vpop.permute.xlu1 %5650  ;;  %v5649_v33 = vpop.permute.xlu0 %5648  ;;  %s170_s22 = scalar_lea.vmem %s9337_s3, %s7291_s17 }
 0x470   : > { %5667 = vst.msk [vmem:[#allocation2 + $0x4c] sm:$0x7] %vm9498_vm15, %v5651_v32  ;;  %vm9512_vm15 = vcmask 748224  }
 0x471   : > { %5666 = vst.msk [vmem:[#allocation2 + $0x48] sm:$0x7] %vm9499_vm1, %v5649_v33  ;;  %5822 = vrot.lane.b32.xlu1 %v5797_v17, %s7372_s11  ;;  %5820 = vrot.lane.b32.xlu0 %v5788_v18, %s7372_s11  ;;  %vm9513_vm1 = vmmov %vm9512_vm15 }
 0x473   : > { %v5227_v45 = vpop.permute.xlu1 %5226  ;;  %v5225_v46 = vpop.permute.xlu0 %5224 }
 0x474   : > { %5239 = vst.msk [vmem:[#allocation2 + $0x5c] sm:$0x7] %vm9500_vm6, %v5227_v45  ;;  %vm9514_vm6 = vmmov %vm9508_vm9 }
 0x475   : > { %5238 = vst.msk [vmem:[#allocation2 + $0x58] sm:$0x7] %vm9501_vm2, %v5225_v46  ;;  %5826 = vrot.lane.b32.xlu1 %v5815_v35, %s7372_s11  ;;  %5824 = vrot.lane.b32.xlu0 %v5806_v36, %s7372_s11  ;;  %vm9515_vm2 = vmmov %vm9514_vm6 }
 0x477   : > { %v5307_v51 = vpop.permute.xlu1 %5306  ;;  %v5305_v53 = vpop.permute.xlu0 %5304 }
 0x478   : > { %5321 = vst.msk [vmem:[#allocation2 + $0x54] sm:$0x7] %vm9502_vm3, %v5307_v51  ;;  %vm9516_vm3 = vcmask 485824  }
 0x479   : > { %5320 = vst.msk [vmem:[#allocation2 + $0x50] sm:$0x7] %vm9503_vm4, %v5305_v53  ;;  %5906 = vrot.lane.b32.xlu1 %v5881_v47, %s9354_s14  ;;  %5904 = vrot.lane.b32.xlu0 %v5872_v48, %s9354_s14  ;;  %vm9517_vm4 = vmmov %vm9516_vm3 }
 0x47b   : > { %v5699_v60 = vpop.permute.xlu1 %5698  ;;  %v5697_v61 = vpop.permute.xlu0 %5696 }
 0x47c   : > { %5715 = vst.msk [vmem:[#allocation2 + $0x4c] sm:$0x7] %vm9504_vm7, %v5699_v60  ;;  %vm9518_vm7 = vcmask 715424  }
 0x47d   : > { %5714 = vst.msk [vmem:[#allocation2 + $0x48] sm:$0x7] %vm9505_vm5, %v5697_v61  ;;  %5910 = vrot.lane.b32.xlu1 %v5899_v54, %s9354_s14  ;;  %5908 = vrot.lane.b32.xlu0 %v5890_v55, %s9354_s14  ;;  %vm9519_vm5 = vmmov %vm9518_vm7 }
 0x47f   : > { %v5311_v6 = vpop.permute.xlu1 %5310  ;;  %v5309_v7 = vpop.permute.xlu0 %5308 }
 0x480   : > { %5323 = vst.msk [vmem:[#allocation2 + $0x5c] sm:$0x7] %vm9506_vm8, %v5311_v6  ;;  %vm9520_vm8 = vcmask 781024  }
 0x481   : > { %5322 = vst.msk [vmem:[#allocation2 + $0x58] sm:$0x7] %vm9507_vm13, %v5309_v7  ;;  %5954 = vrot.lane.b32.xlu1 %v7168_v63, %s7375_s16  ;;  %5952 = vrot.lane.b32.xlu0 %v7167_v0, %s7375_s16  ;;  %vm9521_vm13 = vmmov %vm9520_vm8 }
 0x483   : > { %v5355_v17 = vpop.permute.xlu1 %5354  ;;  %v5353_v18 = vpop.permute.xlu0 %5352 }
 0x484   : > { %5369 = vst.msk [vmem:[#allocation2 + $0x54] sm:$0x7] %vm9508_vm9, %v5355_v17  ;;  %vm9522_vm9 = vmmov %vm9516_vm3 }
 0x485   : > { %5368 = vst.msk [vmem:[#allocation2 + $0x50] sm:$0x7] %vm9509_vm12, %v5353_v18  ;;  %5958 = vrot.lane.b32.xlu1 %v7170_v9, %s7375_s16  ;;  %5956 = vrot.lane.b32.xlu0 %v7169_v10, %s7375_s16  ;;  %vm9523_vm12 = vmmov %vm9516_vm3 }
 0x487   : > { %v5735_v23 = vpop.permute.xlu1 %5734  ;;  %v5733_v24 = vpop.permute.xlu0 %5732 }
 0x488   : > { %5751 = vst.msk [vmem:[#allocation2 + $0x4c] sm:$0x7] %vm9510_vm11, %v5735_v23  ;;  %vm9524_vm11 = vcmask 518624  }
 0x489   : > { %5750 = vst.msk [vmem:[#allocation2 + $0x48] sm:$0x7] %vm9511_vm10, %v5733_v24  ;;  %6002 = vrot.lane.b32.xlu1 %v7180_v19, %s7376_s15  ;;  %6000 = vrot.lane.b32.xlu0 %v7179_v20, %s7376_s15  ;;  %vm9525_vm10 = vmmov %vm9524_vm11 }
 0x48b   : > { %v4398_v28 = vpop.permute.xlu1 %4397  ;;  %v4396_v31 = vpop.permute.xlu0 %4395 }
 0x48c   : > { %4410 = vst.msk [vmem:[#allocation2 + $0x44] sm:$0x7] %vm9512_vm15, %v4398_v28  ;;  %vm9526_vm15 = vmmov %vm9513_vm1 }
 0x48d   : > { %4409 = vst.msk [vmem:[#allocation2 + $0x40] sm:$0x7] %vm9513_vm1, %v4396_v31  ;;  %6006 = vrot.lane.b32.xlu1 %v7182_v26, %s7376_s15  ;;  %6004 = vrot.lane.b32.xlu0 %v7181_v27, %s7376_s15 }
 0x48f   : > { %v5359_v32 = vpop.permute.xlu1 %5358  ;;  %v5357_v33 = vpop.permute.xlu0 %5356 }
 0x490   : > { %5371 = vst.msk [vmem:[#allocation2 + $0x5c] sm:$0x7] %vm9514_vm6, %v5359_v32  ;;  %vm9527_vm6 = vmmov %vm9525_vm10 }
 0x491   : > { %5370 = vst.msk [vmem:[#allocation2 + $0x58] sm:$0x7] %vm9515_vm2, %v5357_v33  ;;  %vm9528_vm2 = vmmov %vm9527_vm6 }
 0x493   : > { %v5403_v35 = vpop.permute.xlu1 %5402  ;;  %v5401_v36 = vpop.permute.xlu0 %5400 }
 0x494   : > { %5417 = vst.msk [vmem:[#allocation2 + $0x54] sm:$0x7] %vm9516_vm3, %v5403_v35  ;;  %vm9529_vm3 = vcmask 551424  }
 0x495   : > { %5416 = vst.msk [vmem:[#allocation2 + $0x50] sm:$0x7] %vm9517_vm4, %v5401_v36  ;;  %vm9530_vm4 = vmmov %vm9529_vm3 }
 0x497   : > { %v5819_v37 = vpop.permute.xlu1 %5818  ;;  %v5817_v40 = vpop.permute.xlu0 %5816 }
 0x498   : > { %5835 = vst.msk [vmem:[#allocation2 + $0x4c] sm:$0x7] %vm9518_vm7, %v5819_v37  ;;  %vm9531_vm7 = vmmov %vm9520_vm8 }
 0x499   : > { %5834 = vst.msk [vmem:[#allocation2 + $0x48] sm:$0x7] %vm9519_vm5, %v5817_v40  ;;  %vm9532_vm5 = vmmov %vm9531_vm7 }
 0x49b   : > { %v4482_v41 = vpop.permute.xlu1 %4481  ;;  %v4480_v42 = vpop.permute.xlu0 %4479 }
 0x49c   : > { %4494 = vst.msk [vmem:[#allocation2 + $0x44] sm:$0x7] %vm9520_vm8, %v4482_v41  ;;  %vm9533_vm8 = vmmov %vm9529_vm3 }
 0x49d   : > { %4493 = vst.msk [vmem:[#allocation2 + $0x40] sm:$0x7] %vm9521_vm13, %v4480_v42  ;;  %vm9534_vm13 = vmmov %vm9529_vm3 }
 0x49f   : > { %v5407_v43 = vpop.permute.xlu1 %5406  ;;  %v5405_v44 = vpop.permute.xlu0 %5404 }
 0x4a0   : > { %5419 = vst.msk [vmem:[#allocation2 + $0x5c] sm:$0x7] %vm9522_vm9, %v5407_v43  ;;  %vm9535_vm9 = vcmask 584224  }
 0x4a1   : > { %5418 = vst.msk [vmem:[#allocation2 + $0x58] sm:$0x7] %vm9523_vm12, %v5405_v44  ;;  %vm9536_vm12 = vmmov %vm9535_vm9 }
 0x4a3   : > { %v5439_v45 = vpop.permute.xlu1 %5438  ;;  %v5437_v46 = vpop.permute.xlu0 %5436 }
 0x4a4   : > { %5453 = vst.msk [vmem:[#allocation2 + $0x54] sm:$0x7] %vm9524_vm11, %v5439_v45  ;;  %vm9537_vm11 = vmmov %vm9535_vm9 }
 0x4a5   : > { %5452 = vst.msk [vmem:[#allocation2 + $0x50] sm:$0x7] %vm9525_vm10, %v5437_v46  ;;  %vm9538_vm10 = vmmov %vm9535_vm9 }
 0x4a7   : > { %v5903_v47 = vpop.permute.xlu1 %5902  ;;  %v5901_v48 = vpop.permute.xlu0 %5900 }
 0x4a8   : > { %5919 = vst.msk [vmem:[#allocation2 + $0x4c] sm:$0x7] %vm9526_vm15, %v5903_v47  ;;  %vm9539_vm15 = vcmask 617024  }
 0x4a9   : > { %5918 = vst.msk [vmem:[#allocation2 + $0x48] sm:$0x7] %vm9513_vm1, %v5901_v48  ;;  %vm9540_vm1 = vmmov %vm9539_vm15 }
 0x4ab   : > { %v4530_v49 = vpop.permute.xlu1 %4529  ;;  %v4528_v50 = vpop.permute.xlu0 %4527 }
 0x4ac   : > { %4542 = vst.msk [vmem:[#allocation2 + $0x44] sm:$0x7] %vm1640_vm0, %v4530_v49  ;;  %4541 = vst.msk [vmem:[#allocation2 + $0x40] sm:$0x7] %vm1640_vm0, %v4528_v50 }
 0x4af   : > { %v5443_v51 = vpop.permute.xlu1 %5442  ;;  %v5441_v53 = vpop.permute.xlu0 %5440 }
 0x4b0   : > { %5455 = vst.msk [vmem:[#allocation2 + $0x5c] sm:$0x7] %vm9527_vm6, %v5443_v51  ;;  %vm9541_vm6 = vmmov %vm9540_vm1 }
 0x4b1   : > { %5454 = vst.msk [vmem:[#allocation2 + $0x58] sm:$0x7] %vm9528_vm2, %v5441_v53  ;;  %vm9542_vm2 = vmmov %vm9540_vm1 }
 0x4b3   : > { %v5523_v54 = vpop.permute.xlu1 %5522  ;;  %v5521_v55 = vpop.permute.xlu0 %5520  ;;  %v7340_v56 = vld [vmem:[#allocation2 + $0x40] sm:$0xff]  }
 0x4b4   : > { %5537 = vst.msk [vmem:[#allocation2 + $0x54] sm:$0x7] %vm9529_vm3, %v5523_v54  ;;  %7267 = vmatprep.mubr.msk.bf16.mxu1 %vm6156_vm14, %v7340_v56  ;;  %vm9543_vm3 = vcmask 649824  }
 0x4b5   : > { %5536 = vst.msk [vmem:[#allocation2 + $0x50] sm:$0x7] %vm9530_vm4, %v5521_v55  ;;  %vm9544_vm4 = vmmov %vm9543_vm3 }
 0x4b7   : > { %v5951_v59 = vpop.permute.xlu1 %5950  ;;  %v5949_v60 = vpop.permute.xlu0 %5948 }
 0x4b8   : > { %5967 = vst.msk [vmem:[#allocation2 + $0x4c] sm:$0x7] %vm9531_vm7, %v5951_v59  ;;  %vm9545_vm7 = vmmov %vm9543_vm3 }
 0x4b9   : > { %5966 = vst.msk [vmem:[#allocation2 + $0x48] sm:$0x7] %vm9532_vm5, %v5949_v60  ;;  %vm9546_vm5 = vmmov %vm9543_vm3 }
 0x4bb   : > { %v5527_v61 = vpop.permute.xlu1 %5526  ;;  %v5525_v63 = vpop.permute.xlu0 %5524 }
 0x4bc   : > { %5539 = vst.msk [vmem:[#allocation2 + $0x5c] sm:$0x7] %vm9533_vm8, %v5527_v61  ;;  %vm9547_vm8 = vcmask 682624  }
 0x4bd   : > { %5538 = vst.msk [vmem:[#allocation2 + $0x58] sm:$0x7] %vm9534_vm13, %v5525_v63  ;;  %vm9548_vm13 = vmmov %vm9547_vm8 }
 0x4bf   : > { %v5607_v0 = vpop.permute.xlu1 %5606  ;;  %v5605_v2 = vpop.permute.xlu0 %5604 }
 0x4c0   : > { %5621 = vst.msk [vmem:[#allocation2 + $0x54] sm:$0x7] %vm9535_vm9, %v5607_v0  ;;  %vm9549_vm9 = vmmov %vm9547_vm8 }
 0x4c1   : > { %5620 = vst.msk [vmem:[#allocation2 + $0x50] sm:$0x7] %vm9536_vm12, %v5605_v2  ;;  %vm9550_vm12 = vmmov %vm9547_vm8 }
 0x4c3   : > { %v5999_v3 = vpop.permute.xlu1 %5998  ;;  %v5997_v6 = vpop.permute.xlu0 %5996 }
 0x4c4   : > { %6015 = vst.msk [vmem:[#allocation2 + $0x4c] sm:$0x7] %vm1640_vm0, %v5999_v3  ;;  %6014 = vst.msk [vmem:[#allocation2 + $0x48] sm:$0x7] %vm1640_vm0, %v5997_v6 }
 0x4c7   : > { %v5611_v7 = vpop.permute.xlu1 %5610  ;;  %v5609_v9 = vpop.permute.xlu0 %5608 }
 0x4c8   : > { %5623 = vst.msk [vmem:[#allocation2 + $0x5c] sm:$0x7] %vm9537_vm11, %v5611_v7  ;;  %vm9551_vm11 = vcmask 715424  }
 0x4c9   : > { %5622 = vst.msk [vmem:[#allocation2 + $0x58] sm:$0x7] %vm9538_vm10, %v5609_v9  ;;  %vm9552_vm10 = vmmov %vm9551_vm11 }
 0x4cb   : > { %v5655_v10 = vpop.permute.xlu1 %5654  ;;  %v5653_v13 = vpop.permute.xlu0 %5652  ;;  %v7341_v16 = vld [vmem:[#allocation2 + $0x48] sm:$0xff]  }
 0x4cc   : > { %5669 = vst.msk [vmem:[#allocation2 + $0x54] sm:$0x7] %vm9539_vm15, %v5655_v10  ;;  %7268 = vmatmul.mubr.msk.bf16.gmra.mrb[4].mxu1 %vm6156_vm14, %v7341_v16  ;;  %vm9553_vm15 = vmmov %vm9552_vm10 }
 0x4cd   : > { %5668 = vst.msk [vmem:[#allocation2 + $0x50] sm:$0x7] %vm9540_vm1, %v5653_v13  ;;  %vm9554_vm1 = vmmov %vm9552_vm10 }
 0x4cf   : > { %v5659_v17 = vpop.permute.xlu1 %5658  ;;  %v5657_v18 = vpop.permute.xlu0 %5656 }
 0x4d0   : > { %5671 = vst.msk [vmem:[#allocation2 + $0x5c] sm:$0x7] %vm9541_vm6, %v5659_v17  ;;  %vm9555_vm6 = vcmask 748224  }
 0x4d1   : > { %5670 = vst.msk [vmem:[#allocation2 + $0x58] sm:$0x7] %vm9542_vm2, %v5657_v18  ;;  %vm9556_vm2 = vmmov %vm9555_vm6 }
 0x4d3   : > { %v5703_v19 = vpop.permute.xlu1 %5702  ;;  %v5701_v20 = vpop.permute.xlu0 %5700 }
 0x4d4   : > { %5717 = vst.msk [vmem:[#allocation2 + $0x54] sm:$0x7] %vm9543_vm3, %v5703_v19  ;;  %vm9557_vm3 = vmmov %vm9556_vm2 }
 0x4d5   : > { %5716 = vst.msk [vmem:[#allocation2 + $0x50] sm:$0x7] %vm9544_vm4, %v5701_v20  ;;  %vm9558_vm4 = vmmov %vm9556_vm2 }
 0x4d7   : > { %v5707_v21 = vpop.permute.xlu1 %5706  ;;  %v5705_v22 = vpop.permute.xlu0 %5704 }
 0x4d8   : > { %5719 = vst.msk [vmem:[#allocation2 + $0x5c] sm:$0x7] %vm9545_vm7, %v5707_v21  ;;  %vm9559_vm7 = vcmask 781024  }
 0x4d9   : > { %5718 = vst.msk [vmem:[#allocation2 + $0x58] sm:$0x7] %vm9546_vm5, %v5705_v22  ;;  %vm9560_vm5 = vmmov %vm9559_vm7 }
 0x4db   : > { %v5739_v23 = vpop.permute.xlu1 %5738  ;;  %v5737_v24 = vpop.permute.xlu0 %5736 }
 0x4dc   : > { %5753 = vst.msk [vmem:[#allocation2 + $0x54] sm:$0x7] %vm9547_vm8, %v5739_v23  ;;  %vm9561_vm8 = vmmov %vm9560_vm5 }
 0x4dd   : > { %5752 = vst.msk [vmem:[#allocation2 + $0x50] sm:$0x7] %vm9548_vm13, %v5737_v24  ;;  %vm9562_vm13 = vmmov %vm9560_vm5 }
 0x4df   : > { %v5743_v26 = vpop.permute.xlu1 %5742  ;;  %v5741_v27 = vpop.permute.xlu0 %5740 }
 0x4e0   : > { %5755 = vst.msk [vmem:[#allocation2 + $0x5c] sm:$0x7] %vm9549_vm9, %v5743_v26 }
 0x4e1   : > { %5754 = vst.msk [vmem:[#allocation2 + $0x58] sm:$0x7] %vm9550_vm12, %v5741_v27 }
 0x4e3   : > { %v5823_v28 = vpop.permute.xlu1 %5822  ;;  %v5821_v31 = vpop.permute.xlu0 %5820 }
 0x4e4   : > { %5837 = vst.msk [vmem:[#allocation2 + $0x54] sm:$0x7] %vm9551_vm11, %v5823_v28 }
 0x4e5   : > { %5836 = vst.msk [vmem:[#allocation2 + $0x50] sm:$0x7] %vm9552_vm10, %v5821_v31 }
 0x4e7   : > { %v5827_v32 = vpop.permute.xlu1 %5826  ;;  %v5825_v33 = vpop.permute.xlu0 %5824 }
 0x4e8   : > { %5839 = vst.msk [vmem:[#allocation2 + $0x5c] sm:$0x7] %vm9553_vm15, %v5827_v32 }
 0x4e9   : > { %5838 = vst.msk [vmem:[#allocation2 + $0x58] sm:$0x7] %vm9554_vm1, %v5825_v33 }
 0x4eb   : > { %v5907_v35 = vpop.permute.xlu1 %5906  ;;  %v5905_v36 = vpop.permute.xlu0 %5904 }
 0x4ec   : > { %5921 = vst.msk [vmem:[#allocation2 + $0x54] sm:$0x7] %vm9555_vm6, %v5907_v35 }
 0x4ed   : > { %5920 = vst.msk [vmem:[#allocation2 + $0x50] sm:$0x7] %vm9556_vm2, %v5905_v36 }
 0x4ef   : > { %v5911_v37 = vpop.permute.xlu1 %5910  ;;  %v5909_v40 = vpop.permute.xlu0 %5908 }
 0x4f0   : > { %5923 = vst.msk [vmem:[#allocation2 + $0x5c] sm:$0x7] %vm9557_vm3, %v5911_v37 }
 0x4f1   : > { %5922 = vst.msk [vmem:[#allocation2 + $0x58] sm:$0x7] %vm9558_vm4, %v5909_v40 }
 0x4f3   : > { %v5955_v41 = vpop.permute.xlu1 %5954  ;;  %v5953_v42 = vpop.permute.xlu0 %5952 }
 0x4f4   : > { %5969 = vst.msk [vmem:[#allocation2 + $0x54] sm:$0x7] %vm9559_vm7, %v5955_v41 }
 0x4f5   : > { %5968 = vst.msk [vmem:[#allocation2 + $0x50] sm:$0x7] %vm9560_vm5, %v5953_v42 }
 0x4f7   : > { %v5959_v43 = vpop.permute.xlu1 %5958  ;;  %v5957_v44 = vpop.permute.xlu0 %5956 }
 0x4f8   : > { %5971 = vst.msk [vmem:[#allocation2 + $0x5c] sm:$0x7] %vm9561_vm8, %v5959_v43 }
 0x4f9   : > { %5970 = vst.msk [vmem:[#allocation2 + $0x58] sm:$0x7] %vm9562_vm13, %v5957_v44 }
 0x4fb   : > { %v6003_v45 = vpop.permute.xlu1 %6002  ;;  %v6001_v46 = vpop.permute.xlu0 %6000 }
 0x4fc   : > { %6017 = vst.msk [vmem:[#allocation2 + $0x54] sm:$0x7] %vm1640_vm0, %v6003_v45  ;;  %6016 = vst.msk [vmem:[#allocation2 + $0x50] sm:$0x7] %vm1640_vm0, %v6001_v46 }
 0x4ff   : > { %v6007_v47 = vpop.permute.xlu1 %6006  ;;  %v6005_v48 = vpop.permute.xlu0 %6004 }
 0x500   : > { %6019 = vst.msk [vmem:[#allocation2 + $0x5c] sm:$0x7] %vm1640_vm0, %v6007_v47  ;;  %6018 = vst.msk [vmem:[#allocation2 + $0x58] sm:$0x7] %vm1640_vm0, %v6005_v48  ;;  %vm6363_vm0 = vcmask 62464  }
 0x503   : > { %v7342_v49 = vld [vmem:[#allocation2 + $0x50] sm:$0xff]  }
 0x504   : > { %7271 = vmatprep.mubr.msk.bf16.mxu1 %vm6156_vm14, %v7342_v49 }
 0x507   : > { %v7343_v50 = vld [vmem:[#allocation2 + $0x58] sm:$0xff]  }
 0x508   : > { %7272 = vmatmul.mubr.msk.bf16.gmra.mrb[8].mxu1 %vm6156_vm14, %v7343_v50 }
 0x527   : > { %v7265_v51 = vpop.f32.mrb[0].mxu1 }
 0x528   : > { %v6334_v53 = vmax.f32 %v6328_v62, %v7265_v51  ;;  %v6279_v54 = vpop.f32.mrb[1].mxu1 }
 0x529   : > { %v6332_v55 = vmax.f32 %v6326_v29, %v6279_v54  ;;  %v7266_v56 = vpop.f32.mrb[2].mxu1 }
 0x52a   : > { %v6335_v59 = vmax.f32 %v6329_v12, %v7266_v56  ;;  %v6282_v60 = vpop.f32.mrb[3].mxu1 }
 0x52b   : > { %v6333_v61 = vmax.f32 %v6327_v38, %v6282_v60 }
 0x59f   : > { %v7269_v63 = vpop.f32.mrb[4].mxu1 }
 0x5a0   : > { %v6338_v58 = vmax.f32 %v6332_v55, %v7269_v63  ;;  %v6295_v62 = vpop.f32.mrb[5].mxu1 }
 0x5a1   : > { %v6336_v11 = vmax.f32 %v6330_v57, %v6295_v62  ;;  %v7270_v25 = vpop.f32.mrb[6].mxu1 }
 0x5a2   : > { %v6351_v14 = vadd.f32 %v7214_v8, %v6338_v58  ;;  %v6339_v29 = vmax.f32 %v6333_v61, %v7270_v25  ;;  %v6298_v5 = vpop.f32.mrb[7].mxu1 }
 0x5a3   : > { %v6337_v15 = vmax.f32 %v6331_v4, %v6298_v5 }
 0x5a4   : > { %v6357_v34 = vmax.f32 %v6351_v14, 0.0  ;;  %v6352_v38 = vadd.f32 %v7214_v8, %v6339_v29 }
 0x5a6   : > { %6364 = vst.msk [vmem:[%s170_s22] sm:$0x3f] %vm6363_vm0, %v6357_v34  ;;  %v6358_v12 = vmax.f32 %v6352_v38, 0.0 }
 0x5a8   : > { %6365 = vst.msk [vmem:[%s170_s22 + $0x8] sm:$0x3f] %vm6363_vm0, %v6358_v12 }
 0x5db   : > { %v7273_v30 = vpop.f32.mrb[8].mxu1 }
 0x5dc   : > { %v6342_v52 = vmax.f32 %v6336_v11, %v7273_v30  ;;  %v6311_v57 = vpop.f32.mrb[9].mxu1 }
 0x5dd   : > { %v6340_v0 = vmax.f32 %v6334_v53, %v6311_v57  ;;  %v7274_v2 = vpop.f32.mrb[10].mxu1 }
 0x5de   : > { %v6355_v3 = vadd.f32 %v7214_v8, %v6342_v52  ;;  %v6343_v6 = vmax.f32 %v6337_v15, %v7274_v2  ;;  %v6314_v7 = vpop.f32.mrb[11].mxu1 }
 0x5df   : > { %v6353_v9 = vadd.f32 %v7214_v8, %v6340_v0  ;;  %v6341_v10 = vmax.f32 %v6335_v59, %v6314_v7 }
 0x5e0   : > { %v6361_v13 = vmax.f32 %v6355_v3, 0.0  ;;  %v6356_v39 = vadd.f32 %v7214_v8, %v6343_v6 }
 0x5e1   : > { %v6359_v1 = vmax.f32 %v6353_v9, 0.0  ;;  %v6354_v4 = vadd.f32 %v7214_v8, %v6341_v10 }
 0x5e2   : > { %6368 = vst.msk [vmem:[%s170_s22 + $0x20] sm:$0x3f] %vm6363_vm0, %v6361_v13  ;;  %v6362_v16 = vmax.f32 %v6356_v39, 0.0 }
 0x5e3   : > { %6366 = vst.msk [vmem:[%s170_s22 + $0x10] sm:$0x3f] %vm6363_vm0, %v6359_v1  ;;  %v6360_v17 = vmax.f32 %v6354_v4, 0.0 }
 0x5e4   : > { %6369 = vst.msk [vmem:[%s170_s22 + $0x28] sm:$0x3f] %vm6363_vm0, %v6362_v16 }
 0x5e5   : > { %6367 = vst.msk [vmem:[%s170_s22 + $0x18] sm:$0x3f] %vm6363_vm0, %v6360_v17 }
 0x5e6 PF: > { %s13_s12 = sadd.s32 1, %s7350_s12  }
 0x5e7   : > { %p10_p4 = scmp.ge.s32.totalorder %s13_s12, 4  }
 0x5e9   :  { %12 = sbr.rel (!%p10_p4) target bundleno = 1 (0x1), region = 76 }

</bundles_post_ra>
